<compile_context>
chip_gen: v7x
topology: tpu7x:2x2x1
jax: 0.10.0
libtpu: 0.0.40
codegen_flags: <defaults>
</compile_context>

<pallas_src>
import math

import jax
import jax.numpy as jnp
from jax.experimental import pallas as pl
from jax.experimental.pallas import tpu as pltpu

# ---- config (mirrors __C) --------------------------------------------------
HIDDEN_SIZE = 32
MULTI_HEAD = 4
HIDDEN_SIZE_HEAD = HIDDEN_SIZE // MULTI_HEAD        # 8
FF_SIZE = HIDDEN_SIZE * 4                           # 128
LAYER = 2
DROPOUT_R = 0.1   # TODO(synk): dropout is identity here (eval-mode forward pass).
LN_EPS = 1e-6     # MCAN-style LayerNorm: a*(x-mean)/(std+eps)+b, unbiased std (torch default).

BATCH = 2
SEQ_X = 8
SEQ_Y = 8

F32 = jnp.float32
BF16 = jnp.bfloat16
INV_SQRT_DK = 1.0 / math.sqrt(HIDDEN_SIZE_HEAD)


# ---------------------------------------------------------------------------
# In-kernel building blocks (activations flattened to (B*S, H), f32 carriers)
# ---------------------------------------------------------------------------
def _layer_norm(x, a, b):
    mean = jnp.mean(x, axis=-1, keepdims=True)
    xc = x - mean
    var = jnp.sum(xc * xc, axis=-1, keepdims=True) * (1.0 / (HIDDEN_SIZE - 1))
    return a * (xc / (jnp.sqrt(var) + LN_EPS)) + b


def _mh_core(qp, kp, vp, mask_b, wm, bm, nb, sq, sk):
    """Shared multi-head softmax-attention core.

    qp: (nb*sq, H) f32; kp/vp: (nb*sk, H) f32; mask_b: (nb, sq, sk) additive f32;
    wm: (H, H) bf16 merge weight; bm: (1, H) f32 merge bias.
    """
    qb = qp.reshape(nb, sq, HIDDEN_SIZE).astype(BF16)
    kb = kp.reshape(nb, sk, HIDDEN_SIZE).astype(BF16)
    vb = vp.reshape(nb, sk, HIDDEN_SIZE).astype(BF16)

    ctx_heads = []
    for h in range(MULTI_HEAD):                      # static unroll over heads
        lo = h * HIDDEN_SIZE_HEAD
        hi = lo + HIDDEN_SIZE_HEAD
        scores = jnp.einsum("bqd,bkd->bqk", qb[:, :, lo:hi], kb[:, :, lo:hi],
                            preferred_element_type=F32) * INV_SQRT_DK + mask_b
        m = jnp.max(scores, axis=-1, keepdims=True)
        e = jnp.exp(scores - m)
        p = e / jnp.sum(e, axis=-1, keepdims=True)
        ctx = jnp.einsum("bqk,bkd->bqd", p.astype(BF16), vb[:, :, lo:hi],
                         preferred_element_type=F32)            # (nb, sq, Dh)
        ctx_heads.append(ctx.reshape(nb * sq, HIDDEN_SIZE_HEAD))

    # head concat (lane concat) + a single merge matmul
    ctx_all = jnp.concatenate(ctx_heads, axis=-1)                # (nb*sq, H)
    return jnp.dot(ctx_all.astype(BF16), wm, preferred_element_type=F32) + bm


def _self_attention(x2d, mask_b, w, b, nb, s):
    """w: (H, 4H) bf16 packed [Wq|Wk|Wv|Wm]; b: (1, 4H) f32 packed biases."""
    h1, h3 = HIDDEN_SIZE, 3 * HIDDEN_SIZE
    qkv = jnp.dot(x2d.astype(BF16), w[:, :h3],
                  preferred_element_type=F32) + b[:, :h3]        # fused Q/K/V projection
    qp = qkv[:, 0:h1]
    kp = qkv[:, h1:2 * h1]
    vp = qkv[:, 2 * h1:h3]
    return _mh_core(qp, kp, vp, mask_b, w[:, h3:], b[:, h3:], nb, s, s)


def _cross_attention(q2d, kv2d, mask_b, w, b, nb, sq, sk):
    h1, h3 = HIDDEN_SIZE, 3 * HIDDEN_SIZE
    qp = jnp.dot(q2d.astype(BF16), w[:, :h1],
                 preferred_element_type=F32) + b[:, :h1]
    kv = jnp.dot(kv2d.astype(BF16), w[:, h1:h3],
                 preferred_element_type=F32) + b[:, h1:h3]       # fused K/V projection
    kp = kv[:, 0:h1]
    vp = kv[:, h1:2 * h1]
    return _mh_core(qp, kp, vp, mask_b, w[:, h3:], b[:, h3:], nb, sq, sk)


def _ffn(x2d, w1, b1, w2, b2):
    h = jnp.maximum(jnp.dot(x2d.astype(BF16), w1, preferred_element_type=F32) + b1, 0.0)
    # (dropout skipped -- eval mode)
    return jnp.dot(h.astype(BF16), w2, preferred_element_type=F32) + b2


def mca_ed_kernel(x_ref, y_ref, xm_ref, ym_ref,
                  att_w_ref, att_b_ref, ff_w1_ref, ff_b1_ref,
                  ff_w2_ref, ff_b2_ref, ln_a_ref, ln_b_ref,
                  x_out_ref, y_out_ref):
    nb = xm_ref.shape[0]
    sx = xm_ref.shape[2]
    sy = ym_ref.shape[2]

    x = x_ref[...]                      # (B*SX, H) f32
    y = y_ref[...]                      # (B*SY, H) f32

    # Hoisted mask-bias broadcasts: one per (query-len, key-len) pair for the whole kernel.
    ym_yy = jnp.broadcast_to(ym_ref[...], (nb, sy, sy))
    xm_xx = jnp.broadcast_to(xm_ref[...], (nb, sx, sx))
    ym_xy = jnp.broadcast_to(ym_ref[...], (nb, sx, sy))

    def ln(v, idx):                     # params indexed at use site (free ref views)
        return _layer_norm(v, ln_a_ref[idx], ln_b_ref[idx])

    def ffn(v, fidx):
        lo = fidx * HIDDEN_SIZE
        hi = lo + HIDDEN_SIZE
        return _ffn(v, ff_w1_ref[fidx], ff_b1_ref[fidx],
                    ff_w2_ref[:, lo:hi], ff_b2_ref[:, lo:hi])

    # ----- encoder: LAYER x SA on y -----
    for l in range(LAYER):
        att = _self_attention(y, ym_yy, att_w_ref[l], att_b_ref[l], nb, sy)
        y = ln(y + att, 2 * l)
        y = ln(y + ffn(y, l), 2 * l + 1)

    # ----- decoder: LAYER x SGA on x, attending to the fully-encoded y -----
    for l in range(LAYER):
        ai = LAYER + 2 * l              # attention-module index (self, then cross)
        li = 2 * LAYER + 3 * l          # layer-norm index
        fi = LAYER + l                  # ffn index
        att1 = _self_attention(x, xm_xx, att_w_ref[ai], att_b_ref[ai], nb, sx)
        x = ln(x + att1, li)
        att2 = _cross_attention(x, y, ym_xy, att_w_ref[ai + 1], att_b_ref[ai + 1],
                                nb, sx, sy)
        x = ln(x + att2, li + 1)
        x = ln(x + ffn(x, fi), li + 2)

    x_out_ref[...] = x.astype(x_out_ref.dtype)
    y_out_ref[...] = y.astype(y_out_ref.dtype)


# ---------------------------------------------------------------------------
# Wrapper: parameter packing + pallas_call
# ---------------------------------------------------------------------------
def _pack_params(params):
    """Repack per-module parameter stacks into a few lane-dense kernel slabs."""
    (enc_aw, enc_ab, enc_f1w, enc_f1b, enc_f2w, enc_f2b, enc_lna, enc_lnb,
     dec_aw, dec_ab, dec_f1w, dec_f1b, dec_f2w, dec_f2b, dec_lna, dec_lnb) = params
    H, FF = HIDDEN_SIZE, FF_SIZE

    def pack_att_w(aw4):    # (4,H,H) -> (H,4H) : [Wq|Wk|Wv|Wm] along lanes
        return jnp.transpose(aw4, (1, 0, 2)).reshape(H, 4 * H)

    def pack_att_b(ab4):    # (4,1,H) -> (1,4H)
        return ab4.reshape(1, 4 * H)

    att_w_list = [pack_att_w(enc_aw[l]) for l in range(LAYER)]
    att_b_list = [pack_att_b(enc_ab[l]) for l in range(LAYER)]
    for l in range(LAYER):
        att_w_list += [pack_att_w(dec_aw[l, 0:4]), pack_att_w(dec_aw[l, 4:8])]
        att_b_list += [pack_att_b(dec_ab[l, 0:4]), pack_att_b(dec_ab[l, 4:8])]
    att_w = jnp.stack(att_w_list).astype(BF16)                      # (3*LAYER, H, 4H)
    att_b = jnp.stack(att_b_list)                                   # (3*LAYER, 1, 4H) f32

    ff_w1 = jnp.concatenate([enc_f1w, dec_f1w], axis=0).astype(BF16)   # (2*LAYER, H, FF)
    ff_b1 = jnp.concatenate([enc_f1b, dec_f1b], axis=0)                # (2*LAYER, 1, FF)
    f2w = jnp.concatenate([enc_f2w, dec_f2w], axis=0)                  # (2*LAYER, FF, H)
    ff_w2 = jnp.transpose(f2w, (1, 0, 2)).reshape(FF, 2 * LAYER * H).astype(BF16)  # (FF,128)
    f2b = jnp.concatenate([enc_f2b, dec_f2b], axis=0)                  # (2*LAYER, 1, H)
    ff_b2 = f2b.reshape(1, 2 * LAYER * H)                              # (1, 128)

    ln_a = jnp.concatenate([enc_lna.reshape(2 * LAYER, 1, H),
                            dec_lna.reshape(3 * LAYER, 1, H)], axis=0)  # (5*LAYER, 1, H)
    ln_b = jnp.concatenate([enc_lnb.reshape(2 * LAYER, 1, H),
                            dec_lnb.reshape(3 * LAYER, 1, H)], axis=0)
    return att_w, att_b, ff_w1, ff_b1, ff_w2, ff_b2, ln_a, ln_b


def _cost_estimate(B, SX, SY, in_bytes, out_bytes):
    H, FF, Dh, nH = HIDDEN_SIZE, FF_SIZE, HIDDEN_SIZE_HEAD, MULTI_HEAD

    def attn_flops(sq, sk):
        proj = 2 * B * (2 * sq + 2 * sk) * H * H      # q + merge on sq; k, v on sk
        core = 4 * B * nH * sq * sk * Dh              # scores + context matmuls
        return proj + core

    def ffn_flops(s):
        return 4 * B * s * H * FF

    flops = (LAYER * (attn_flops(SY, SY) + ffn_flops(SY))
             + LAYER * (attn_flops(SX, SX) + attn_flops(SX, SY) + ffn_flops(SX)))
    trans = LAYER * B * nH * (SY * SY + SX * SX + SX * SY)   # exps in softmax
    return pl.CostEstimate(flops=int(flops), transcendentals=int(trans),
                           bytes_accessed=int(in_bytes + out_bytes))


@jax.jit
def mca_ed_pallas(x, y, x_mask, y_mask, params):
    B, SX, H = x.shape
    SY = y.shape[1]

    # Flatten batch*seq (free contiguous reshape) and precompute additive mask biases.
    x2 = x.reshape(B * SX, H)
    y2 = y.reshape(B * SY, H)
    xm_bias = (x_mask.reshape(B, 1, SX) * jnp.float32(-1e9)).astype(F32)
    ym_bias = (y_mask.reshape(B, 1, SY) * jnp.float32(-1e9)).astype(F32)

    packed = _pack_params(params)
    inputs = (x2, y2, xm_bias, ym_bias) + packed

    out_shape = (jax.ShapeDtypeStruct((B * SX, H), F32),
                 jax.ShapeDtypeStruct((B * SY, H), F32))

    in_bytes = sum(int(a.size) * a.dtype.itemsize for a in inputs)
    out_bytes = 4 * (B * SX * H + B * SY * H)

    # Single invocation, whole-array VMEM refs: no grid, no BlockSpec double buffering.
    x2o, y2o = pl.pallas_call(
        mca_ed_kernel,
        out_shape=out_shape,
        in_specs=[pl.BlockSpec(memory_space=pltpu.MemorySpace.VMEM) for _ in inputs],
        out_specs=(pl.BlockSpec(memory_space=pltpu.MemorySpace.VMEM),
                   pl.BlockSpec(memory_space=pltpu.MemorySpace.VMEM)),
        cost_estimate=_cost_estimate(B, SX, SY, in_bytes, out_bytes),
    )(*inputs)

    return x2o.reshape(B, SX, H), y2o.reshape(B, SY, H)


# ---------------------------------------------------------------------------
# Pure-JAX reference (mirrors the PyTorch forward in eval mode).
# mm_dtype lets us also emulate the kernel's bf16-operand / f32-accumulate matmuls.
# ---------------------------------------------------------------------------
def _mm(a, b, mm_dtype):
    return jnp.dot(a.astype(mm_dtype), b.astype(mm_dtype),
                   preferred_element_type=jnp.float32)


def _ref_attention(q, k, v, mask, w4, b4, mm_dtype):
    B_, Sq, _ = q.shape

    def proj(t, w, b):
        p = _mm(t, w, mm_dtype) + b
        p = p.reshape(B_, -1, MULTI_HEAD, HIDDEN_SIZE_HEAD)
        return jnp.transpose(p, (0, 2, 1, 3))

    qh, kh, vh = proj(q, w4[0], b4[0]), proj(k, w4[1], b4[1]), proj(v, w4[2], b4[2])
    scores = jnp.einsum("bhqd,bhkd->bhqk", qh.astype(mm_dtype), kh.astype(mm_dtype),
                        preferred_element_type=jnp.float32) / math.sqrt(HIDDEN_SIZE_HEAD)
    scores = jnp.where(mask > 0.0, -1e9, scores)
    att = jax.nn.softmax(scores, axis=-1)
    ctx = jnp.einsum("bhqk,bhkd->bhqd", att.astype(mm_dtype), vh.astype(mm_dtype),
                     preferred_element_type=jnp.float32)
    ctx = jnp.transpose(ctx, (0, 2, 1, 3)).reshape(B_, Sq, HIDDEN_SIZE)
    return _mm(ctx, w4[3], mm_dtype) + b4[3]


def _ref_layer_norm(x, a, b):
    mean = x.mean(-1, keepdims=True)
    std = jnp.sqrt(((x - mean) ** 2).sum(-1, keepdims=True) / (HIDDEN_SIZE - 1))
    return a * (x - mean) / (std + LN_EPS) + b


def _ref_ffn(x, w1, b1, w2, b2, mm_dtype):
    return _mm(jnp.maximum(_mm(x, w1, mm_dtype) + b1, 0.0), w2, mm_dtype) + b2


def mca_ed_reference(x, y, x_mask, y_mask, params, mm_dtype=jnp.float32):
    (enc_aw, enc_ab, enc_f1w, enc_f1b, enc_f2w, enc_f2b, enc_lna, enc_lnb,
     dec_aw, dec_ab, dec_f1w, dec_f1b, dec_f2w, dec_f2b, dec_lna, dec_lnb) = params

    for l in range(LAYER):
        att = _ref_attention(y, y, y, y_mask, enc_aw[l], enc_ab[l], mm_dtype)
        y = _ref_layer_norm(y + att, enc_lna[l, 0], enc_lnb[l, 0])
        ff = _ref_ffn(y, enc_f1w[l], enc_f1b[l], enc_f2w[l], enc_f2b[l], mm_dtype)
        y = _ref_layer_norm(y + ff, enc_lna[l, 1], enc_lnb[l, 1])

    for l in range(LAYER):
        att1 = _ref_attention(x, x, x, x_mask, dec_aw[l, 0:4], dec_ab[l, 0:4], mm_dtype)
        x = _ref_layer_norm(x + att1, dec_lna[l, 0], dec_lnb[l, 0])
        att2 = _ref_attention(x, y, y, y_mask, dec_aw[l, 4:8], dec_ab[l, 4:8], mm_dtype)
        x = _ref_layer_norm(x + att2, dec_lna[l, 1], dec_lnb[l, 1])
        ff = _ref_ffn(x, dec_f1w[l], dec_f1b[l], dec_f2w[l], dec_f2b[l], mm_dtype)
        x = _ref_layer_norm(x + ff, dec_lna[l, 2], dec_lnb[l, 2])
    return x, y


# ---------------------------------------------------------------------------
# Parameter construction (nn.Linear-style init, weights pre-transposed to (in, out))
# ---------------------------------------------------------------------------
def init_params(key):
    H, FF = HIDDEN_SIZE, FF_SIZE
    keys = iter(jax.random.split(key, 256))
    nk = lambda: next(keys)

    def linear(n_in, n_out):
        bound = 1.0 / math.sqrt(n_in)
        w = jax.random.uniform(nk(), (n_in, n_out), jnp.float32, -bound, bound)
        b = jax.random.uniform(nk(), (1, n_out), jnp.float32, -bound, bound)
        return w, b

    def attn_pack(n_lin):
        ws, bs = [], []
        for _ in range(n_lin):
            w, b = linear(H, H)
            ws.append(w); bs.append(b)
        return jnp.stack(ws), jnp.stack(bs)        # (n_lin,H,H), (n_lin,1,H)

    def ln_pack(n_ln):
        a = 1.0 + 0.1 * jax.random.normal(nk(), (n_ln, 1, H), jnp.float32)
        b = 0.1 * jax.random.normal(nk(), (n_ln, 1, H), jnp.float32)
        return a, b

    enc = {k: [] for k in "aw ab f1w f1b f2w f2b lna lnb".split()}
    dec = {k: [] for k in "aw ab f1w f1b f2w f2b lna lnb".split()}
    for _ in range(LAYER):
        aw, ab = attn_pack(4)
        w1, b1 = linear(H, FF); w2, b2 = linear(FF, H)
        la, lb = ln_pack(2)
        for k, v in zip("aw ab f1w f1b f2w f2b lna lnb".split(),
                        (aw, ab, w1, b1, w2, b2, la, lb)):
            enc[k].append(v)
    for _ in range(LAYER):
        aw, ab = attn_pack(8)                      # [0:4] self-att, [4:8] cross-att
        w1, b1 = linear(H, FF); w2, b2 = linear(FF, H)
        la, lb = ln_pack(3)
        for k, v in zip("aw ab f1w f1b f2w f2b lna lnb".split(),
                        (aw, ab, w1, b1, w2, b2, la, lb)):
            dec[k].append(v)

    order = "aw ab f1w f1b f2w f2b lna lnb".split()
    return tuple(jnp.stack(enc[k]) for k in order) + tuple(jnp.stack(dec[k]) for k in order)


if __name__ == "__main__":
    key = jax.random.PRNGKey(0)
    kx, ky, kp = jax.random.split(key, 3)

    x = jax.random.normal(kx, (BATCH, SEQ_X, HIDDEN_SIZE), jnp.float32)
    y = jax.random.normal(ky, (BATCH, SEQ_Y, HIDDEN_SIZE), jnp.float32)

    # key-padding masks, PyTorch layout (B,1,1,S) with 1.0 == masked
    x_mask = jnp.zeros((BATCH, 1, 1, SEQ_X), jnp.float32).at[1, 0, 0, -2:].set(1.0)
    y_mask = jnp.zeros((BATCH, 1, 1, SEQ_Y), jnp.float32).at[0, 0, 0, -3:].set(1.0)

    params = init_params(kp)

    x_out, y_out = mca_ed_pallas(x, y, x_mask, y_mask, params)
    jax.block_until_ready((x_out, y_out))
    assert x_out.shape == (BATCH, SEQ_X, HIDDEN_SIZE)
    assert y_out.shape == (BATCH, SEQ_Y, HIDDEN_SIZE)

    # (1) Algorithmic parity: reference with the SAME matmul numerics as the kernel
    #     (bf16 operands, f32 accumulation) must match tightly.
    x_rb, y_rb = mca_ed_reference(x, y, x_mask, y_mask, params, mm_dtype=jnp.bfloat16)
    err_bf = max(float(jnp.max(jnp.abs(x_out - x_rb))),
                 float(jnp.max(jnp.abs(y_out - y_rb))))
    assert err_bf < 1e-2, f"bf16-matched reference max abs err {err_bf}"

    # (2) Drift vs. exact-f32 PyTorch semantics: attributable only to bf16 MXU-operand
    #     rounding (an intentional TPU perf trade); loose bound catches structural bugs.
    x_rf, y_rf = mca_ed_reference(x, y, x_mask, y_mask, params, mm_dtype=jnp.float32)
    err_f32 = max(float(jnp.max(jnp.abs(x_out - x_rf))),
                  float(jnp.max(jnp.abs(y_out - y_rf))))
    assert err_f32 < 0.25, f"f32 reference max abs err {err_f32}"

    print("KERNEL_OK")
</pallas_src>

<mosaic_0001>
module attributes {stable_mosaic.version = 11 : i64} {
  func.func @mca_ed_kernel(%arg0: memref<16x32xf32, #tpu.memory_space<vmem>>, %arg1: memref<16x32xf32, #tpu.memory_space<vmem>>, %arg2: memref<2x1x8xf32, #tpu.memory_space<vmem>>, %arg3: memref<2x1x8xf32, #tpu.memory_space<vmem>>, %arg4: memref<6x32x128xbf16, #tpu.memory_space<vmem>>, %arg5: memref<6x1x128xf32, #tpu.memory_space<vmem>>, %arg6: memref<4x32x128xbf16, #tpu.memory_space<vmem>>, %arg7: memref<4x1x128xf32, #tpu.memory_space<vmem>>, %arg8: memref<128x128xbf16, #tpu.memory_space<vmem>>, %arg9: memref<1x128xf32, #tpu.memory_space<vmem>>, %arg10: memref<10x1x32xf32, #tpu.memory_space<vmem>>, %arg11: memref<10x1x32xf32, #tpu.memory_space<vmem>>, %arg12: memref<16x32xf32, #tpu.memory_space<vmem>>, %arg13: memref<16x32xf32, #tpu.memory_space<vmem>>) attributes {dimension_semantics = [], scalar_prefetch = 0 : i64, scratch_operands = 0 : i64, tpu.core_type = #tpu.core_type<tc>} {
    %c0 = arith.constant 0 : index
    %c0_0 = arith.constant 0 : index
    %0 = vector.load %arg0[%c0, %c0_0] : memref<16x32xf32, #tpu.memory_space<vmem>>, vector<16x32xf32>
    %c0_1 = arith.constant 0 : index
    %c0_2 = arith.constant 0 : index
    %1 = vector.load %arg1[%c0_1, %c0_2] : memref<16x32xf32, #tpu.memory_space<vmem>>, vector<16x32xf32>
    %c0_3 = arith.constant 0 : index
    %c0_4 = arith.constant 0 : index
    %c0_5 = arith.constant 0 : index
    %2 = vector.load %arg3[%c0_3, %c0_4, %c0_5] : memref<2x1x8xf32, #tpu.memory_space<vmem>>, vector<2x1x8xf32>
    %3 = vector.shape_cast %2 : vector<2x1x8xf32> to vector<2x1x8xf32>
    %4 = vector.broadcast %3 : vector<2x1x8xf32> to vector<2x8x8xf32>
    %c0_6 = arith.constant 0 : index
    %c0_7 = arith.constant 0 : index
    %c0_8 = arith.constant 0 : index
    %5 = vector.load %arg2[%c0_6, %c0_7, %c0_8] : memref<2x1x8xf32, #tpu.memory_space<vmem>>, vector<2x1x8xf32>
    %6 = vector.shape_cast %5 : vector<2x1x8xf32> to vector<2x1x8xf32>
    %7 = vector.broadcast %6 : vector<2x1x8xf32> to vector<2x8x8xf32>
    %c0_9 = arith.constant 0 : index
    %c0_10 = arith.constant 0 : index
    %c0_11 = arith.constant 0 : index
    %8 = vector.load %arg3[%c0_9, %c0_10, %c0_11] : memref<2x1x8xf32, #tpu.memory_space<vmem>>, vector<2x1x8xf32>
    %9 = vector.shape_cast %8 : vector<2x1x8xf32> to vector<2x1x8xf32>
    %10 = vector.broadcast %9 : vector<2x1x8xf32> to vector<2x8x8xf32>
    %c0_12 = arith.constant 0 : index
    %c0_13 = arith.constant 0 : index
    %c0_14 = arith.constant 0 : index
    %11 = vector.load %arg4[%c0_12, %c0_13, %c0_14] : memref<6x32x128xbf16, #tpu.memory_space<vmem>>, vector<1x32x128xbf16>
    %12 = vector.shape_cast %11 : vector<1x32x128xbf16> to vector<32x128xbf16>
    %c0_15 = arith.constant 0 : index
    %c0_16 = arith.constant 0 : index
    %c0_17 = arith.constant 0 : index
    %13 = vector.load %arg5[%c0_15, %c0_16, %c0_17] : memref<6x1x128xf32, #tpu.memory_space<vmem>>, vector<1x1x128xf32>
    %14 = vector.shape_cast %13 : vector<1x1x128xf32> to vector<1x128xf32>
    %15 = arith.truncf %1 : vector<16x32xf32> to vector<16x32xbf16>
    %16 = vector.extract_strided_slice %12 {offsets = [0, 0], sizes = [32, 96], strides = [1, 1]} : vector<32x128xbf16> to vector<32x96xbf16>
    %cst = arith.constant dense<0.000000e+00> : vector<16x96xf32>
    %17 = tpu.matmul %15, %16, %cst {dimension_numbers = #tpu.dot_dimension_numbers<[1], [0], [0], [1], [0, 0, 1, 1], [], []>} : vector<16x32xbf16>, vector<32x96xbf16>, vector<16x96xf32> -> vector<16x96xf32>
    %18 = vector.extract_strided_slice %14 {offsets = [0, 0], sizes = [1, 96], strides = [1, 1]} : vector<1x128xf32> to vector<1x96xf32>
    %19 = vector.broadcast %18 : vector<1x96xf32> to vector<16x96xf32>
    %20 = arith.addf %17, %19 : vector<16x96xf32>
    %21 = vector.extract_strided_slice %20 {offsets = [0, 0], sizes = [16, 32], strides = [1, 1]} : vector<16x96xf32> to vector<16x32xf32>
    %22 = vector.extract_strided_slice %20 {offsets = [0, 32], sizes = [16, 32], strides = [1, 1]} : vector<16x96xf32> to vector<16x32xf32>
    %23 = vector.extract_strided_slice %20 {offsets = [0, 64], sizes = [16, 32], strides = [1, 1]} : vector<16x96xf32> to vector<16x32xf32>
    %24 = vector.extract_strided_slice %12 {offsets = [0, 96], sizes = [32, 32], strides = [1, 1]} : vector<32x128xbf16> to vector<32x32xbf16>
    %25 = vector.extract_strided_slice %14 {offsets = [0, 96], sizes = [1, 32], strides = [1, 1]} : vector<1x128xf32> to vector<1x32xf32>
    %26 = vector.shape_cast %21 : vector<16x32xf32> to vector<2x8x32xf32>
    %27 = arith.truncf %26 : vector<2x8x32xf32> to vector<2x8x32xbf16>
    %28 = vector.shape_cast %22 : vector<16x32xf32> to vector<2x8x32xf32>
    %29 = arith.truncf %28 : vector<2x8x32xf32> to vector<2x8x32xbf16>
    %30 = vector.shape_cast %23 : vector<16x32xf32> to vector<2x8x32xf32>
    %31 = arith.truncf %30 : vector<2x8x32xf32> to vector<2x8x32xbf16>
    %32 = vector.extract_strided_slice %27 {offsets = [0, 0, 0], sizes = [2, 8, 8], strides = [1, 1, 1]} : vector<2x8x32xbf16> to vector<2x8x8xbf16>
    %33 = vector.extract_strided_slice %29 {offsets = [0, 0, 0], sizes = [2, 8, 8], strides = [1, 1, 1]} : vector<2x8x32xbf16> to vector<2x8x8xbf16>
    "tpu.trace_start"() <{level = 10 : i32, message = "bqd,bkd->bqk"}> : () -> ()
    %cst_18 = arith.constant dense<0.000000e+00> : vector<2x8x8xf32>
    %34 = tpu.matmul %32, %33, %cst_18 {dimension_numbers = #tpu.dot_dimension_numbers<[2], [2], [1], [1], [0, 0, 0, 1, 1, 1], [0], [0]>} : vector<2x8x8xbf16>, vector<2x8x8xbf16>, vector<2x8x8xf32> -> vector<2x8x8xf32>
    "tpu.trace_stop"() : () -> ()
    %cst_19 = arith.constant 0.353553385 : f32
    %35 = vector.broadcast %cst_19 : f32 to vector<2x8x8xf32>
    %36 = arith.mulf %34, %35 : vector<2x8x8xf32>
    %37 = arith.addf %36, %4 : vector<2x8x8xf32>
    %cst_20 = arith.constant dense<0xFF800000> : vector<2x8xf32>
    %38 = vector.multi_reduction <maximumf>, %37, %cst_20 [2] : vector<2x8x8xf32> to vector<2x8xf32>
    %39 = vector.shape_cast %38 : vector<2x8xf32> to vector<2x8x1xf32>
    %40 = vector.broadcast %39 : vector<2x8x1xf32> to vector<2x8x8xf32>
    %41 = arith.subf %37, %40 : vector<2x8x8xf32>
    %42 = math.exp %41 : vector<2x8x8xf32>
    %cst_21 = arith.constant dense<0.000000e+00> : vector<2x8xf32>
    %43 = vector.multi_reduction <add>, %42, %cst_21 [2] : vector<2x8x8xf32> to vector<2x8xf32>
    %44 = vector.shape_cast %43 : vector<2x8xf32> to vector<2x8x1xf32>
    %45 = vector.broadcast %44 : vector<2x8x1xf32> to vector<2x8x8xf32>
    %46 = arith.divf %42, %45 : vector<2x8x8xf32>
    %47 = arith.truncf %46 : vector<2x8x8xf32> to vector<2x8x8xbf16>
    %48 = vector.extract_strided_slice %31 {offsets = [0, 0, 0], sizes = [2, 8, 8], strides = [1, 1, 1]} : vector<2x8x32xbf16> to vector<2x8x8xbf16>
    "tpu.trace_start"() <{level = 10 : i32, message = "bqk,bkd->bqd"}> : () -> ()
    %cst_22 = arith.constant dense<0.000000e+00> : vector<2x8x8xf32>
    %49 = tpu.matmul %47, %48, %cst_22 {dimension_numbers = #tpu.dot_dimension_numbers<[2], [1], [1], [2], [0, 0, 0, 1, 1, 2], [0], [0]>} : vector<2x8x8xbf16>, vector<2x8x8xbf16>, vector<2x8x8xf32> -> vector<2x8x8xf32>
    "tpu.trace_stop"() : () -> ()
    %50 = vector.shape_cast %49 : vector<2x8x8xf32> to vector<16x8xf32>
    %51 = vector.extract_strided_slice %27 {offsets = [0, 0, 8], sizes = [2, 8, 8], strides = [1, 1, 1]} : vector<2x8x32xbf16> to vector<2x8x8xbf16>
    %52 = vector.extract_strided_slice %29 {offsets = [0, 0, 8], sizes = [2, 8, 8], strides = [1, 1, 1]} : vector<2x8x32xbf16> to vector<2x8x8xbf16>
    "tpu.trace_start"() <{level = 10 : i32, message = "bqd,bkd->bqk"}> : () -> ()
    %cst_23 = arith.constant dense<0.000000e+00> : vector<2x8x8xf32>
    %53 = tpu.matmul %51, %52, %cst_23 {dimension_numbers = #tpu.dot_dimension_numbers<[2], [2], [1], [1], [0, 0, 0, 1, 1, 1], [0], [0]>} : vector<2x8x8xbf16>, vector<2x8x8xbf16>, vector<2x8x8xf32> -> vector<2x8x8xf32>
    "tpu.trace_stop"() : () -> ()
    %cst_24 = arith.constant 0.353553385 : f32
    %54 = vector.broadcast %cst_24 : f32 to vector<2x8x8xf32>
    %55 = arith.mulf %53, %54 : vector<2x8x8xf32>
    %56 = arith.addf %55, %4 : vector<2x8x8xf32>
    %cst_25 = arith.constant dense<0xFF800000> : vector<2x8xf32>
    %57 = vector.multi_reduction <maximumf>, %56, %cst_25 [2] : vector<2x8x8xf32> to vector<2x8xf32>
    %58 = vector.shape_cast %57 : vector<2x8xf32> to vector<2x8x1xf32>
    %59 = vector.broadcast %58 : vector<2x8x1xf32> to vector<2x8x8xf32>
    %60 = arith.subf %56, %59 : vector<2x8x8xf32>
    %61 = math.exp %60 : vector<2x8x8xf32>
    %cst_26 = arith.constant dense<0.000000e+00> : vector<2x8xf32>
    %62 = vector.multi_reduction <add>, %61, %cst_26 [2] : vector<2x8x8xf32> to vector<2x8xf32>
    %63 = vector.shape_cast %62 : vector<2x8xf32> to vector<2x8x1xf32>
    %64 = vector.broadcast %63 : vector<2x8x1xf32> to vector<2x8x8xf32>
    %65 = arith.divf %61, %64 : vector<2x8x8xf32>
    %66 = arith.truncf %65 : vector<2x8x8xf32> to vector<2x8x8xbf16>
    %67 = vector.extract_strided_slice %31 {offsets = [0, 0, 8], sizes = [2, 8, 8], strides = [1, 1, 1]} : vector<2x8x32xbf16> to vector<2x8x8xbf16>
    "tpu.trace_start"() <{level = 10 : i32, message = "bqk,bkd->bqd"}> : () -> ()
    %cst_27 = arith.constant dense<0.000000e+00> : vector<2x8x8xf32>
    %68 = tpu.matmul %66, %67, %cst_27 {dimension_numbers = #tpu.dot_dimension_numbers<[2], [1], [1], [2], [0, 0, 0, 1, 1, 2], [0], [0]>} : vector<2x8x8xbf16>, vector<2x8x8xbf16>, vector<2x8x8xf32> -> vector<2x8x8xf32>
    "tpu.trace_stop"() : () -> ()
    %69 = vector.shape_cast %68 : vector<2x8x8xf32> to vector<16x8xf32>
    %70 = vector.extract_strided_slice %27 {offsets = [0, 0, 16], sizes = [2, 8, 8], strides = [1, 1, 1]} : vector<2x8x32xbf16> to vector<2x8x8xbf16>
    %71 = vector.extract_strided_slice %29 {offsets = [0, 0, 16], sizes = [2, 8, 8], strides = [1, 1, 1]} : vector<2x8x32xbf16> to vector<2x8x8xbf16>
    "tpu.trace_start"() <{level = 10 : i32, message = "bqd,bkd->bqk"}> : () -> ()
    %cst_28 = arith.constant dense<0.000000e+00> : vector<2x8x8xf32>
    %72 = tpu.matmul %70, %71, %cst_28 {dimension_numbers = #tpu.dot_dimension_numbers<[2], [2], [1], [1], [0, 0, 0, 1, 1, 1], [0], [0]>} : vector<2x8x8xbf16>, vector<2x8x8xbf16>, vector<2x8x8xf32> -> vector<2x8x8xf32>
    "tpu.trace_stop"() : () -> ()
    %cst_29 = arith.constant 0.353553385 : f32
    %73 = vector.broadcast %cst_29 : f32 to vector<2x8x8xf32>
    %74 = arith.mulf %72, %73 : vector<2x8x8xf32>
    %75 = arith.addf %74, %4 : vector<2x8x8xf32>
    %cst_30 = arith.constant dense<0xFF800000> : vector<2x8xf32>
    %76 = vector.multi_reduction <maximumf>, %75, %cst_30 [2] : vector<2x8x8xf32> to vector<2x8xf32>
    %77 = vector.shape_cast %76 : vector<2x8xf32> to vector<2x8x1xf32>
    %78 = vector.broadcast %77 : vector<2x8x1xf32> to vector<2x8x8xf32>
    %79 = arith.subf %75, %78 : vector<2x8x8xf32>
    %80 = math.exp %79 : vector<2x8x8xf32>
    %cst_31 = arith.constant dense<0.000000e+00> : vector<2x8xf32>
    %81 = vector.multi_reduction <add>, %80, %cst_31 [2] : vector<2x8x8xf32> to vector<2x8xf32>
    %82 = vector.shape_cast %81 : vector<2x8xf32> to vector<2x8x1xf32>
    %83 = vector.broadcast %82 : vector<2x8x1xf32> to vector<2x8x8xf32>
    %84 = arith.divf %80, %83 : vector<2x8x8xf32>
    %85 = arith.truncf %84 : vector<2x8x8xf32> to vector<2x8x8xbf16>
    %86 = vector.extract_strided_slice %31 {offsets = [0, 0, 16], sizes = [2, 8, 8], strides = [1, 1, 1]} : vector<2x8x32xbf16> to vector<2x8x8xbf16>
    "tpu.trace_start"() <{level = 10 : i32, message = "bqk,bkd->bqd"}> : () -> ()
    %cst_32 = arith.constant dense<0.000000e+00> : vector<2x8x8xf32>
    %87 = tpu.matmul %85, %86, %cst_32 {dimension_numbers = #tpu.dot_dimension_numbers<[2], [1], [1], [2], [0, 0, 0, 1, 1, 2], [0], [0]>} : vector<2x8x8xbf16>, vector<2x8x8xbf16>, vector<2x8x8xf32> -> vector<2x8x8xf32>
    "tpu.trace_stop"() : () -> ()
    %88 = vector.shape_cast %87 : vector<2x8x8xf32> to vector<16x8xf32>
    %89 = vector.extract_strided_slice %27 {offsets = [0, 0, 24], sizes = [2, 8, 8], strides = [1, 1, 1]} : vector<2x8x32xbf16> to vector<2x8x8xbf16>
    %90 = vector.extract_strided_slice %29 {offsets = [0, 0, 24], sizes = [2, 8, 8], strides = [1, 1, 1]} : vector<2x8x32xbf16> to vector<2x8x8xbf16>
    "tpu.trace_start"() <{level = 10 : i32, message = "bqd,bkd->bqk"}> : () -> ()
    %cst_33 = arith.constant dense<0.000000e+00> : vector<2x8x8xf32>
    %91 = tpu.matmul %89, %90, %cst_33 {dimension_numbers = #tpu.dot_dimension_numbers<[2], [2], [1], [1], [0, 0, 0, 1, 1, 1], [0], [0]>} : vector<2x8x8xbf16>, vector<2x8x8xbf16>, vector<2x8x8xf32> -> vector<2x8x8xf32>
    "tpu.trace_stop"() : () -> ()
    %cst_34 = arith.constant 0.353553385 : f32
    %92 = vector.broadcast %cst_34 : f32 to vector<2x8x8xf32>
    %93 = arith.mulf %91, %92 : vector<2x8x8xf32>
    %94 = arith.addf %93, %4 : vector<2x8x8xf32>
    %cst_35 = arith.constant dense<0xFF800000> : vector<2x8xf32>
    %95 = vector.multi_reduction <maximumf>, %94, %cst_35 [2] : vector<2x8x8xf32> to vector<2x8xf32>
    %96 = vector.shape_cast %95 : vector<2x8xf32> to vector<2x8x1xf32>
    %97 = vector.broadcast %96 : vector<2x8x1xf32> to vector<2x8x8xf32>
    %98 = arith.subf %94, %97 : vector<2x8x8xf32>
    %99 = math.exp %98 : vector<2x8x8xf32>
    %cst_36 = arith.constant dense<0.000000e+00> : vector<2x8xf32>
    %100 = vector.multi_reduction <add>, %99, %cst_36 [2] : vector<2x8x8xf32> to vector<2x8xf32>
    %101 = vector.shape_cast %100 : vector<2x8xf32> to vector<2x8x1xf32>
    %102 = vector.broadcast %101 : vector<2x8x1xf32> to vector<2x8x8xf32>
    %103 = arith.divf %99, %102 : vector<2x8x8xf32>
    %104 = arith.truncf %103 : vector<2x8x8xf32> to vector<2x8x8xbf16>
    %105 = vector.extract_strided_slice %31 {offsets = [0, 0, 24], sizes = [2, 8, 8], strides = [1, 1, 1]} : vector<2x8x32xbf16> to vector<2x8x8xbf16>
    "tpu.trace_start"() <{level = 10 : i32, message = "bqk,bkd->bqd"}> : () -> ()
    %cst_37 = arith.constant dense<0.000000e+00> : vector<2x8x8xf32>
    %106 = tpu.matmul %104, %105, %cst_37 {dimension_numbers = #tpu.dot_dimension_numbers<[2], [1], [1], [2], [0, 0, 0, 1, 1, 2], [0], [0]>} : vector<2x8x8xbf16>, vector<2x8x8xbf16>, vector<2x8x8xf32> -> vector<2x8x8xf32>
    "tpu.trace_stop"() : () -> ()
    %107 = vector.shape_cast %106 : vector<2x8x8xf32> to vector<16x8xf32>
    %108 = tpu.concatenate %50, %69, %88, %107 in 1 : vector<16x8xf32>, vector<16x8xf32>, vector<16x8xf32>, vector<16x8xf32> -> vector<16x32xf32>
    %109 = arith.truncf %108 : vector<16x32xf32> to vector<16x32xbf16>
    %cst_38 = arith.constant dense<0.000000e+00> : vector<16x32xf32>
    %110 = tpu.matmul %109, %24, %cst_38 {dimension_numbers = #tpu.dot_dimension_numbers<[1], [0], [0], [1], [0, 0, 1, 1], [], []>} : vector<16x32xbf16>, vector<32x32xbf16>, vector<16x32xf32> -> vector<16x32xf32>
    %111 = vector.broadcast %25 : vector<1x32xf32> to vector<16x32xf32>
    %112 = arith.addf %110, %111 : vector<16x32xf32>
    %113 = arith.addf %1, %112 : vector<16x32xf32>
    %c0_39 = arith.constant 0 : index
    %c0_40 = arith.constant 0 : index
    %c0_41 = arith.constant 0 : index
    %114 = vector.load %arg10[%c0_39, %c0_40, %c0_41] : memref<10x1x32xf32, #tpu.memory_space<vmem>>, vector<1x1x32xf32>
    %115 = vector.shape_cast %114 : vector<1x1x32xf32> to vector<1x32xf32>
    %c0_42 = arith.constant 0 : index
    %c0_43 = arith.constant 0 : index
    %c0_44 = arith.constant 0 : index
    %116 = vector.load %arg11[%c0_42, %c0_43, %c0_44] : memref<10x1x32xf32, #tpu.memory_space<vmem>>, vector<1x1x32xf32>
    %117 = vector.shape_cast %116 : vector<1x1x32xf32> to vector<1x32xf32>
    %cst_45 = arith.constant dense<0.000000e+00> : vector<16xf32>
    %118 = vector.multi_reduction <add>, %113, %cst_45 [1] : vector<16x32xf32> to vector<16xf32>
    %119 = vector.shape_cast %118 : vector<16xf32> to vector<16x1xf32>
    %cst_46 = arith.constant 3.200000e+01 : f32
    %120 = vector.broadcast %cst_46 : f32 to vector<16x1xf32>
    %121 = arith.divf %119, %120 : vector<16x1xf32>
    %122 = vector.broadcast %121 : vector<16x1xf32> to vector<16x32xf32>
    %123 = arith.subf %113, %122 : vector<16x32xf32>
    %124 = arith.mulf %123, %123 : vector<16x32xf32>
    %cst_47 = arith.constant dense<0.000000e+00> : vector<16xf32>
    %125 = vector.multi_reduction <add>, %124, %cst_47 [1] : vector<16x32xf32> to vector<16xf32>
    %126 = vector.shape_cast %125 : vector<16xf32> to vector<16x1xf32>
    %cst_48 = arith.constant 0.0322580636 : f32
    %127 = vector.broadcast %cst_48 : f32 to vector<16x1xf32>
    %128 = arith.mulf %126, %127 : vector<16x1xf32>
    %129 = math.sqrt %128 : vector<16x1xf32>
    %cst_49 = arith.constant 9.99999997E-7 : f32
    %130 = vector.broadcast %cst_49 : f32 to vector<16x1xf32>
    %131 = arith.addf %129, %130 : vector<16x1xf32>
    %132 = vector.broadcast %131 : vector<16x1xf32> to vector<16x32xf32>
    %133 = arith.divf %123, %132 : vector<16x32xf32>
    %134 = vector.broadcast %115 : vector<1x32xf32> to vector<16x32xf32>
    %135 = arith.mulf %134, %133 : vector<16x32xf32>
    %136 = vector.broadcast %117 : vector<1x32xf32> to vector<16x32xf32>
    %137 = arith.addf %135, %136 : vector<16x32xf32>
    %c0_50 = arith.constant 0 : index
    %c0_51 = arith.constant 0 : index
    %c0_52 = arith.constant 0 : index
    %138 = vector.load %arg6[%c0_50, %c0_51, %c0_52] : memref<4x32x128xbf16, #tpu.memory_space<vmem>>, vector<1x32x128xbf16>
    %139 = vector.shape_cast %138 : vector<1x32x128xbf16> to vector<32x128xbf16>
    %c0_53 = arith.constant 0 : index
    %c0_54 = arith.constant 0 : index
    %c0_55 = arith.constant 0 : index
    %140 = vector.load %arg7[%c0_53, %c0_54, %c0_55] : memref<4x1x128xf32, #tpu.memory_space<vmem>>, vector<1x1x128xf32>
    %141 = vector.shape_cast %140 : vector<1x1x128xf32> to vector<1x128xf32>
    %c0_56 = arith.constant 0 : index
    %c0_57 = arith.constant 0 : index
    %142 = vector.load %arg8[%c0_56, %c0_57] : memref<128x128xbf16, #tpu.memory_space<vmem>>, vector<128x32xbf16>
    %c0_58 = arith.constant 0 : index
    %c0_59 = arith.constant 0 : index
    %143 = vector.load %arg9[%c0_58, %c0_59] : memref<1x128xf32, #tpu.memory_space<vmem>>, vector<1x32xf32>
    %144 = arith.truncf %137 : vector<16x32xf32> to vector<16x32xbf16>
    %cst_60 = arith.constant dense<0.000000e+00> : vector<16x128xf32>
    %145 = tpu.matmul %144, %139, %cst_60 {dimension_numbers = #tpu.dot_dimension_numbers<[1], [0], [0], [1], [0, 0, 1, 1], [], []>} : vector<16x32xbf16>, vector<32x128xbf16>, vector<16x128xf32> -> vector<16x128xf32>
    %146 = vector.broadcast %141 : vector<1x128xf32> to vector<16x128xf32>
    %147 = arith.addf %145, %146 : vector<16x128xf32>
    %cst_61 = arith.constant 0.000000e+00 : f32
    %148 = vector.broadcast %cst_61 : f32 to vector<16x128xf32>
    %149 = arith.maximumf %147, %148 : vector<16x128xf32>
    %150 = arith.truncf %149 : vector<16x128xf32> to vector<16x128xbf16>
    %cst_62 = arith.constant dense<0.000000e+00> : vector<16x32xf32>
    %151 = tpu.matmul %150, %142, %cst_62 {dimension_numbers = #tpu.dot_dimension_numbers<[1], [0], [0], [1], [0, 0, 1, 1], [], []>} : vector<16x128xbf16>, vector<128x32xbf16>, vector<16x32xf32> -> vector<16x32xf32>
    %152 = vector.broadcast %143 : vector<1x32xf32> to vector<16x32xf32>
    %153 = arith.addf %151, %152 : vector<16x32xf32>
    %154 = arith.addf %137, %153 : vector<16x32xf32>
    %c1 = arith.constant 1 : index
    %c0_63 = arith.constant 0 : index
    %c0_64 = arith.constant 0 : index
    %155 = vector.load %arg10[%c1, %c0_63, %c0_64] : memref<10x1x32xf32, #tpu.memory_space<vmem>>, vector<1x1x32xf32>
    %156 = vector.shape_cast %155 : vector<1x1x32xf32> to vector<1x32xf32>
    %c1_65 = arith.constant 1 : index
    %c0_66 = arith.constant 0 : index
    %c0_67 = arith.constant 0 : index
    %157 = vector.load %arg11[%c1_65, %c0_66, %c0_67] : memref<10x1x32xf32, #tpu.memory_space<vmem>>, vector<1x1x32xf32>
    %158 = vector.shape_cast %157 : vector<1x1x32xf32> to vector<1x32xf32>
    %cst_68 = arith.constant dense<0.000000e+00> : vector<16xf32>
    %159 = vector.multi_reduction <add>, %154, %cst_68 [1] : vector<16x32xf32> to vector<16xf32>
    %160 = vector.shape_cast %159 : vector<16xf32> to vector<16x1xf32>
    %cst_69 = arith.constant 3.200000e+01 : f32
    %161 = vector.broadcast %cst_69 : f32 to vector<16x1xf32>
    %162 = arith.divf %160, %161 : vector<16x1xf32>
    %163 = vector.broadcast %162 : vector<16x1xf32> to vector<16x32xf32>
    %164 = arith.subf %154, %163 : vector<16x32xf32>
    %165 = arith.mulf %164, %164 : vector<16x32xf32>
    %cst_70 = arith.constant dense<0.000000e+00> : vector<16xf32>
    %166 = vector.multi_reduction <add>, %165, %cst_70 [1] : vector<16x32xf32> to vector<16xf32>
    %167 = vector.shape_cast %166 : vector<16xf32> to vector<16x1xf32>
    %cst_71 = arith.constant 0.0322580636 : f32
    %168 = vector.broadcast %cst_71 : f32 to vector<16x1xf32>
    %169 = arith.mulf %167, %168 : vector<16x1xf32>
    %170 = math.sqrt %169 : vector<16x1xf32>
    %cst_72 = arith.constant 9.99999997E-7 : f32
    %171 = vector.broadcast %cst_72 : f32 to vector<16x1xf32>
    %172 = arith.addf %170, %171 : vector<16x1xf32>
    %173 = vector.broadcast %172 : vector<16x1xf32> to vector<16x32xf32>
    %174 = arith.divf %164, %173 : vector<16x32xf32>
    %175 = vector.broadcast %156 : vector<1x32xf32> to vector<16x32xf32>
    %176 = arith.mulf %175, %174 : vector<16x32xf32>
    %177 = vector.broadcast %158 : vector<1x32xf32> to vector<16x32xf32>
    %178 = arith.addf %176, %177 : vector<16x32xf32>
    %c1_73 = arith.constant 1 : index
    %c0_74 = arith.constant 0 : index
    %c0_75 = arith.constant 0 : index
    %179 = vector.load %arg4[%c1_73, %c0_74, %c0_75] : memref<6x32x128xbf16, #tpu.memory_space<vmem>>, vector<1x32x128xbf16>
    %180 = vector.shape_cast %179 : vector<1x32x128xbf16> to vector<32x128xbf16>
    %c1_76 = arith.constant 1 : index
    %c0_77 = arith.constant 0 : index
    %c0_78 = arith.constant 0 : index
    %181 = vector.load %arg5[%c1_76, %c0_77, %c0_78] : memref<6x1x128xf32, #tpu.memory_space<vmem>>, vector<1x1x128xf32>
    %182 = vector.shape_cast %181 : vector<1x1x128xf32> to vector<1x128xf32>
    %183 = arith.truncf %178 : vector<16x32xf32> to vector<16x32xbf16>
    %184 = vector.extract_strided_slice %180 {offsets = [0, 0], sizes = [32, 96], strides = [1, 1]} : vector<32x128xbf16> to vector<32x96xbf16>
    %cst_79 = arith.constant dense<0.000000e+00> : vector<16x96xf32>
    %185 = tpu.matmul %183, %184, %cst_79 {dimension_numbers = #tpu.dot_dimension_numbers<[1], [0], [0], [1], [0, 0, 1, 1], [], []>} : vector<16x32xbf16>, vector<32x96xbf16>, vector<16x96xf32> -> vector<16x96xf32>
    %186 = vector.extract_strided_slice %182 {offsets = [0, 0], sizes = [1, 96], strides = [1, 1]} : vector<1x128xf32> to vector<1x96xf32>
    %187 = vector.broadcast %186 : vector<1x96xf32> to vector<16x96xf32>
    %188 = arith.addf %185, %187 : vector<16x96xf32>
    %189 = vector.extract_strided_slice %188 {offsets = [0, 0], sizes = [16, 32], strides = [1, 1]} : vector<16x96xf32> to vector<16x32xf32>
    %190 = vector.extract_strided_slice %188 {offsets = [0, 32], sizes = [16, 32], strides = [1, 1]} : vector<16x96xf32> to vector<16x32xf32>
    %191 = vector.extract_strided_slice %188 {offsets = [0, 64], sizes = [16, 32], strides = [1, 1]} : vector<16x96xf32> to vector<16x32xf32>
    %192 = vector.extract_strided_slice %180 {offsets = [0, 96], sizes = [32, 32], strides = [1, 1]} : vector<32x128xbf16> to vector<32x32xbf16>
    %193 = vector.extract_strided_slice %182 {offsets = [0, 96], sizes = [1, 32], strides = [1, 1]} : vector<1x128xf32> to vector<1x32xf32>
    %194 = vector.shape_cast %189 : vector<16x32xf32> to vector<2x8x32xf32>
    %195 = arith.truncf %194 : vector<2x8x32xf32> to vector<2x8x32xbf16>
    %196 = vector.shape_cast %190 : vector<16x32xf32> to vector<2x8x32xf32>
    %197 = arith.truncf %196 : vector<2x8x32xf32> to vector<2x8x32xbf16>
    %198 = vector.shape_cast %191 : vector<16x32xf32> to vector<2x8x32xf32>
    %199 = arith.truncf %198 : vector<2x8x32xf32> to vector<2x8x32xbf16>
    %200 = vector.extract_strided_slice %195 {offsets = [0, 0, 0], sizes = [2, 8, 8], strides = [1, 1, 1]} : vector<2x8x32xbf16> to vector<2x8x8xbf16>
    %201 = vector.extract_strided_slice %197 {offsets = [0, 0, 0], sizes = [2, 8, 8], strides = [1, 1, 1]} : vector<2x8x32xbf16> to vector<2x8x8xbf16>
    "tpu.trace_start"() <{level = 10 : i32, message = "bqd,bkd->bqk"}> : () -> ()
    %cst_80 = arith.constant dense<0.000000e+00> : vector<2x8x8xf32>
    %202 = tpu.matmul %200, %201, %cst_80 {dimension_numbers = #tpu.dot_dimension_numbers<[2], [2], [1], [1], [0, 0, 0, 1, 1, 1], [0], [0]>} : vector<2x8x8xbf16>, vector<2x8x8xbf16>, vector<2x8x8xf32> -> vector<2x8x8xf32>
    "tpu.trace_stop"() : () -> ()
    %cst_81 = arith.constant 0.353553385 : f32
    %203 = vector.broadcast %cst_81 : f32 to vector<2x8x8xf32>
    %204 = arith.mulf %202, %203 : vector<2x8x8xf32>
    %205 = arith.addf %204, %4 : vector<2x8x8xf32>
    %cst_82 = arith.constant dense<0xFF800000> : vector<2x8xf32>
    %206 = vector.multi_reduction <maximumf>, %205, %cst_82 [2] : vector<2x8x8xf32> to vector<2x8xf32>
    %207 = vector.shape_cast %206 : vector<2x8xf32> to vector<2x8x1xf32>
    %208 = vector.broadcast %207 : vector<2x8x1xf32> to vector<2x8x8xf32>
    %209 = arith.subf %205, %208 : vector<2x8x8xf32>
    %210 = math.exp %209 : vector<2x8x8xf32>
    %cst_83 = arith.constant dense<0.000000e+00> : vector<2x8xf32>
    %211 = vector.multi_reduction <add>, %210, %cst_83 [2] : vector<2x8x8xf32> to vector<2x8xf32>
    %212 = vector.shape_cast %211 : vector<2x8xf32> to vector<2x8x1xf32>
    %213 = vector.broadcast %212 : vector<2x8x1xf32> to vector<2x8x8xf32>
    %214 = arith.divf %210, %213 : vector<2x8x8xf32>
    %215 = arith.truncf %214 : vector<2x8x8xf32> to vector<2x8x8xbf16>
    %216 = vector.extract_strided_slice %199 {offsets = [0, 0, 0], sizes = [2, 8, 8], strides = [1, 1, 1]} : vector<2x8x32xbf16> to vector<2x8x8xbf16>
    "tpu.trace_start"() <{level = 10 : i32, message = "bqk,bkd->bqd"}> : () -> ()
    %cst_84 = arith.constant dense<0.000000e+00> : vector<2x8x8xf32>
    %217 = tpu.matmul %215, %216, %cst_84 {dimension_numbers = #tpu.dot_dimension_numbers<[2], [1], [1], [2], [0, 0, 0, 1, 1, 2], [0], [0]>} : vector<2x8x8xbf16>, vector<2x8x8xbf16>, vector<2x8x8xf32> -> vector<2x8x8xf32>
    "tpu.trace_stop"() : () -> ()
    %218 = vector.shape_cast %217 : vector<2x8x8xf32> to vector<16x8xf32>
    %219 = vector.extract_strided_slice %195 {offsets = [0, 0, 8], sizes = [2, 8, 8], strides = [1, 1, 1]} : vector<2x8x32xbf16> to vector<2x8x8xbf16>
    %220 = vector.extract_strided_slice %197 {offsets = [0, 0, 8], sizes = [2, 8, 8], strides = [1, 1, 1]} : vector<2x8x32xbf16> to vector<2x8x8xbf16>
    "tpu.trace_start"() <{level = 10 : i32, message = "bqd,bkd->bqk"}> : () -> ()
    %cst_85 = arith.constant dense<0.000000e+00> : vector<2x8x8xf32>
    %221 = tpu.matmul %219, %220, %cst_85 {dimension_numbers = #tpu.dot_dimension_numbers<[2], [2], [1], [1], [0, 0, 0, 1, 1, 1], [0], [0]>} : vector<2x8x8xbf16>, vector<2x8x8xbf16>, vector<2x8x8xf32> -> vector<2x8x8xf32>
    "tpu.trace_stop"() : () -> ()
    %cst_86 = arith.constant 0.353553385 : f32
    %222 = vector.broadcast %cst_86 : f32 to vector<2x8x8xf32>
    %223 = arith.mulf %221, %222 : vector<2x8x8xf32>
    %224 = arith.addf %223, %4 : vector<2x8x8xf32>
    %cst_87 = arith.constant dense<0xFF800000> : vector<2x8xf32>
    %225 = vector.multi_reduction <maximumf>, %224, %cst_87 [2] : vector<2x8x8xf32> to vector<2x8xf32>
    %226 = vector.shape_cast %225 : vector<2x8xf32> to vector<2x8x1xf32>
    %227 = vector.broadcast %226 : vector<2x8x1xf32> to vector<2x8x8xf32>
    %228 = arith.subf %224, %227 : vector<2x8x8xf32>
    %229 = math.exp %228 : vector<2x8x8xf32>
    %cst_88 = arith.constant dense<0.000000e+00> : vector<2x8xf32>
    %230 = vector.multi_reduction <add>, %229, %cst_88 [2] : vector<2x8x8xf32> to vector<2x8xf32>
    %231 = vector.shape_cast %230 : vector<2x8xf32> to vector<2x8x1xf32>
    %232 = vector.broadcast %231 : vector<2x8x1xf32> to vector<2x8x8xf32>
    %233 = arith.divf %229, %232 : vector<2x8x8xf32>
    %234 = arith.truncf %233 : vector<2x8x8xf32> to vector<2x8x8xbf16>
    %235 = vector.extract_strided_slice %199 {offsets = [0, 0, 8], sizes = [2, 8, 8], strides = [1, 1, 1]} : vector<2x8x32xbf16> to vector<2x8x8xbf16>
    "tpu.trace_start"() <{level = 10 : i32, message = "bqk,bkd->bqd"}> : () -> ()
    %cst_89 = arith.constant dense<0.000000e+00> : vector<2x8x8xf32>
    %236 = tpu.matmul %234, %235, %cst_89 {dimension_numbers = #tpu.dot_dimension_numbers<[2], [1], [1], [2], [0, 0, 0, 1, 1, 2], [0], [0]>} : vector<2x8x8xbf16>, vector<2x8x8xbf16>, vector<2x8x8xf32> -> vector<2x8x8xf32>
    "tpu.trace_stop"() : () -> ()
    %237 = vector.shape_cast %236 : vector<2x8x8xf32> to vector<16x8xf32>
    %238 = vector.extract_strided_slice %195 {offsets = [0, 0, 16], sizes = [2, 8, 8], strides = [1, 1, 1]} : vector<2x8x32xbf16> to vector<2x8x8xbf16>
    %239 = vector.extract_strided_slice %197 {offsets = [0, 0, 16], sizes = [2, 8, 8], strides = [1, 1, 1]} : vector<2x8x32xbf16> to vector<2x8x8xbf16>
    "tpu.trace_start"() <{level = 10 : i32, message = "bqd,bkd->bqk"}> : () -> ()
    %cst_90 = arith.constant dense<0.000000e+00> : vector<2x8x8xf32>
    %240 = tpu.matmul %238, %239, %cst_90 {dimension_numbers = #tpu.dot_dimension_numbers<[2], [2], [1], [1], [0, 0, 0, 1, 1, 1], [0], [0]>} : vector<2x8x8xbf16>, vector<2x8x8xbf16>, vector<2x8x8xf32> -> vector<2x8x8xf32>
    "tpu.trace_stop"() : () -> ()
    %cst_91 = arith.constant 0.353553385 : f32
    %241 = vector.broadcast %cst_91 : f32 to vector<2x8x8xf32>
    %242 = arith.mulf %240, %241 : vector<2x8x8xf32>
    %243 = arith.addf %242, %4 : vector<2x8x8xf32>
    %cst_92 = arith.constant dense<0xFF800000> : vector<2x8xf32>
    %244 = vector.multi_reduction <maximumf>, %243, %cst_92 [2] : vector<2x8x8xf32> to vector<2x8xf32>
    %245 = vector.shape_cast %244 : vector<2x8xf32> to vector<2x8x1xf32>
    %246 = vector.broadcast %245 : vector<2x8x1xf32> to vector<2x8x8xf32>
    %247 = arith.subf %243, %246 : vector<2x8x8xf32>
    %248 = math.exp %247 : vector<2x8x8xf32>
    %cst_93 = arith.constant dense<0.000000e+00> : vector<2x8xf32>
    %249 = vector.multi_reduction <add>, %248, %cst_93 [2] : vector<2x8x8xf32> to vector<2x8xf32>
    %250 = vector.shape_cast %249 : vector<2x8xf32> to vector<2x8x1xf32>
    %251 = vector.broadcast %250 : vector<2x8x1xf32> to vector<2x8x8xf32>
    %252 = arith.divf %248, %251 : vector<2x8x8xf32>
    %253 = arith.truncf %252 : vector<2x8x8xf32> to vector<2x8x8xbf16>
    %254 = vector.extract_strided_slice %199 {offsets = [0, 0, 16], sizes = [2, 8, 8], strides = [1, 1, 1]} : vector<2x8x32xbf16> to vector<2x8x8xbf16>
    "tpu.trace_start"() <{level = 10 : i32, message = "bqk,bkd->bqd"}> : () -> ()
    %cst_94 = arith.constant dense<0.000000e+00> : vector<2x8x8xf32>
    %255 = tpu.matmul %253, %254, %cst_94 {dimension_numbers = #tpu.dot_dimension_numbers<[2], [1], [1], [2], [0, 0, 0, 1, 1, 2], [0], [0]>} : vector<2x8x8xbf16>, vector<2x8x8xbf16>, vector<2x8x8xf32> -> vector<2x8x8xf32>
    "tpu.trace_stop"() : () -> ()
    %256 = vector.shape_cast %255 : vector<2x8x8xf32> to vector<16x8xf32>
    %257 = vector.extract_strided_slice %195 {offsets = [0, 0, 24], sizes = [2, 8, 8], strides = [1, 1, 1]} : vector<2x8x32xbf16> to vector<2x8x8xbf16>
    %258 = vector.extract_strided_slice %197 {offsets = [0, 0, 24], sizes = [2, 8, 8], strides = [1, 1, 1]} : vector<2x8x32xbf16> to vector<2x8x8xbf16>
    "tpu.trace_start"() <{level = 10 : i32, message = "bqd,bkd->bqk"}> : () -> ()
    %cst_95 = arith.constant dense<0.000000e+00> : vector<2x8x8xf32>
    %259 = tpu.matmul %257, %258, %cst_95 {dimension_numbers = #tpu.dot_dimension_numbers<[2], [2], [1], [1], [0, 0, 0, 1, 1, 1], [0], [0]>} : vector<2x8x8xbf16>, vector<2x8x8xbf16>, vector<2x8x8xf32> -> vector<2x8x8xf32>
    "tpu.trace_stop"() : () -> ()
    %cst_96 = arith.constant 0.353553385 : f32
    %260 = vector.broadcast %cst_96 : f32 to vector<2x8x8xf32>
    %261 = arith.mulf %259, %260 : vector<2x8x8xf32>
    %262 = arith.addf %261, %4 : vector<2x8x8xf32>
    %cst_97 = arith.constant dense<0xFF800000> : vector<2x8xf32>
    %263 = vector.multi_reduction <maximumf>, %262, %cst_97 [2] : vector<2x8x8xf32> to vector<2x8xf32>
    %264 = vector.shape_cast %263 : vector<2x8xf32> to vector<2x8x1xf32>
    %265 = vector.broadcast %264 : vector<2x8x1xf32> to vector<2x8x8xf32>
    %266 = arith.subf %262, %265 : vector<2x8x8xf32>
    %267 = math.exp %266 : vector<2x8x8xf32>
    %cst_98 = arith.constant dense<0.000000e+00> : vector<2x8xf32>
    %268 = vector.multi_reduction <add>, %267, %cst_98 [2] : vector<2x8x8xf32> to vector<2x8xf32>
    %269 = vector.shape_cast %268 : vector<2x8xf32> to vector<2x8x1xf32>
    %270 = vector.broadcast %269 : vector<2x8x1xf32> to vector<2x8x8xf32>
    %271 = arith.divf %267, %270 : vector<2x8x8xf32>
    %272 = arith.truncf %271 : vector<2x8x8xf32> to vector<2x8x8xbf16>
    %273 = vector.extract_strided_slice %199 {offsets = [0, 0, 24], sizes = [2, 8, 8], strides = [1, 1, 1]} : vector<2x8x32xbf16> to vector<2x8x8xbf16>
    "tpu.trace_start"() <{level = 10 : i32, message = "bqk,bkd->bqd"}> : () -> ()
    %cst_99 = arith.constant dense<0.000000e+00> : vector<2x8x8xf32>
    %274 = tpu.matmul %272, %273, %cst_99 {dimension_numbers = #tpu.dot_dimension_numbers<[2], [1], [1], [2], [0, 0, 0, 1, 1, 2], [0], [0]>} : vector<2x8x8xbf16>, vector<2x8x8xbf16>, vector<2x8x8xf32> -> vector<2x8x8xf32>
    "tpu.trace_stop"() : () -> ()
    %275 = vector.shape_cast %274 : vector<2x8x8xf32> to vector<16x8xf32>
    %276 = tpu.concatenate %218, %237, %256, %275 in 1 : vector<16x8xf32>, vector<16x8xf32>, vector<16x8xf32>, vector<16x8xf32> -> vector<16x32xf32>
    %277 = arith.truncf %276 : vector<16x32xf32> to vector<16x32xbf16>
    %cst_100 = arith.constant dense<0.000000e+00> : vector<16x32xf32>
    %278 = tpu.matmul %277, %192, %cst_100 {dimension_numbers = #tpu.dot_dimension_numbers<[1], [0], [0], [1], [0, 0, 1, 1], [], []>} : vector<16x32xbf16>, vector<32x32xbf16>, vector<16x32xf32> -> vector<16x32xf32>
    %279 = vector.broadcast %193 : vector<1x32xf32> to vector<16x32xf32>
    %280 = arith.addf %278, %279 : vector<16x32xf32>
    %281 = arith.addf %178, %280 : vector<16x32xf32>
    %c2 = arith.constant 2 : index
    %c0_101 = arith.constant 0 : index
    %c0_102 = arith.constant 0 : index
    %282 = vector.load %arg10[%c2, %c0_101, %c0_102] : memref<10x1x32xf32, #tpu.memory_space<vmem>>, vector<1x1x32xf32>
    %283 = vector.shape_cast %282 : vector<1x1x32xf32> to vector<1x32xf32>
    %c2_103 = arith.constant 2 : index
    %c0_104 = arith.constant 0 : index
    %c0_105 = arith.constant 0 : index
    %284 = vector.load %arg11[%c2_103, %c0_104, %c0_105] : memref<10x1x32xf32, #tpu.memory_space<vmem>>, vector<1x1x32xf32>
    %285 = vector.shape_cast %284 : vector<1x1x32xf32> to vector<1x32xf32>
    %cst_106 = arith.constant dense<0.000000e+00> : vector<16xf32>
    %286 = vector.multi_reduction <add>, %281, %cst_106 [1] : vector<16x32xf32> to vector<16xf32>
    %287 = vector.shape_cast %286 : vector<16xf32> to vector<16x1xf32>
    %cst_107 = arith.constant 3.200000e+01 : f32
    %288 = vector.broadcast %cst_107 : f32 to vector<16x1xf32>
    %289 = arith.divf %287, %288 : vector<16x1xf32>
    %290 = vector.broadcast %289 : vector<16x1xf32> to vector<16x32xf32>
    %291 = arith.subf %281, %290 : vector<16x32xf32>
    %292 = arith.mulf %291, %291 : vector<16x32xf32>
    %cst_108 = arith.constant dense<0.000000e+00> : vector<16xf32>
    %293 = vector.multi_reduction <add>, %292, %cst_108 [1] : vector<16x32xf32> to vector<16xf32>
    %294 = vector.shape_cast %293 : vector<16xf32> to vector<16x1xf32>
    %cst_109 = arith.constant 0.0322580636 : f32
    %295 = vector.broadcast %cst_109 : f32 to vector<16x1xf32>
    %296 = arith.mulf %294, %295 : vector<16x1xf32>
    %297 = math.sqrt %296 : vector<16x1xf32>
    %cst_110 = arith.constant 9.99999997E-7 : f32
    %298 = vector.broadcast %cst_110 : f32 to vector<16x1xf32>
    %299 = arith.addf %297, %298 : vector<16x1xf32>
    %300 = vector.broadcast %299 : vector<16x1xf32> to vector<16x32xf32>
    %301 = arith.divf %291, %300 : vector<16x32xf32>
    %302 = vector.broadcast %283 : vector<1x32xf32> to vector<16x32xf32>
    %303 = arith.mulf %302, %301 : vector<16x32xf32>
    %304 = vector.broadcast %285 : vector<1x32xf32> to vector<16x32xf32>
    %305 = arith.addf %303, %304 : vector<16x32xf32>
    %c1_111 = arith.constant 1 : index
    %c0_112 = arith.constant 0 : index
    %c0_113 = arith.constant 0 : index
    %306 = vector.load %arg6[%c1_111, %c0_112, %c0_113] : memref<4x32x128xbf16, #tpu.memory_space<vmem>>, vector<1x32x128xbf16>
    %307 = vector.shape_cast %306 : vector<1x32x128xbf16> to vector<32x128xbf16>
    %c1_114 = arith.constant 1 : index
    %c0_115 = arith.constant 0 : index
    %c0_116 = arith.constant 0 : index
    %308 = vector.load %arg7[%c1_114, %c0_115, %c0_116] : memref<4x1x128xf32, #tpu.memory_space<vmem>>, vector<1x1x128xf32>
    %309 = vector.shape_cast %308 : vector<1x1x128xf32> to vector<1x128xf32>
    %c0_117 = arith.constant 0 : index
    %c32 = arith.constant 32 : index
    %310 = vector.load %arg8[%c0_117, %c32] : memref<128x128xbf16, #tpu.memory_space<vmem>>, vector<128x32xbf16>
    %c0_118 = arith.constant 0 : index
    %c32_119 = arith.constant 32 : index
    %311 = vector.load %arg9[%c0_118, %c32_119] : memref<1x128xf32, #tpu.memory_space<vmem>>, vector<1x32xf32>
    %312 = arith.truncf %305 : vector<16x32xf32> to vector<16x32xbf16>
    %cst_120 = arith.constant dense<0.000000e+00> : vector<16x128xf32>
    %313 = tpu.matmul %312, %307, %cst_120 {dimension_numbers = #tpu.dot_dimension_numbers<[1], [0], [0], [1], [0, 0, 1, 1], [], []>} : vector<16x32xbf16>, vector<32x128xbf16>, vector<16x128xf32> -> vector<16x128xf32>
    %314 = vector.broadcast %309 : vector<1x128xf32> to vector<16x128xf32>
    %315 = arith.addf %313, %314 : vector<16x128xf32>
    %cst_121 = arith.constant 0.000000e+00 : f32
    %316 = vector.broadcast %cst_121 : f32 to vector<16x128xf32>
    %317 = arith.maximumf %315, %316 : vector<16x128xf32>
    %318 = arith.truncf %317 : vector<16x128xf32> to vector<16x128xbf16>
    %cst_122 = arith.constant dense<0.000000e+00> : vector<16x32xf32>
    %319 = tpu.matmul %318, %310, %cst_122 {dimension_numbers = #tpu.dot_dimension_numbers<[1], [0], [0], [1], [0, 0, 1, 1], [], []>} : vector<16x128xbf16>, vector<128x32xbf16>, vector<16x32xf32> -> vector<16x32xf32>
    %320 = vector.broadcast %311 : vector<1x32xf32> to vector<16x32xf32>
    %321 = arith.addf %319, %320 : vector<16x32xf32>
    %322 = arith.addf %305, %321 : vector<16x32xf32>
    %c3 = arith.constant 3 : index
    %c0_123 = arith.constant 0 : index
    %c0_124 = arith.constant 0 : index
    %323 = vector.load %arg10[%c3, %c0_123, %c0_124] : memref<10x1x32xf32, #tpu.memory_space<vmem>>, vector<1x1x32xf32>
    %324 = vector.shape_cast %323 : vector<1x1x32xf32> to vector<1x32xf32>
    %c3_125 = arith.constant 3 : index
    %c0_126 = arith.constant 0 : index
    %c0_127 = arith.constant 0 : index
    %325 = vector.load %arg11[%c3_125, %c0_126, %c0_127] : memref<10x1x32xf32, #tpu.memory_space<vmem>>, vector<1x1x32xf32>
    %326 = vector.shape_cast %325 : vector<1x1x32xf32> to vector<1x32xf32>
    %cst_128 = arith.constant dense<0.000000e+00> : vector<16xf32>
    %327 = vector.multi_reduction <add>, %322, %cst_128 [1] : vector<16x32xf32> to vector<16xf32>
    %328 = vector.shape_cast %327 : vector<16xf32> to vector<16x1xf32>
    %cst_129 = arith.constant 3.200000e+01 : f32
    %329 = vector.broadcast %cst_129 : f32 to vector<16x1xf32>
    %330 = arith.divf %328, %329 : vector<16x1xf32>
    %331 = vector.broadcast %330 : vector<16x1xf32> to vector<16x32xf32>
    %332 = arith.subf %322, %331 : vector<16x32xf32>
    %333 = arith.mulf %332, %332 : vector<16x32xf32>
    %cst_130 = arith.constant dense<0.000000e+00> : vector<16xf32>
    %334 = vector.multi_reduction <add>, %333, %cst_130 [1] : vector<16x32xf32> to vector<16xf32>
    %335 = vector.shape_cast %334 : vector<16xf32> to vector<16x1xf32>
    %cst_131 = arith.constant 0.0322580636 : f32
    %336 = vector.broadcast %cst_131 : f32 to vector<16x1xf32>
    %337 = arith.mulf %335, %336 : vector<16x1xf32>
    %338 = math.sqrt %337 : vector<16x1xf32>
    %cst_132 = arith.constant 9.99999997E-7 : f32
    %339 = vector.broadcast %cst_132 : f32 to vector<16x1xf32>
    %340 = arith.addf %338, %339 : vector<16x1xf32>
    %341 = vector.broadcast %340 : vector<16x1xf32> to vector<16x32xf32>
    %342 = arith.divf %332, %341 : vector<16x32xf32>
    %343 = vector.broadcast %324 : vector<1x32xf32> to vector<16x32xf32>
    %344 = arith.mulf %343, %342 : vector<16x32xf32>
    %345 = vector.broadcast %326 : vector<1x32xf32> to vector<16x32xf32>
    %346 = arith.addf %344, %345 : vector<16x32xf32>
    %c2_133 = arith.constant 2 : index
    %c0_134 = arith.constant 0 : index
    %c0_135 = arith.constant 0 : index
    %347 = vector.load %arg4[%c2_133, %c0_134, %c0_135] : memref<6x32x128xbf16, #tpu.memory_space<vmem>>, vector<1x32x128xbf16>
    %348 = vector.shape_cast %347 : vector<1x32x128xbf16> to vector<32x128xbf16>
    %c2_136 = arith.constant 2 : index
    %c0_137 = arith.constant 0 : index
    %c0_138 = arith.constant 0 : index
    %349 = vector.load %arg5[%c2_136, %c0_137, %c0_138] : memref<6x1x128xf32, #tpu.memory_space<vmem>>, vector<1x1x128xf32>
    %350 = vector.shape_cast %349 : vector<1x1x128xf32> to vector<1x128xf32>
    %351 = arith.truncf %0 : vector<16x32xf32> to vector<16x32xbf16>
    %352 = vector.extract_strided_slice %348 {offsets = [0, 0], sizes = [32, 96], strides = [1, 1]} : vector<32x128xbf16> to vector<32x96xbf16>
    %cst_139 = arith.constant dense<0.000000e+00> : vector<16x96xf32>
    %353 = tpu.matmul %351, %352, %cst_139 {dimension_numbers = #tpu.dot_dimension_numbers<[1], [0], [0], [1], [0, 0, 1, 1], [], []>} : vector<16x32xbf16>, vector<32x96xbf16>, vector<16x96xf32> -> vector<16x96xf32>
    %354 = vector.extract_strided_slice %350 {offsets = [0, 0], sizes = [1, 96], strides = [1, 1]} : vector<1x128xf32> to vector<1x96xf32>
    %355 = vector.broadcast %354 : vector<1x96xf32> to vector<16x96xf32>
    %356 = arith.addf %353, %355 : vector<16x96xf32>
    %357 = vector.extract_strided_slice %356 {offsets = [0, 0], sizes = [16, 32], strides = [1, 1]} : vector<16x96xf32> to vector<16x32xf32>
    %358 = vector.extract_strided_slice %356 {offsets = [0, 32], sizes = [16, 32], strides = [1, 1]} : vector<16x96xf32> to vector<16x32xf32>
    %359 = vector.extract_strided_slice %356 {offsets = [0, 64], sizes = [16, 32], strides = [1, 1]} : vector<16x96xf32> to vector<16x32xf32>
    %360 = vector.extract_strided_slice %348 {offsets = [0, 96], sizes = [32, 32], strides = [1, 1]} : vector<32x128xbf16> to vector<32x32xbf16>
    %361 = vector.extract_strided_slice %350 {offsets = [0, 96], sizes = [1, 32], strides = [1, 1]} : vector<1x128xf32> to vector<1x32xf32>
    %362 = vector.shape_cast %357 : vector<16x32xf32> to vector<2x8x32xf32>
    %363 = arith.truncf %362 : vector<2x8x32xf32> to vector<2x8x32xbf16>
    %364 = vector.shape_cast %358 : vector<16x32xf32> to vector<2x8x32xf32>
    %365 = arith.truncf %364 : vector<2x8x32xf32> to vector<2x8x32xbf16>
    %366 = vector.shape_cast %359 : vector<16x32xf32> to vector<2x8x32xf32>
    %367 = arith.truncf %366 : vector<2x8x32xf32> to vector<2x8x32xbf16>
    %368 = vector.extract_strided_slice %363 {offsets = [0, 0, 0], sizes = [2, 8, 8], strides = [1, 1, 1]} : vector<2x8x32xbf16> to vector<2x8x8xbf16>
    %369 = vector.extract_strided_slice %365 {offsets = [0, 0, 0], sizes = [2, 8, 8], strides = [1, 1, 1]} : vector<2x8x32xbf16> to vector<2x8x8xbf16>
    "tpu.trace_start"() <{level = 10 : i32, message = "bqd,bkd->bqk"}> : () -> ()
    %cst_140 = arith.constant dense<0.000000e+00> : vector<2x8x8xf32>
    %370 = tpu.matmul %368, %369, %cst_140 {dimension_numbers = #tpu.dot_dimension_numbers<[2], [2], [1], [1], [0, 0, 0, 1, 1, 1], [0], [0]>} : vector<2x8x8xbf16>, vector<2x8x8xbf16>, vector<2x8x8xf32> -> vector<2x8x8xf32>
    "tpu.trace_stop"() : () -> ()
    %cst_141 = arith.constant 0.353553385 : f32
    %371 = vector.broadcast %cst_141 : f32 to vector<2x8x8xf32>
    %372 = arith.mulf %370, %371 : vector<2x8x8xf32>
    %373 = arith.addf %372, %7 : vector<2x8x8xf32>
    %cst_142 = arith.constant dense<0xFF800000> : vector<2x8xf32>
    %374 = vector.multi_reduction <maximumf>, %373, %cst_142 [2] : vector<2x8x8xf32> to vector<2x8xf32>
    %375 = vector.shape_cast %374 : vector<2x8xf32> to vector<2x8x1xf32>
    %376 = vector.broadcast %375 : vector<2x8x1xf32> to vector<2x8x8xf32>
    %377 = arith.subf %373, %376 : vector<2x8x8xf32>
    %378 = math.exp %377 : vector<2x8x8xf32>
    %cst_143 = arith.constant dense<0.000000e+00> : vector<2x8xf32>
    %379 = vector.multi_reduction <add>, %378, %cst_143 [2] : vector<2x8x8xf32> to vector<2x8xf32>
    %380 = vector.shape_cast %379 : vector<2x8xf32> to vector<2x8x1xf32>
    %381 = vector.broadcast %380 : vector<2x8x1xf32> to vector<2x8x8xf32>
    %382 = arith.divf %378, %381 : vector<2x8x8xf32>
    %383 = arith.truncf %382 : vector<2x8x8xf32> to vector<2x8x8xbf16>
    %384 = vector.extract_strided_slice %367 {offsets = [0, 0, 0], sizes = [2, 8, 8], strides = [1, 1, 1]} : vector<2x8x32xbf16> to vector<2x8x8xbf16>
    "tpu.trace_start"() <{level = 10 : i32, message = "bqk,bkd->bqd"}> : () -> ()
    %cst_144 = arith.constant dense<0.000000e+00> : vector<2x8x8xf32>
    %385 = tpu.matmul %383, %384, %cst_144 {dimension_numbers = #tpu.dot_dimension_numbers<[2], [1], [1], [2], [0, 0, 0, 1, 1, 2], [0], [0]>} : vector<2x8x8xbf16>, vector<2x8x8xbf16>, vector<2x8x8xf32> -> vector<2x8x8xf32>
    "tpu.trace_stop"() : () -> ()
    %386 = vector.shape_cast %385 : vector<2x8x8xf32> to vector<16x8xf32>
    %387 = vector.extract_strided_slice %363 {offsets = [0, 0, 8], sizes = [2, 8, 8], strides = [1, 1, 1]} : vector<2x8x32xbf16> to vector<2x8x8xbf16>
    %388 = vector.extract_strided_slice %365 {offsets = [0, 0, 8], sizes = [2, 8, 8], strides = [1, 1, 1]} : vector<2x8x32xbf16> to vector<2x8x8xbf16>
    "tpu.trace_start"() <{level = 10 : i32, message = "bqd,bkd->bqk"}> : () -> ()
    %cst_145 = arith.constant dense<0.000000e+00> : vector<2x8x8xf32>
    %389 = tpu.matmul %387, %388, %cst_145 {dimension_numbers = #tpu.dot_dimension_numbers<[2], [2], [1], [1], [0, 0, 0, 1, 1, 1], [0], [0]>} : vector<2x8x8xbf16>, vector<2x8x8xbf16>, vector<2x8x8xf32> -> vector<2x8x8xf32>
    "tpu.trace_stop"() : () -> ()
    %cst_146 = arith.constant 0.353553385 : f32
    %390 = vector.broadcast %cst_146 : f32 to vector<2x8x8xf32>
    %391 = arith.mulf %389, %390 : vector<2x8x8xf32>
    %392 = arith.addf %391, %7 : vector<2x8x8xf32>
    %cst_147 = arith.constant dense<0xFF800000> : vector<2x8xf32>
    %393 = vector.multi_reduction <maximumf>, %392, %cst_147 [2] : vector<2x8x8xf32> to vector<2x8xf32>
    %394 = vector.shape_cast %393 : vector<2x8xf32> to vector<2x8x1xf32>
    %395 = vector.broadcast %394 : vector<2x8x1xf32> to vector<2x8x8xf32>
    %396 = arith.subf %392, %395 : vector<2x8x8xf32>
    %397 = math.exp %396 : vector<2x8x8xf32>
    %cst_148 = arith.constant dense<0.000000e+00> : vector<2x8xf32>
    %398 = vector.multi_reduction <add>, %397, %cst_148 [2] : vector<2x8x8xf32> to vector<2x8xf32>
    %399 = vector.shape_cast %398 : vector<2x8xf32> to vector<2x8x1xf32>
    %400 = vector.broadcast %399 : vector<2x8x1xf32> to vector<2x8x8xf32>
    %401 = arith.divf %397, %400 : vector<2x8x8xf32>
    %402 = arith.truncf %401 : vector<2x8x8xf32> to vector<2x8x8xbf16>
    %403 = vector.extract_strided_slice %367 {offsets = [0, 0, 8], sizes = [2, 8, 8], strides = [1, 1, 1]} : vector<2x8x32xbf16> to vector<2x8x8xbf16>
    "tpu.trace_start"() <{level = 10 : i32, message = "bqk,bkd->bqd"}> : () -> ()
    %cst_149 = arith.constant dense<0.000000e+00> : vector<2x8x8xf32>
    %404 = tpu.matmul %402, %403, %cst_149 {dimension_numbers = #tpu.dot_dimension_numbers<[2], [1], [1], [2], [0, 0, 0, 1, 1, 2], [0], [0]>} : vector<2x8x8xbf16>, vector<2x8x8xbf16>, vector<2x8x8xf32> -> vector<2x8x8xf32>
    "tpu.trace_stop"() : () -> ()
    %405 = vector.shape_cast %404 : vector<2x8x8xf32> to vector<16x8xf32>
    %406 = vector.extract_strided_slice %363 {offsets = [0, 0, 16], sizes = [2, 8, 8], strides = [1, 1, 1]} : vector<2x8x32xbf16> to vector<2x8x8xbf16>
    %407 = vector.extract_strided_slice %365 {offsets = [0, 0, 16], sizes = [2, 8, 8], strides = [1, 1, 1]} : vector<2x8x32xbf16> to vector<2x8x8xbf16>
    "tpu.trace_start"() <{level = 10 : i32, message = "bqd,bkd->bqk"}> : () -> ()
    %cst_150 = arith.constant dense<0.000000e+00> : vector<2x8x8xf32>
    %408 = tpu.matmul %406, %407, %cst_150 {dimension_numbers = #tpu.dot_dimension_numbers<[2], [2], [1], [1], [0, 0, 0, 1, 1, 1], [0], [0]>} : vector<2x8x8xbf16>, vector<2x8x8xbf16>, vector<2x8x8xf32> -> vector<2x8x8xf32>
    "tpu.trace_stop"() : () -> ()
    %cst_151 = arith.constant 0.353553385 : f32
    %409 = vector.broadcast %cst_151 : f32 to vector<2x8x8xf32>
    %410 = arith.mulf %408, %409 : vector<2x8x8xf32>
    %411 = arith.addf %410, %7 : vector<2x8x8xf32>
    %cst_152 = arith.constant dense<0xFF800000> : vector<2x8xf32>
    %412 = vector.multi_reduction <maximumf>, %411, %cst_152 [2] : vector<2x8x8xf32> to vector<2x8xf32>
    %413 = vector.shape_cast %412 : vector<2x8xf32> to vector<2x8x1xf32>
    %414 = vector.broadcast %413 : vector<2x8x1xf32> to vector<2x8x8xf32>
    %415 = arith.subf %411, %414 : vector<2x8x8xf32>
    %416 = math.exp %415 : vector<2x8x8xf32>
    %cst_153 = arith.constant dense<0.000000e+00> : vector<2x8xf32>
    %417 = vector.multi_reduction <add>, %416, %cst_153 [2] : vector<2x8x8xf32> to vector<2x8xf32>
    %418 = vector.shape_cast %417 : vector<2x8xf32> to vector<2x8x1xf32>
    %419 = vector.broadcast %418 : vector<2x8x1xf32> to vector<2x8x8xf32>
    %420 = arith.divf %416, %419 : vector<2x8x8xf32>
    %421 = arith.truncf %420 : vector<2x8x8xf32> to vector<2x8x8xbf16>
    %422 = vector.extract_strided_slice %367 {offsets = [0, 0, 16], sizes = [2, 8, 8], strides = [1, 1, 1]} : vector<2x8x32xbf16> to vector<2x8x8xbf16>
    "tpu.trace_start"() <{level = 10 : i32, message = "bqk,bkd->bqd"}> : () -> ()
    %cst_154 = arith.constant dense<0.000000e+00> : vector<2x8x8xf32>
    %423 = tpu.matmul %421, %422, %cst_154 {dimension_numbers = #tpu.dot_dimension_numbers<[2], [1], [1], [2], [0, 0, 0, 1, 1, 2], [0], [0]>} : vector<2x8x8xbf16>, vector<2x8x8xbf16>, vector<2x8x8xf32> -> vector<2x8x8xf32>
    "tpu.trace_stop"() : () -> ()
    %424 = vector.shape_cast %423 : vector<2x8x8xf32> to vector<16x8xf32>
    %425 = vector.extract_strided_slice %363 {offsets = [0, 0, 24], sizes = [2, 8, 8], strides = [1, 1, 1]} : vector<2x8x32xbf16> to vector<2x8x8xbf16>
    %426 = vector.extract_strided_slice %365 {offsets = [0, 0, 24], sizes = [2, 8, 8], strides = [1, 1, 1]} : vector<2x8x32xbf16> to vector<2x8x8xbf16>
    "tpu.trace_start"() <{level = 10 : i32, message = "bqd,bkd->bqk"}> : () -> ()
    %cst_155 = arith.constant dense<0.000000e+00> : vector<2x8x8xf32>
    %427 = tpu.matmul %425, %426, %cst_155 {dimension_numbers = #tpu.dot_dimension_numbers<[2], [2], [1], [1], [0, 0, 0, 1, 1, 1], [0], [0]>} : vector<2x8x8xbf16>, vector<2x8x8xbf16>, vector<2x8x8xf32> -> vector<2x8x8xf32>
    "tpu.trace_stop"() : () -> ()
    %cst_156 = arith.constant 0.353553385 : f32
    %428 = vector.broadcast %cst_156 : f32 to vector<2x8x8xf32>
    %429 = arith.mulf %427, %428 : vector<2x8x8xf32>
    %430 = arith.addf %429, %7 : vector<2x8x8xf32>
    %cst_157 = arith.constant dense<0xFF800000> : vector<2x8xf32>
    %431 = vector.multi_reduction <maximumf>, %430, %cst_157 [2] : vector<2x8x8xf32> to vector<2x8xf32>
    %432 = vector.shape_cast %431 : vector<2x8xf32> to vector<2x8x1xf32>
    %433 = vector.broadcast %432 : vector<2x8x1xf32> to vector<2x8x8xf32>
    %434 = arith.subf %430, %433 : vector<2x8x8xf32>
    %435 = math.exp %434 : vector<2x8x8xf32>
    %cst_158 = arith.constant dense<0.000000e+00> : vector<2x8xf32>
    %436 = vector.multi_reduction <add>, %435, %cst_158 [2] : vector<2x8x8xf32> to vector<2x8xf32>
    %437 = vector.shape_cast %436 : vector<2x8xf32> to vector<2x8x1xf32>
    %438 = vector.broadcast %437 : vector<2x8x1xf32> to vector<2x8x8xf32>
    %439 = arith.divf %435, %438 : vector<2x8x8xf32>
    %440 = arith.truncf %439 : vector<2x8x8xf32> to vector<2x8x8xbf16>
    %441 = vector.extract_strided_slice %367 {offsets = [0, 0, 24], sizes = [2, 8, 8], strides = [1, 1, 1]} : vector<2x8x32xbf16> to vector<2x8x8xbf16>
    "tpu.trace_start"() <{level = 10 : i32, message = "bqk,bkd->bqd"}> : () -> ()
    %cst_159 = arith.constant dense<0.000000e+00> : vector<2x8x8xf32>
    %442 = tpu.matmul %440, %441, %cst_159 {dimension_numbers = #tpu.dot_dimension_numbers<[2], [1], [1], [2], [0, 0, 0, 1, 1, 2], [0], [0]>} : vector<2x8x8xbf16>, vector<2x8x8xbf16>, vector<2x8x8xf32> -> vector<2x8x8xf32>
    "tpu.trace_stop"() : () -> ()
    %443 = vector.shape_cast %442 : vector<2x8x8xf32> to vector<16x8xf32>
    %444 = tpu.concatenate %386, %405, %424, %443 in 1 : vector<16x8xf32>, vector<16x8xf32>, vector<16x8xf32>, vector<16x8xf32> -> vector<16x32xf32>
    %445 = arith.truncf %444 : vector<16x32xf32> to vector<16x32xbf16>
    %cst_160 = arith.constant dense<0.000000e+00> : vector<16x32xf32>
    %446 = tpu.matmul %445, %360, %cst_160 {dimension_numbers = #tpu.dot_dimension_numbers<[1], [0], [0], [1], [0, 0, 1, 1], [], []>} : vector<16x32xbf16>, vector<32x32xbf16>, vector<16x32xf32> -> vector<16x32xf32>
    %447 = vector.broadcast %361 : vector<1x32xf32> to vector<16x32xf32>
    %448 = arith.addf %446, %447 : vector<16x32xf32>
    %449 = arith.addf %0, %448 : vector<16x32xf32>
    %c4 = arith.constant 4 : index
    %c0_161 = arith.constant 0 : index
    %c0_162 = arith.constant 0 : index
    %450 = vector.load %arg10[%c4, %c0_161, %c0_162] : memref<10x1x32xf32, #tpu.memory_space<vmem>>, vector<1x1x32xf32>
    %451 = vector.shape_cast %450 : vector<1x1x32xf32> to vector<1x32xf32>
    %c4_163 = arith.constant 4 : index
    %c0_164 = arith.constant 0 : index
    %c0_165 = arith.constant 0 : index
    %452 = vector.load %arg11[%c4_163, %c0_164, %c0_165] : memref<10x1x32xf32, #tpu.memory_space<vmem>>, vector<1x1x32xf32>
    %453 = vector.shape_cast %452 : vector<1x1x32xf32> to vector<1x32xf32>
    %cst_166 = arith.constant dense<0.000000e+00> : vector<16xf32>
    %454 = vector.multi_reduction <add>, %449, %cst_166 [1] : vector<16x32xf32> to vector<16xf32>
    %455 = vector.shape_cast %454 : vector<16xf32> to vector<16x1xf32>
    %cst_167 = arith.constant 3.200000e+01 : f32
    %456 = vector.broadcast %cst_167 : f32 to vector<16x1xf32>
    %457 = arith.divf %455, %456 : vector<16x1xf32>
    %458 = vector.broadcast %457 : vector<16x1xf32> to vector<16x32xf32>
    %459 = arith.subf %449, %458 : vector<16x32xf32>
    %460 = arith.mulf %459, %459 : vector<16x32xf32>
    %cst_168 = arith.constant dense<0.000000e+00> : vector<16xf32>
    %461 = vector.multi_reduction <add>, %460, %cst_168 [1] : vector<16x32xf32> to vector<16xf32>
    %462 = vector.shape_cast %461 : vector<16xf32> to vector<16x1xf32>
    %cst_169 = arith.constant 0.0322580636 : f32
    %463 = vector.broadcast %cst_169 : f32 to vector<16x1xf32>
    %464 = arith.mulf %462, %463 : vector<16x1xf32>
    %465 = math.sqrt %464 : vector<16x1xf32>
    %cst_170 = arith.constant 9.99999997E-7 : f32
    %466 = vector.broadcast %cst_170 : f32 to vector<16x1xf32>
    %467 = arith.addf %465, %466 : vector<16x1xf32>
    %468 = vector.broadcast %467 : vector<16x1xf32> to vector<16x32xf32>
    %469 = arith.divf %459, %468 : vector<16x32xf32>
    %470 = vector.broadcast %451 : vector<1x32xf32> to vector<16x32xf32>
    %471 = arith.mulf %470, %469 : vector<16x32xf32>
    %472 = vector.broadcast %453 : vector<1x32xf32> to vector<16x32xf32>
    %473 = arith.addf %471, %472 : vector<16x32xf32>
    %c3_171 = arith.constant 3 : index
    %c0_172 = arith.constant 0 : index
    %c0_173 = arith.constant 0 : index
    %474 = vector.load %arg4[%c3_171, %c0_172, %c0_173] : memref<6x32x128xbf16, #tpu.memory_space<vmem>>, vector<1x32x128xbf16>
    %475 = vector.shape_cast %474 : vector<1x32x128xbf16> to vector<32x128xbf16>
    %c3_174 = arith.constant 3 : index
    %c0_175 = arith.constant 0 : index
    %c0_176 = arith.constant 0 : index
    %476 = vector.load %arg5[%c3_174, %c0_175, %c0_176] : memref<6x1x128xf32, #tpu.memory_space<vmem>>, vector<1x1x128xf32>
    %477 = vector.shape_cast %476 : vector<1x1x128xf32> to vector<1x128xf32>
    %478 = arith.truncf %473 : vector<16x32xf32> to vector<16x32xbf16>
    %479 = vector.extract_strided_slice %475 {offsets = [0, 0], sizes = [32, 32], strides = [1, 1]} : vector<32x128xbf16> to vector<32x32xbf16>
    %cst_177 = arith.constant dense<0.000000e+00> : vector<16x32xf32>
    %480 = tpu.matmul %478, %479, %cst_177 {dimension_numbers = #tpu.dot_dimension_numbers<[1], [0], [0], [1], [0, 0, 1, 1], [], []>} : vector<16x32xbf16>, vector<32x32xbf16>, vector<16x32xf32> -> vector<16x32xf32>
    %481 = vector.extract_strided_slice %477 {offsets = [0, 0], sizes = [1, 32], strides = [1, 1]} : vector<1x128xf32> to vector<1x32xf32>
    %482 = vector.broadcast %481 : vector<1x32xf32> to vector<16x32xf32>
    %483 = arith.addf %480, %482 : vector<16x32xf32>
    %484 = arith.truncf %346 : vector<16x32xf32> to vector<16x32xbf16>
    %485 = vector.extract_strided_slice %475 {offsets = [0, 32], sizes = [32, 64], strides = [1, 1]} : vector<32x128xbf16> to vector<32x64xbf16>
    %cst_178 = arith.constant dense<0.000000e+00> : vector<16x64xf32>
    %486 = tpu.matmul %484, %485, %cst_178 {dimension_numbers = #tpu.dot_dimension_numbers<[1], [0], [0], [1], [0, 0, 1, 1], [], []>} : vector<16x32xbf16>, vector<32x64xbf16>, vector<16x64xf32> -> vector<16x64xf32>
    %487 = vector.extract_strided_slice %477 {offsets = [0, 32], sizes = [1, 64], strides = [1, 1]} : vector<1x128xf32> to vector<1x64xf32>
    %488 = vector.broadcast %487 : vector<1x64xf32> to vector<16x64xf32>
    %489 = arith.addf %486, %488 : vector<16x64xf32>
    %490 = vector.extract_strided_slice %489 {offsets = [0, 0], sizes = [16, 32], strides = [1, 1]} : vector<16x64xf32> to vector<16x32xf32>
    %491 = vector.extract_strided_slice %489 {offsets = [0, 32], sizes = [16, 32], strides = [1, 1]} : vector<16x64xf32> to vector<16x32xf32>
    %492 = vector.extract_strided_slice %475 {offsets = [0, 96], sizes = [32, 32], strides = [1, 1]} : vector<32x128xbf16> to vector<32x32xbf16>
    %493 = vector.extract_strided_slice %477 {offsets = [0, 96], sizes = [1, 32], strides = [1, 1]} : vector<1x128xf32> to vector<1x32xf32>
    %494 = vector.shape_cast %483 : vector<16x32xf32> to vector<2x8x32xf32>
    %495 = arith.truncf %494 : vector<2x8x32xf32> to vector<2x8x32xbf16>
    %496 = vector.shape_cast %490 : vector<16x32xf32> to vector<2x8x32xf32>
    %497 = arith.truncf %496 : vector<2x8x32xf32> to vector<2x8x32xbf16>
    %498 = vector.shape_cast %491 : vector<16x32xf32> to vector<2x8x32xf32>
    %499 = arith.truncf %498 : vector<2x8x32xf32> to vector<2x8x32xbf16>
    %500 = vector.extract_strided_slice %495 {offsets = [0, 0, 0], sizes = [2, 8, 8], strides = [1, 1, 1]} : vector<2x8x32xbf16> to vector<2x8x8xbf16>
    %501 = vector.extract_strided_slice %497 {offsets = [0, 0, 0], sizes = [2, 8, 8], strides = [1, 1, 1]} : vector<2x8x32xbf16> to vector<2x8x8xbf16>
    "tpu.trace_start"() <{level = 10 : i32, message = "bqd,bkd->bqk"}> : () -> ()
    %cst_179 = arith.constant dense<0.000000e+00> : vector<2x8x8xf32>
    %502 = tpu.matmul %500, %501, %cst_179 {dimension_numbers = #tpu.dot_dimension_numbers<[2], [2], [1], [1], [0, 0, 0, 1, 1, 1], [0], [0]>} : vector<2x8x8xbf16>, vector<2x8x8xbf16>, vector<2x8x8xf32> -> vector<2x8x8xf32>
    "tpu.trace_stop"() : () -> ()
    %cst_180 = arith.constant 0.353553385 : f32
    %503 = vector.broadcast %cst_180 : f32 to vector<2x8x8xf32>
    %504 = arith.mulf %502, %503 : vector<2x8x8xf32>
    %505 = arith.addf %504, %10 : vector<2x8x8xf32>
    %cst_181 = arith.constant dense<0xFF800000> : vector<2x8xf32>
    %506 = vector.multi_reduction <maximumf>, %505, %cst_181 [2] : vector<2x8x8xf32> to vector<2x8xf32>
    %507 = vector.shape_cast %506 : vector<2x8xf32> to vector<2x8x1xf32>
    %508 = vector.broadcast %507 : vector<2x8x1xf32> to vector<2x8x8xf32>
    %509 = arith.subf %505, %508 : vector<2x8x8xf32>
    %510 = math.exp %509 : vector<2x8x8xf32>
    %cst_182 = arith.constant dense<0.000000e+00> : vector<2x8xf32>
    %511 = vector.multi_reduction <add>, %510, %cst_182 [2] : vector<2x8x8xf32> to vector<2x8xf32>
    %512 = vector.shape_cast %511 : vector<2x8xf32> to vector<2x8x1xf32>
    %513 = vector.broadcast %512 : vector<2x8x1xf32> to vector<2x8x8xf32>
    %514 = arith.divf %510, %513 : vector<2x8x8xf32>
    %515 = arith.truncf %514 : vector<2x8x8xf32> to vector<2x8x8xbf16>
    %516 = vector.extract_strided_slice %499 {offsets = [0, 0, 0], sizes = [2, 8, 8], strides = [1, 1, 1]} : vector<2x8x32xbf16> to vector<2x8x8xbf16>
    "tpu.trace_start"() <{level = 10 : i32, message = "bqk,bkd->bqd"}> : () -> ()
    %cst_183 = arith.constant dense<0.000000e+00> : vector<2x8x8xf32>
    %517 = tpu.matmul %515, %516, %cst_183 {dimension_numbers = #tpu.dot_dimension_numbers<[2], [1], [1], [2], [0, 0, 0, 1, 1, 2], [0], [0]>} : vector<2x8x8xbf16>, vector<2x8x8xbf16>, vector<2x8x8xf32> -> vector<2x8x8xf32>
    "tpu.trace_stop"() : () -> ()
    %518 = vector.shape_cast %517 : vector<2x8x8xf32> to vector<16x8xf32>
    %519 = vector.extract_strided_slice %495 {offsets = [0, 0, 8], sizes = [2, 8, 8], strides = [1, 1, 1]} : vector<2x8x32xbf16> to vector<2x8x8xbf16>
    %520 = vector.extract_strided_slice %497 {offsets = [0, 0, 8], sizes = [2, 8, 8], strides = [1, 1, 1]} : vector<2x8x32xbf16> to vector<2x8x8xbf16>
    "tpu.trace_start"() <{level = 10 : i32, message = "bqd,bkd->bqk"}> : () -> ()
    %cst_184 = arith.constant dense<0.000000e+00> : vector<2x8x8xf32>
    %521 = tpu.matmul %519, %520, %cst_184 {dimension_numbers = #tpu.dot_dimension_numbers<[2], [2], [1], [1], [0, 0, 0, 1, 1, 1], [0], [0]>} : vector<2x8x8xbf16>, vector<2x8x8xbf16>, vector<2x8x8xf32> -> vector<2x8x8xf32>
    "tpu.trace_stop"() : () -> ()
    %cst_185 = arith.constant 0.353553385 : f32
    %522 = vector.broadcast %cst_185 : f32 to vector<2x8x8xf32>
    %523 = arith.mulf %521, %522 : vector<2x8x8xf32>
    %524 = arith.addf %523, %10 : vector<2x8x8xf32>
    %cst_186 = arith.constant dense<0xFF800000> : vector<2x8xf32>
    %525 = vector.multi_reduction <maximumf>, %524, %cst_186 [2] : vector<2x8x8xf32> to vector<2x8xf32>
    %526 = vector.shape_cast %525 : vector<2x8xf32> to vector<2x8x1xf32>
    %527 = vector.broadcast %526 : vector<2x8x1xf32> to vector<2x8x8xf32>
    %528 = arith.subf %524, %527 : vector<2x8x8xf32>
    %529 = math.exp %528 : vector<2x8x8xf32>
    %cst_187 = arith.constant dense<0.000000e+00> : vector<2x8xf32>
    %530 = vector.multi_reduction <add>, %529, %cst_187 [2] : vector<2x8x8xf32> to vector<2x8xf32>
    %531 = vector.shape_cast %530 : vector<2x8xf32> to vector<2x8x1xf32>
    %532 = vector.broadcast %531 : vector<2x8x1xf32> to vector<2x8x8xf32>
    %533 = arith.divf %529, %532 : vector<2x8x8xf32>
    %534 = arith.truncf %533 : vector<2x8x8xf32> to vector<2x8x8xbf16>
    %535 = vector.extract_strided_slice %499 {offsets = [0, 0, 8], sizes = [2, 8, 8], strides = [1, 1, 1]} : vector<2x8x32xbf16> to vector<2x8x8xbf16>
    "tpu.trace_start"() <{level = 10 : i32, message = "bqk,bkd->bqd"}> : () -> ()
    %cst_188 = arith.constant dense<0.000000e+00> : vector<2x8x8xf32>
    %536 = tpu.matmul %534, %535, %cst_188 {dimension_numbers = #tpu.dot_dimension_numbers<[2], [1], [1], [2], [0, 0, 0, 1, 1, 2], [0], [0]>} : vector<2x8x8xbf16>, vector<2x8x8xbf16>, vector<2x8x8xf32> -> vector<2x8x8xf32>
    "tpu.trace_stop"() : () -> ()
    %537 = vector.shape_cast %536 : vector<2x8x8xf32> to vector<16x8xf32>
    %538 = vector.extract_strided_slice %495 {offsets = [0, 0, 16], sizes = [2, 8, 8], strides = [1, 1, 1]} : vector<2x8x32xbf16> to vector<2x8x8xbf16>
    %539 = vector.extract_strided_slice %497 {offsets = [0, 0, 16], sizes = [2, 8, 8], strides = [1, 1, 1]} : vector<2x8x32xbf16> to vector<2x8x8xbf16>
    "tpu.trace_start"() <{level = 10 : i32, message = "bqd,bkd->bqk"}> : () -> ()
    %cst_189 = arith.constant dense<0.000000e+00> : vector<2x8x8xf32>
    %540 = tpu.matmul %538, %539, %cst_189 {dimension_numbers = #tpu.dot_dimension_numbers<[2], [2], [1], [1], [0, 0, 0, 1, 1, 1], [0], [0]>} : vector<2x8x8xbf16>, vector<2x8x8xbf16>, vector<2x8x8xf32> -> vector<2x8x8xf32>
    "tpu.trace_stop"() : () -> ()
    %cst_190 = arith.constant 0.353553385 : f32
    %541 = vector.broadcast %cst_190 : f32 to vector<2x8x8xf32>
    %542 = arith.mulf %540, %541 : vector<2x8x8xf32>
    %543 = arith.addf %542, %10 : vector<2x8x8xf32>
    %cst_191 = arith.constant dense<0xFF800000> : vector<2x8xf32>
    %544 = vector.multi_reduction <maximumf>, %543, %cst_191 [2] : vector<2x8x8xf32> to vector<2x8xf32>
    %545 = vector.shape_cast %544 : vector<2x8xf32> to vector<2x8x1xf32>
    %546 = vector.broadcast %545 : vector<2x8x1xf32> to vector<2x8x8xf32>
    %547 = arith.subf %543, %546 : vector<2x8x8xf32>
    %548 = math.exp %547 : vector<2x8x8xf32>
    %cst_192 = arith.constant dense<0.000000e+00> : vector<2x8xf32>
    %549 = vector.multi_reduction <add>, %548, %cst_192 [2] : vector<2x8x8xf32> to vector<2x8xf32>
    %550 = vector.shape_cast %549 : vector<2x8xf32> to vector<2x8x1xf32>
    %551 = vector.broadcast %550 : vector<2x8x1xf32> to vector<2x8x8xf32>
    %552 = arith.divf %548, %551 : vector<2x8x8xf32>
    %553 = arith.truncf %552 : vector<2x8x8xf32> to vector<2x8x8xbf16>
    %554 = vector.extract_strided_slice %499 {offsets = [0, 0, 16], sizes = [2, 8, 8], strides = [1, 1, 1]} : vector<2x8x32xbf16> to vector<2x8x8xbf16>
    "tpu.trace_start"() <{level = 10 : i32, message = "bqk,bkd->bqd"}> : () -> ()
    %cst_193 = arith.constant dense<0.000000e+00> : vector<2x8x8xf32>
    %555 = tpu.matmul %553, %554, %cst_193 {dimension_numbers = #tpu.dot_dimension_numbers<[2], [1], [1], [2], [0, 0, 0, 1, 1, 2], [0], [0]>} : vector<2x8x8xbf16>, vector<2x8x8xbf16>, vector<2x8x8xf32> -> vector<2x8x8xf32>
    "tpu.trace_stop"() : () -> ()
    %556 = vector.shape_cast %555 : vector<2x8x8xf32> to vector<16x8xf32>
    %557 = vector.extract_strided_slice %495 {offsets = [0, 0, 24], sizes = [2, 8, 8], strides = [1, 1, 1]} : vector<2x8x32xbf16> to vector<2x8x8xbf16>
    %558 = vector.extract_strided_slice %497 {offsets = [0, 0, 24], sizes = [2, 8, 8], strides = [1, 1, 1]} : vector<2x8x32xbf16> to vector<2x8x8xbf16>
    "tpu.trace_start"() <{level = 10 : i32, message = "bqd,bkd->bqk"}> : () -> ()
    %cst_194 = arith.constant dense<0.000000e+00> : vector<2x8x8xf32>
    %559 = tpu.matmul %557, %558, %cst_194 {dimension_numbers = #tpu.dot_dimension_numbers<[2], [2], [1], [1], [0, 0, 0, 1, 1, 1], [0], [0]>} : vector<2x8x8xbf16>, vector<2x8x8xbf16>, vector<2x8x8xf32> -> vector<2x8x8xf32>
    "tpu.trace_stop"() : () -> ()
    %cst_195 = arith.constant 0.353553385 : f32
    %560 = vector.broadcast %cst_195 : f32 to vector<2x8x8xf32>
    %561 = arith.mulf %559, %560 : vector<2x8x8xf32>
    %562 = arith.addf %561, %10 : vector<2x8x8xf32>
    %cst_196 = arith.constant dense<0xFF800000> : vector<2x8xf32>
    %563 = vector.multi_reduction <maximumf>, %562, %cst_196 [2] : vector<2x8x8xf32> to vector<2x8xf32>
    %564 = vector.shape_cast %563 : vector<2x8xf32> to vector<2x8x1xf32>
    %565 = vector.broadcast %564 : vector<2x8x1xf32> to vector<2x8x8xf32>
    %566 = arith.subf %562, %565 : vector<2x8x8xf32>
    %567 = math.exp %566 : vector<2x8x8xf32>
    %cst_197 = arith.constant dense<0.000000e+00> : vector<2x8xf32>
    %568 = vector.multi_reduction <add>, %567, %cst_197 [2] : vector<2x8x8xf32> to vector<2x8xf32>
    %569 = vector.shape_cast %568 : vector<2x8xf32> to vector<2x8x1xf32>
    %570 = vector.broadcast %569 : vector<2x8x1xf32> to vector<2x8x8xf32>
    %571 = arith.divf %567, %570 : vector<2x8x8xf32>
    %572 = arith.truncf %571 : vector<2x8x8xf32> to vector<2x8x8xbf16>
    %573 = vector.extract_strided_slice %499 {offsets = [0, 0, 24], sizes = [2, 8, 8], strides = [1, 1, 1]} : vector<2x8x32xbf16> to vector<2x8x8xbf16>
    "tpu.trace_start"() <{level = 10 : i32, message = "bqk,bkd->bqd"}> : () -> ()
    %cst_198 = arith.constant dense<0.000000e+00> : vector<2x8x8xf32>
    %574 = tpu.matmul %572, %573, %cst_198 {dimension_numbers = #tpu.dot_dimension_numbers<[2], [1], [1], [2], [0, 0, 0, 1, 1, 2], [0], [0]>} : vector<2x8x8xbf16>, vector<2x8x8xbf16>, vector<2x8x8xf32> -> vector<2x8x8xf32>
    "tpu.trace_stop"() : () -> ()
    %575 = vector.shape_cast %574 : vector<2x8x8xf32> to vector<16x8xf32>
    %576 = tpu.concatenate %518, %537, %556, %575 in 1 : vector<16x8xf32>, vector<16x8xf32>, vector<16x8xf32>, vector<16x8xf32> -> vector<16x32xf32>
    %577 = arith.truncf %576 : vector<16x32xf32> to vector<16x32xbf16>
    %cst_199 = arith.constant dense<0.000000e+00> : vector<16x32xf32>
    %578 = tpu.matmul %577, %492, %cst_199 {dimension_numbers = #tpu.dot_dimension_numbers<[1], [0], [0], [1], [0, 0, 1, 1], [], []>} : vector<16x32xbf16>, vector<32x32xbf16>, vector<16x32xf32> -> vector<16x32xf32>
    %579 = vector.broadcast %493 : vector<1x32xf32> to vector<16x32xf32>
    %580 = arith.addf %578, %579 : vector<16x32xf32>
    %581 = arith.addf %473, %580 : vector<16x32xf32>
    %c5 = arith.constant 5 : index
    %c0_200 = arith.constant 0 : index
    %c0_201 = arith.constant 0 : index
    %582 = vector.load %arg10[%c5, %c0_200, %c0_201] : memref<10x1x32xf32, #tpu.memory_space<vmem>>, vector<1x1x32xf32>
    %583 = vector.shape_cast %582 : vector<1x1x32xf32> to vector<1x32xf32>
    %c5_202 = arith.constant 5 : index
    %c0_203 = arith.constant 0 : index
    %c0_204 = arith.constant 0 : index
    %584 = vector.load %arg11[%c5_202, %c0_203, %c0_204] : memref<10x1x32xf32, #tpu.memory_space<vmem>>, vector<1x1x32xf32>
    %585 = vector.shape_cast %584 : vector<1x1x32xf32> to vector<1x32xf32>
    %cst_205 = arith.constant dense<0.000000e+00> : vector<16xf32>
    %586 = vector.multi_reduction <add>, %581, %cst_205 [1] : vector<16x32xf32> to vector<16xf32>
    %587 = vector.shape_cast %586 : vector<16xf32> to vector<16x1xf32>
    %cst_206 = arith.constant 3.200000e+01 : f32
    %588 = vector.broadcast %cst_206 : f32 to vector<16x1xf32>
    %589 = arith.divf %587, %588 : vector<16x1xf32>
    %590 = vector.broadcast %589 : vector<16x1xf32> to vector<16x32xf32>
    %591 = arith.subf %581, %590 : vector<16x32xf32>
    %592 = arith.mulf %591, %591 : vector<16x32xf32>
    %cst_207 = arith.constant dense<0.000000e+00> : vector<16xf32>
    %593 = vector.multi_reduction <add>, %592, %cst_207 [1] : vector<16x32xf32> to vector<16xf32>
    %594 = vector.shape_cast %593 : vector<16xf32> to vector<16x1xf32>
    %cst_208 = arith.constant 0.0322580636 : f32
    %595 = vector.broadcast %cst_208 : f32 to vector<16x1xf32>
    %596 = arith.mulf %594, %595 : vector<16x1xf32>
    %597 = math.sqrt %596 : vector<16x1xf32>
    %cst_209 = arith.constant 9.99999997E-7 : f32
    %598 = vector.broadcast %cst_209 : f32 to vector<16x1xf32>
    %599 = arith.addf %597, %598 : vector<16x1xf32>
    %600 = vector.broadcast %599 : vector<16x1xf32> to vector<16x32xf32>
    %601 = arith.divf %591, %600 : vector<16x32xf32>
    %602 = vector.broadcast %583 : vector<1x32xf32> to vector<16x32xf32>
    %603 = arith.mulf %602, %601 : vector<16x32xf32>
    %604 = vector.broadcast %585 : vector<1x32xf32> to vector<16x32xf32>
    %605 = arith.addf %603, %604 : vector<16x32xf32>
    %c2_210 = arith.constant 2 : index
    %c0_211 = arith.constant 0 : index
    %c0_212 = arith.constant 0 : index
    %606 = vector.load %arg6[%c2_210, %c0_211, %c0_212] : memref<4x32x128xbf16, #tpu.memory_space<vmem>>, vector<1x32x128xbf16>
    %607 = vector.shape_cast %606 : vector<1x32x128xbf16> to vector<32x128xbf16>
    %c2_213 = arith.constant 2 : index
    %c0_214 = arith.constant 0 : index
    %c0_215 = arith.constant 0 : index
    %608 = vector.load %arg7[%c2_213, %c0_214, %c0_215] : memref<4x1x128xf32, #tpu.memory_space<vmem>>, vector<1x1x128xf32>
    %609 = vector.shape_cast %608 : vector<1x1x128xf32> to vector<1x128xf32>
    %c0_216 = arith.constant 0 : index
    %c64 = arith.constant 64 : index
    %610 = vector.load %arg8[%c0_216, %c64] : memref<128x128xbf16, #tpu.memory_space<vmem>>, vector<128x32xbf16>
    %c0_217 = arith.constant 0 : index
    %c64_218 = arith.constant 64 : index
    %611 = vector.load %arg9[%c0_217, %c64_218] : memref<1x128xf32, #tpu.memory_space<vmem>>, vector<1x32xf32>
    %612 = arith.truncf %605 : vector<16x32xf32> to vector<16x32xbf16>
    %cst_219 = arith.constant dense<0.000000e+00> : vector<16x128xf32>
    %613 = tpu.matmul %612, %607, %cst_219 {dimension_numbers = #tpu.dot_dimension_numbers<[1], [0], [0], [1], [0, 0, 1, 1], [], []>} : vector<16x32xbf16>, vector<32x128xbf16>, vector<16x128xf32> -> vector<16x128xf32>
    %614 = vector.broadcast %609 : vector<1x128xf32> to vector<16x128xf32>
    %615 = arith.addf %613, %614 : vector<16x128xf32>
    %cst_220 = arith.constant 0.000000e+00 : f32
    %616 = vector.broadcast %cst_220 : f32 to vector<16x128xf32>
    %617 = arith.maximumf %615, %616 : vector<16x128xf32>
    %618 = arith.truncf %617 : vector<16x128xf32> to vector<16x128xbf16>
    %cst_221 = arith.constant dense<0.000000e+00> : vector<16x32xf32>
    %619 = tpu.matmul %618, %610, %cst_221 {dimension_numbers = #tpu.dot_dimension_numbers<[1], [0], [0], [1], [0, 0, 1, 1], [], []>} : vector<16x128xbf16>, vector<128x32xbf16>, vector<16x32xf32> -> vector<16x32xf32>
    %620 = vector.broadcast %611 : vector<1x32xf32> to vector<16x32xf32>
    %621 = arith.addf %619, %620 : vector<16x32xf32>
    %622 = arith.addf %605, %621 : vector<16x32xf32>
    %c6 = arith.constant 6 : index
    %c0_222 = arith.constant 0 : index
    %c0_223 = arith.constant 0 : index
    %623 = vector.load %arg10[%c6, %c0_222, %c0_223] : memref<10x1x32xf32, #tpu.memory_space<vmem>>, vector<1x1x32xf32>
    %624 = vector.shape_cast %623 : vector<1x1x32xf32> to vector<1x32xf32>
    %c6_224 = arith.constant 6 : index
    %c0_225 = arith.constant 0 : index
    %c0_226 = arith.constant 0 : index
    %625 = vector.load %arg11[%c6_224, %c0_225, %c0_226] : memref<10x1x32xf32, #tpu.memory_space<vmem>>, vector<1x1x32xf32>
    %626 = vector.shape_cast %625 : vector<1x1x32xf32> to vector<1x32xf32>
    %cst_227 = arith.constant dense<0.000000e+00> : vector<16xf32>
    %627 = vector.multi_reduction <add>, %622, %cst_227 [1] : vector<16x32xf32> to vector<16xf32>
    %628 = vector.shape_cast %627 : vector<16xf32> to vector<16x1xf32>
    %cst_228 = arith.constant 3.200000e+01 : f32
    %629 = vector.broadcast %cst_228 : f32 to vector<16x1xf32>
    %630 = arith.divf %628, %629 : vector<16x1xf32>
    %631 = vector.broadcast %630 : vector<16x1xf32> to vector<16x32xf32>
    %632 = arith.subf %622, %631 : vector<16x32xf32>
    %633 = arith.mulf %632, %632 : vector<16x32xf32>
    %cst_229 = arith.constant dense<0.000000e+00> : vector<16xf32>
    %634 = vector.multi_reduction <add>, %633, %cst_229 [1] : vector<16x32xf32> to vector<16xf32>
    %635 = vector.shape_cast %634 : vector<16xf32> to vector<16x1xf32>
    %cst_230 = arith.constant 0.0322580636 : f32
    %636 = vector.broadcast %cst_230 : f32 to vector<16x1xf32>
    %637 = arith.mulf %635, %636 : vector<16x1xf32>
    %638 = math.sqrt %637 : vector<16x1xf32>
    %cst_231 = arith.constant 9.99999997E-7 : f32
    %639 = vector.broadcast %cst_231 : f32 to vector<16x1xf32>
    %640 = arith.addf %638, %639 : vector<16x1xf32>
    %641 = vector.broadcast %640 : vector<16x1xf32> to vector<16x32xf32>
    %642 = arith.divf %632, %641 : vector<16x32xf32>
    %643 = vector.broadcast %624 : vector<1x32xf32> to vector<16x32xf32>
    %644 = arith.mulf %643, %642 : vector<16x32xf32>
    %645 = vector.broadcast %626 : vector<1x32xf32> to vector<16x32xf32>
    %646 = arith.addf %644, %645 : vector<16x32xf32>
    %c4_232 = arith.constant 4 : index
    %c0_233 = arith.constant 0 : index
    %c0_234 = arith.constant 0 : index
    %647 = vector.load %arg4[%c4_232, %c0_233, %c0_234] : memref<6x32x128xbf16, #tpu.memory_space<vmem>>, vector<1x32x128xbf16>
    %648 = vector.shape_cast %647 : vector<1x32x128xbf16> to vector<32x128xbf16>
    %c4_235 = arith.constant 4 : index
    %c0_236 = arith.constant 0 : index
    %c0_237 = arith.constant 0 : index
    %649 = vector.load %arg5[%c4_235, %c0_236, %c0_237] : memref<6x1x128xf32, #tpu.memory_space<vmem>>, vector<1x1x128xf32>
    %650 = vector.shape_cast %649 : vector<1x1x128xf32> to vector<1x128xf32>
    %651 = arith.truncf %646 : vector<16x32xf32> to vector<16x32xbf16>
    %652 = vector.extract_strided_slice %648 {offsets = [0, 0], sizes = [32, 96], strides = [1, 1]} : vector<32x128xbf16> to vector<32x96xbf16>
    %cst_238 = arith.constant dense<0.000000e+00> : vector<16x96xf32>
    %653 = tpu.matmul %651, %652, %cst_238 {dimension_numbers = #tpu.dot_dimension_numbers<[1], [0], [0], [1], [0, 0, 1, 1], [], []>} : vector<16x32xbf16>, vector<32x96xbf16>, vector<16x96xf32> -> vector<16x96xf32>
    %654 = vector.extract_strided_slice %650 {offsets = [0, 0], sizes = [1, 96], strides = [1, 1]} : vector<1x128xf32> to vector<1x96xf32>
    %655 = vector.broadcast %654 : vector<1x96xf32> to vector<16x96xf32>
    %656 = arith.addf %653, %655 : vector<16x96xf32>
    %657 = vector.extract_strided_slice %656 {offsets = [0, 0], sizes = [16, 32], strides = [1, 1]} : vector<16x96xf32> to vector<16x32xf32>
    %658 = vector.extract_strided_slice %656 {offsets = [0, 32], sizes = [16, 32], strides = [1, 1]} : vector<16x96xf32> to vector<16x32xf32>
    %659 = vector.extract_strided_slice %656 {offsets = [0, 64], sizes = [16, 32], strides = [1, 1]} : vector<16x96xf32> to vector<16x32xf32>
    %660 = vector.extract_strided_slice %648 {offsets = [0, 96], sizes = [32, 32], strides = [1, 1]} : vector<32x128xbf16> to vector<32x32xbf16>
    %661 = vector.extract_strided_slice %650 {offsets = [0, 96], sizes = [1, 32], strides = [1, 1]} : vector<1x128xf32> to vector<1x32xf32>
    %662 = vector.shape_cast %657 : vector<16x32xf32> to vector<2x8x32xf32>
    %663 = arith.truncf %662 : vector<2x8x32xf32> to vector<2x8x32xbf16>
    %664 = vector.shape_cast %658 : vector<16x32xf32> to vector<2x8x32xf32>
    %665 = arith.truncf %664 : vector<2x8x32xf32> to vector<2x8x32xbf16>
    %666 = vector.shape_cast %659 : vector<16x32xf32> to vector<2x8x32xf32>
    %667 = arith.truncf %666 : vector<2x8x32xf32> to vector<2x8x32xbf16>
    %668 = vector.extract_strided_slice %663 {offsets = [0, 0, 0], sizes = [2, 8, 8], strides = [1, 1, 1]} : vector<2x8x32xbf16> to vector<2x8x8xbf16>
    %669 = vector.extract_strided_slice %665 {offsets = [0, 0, 0], sizes = [2, 8, 8], strides = [1, 1, 1]} : vector<2x8x32xbf16> to vector<2x8x8xbf16>
    "tpu.trace_start"() <{level = 10 : i32, message = "bqd,bkd->bqk"}> : () -> ()
    %cst_239 = arith.constant dense<0.000000e+00> : vector<2x8x8xf32>
    %670 = tpu.matmul %668, %669, %cst_239 {dimension_numbers = #tpu.dot_dimension_numbers<[2], [2], [1], [1], [0, 0, 0, 1, 1, 1], [0], [0]>} : vector<2x8x8xbf16>, vector<2x8x8xbf16>, vector<2x8x8xf32> -> vector<2x8x8xf32>
    "tpu.trace_stop"() : () -> ()
    %cst_240 = arith.constant 0.353553385 : f32
    %671 = vector.broadcast %cst_240 : f32 to vector<2x8x8xf32>
    %672 = arith.mulf %670, %671 : vector<2x8x8xf32>
    %673 = arith.addf %672, %7 : vector<2x8x8xf32>
    %cst_241 = arith.constant dense<0xFF800000> : vector<2x8xf32>
    %674 = vector.multi_reduction <maximumf>, %673, %cst_241 [2] : vector<2x8x8xf32> to vector<2x8xf32>
    %675 = vector.shape_cast %674 : vector<2x8xf32> to vector<2x8x1xf32>
    %676 = vector.broadcast %675 : vector<2x8x1xf32> to vector<2x8x8xf32>
    %677 = arith.subf %673, %676 : vector<2x8x8xf32>
    %678 = math.exp %677 : vector<2x8x8xf32>
    %cst_242 = arith.constant dense<0.000000e+00> : vector<2x8xf32>
    %679 = vector.multi_reduction <add>, %678, %cst_242 [2] : vector<2x8x8xf32> to vector<2x8xf32>
    %680 = vector.shape_cast %679 : vector<2x8xf32> to vector<2x8x1xf32>
    %681 = vector.broadcast %680 : vector<2x8x1xf32> to vector<2x8x8xf32>
    %682 = arith.divf %678, %681 : vector<2x8x8xf32>
    %683 = arith.truncf %682 : vector<2x8x8xf32> to vector<2x8x8xbf16>
    %684 = vector.extract_strided_slice %667 {offsets = [0, 0, 0], sizes = [2, 8, 8], strides = [1, 1, 1]} : vector<2x8x32xbf16> to vector<2x8x8xbf16>
    "tpu.trace_start"() <{level = 10 : i32, message = "bqk,bkd->bqd"}> : () -> ()
    %cst_243 = arith.constant dense<0.000000e+00> : vector<2x8x8xf32>
    %685 = tpu.matmul %683, %684, %cst_243 {dimension_numbers = #tpu.dot_dimension_numbers<[2], [1], [1], [2], [0, 0, 0, 1, 1, 2], [0], [0]>} : vector<2x8x8xbf16>, vector<2x8x8xbf16>, vector<2x8x8xf32> -> vector<2x8x8xf32>
    "tpu.trace_stop"() : () -> ()
    %686 = vector.shape_cast %685 : vector<2x8x8xf32> to vector<16x8xf32>
    %687 = vector.extract_strided_slice %663 {offsets = [0, 0, 8], sizes = [2, 8, 8], strides = [1, 1, 1]} : vector<2x8x32xbf16> to vector<2x8x8xbf16>
    %688 = vector.extract_strided_slice %665 {offsets = [0, 0, 8], sizes = [2, 8, 8], strides = [1, 1, 1]} : vector<2x8x32xbf16> to vector<2x8x8xbf16>
    "tpu.trace_start"() <{level = 10 : i32, message = "bqd,bkd->bqk"}> : () -> ()
    %cst_244 = arith.constant dense<0.000000e+00> : vector<2x8x8xf32>
    %689 = tpu.matmul %687, %688, %cst_244 {dimension_numbers = #tpu.dot_dimension_numbers<[2], [2], [1], [1], [0, 0, 0, 1, 1, 1], [0], [0]>} : vector<2x8x8xbf16>, vector<2x8x8xbf16>, vector<2x8x8xf32> -> vector<2x8x8xf32>
    "tpu.trace_stop"() : () -> ()
    %cst_245 = arith.constant 0.353553385 : f32
    %690 = vector.broadcast %cst_245 : f32 to vector<2x8x8xf32>
    %691 = arith.mulf %689, %690 : vector<2x8x8xf32>
    %692 = arith.addf %691, %7 : vector<2x8x8xf32>
    %cst_246 = arith.constant dense<0xFF800000> : vector<2x8xf32>
    %693 = vector.multi_reduction <maximumf>, %692, %cst_246 [2] : vector<2x8x8xf32> to vector<2x8xf32>
    %694 = vector.shape_cast %693 : vector<2x8xf32> to vector<2x8x1xf32>
    %695 = vector.broadcast %694 : vector<2x8x1xf32> to vector<2x8x8xf32>
    %696 = arith.subf %692, %695 : vector<2x8x8xf32>
    %697 = math.exp %696 : vector<2x8x8xf32>
    %cst_247 = arith.constant dense<0.000000e+00> : vector<2x8xf32>
    %698 = vector.multi_reduction <add>, %697, %cst_247 [2] : vector<2x8x8xf32> to vector<2x8xf32>
    %699 = vector.shape_cast %698 : vector<2x8xf32> to vector<2x8x1xf32>
    %700 = vector.broadcast %699 : vector<2x8x1xf32> to vector<2x8x8xf32>
    %701 = arith.divf %697, %700 : vector<2x8x8xf32>
    %702 = arith.truncf %701 : vector<2x8x8xf32> to vector<2x8x8xbf16>
    %703 = vector.extract_strided_slice %667 {offsets = [0, 0, 8], sizes = [2, 8, 8], strides = [1, 1, 1]} : vector<2x8x32xbf16> to vector<2x8x8xbf16>
    "tpu.trace_start"() <{level = 10 : i32, message = "bqk,bkd->bqd"}> : () -> ()
    %cst_248 = arith.constant dense<0.000000e+00> : vector<2x8x8xf32>
    %704 = tpu.matmul %702, %703, %cst_248 {dimension_numbers = #tpu.dot_dimension_numbers<[2], [1], [1], [2], [0, 0, 0, 1, 1, 2], [0], [0]>} : vector<2x8x8xbf16>, vector<2x8x8xbf16>, vector<2x8x8xf32> -> vector<2x8x8xf32>
    "tpu.trace_stop"() : () -> ()
    %705 = vector.shape_cast %704 : vector<2x8x8xf32> to vector<16x8xf32>
    %706 = vector.extract_strided_slice %663 {offsets = [0, 0, 16], sizes = [2, 8, 8], strides = [1, 1, 1]} : vector<2x8x32xbf16> to vector<2x8x8xbf16>
    %707 = vector.extract_strided_slice %665 {offsets = [0, 0, 16], sizes = [2, 8, 8], strides = [1, 1, 1]} : vector<2x8x32xbf16> to vector<2x8x8xbf16>
    "tpu.trace_start"() <{level = 10 : i32, message = "bqd,bkd->bqk"}> : () -> ()
    %cst_249 = arith.constant dense<0.000000e+00> : vector<2x8x8xf32>
    %708 = tpu.matmul %706, %707, %cst_249 {dimension_numbers = #tpu.dot_dimension_numbers<[2], [2], [1], [1], [0, 0, 0, 1, 1, 1], [0], [0]>} : vector<2x8x8xbf16>, vector<2x8x8xbf16>, vector<2x8x8xf32> -> vector<2x8x8xf32>
    "tpu.trace_stop"() : () -> ()
    %cst_250 = arith.constant 0.353553385 : f32
    %709 = vector.broadcast %cst_250 : f32 to vector<2x8x8xf32>
    %710 = arith.mulf %708, %709 : vector<2x8x8xf32>
    %711 = arith.addf %710, %7 : vector<2x8x8xf32>
    %cst_251 = arith.constant dense<0xFF800000> : vector<2x8xf32>
    %712 = vector.multi_reduction <maximumf>, %711, %cst_251 [2] : vector<2x8x8xf32> to vector<2x8xf32>
    %713 = vector.shape_cast %712 : vector<2x8xf32> to vector<2x8x1xf32>
    %714 = vector.broadcast %713 : vector<2x8x1xf32> to vector<2x8x8xf32>
    %715 = arith.subf %711, %714 : vector<2x8x8xf32>
    %716 = math.exp %715 : vector<2x8x8xf32>
    %cst_252 = arith.constant dense<0.000000e+00> : vector<2x8xf32>
    %717 = vector.multi_reduction <add>, %716, %cst_252 [2] : vector<2x8x8xf32> to vector<2x8xf32>
    %718 = vector.shape_cast %717 : vector<2x8xf32> to vector<2x8x1xf32>
    %719 = vector.broadcast %718 : vector<2x8x1xf32> to vector<2x8x8xf32>
    %720 = arith.divf %716, %719 : vector<2x8x8xf32>
    %721 = arith.truncf %720 : vector<2x8x8xf32> to vector<2x8x8xbf16>
    %722 = vector.extract_strided_slice %667 {offsets = [0, 0, 16], sizes = [2, 8, 8], strides = [1, 1, 1]} : vector<2x8x32xbf16> to vector<2x8x8xbf16>
    "tpu.trace_start"() <{level = 10 : i32, message = "bqk,bkd->bqd"}> : () -> ()
    %cst_253 = arith.constant dense<0.000000e+00> : vector<2x8x8xf32>
    %723 = tpu.matmul %721, %722, %cst_253 {dimension_numbers = #tpu.dot_dimension_numbers<[2], [1], [1], [2], [0, 0, 0, 1, 1, 2], [0], [0]>} : vector<2x8x8xbf16>, vector<2x8x8xbf16>, vector<2x8x8xf32> -> vector<2x8x8xf32>
    "tpu.trace_stop"() : () -> ()
    %724 = vector.shape_cast %723 : vector<2x8x8xf32> to vector<16x8xf32>
    %725 = vector.extract_strided_slice %663 {offsets = [0, 0, 24], sizes = [2, 8, 8], strides = [1, 1, 1]} : vector<2x8x32xbf16> to vector<2x8x8xbf16>
    %726 = vector.extract_strided_slice %665 {offsets = [0, 0, 24], sizes = [2, 8, 8], strides = [1, 1, 1]} : vector<2x8x32xbf16> to vector<2x8x8xbf16>
    "tpu.trace_start"() <{level = 10 : i32, message = "bqd,bkd->bqk"}> : () -> ()
    %cst_254 = arith.constant dense<0.000000e+00> : vector<2x8x8xf32>
    %727 = tpu.matmul %725, %726, %cst_254 {dimension_numbers = #tpu.dot_dimension_numbers<[2], [2], [1], [1], [0, 0, 0, 1, 1, 1], [0], [0]>} : vector<2x8x8xbf16>, vector<2x8x8xbf16>, vector<2x8x8xf32> -> vector<2x8x8xf32>
    "tpu.trace_stop"() : () -> ()
    %cst_255 = arith.constant 0.353553385 : f32
    %728 = vector.broadcast %cst_255 : f32 to vector<2x8x8xf32>
    %729 = arith.mulf %727, %728 : vector<2x8x8xf32>
    %730 = arith.addf %729, %7 : vector<2x8x8xf32>
    %cst_256 = arith.constant dense<0xFF800000> : vector<2x8xf32>
    %731 = vector.multi_reduction <maximumf>, %730, %cst_256 [2] : vector<2x8x8xf32> to vector<2x8xf32>
    %732 = vector.shape_cast %731 : vector<2x8xf32> to vector<2x8x1xf32>
    %733 = vector.broadcast %732 : vector<2x8x1xf32> to vector<2x8x8xf32>
    %734 = arith.subf %730, %733 : vector<2x8x8xf32>
    %735 = math.exp %734 : vector<2x8x8xf32>
    %cst_257 = arith.constant dense<0.000000e+00> : vector<2x8xf32>
    %736 = vector.multi_reduction <add>, %735, %cst_257 [2] : vector<2x8x8xf32> to vector<2x8xf32>
    %737 = vector.shape_cast %736 : vector<2x8xf32> to vector<2x8x1xf32>
    %738 = vector.broadcast %737 : vector<2x8x1xf32> to vector<2x8x8xf32>
    %739 = arith.divf %735, %738 : vector<2x8x8xf32>
    %740 = arith.truncf %739 : vector<2x8x8xf32> to vector<2x8x8xbf16>
    %741 = vector.extract_strided_slice %667 {offsets = [0, 0, 24], sizes = [2, 8, 8], strides = [1, 1, 1]} : vector<2x8x32xbf16> to vector<2x8x8xbf16>
    "tpu.trace_start"() <{level = 10 : i32, message = "bqk,bkd->bqd"}> : () -> ()
    %cst_258 = arith.constant dense<0.000000e+00> : vector<2x8x8xf32>
    %742 = tpu.matmul %740, %741, %cst_258 {dimension_numbers = #tpu.dot_dimension_numbers<[2], [1], [1], [2], [0, 0, 0, 1, 1, 2], [0], [0]>} : vector<2x8x8xbf16>, vector<2x8x8xbf16>, vector<2x8x8xf32> -> vector<2x8x8xf32>
    "tpu.trace_stop"() : () -> ()
    %743 = vector.shape_cast %742 : vector<2x8x8xf32> to vector<16x8xf32>
    %744 = tpu.concatenate %686, %705, %724, %743 in 1 : vector<16x8xf32>, vector<16x8xf32>, vector<16x8xf32>, vector<16x8xf32> -> vector<16x32xf32>
    %745 = arith.truncf %744 : vector<16x32xf32> to vector<16x32xbf16>
    %cst_259 = arith.constant dense<0.000000e+00> : vector<16x32xf32>
    %746 = tpu.matmul %745, %660, %cst_259 {dimension_numbers = #tpu.dot_dimension_numbers<[1], [0], [0], [1], [0, 0, 1, 1], [], []>} : vector<16x32xbf16>, vector<32x32xbf16>, vector<16x32xf32> -> vector<16x32xf32>
    %747 = vector.broadcast %661 : vector<1x32xf32> to vector<16x32xf32>
    %748 = arith.addf %746, %747 : vector<16x32xf32>
    %749 = arith.addf %646, %748 : vector<16x32xf32>
    %c7 = arith.constant 7 : index
    %c0_260 = arith.constant 0 : index
    %c0_261 = arith.constant 0 : index
    %750 = vector.load %arg10[%c7, %c0_260, %c0_261] : memref<10x1x32xf32, #tpu.memory_space<vmem>>, vector<1x1x32xf32>
    %751 = vector.shape_cast %750 : vector<1x1x32xf32> to vector<1x32xf32>
    %c7_262 = arith.constant 7 : index
    %c0_263 = arith.constant 0 : index
    %c0_264 = arith.constant 0 : index
    %752 = vector.load %arg11[%c7_262, %c0_263, %c0_264] : memref<10x1x32xf32, #tpu.memory_space<vmem>>, vector<1x1x32xf32>
    %753 = vector.shape_cast %752 : vector<1x1x32xf32> to vector<1x32xf32>
    %cst_265 = arith.constant dense<0.000000e+00> : vector<16xf32>
    %754 = vector.multi_reduction <add>, %749, %cst_265 [1] : vector<16x32xf32> to vector<16xf32>
    %755 = vector.shape_cast %754 : vector<16xf32> to vector<16x1xf32>
    %cst_266 = arith.constant 3.200000e+01 : f32
    %756 = vector.broadcast %cst_266 : f32 to vector<16x1xf32>
    %757 = arith.divf %755, %756 : vector<16x1xf32>
    %758 = vector.broadcast %757 : vector<16x1xf32> to vector<16x32xf32>
    %759 = arith.subf %749, %758 : vector<16x32xf32>
    %760 = arith.mulf %759, %759 : vector<16x32xf32>
    %cst_267 = arith.constant dense<0.000000e+00> : vector<16xf32>
    %761 = vector.multi_reduction <add>, %760, %cst_267 [1] : vector<16x32xf32> to vector<16xf32>
    %762 = vector.shape_cast %761 : vector<16xf32> to vector<16x1xf32>
    %cst_268 = arith.constant 0.0322580636 : f32
    %763 = vector.broadcast %cst_268 : f32 to vector<16x1xf32>
    %764 = arith.mulf %762, %763 : vector<16x1xf32>
    %765 = math.sqrt %764 : vector<16x1xf32>
    %cst_269 = arith.constant 9.99999997E-7 : f32
    %766 = vector.broadcast %cst_269 : f32 to vector<16x1xf32>
    %767 = arith.addf %765, %766 : vector<16x1xf32>
    %768 = vector.broadcast %767 : vector<16x1xf32> to vector<16x32xf32>
    %769 = arith.divf %759, %768 : vector<16x32xf32>
    %770 = vector.broadcast %751 : vector<1x32xf32> to vector<16x32xf32>
    %771 = arith.mulf %770, %769 : vector<16x32xf32>
    %772 = vector.broadcast %753 : vector<1x32xf32> to vector<16x32xf32>
    %773 = arith.addf %771, %772 : vector<16x32xf32>
    %c5_270 = arith.constant 5 : index
    %c0_271 = arith.constant 0 : index
    %c0_272 = arith.constant 0 : index
    %774 = vector.load %arg4[%c5_270, %c0_271, %c0_272] : memref<6x32x128xbf16, #tpu.memory_space<vmem>>, vector<1x32x128xbf16>
    %775 = vector.shape_cast %774 : vector<1x32x128xbf16> to vector<32x128xbf16>
    %c5_273 = arith.constant 5 : index
    %c0_274 = arith.constant 0 : index
    %c0_275 = arith.constant 0 : index
    %776 = vector.load %arg5[%c5_273, %c0_274, %c0_275] : memref<6x1x128xf32, #tpu.memory_space<vmem>>, vector<1x1x128xf32>
    %777 = vector.shape_cast %776 : vector<1x1x128xf32> to vector<1x128xf32>
    %778 = arith.truncf %773 : vector<16x32xf32> to vector<16x32xbf16>
    %779 = vector.extract_strided_slice %775 {offsets = [0, 0], sizes = [32, 32], strides = [1, 1]} : vector<32x128xbf16> to vector<32x32xbf16>
    %cst_276 = arith.constant dense<0.000000e+00> : vector<16x32xf32>
    %780 = tpu.matmul %778, %779, %cst_276 {dimension_numbers = #tpu.dot_dimension_numbers<[1], [0], [0], [1], [0, 0, 1, 1], [], []>} : vector<16x32xbf16>, vector<32x32xbf16>, vector<16x32xf32> -> vector<16x32xf32>
    %781 = vector.extract_strided_slice %777 {offsets = [0, 0], sizes = [1, 32], strides = [1, 1]} : vector<1x128xf32> to vector<1x32xf32>
    %782 = vector.broadcast %781 : vector<1x32xf32> to vector<16x32xf32>
    %783 = arith.addf %780, %782 : vector<16x32xf32>
    %784 = arith.truncf %346 : vector<16x32xf32> to vector<16x32xbf16>
    %785 = vector.extract_strided_slice %775 {offsets = [0, 32], sizes = [32, 64], strides = [1, 1]} : vector<32x128xbf16> to vector<32x64xbf16>
    %cst_277 = arith.constant dense<0.000000e+00> : vector<16x64xf32>
    %786 = tpu.matmul %784, %785, %cst_277 {dimension_numbers = #tpu.dot_dimension_numbers<[1], [0], [0], [1], [0, 0, 1, 1], [], []>} : vector<16x32xbf16>, vector<32x64xbf16>, vector<16x64xf32> -> vector<16x64xf32>
    %787 = vector.extract_strided_slice %777 {offsets = [0, 32], sizes = [1, 64], strides = [1, 1]} : vector<1x128xf32> to vector<1x64xf32>
    %788 = vector.broadcast %787 : vector<1x64xf32> to vector<16x64xf32>
    %789 = arith.addf %786, %788 : vector<16x64xf32>
    %790 = vector.extract_strided_slice %789 {offsets = [0, 0], sizes = [16, 32], strides = [1, 1]} : vector<16x64xf32> to vector<16x32xf32>
    %791 = vector.extract_strided_slice %789 {offsets = [0, 32], sizes = [16, 32], strides = [1, 1]} : vector<16x64xf32> to vector<16x32xf32>
    %792 = vector.extract_strided_slice %775 {offsets = [0, 96], sizes = [32, 32], strides = [1, 1]} : vector<32x128xbf16> to vector<32x32xbf16>
    %793 = vector.extract_strided_slice %777 {offsets = [0, 96], sizes = [1, 32], strides = [1, 1]} : vector<1x128xf32> to vector<1x32xf32>
    %794 = vector.shape_cast %783 : vector<16x32xf32> to vector<2x8x32xf32>
    %795 = arith.truncf %794 : vector<2x8x32xf32> to vector<2x8x32xbf16>
    %796 = vector.shape_cast %790 : vector<16x32xf32> to vector<2x8x32xf32>
    %797 = arith.truncf %796 : vector<2x8x32xf32> to vector<2x8x32xbf16>
    %798 = vector.shape_cast %791 : vector<16x32xf32> to vector<2x8x32xf32>
    %799 = arith.truncf %798 : vector<2x8x32xf32> to vector<2x8x32xbf16>
    %800 = vector.extract_strided_slice %795 {offsets = [0, 0, 0], sizes = [2, 8, 8], strides = [1, 1, 1]} : vector<2x8x32xbf16> to vector<2x8x8xbf16>
    %801 = vector.extract_strided_slice %797 {offsets = [0, 0, 0], sizes = [2, 8, 8], strides = [1, 1, 1]} : vector<2x8x32xbf16> to vector<2x8x8xbf16>
    "tpu.trace_start"() <{level = 10 : i32, message = "bqd,bkd->bqk"}> : () -> ()
    %cst_278 = arith.constant dense<0.000000e+00> : vector<2x8x8xf32>
    %802 = tpu.matmul %800, %801, %cst_278 {dimension_numbers = #tpu.dot_dimension_numbers<[2], [2], [1], [1], [0, 0, 0, 1, 1, 1], [0], [0]>} : vector<2x8x8xbf16>, vector<2x8x8xbf16>, vector<2x8x8xf32> -> vector<2x8x8xf32>
    "tpu.trace_stop"() : () -> ()
    %cst_279 = arith.constant 0.353553385 : f32
    %803 = vector.broadcast %cst_279 : f32 to vector<2x8x8xf32>
    %804 = arith.mulf %802, %803 : vector<2x8x8xf32>
    %805 = arith.addf %804, %10 : vector<2x8x8xf32>
    %cst_280 = arith.constant dense<0xFF800000> : vector<2x8xf32>
    %806 = vector.multi_reduction <maximumf>, %805, %cst_280 [2] : vector<2x8x8xf32> to vector<2x8xf32>
    %807 = vector.shape_cast %806 : vector<2x8xf32> to vector<2x8x1xf32>
    %808 = vector.broadcast %807 : vector<2x8x1xf32> to vector<2x8x8xf32>
    %809 = arith.subf %805, %808 : vector<2x8x8xf32>
    %810 = math.exp %809 : vector<2x8x8xf32>
    %cst_281 = arith.constant dense<0.000000e+00> : vector<2x8xf32>
    %811 = vector.multi_reduction <add>, %810, %cst_281 [2] : vector<2x8x8xf32> to vector<2x8xf32>
    %812 = vector.shape_cast %811 : vector<2x8xf32> to vector<2x8x1xf32>
    %813 = vector.broadcast %812 : vector<2x8x1xf32> to vector<2x8x8xf32>
    %814 = arith.divf %810, %813 : vector<2x8x8xf32>
    %815 = arith.truncf %814 : vector<2x8x8xf32> to vector<2x8x8xbf16>
    %816 = vector.extract_strided_slice %799 {offsets = [0, 0, 0], sizes = [2, 8, 8], strides = [1, 1, 1]} : vector<2x8x32xbf16> to vector<2x8x8xbf16>
    "tpu.trace_start"() <{level = 10 : i32, message = "bqk,bkd->bqd"}> : () -> ()
    %cst_282 = arith.constant dense<0.000000e+00> : vector<2x8x8xf32>
    %817 = tpu.matmul %815, %816, %cst_282 {dimension_numbers = #tpu.dot_dimension_numbers<[2], [1], [1], [2], [0, 0, 0, 1, 1, 2], [0], [0]>} : vector<2x8x8xbf16>, vector<2x8x8xbf16>, vector<2x8x8xf32> -> vector<2x8x8xf32>
    "tpu.trace_stop"() : () -> ()
    %818 = vector.shape_cast %817 : vector<2x8x8xf32> to vector<16x8xf32>
    %819 = vector.extract_strided_slice %795 {offsets = [0, 0, 8], sizes = [2, 8, 8], strides = [1, 1, 1]} : vector<2x8x32xbf16> to vector<2x8x8xbf16>
    %820 = vector.extract_strided_slice %797 {offsets = [0, 0, 8], sizes = [2, 8, 8], strides = [1, 1, 1]} : vector<2x8x32xbf16> to vector<2x8x8xbf16>
    "tpu.trace_start"() <{level = 10 : i32, message = "bqd,bkd->bqk"}> : () -> ()
    %cst_283 = arith.constant dense<0.000000e+00> : vector<2x8x8xf32>
    %821 = tpu.matmul %819, %820, %cst_283 {dimension_numbers = #tpu.dot_dimension_numbers<[2], [2], [1], [1], [0, 0, 0, 1, 1, 1], [0], [0]>} : vector<2x8x8xbf16>, vector<2x8x8xbf16>, vector<2x8x8xf32> -> vector<2x8x8xf32>
    "tpu.trace_stop"() : () -> ()
    %cst_284 = arith.constant 0.353553385 : f32
    %822 = vector.broadcast %cst_284 : f32 to vector<2x8x8xf32>
    %823 = arith.mulf %821, %822 : vector<2x8x8xf32>
    %824 = arith.addf %823, %10 : vector<2x8x8xf32>
    %cst_285 = arith.constant dense<0xFF800000> : vector<2x8xf32>
    %825 = vector.multi_reduction <maximumf>, %824, %cst_285 [2] : vector<2x8x8xf32> to vector<2x8xf32>
    %826 = vector.shape_cast %825 : vector<2x8xf32> to vector<2x8x1xf32>
    %827 = vector.broadcast %826 : vector<2x8x1xf32> to vector<2x8x8xf32>
    %828 = arith.subf %824, %827 : vector<2x8x8xf32>
    %829 = math.exp %828 : vector<2x8x8xf32>
    %cst_286 = arith.constant dense<0.000000e+00> : vector<2x8xf32>
    %830 = vector.multi_reduction <add>, %829, %cst_286 [2] : vector<2x8x8xf32> to vector<2x8xf32>
    %831 = vector.shape_cast %830 : vector<2x8xf32> to vector<2x8x1xf32>
    %832 = vector.broadcast %831 : vector<2x8x1xf32> to vector<2x8x8xf32>
    %833 = arith.divf %829, %832 : vector<2x8x8xf32>
    %834 = arith.truncf %833 : vector<2x8x8xf32> to vector<2x8x8xbf16>
    %835 = vector.extract_strided_slice %799 {offsets = [0, 0, 8], sizes = [2, 8, 8], strides = [1, 1, 1]} : vector<2x8x32xbf16> to vector<2x8x8xbf16>
    "tpu.trace_start"() <{level = 10 : i32, message = "bqk,bkd->bqd"}> : () -> ()
    %cst_287 = arith.constant dense<0.000000e+00> : vector<2x8x8xf32>
    %836 = tpu.matmul %834, %835, %cst_287 {dimension_numbers = #tpu.dot_dimension_numbers<[2], [1], [1], [2], [0, 0, 0, 1, 1, 2], [0], [0]>} : vector<2x8x8xbf16>, vector<2x8x8xbf16>, vector<2x8x8xf32> -> vector<2x8x8xf32>
    "tpu.trace_stop"() : () -> ()
    %837 = vector.shape_cast %836 : vector<2x8x8xf32> to vector<16x8xf32>
    %838 = vector.extract_strided_slice %795 {offsets = [0, 0, 16], sizes = [2, 8, 8], strides = [1, 1, 1]} : vector<2x8x32xbf16> to vector<2x8x8xbf16>
    %839 = vector.extract_strided_slice %797 {offsets = [0, 0, 16], sizes = [2, 8, 8], strides = [1, 1, 1]} : vector<2x8x32xbf16> to vector<2x8x8xbf16>
    "tpu.trace_start"() <{level = 10 : i32, message = "bqd,bkd->bqk"}> : () -> ()
    %cst_288 = arith.constant dense<0.000000e+00> : vector<2x8x8xf32>
    %840 = tpu.matmul %838, %839, %cst_288 {dimension_numbers = #tpu.dot_dimension_numbers<[2], [2], [1], [1], [0, 0, 0, 1, 1, 1], [0], [0]>} : vector<2x8x8xbf16>, vector<2x8x8xbf16>, vector<2x8x8xf32> -> vector<2x8x8xf32>
    "tpu.trace_stop"() : () -> ()
    %cst_289 = arith.constant 0.353553385 : f32
    %841 = vector.broadcast %cst_289 : f32 to vector<2x8x8xf32>
    %842 = arith.mulf %840, %841 : vector<2x8x8xf32>
    %843 = arith.addf %842, %10 : vector<2x8x8xf32>
    %cst_290 = arith.constant dense<0xFF800000> : vector<2x8xf32>
    %844 = vector.multi_reduction <maximumf>, %843, %cst_290 [2] : vector<2x8x8xf32> to vector<2x8xf32>
    %845 = vector.shape_cast %844 : vector<2x8xf32> to vector<2x8x1xf32>
    %846 = vector.broadcast %845 : vector<2x8x1xf32> to vector<2x8x8xf32>
    %847 = arith.subf %843, %846 : vector<2x8x8xf32>
    %848 = math.exp %847 : vector<2x8x8xf32>
    %cst_291 = arith.constant dense<0.000000e+00> : vector<2x8xf32>
    %849 = vector.multi_reduction <add>, %848, %cst_291 [2] : vector<2x8x8xf32> to vector<2x8xf32>
    %850 = vector.shape_cast %849 : vector<2x8xf32> to vector<2x8x1xf32>
    %851 = vector.broadcast %850 : vector<2x8x1xf32> to vector<2x8x8xf32>
    %852 = arith.divf %848, %851 : vector<2x8x8xf32>
    %853 = arith.truncf %852 : vector<2x8x8xf32> to vector<2x8x8xbf16>
    %854 = vector.extract_strided_slice %799 {offsets = [0, 0, 16], sizes = [2, 8, 8], strides = [1, 1, 1]} : vector<2x8x32xbf16> to vector<2x8x8xbf16>
    "tpu.trace_start"() <{level = 10 : i32, message = "bqk,bkd->bqd"}> : () -> ()
    %cst_292 = arith.constant dense<0.000000e+00> : vector<2x8x8xf32>
    %855 = tpu.matmul %853, %854, %cst_292 {dimension_numbers = #tpu.dot_dimension_numbers<[2], [1], [1], [2], [0, 0, 0, 1, 1, 2], [0], [0]>} : vector<2x8x8xbf16>, vector<2x8x8xbf16>, vector<2x8x8xf32> -> vector<2x8x8xf32>
    "tpu.trace_stop"() : () -> ()
    %856 = vector.shape_cast %855 : vector<2x8x8xf32> to vector<16x8xf32>
    %857 = vector.extract_strided_slice %795 {offsets = [0, 0, 24], sizes = [2, 8, 8], strides = [1, 1, 1]} : vector<2x8x32xbf16> to vector<2x8x8xbf16>
    %858 = vector.extract_strided_slice %797 {offsets = [0, 0, 24], sizes = [2, 8, 8], strides = [1, 1, 1]} : vector<2x8x32xbf16> to vector<2x8x8xbf16>
    "tpu.trace_start"() <{level = 10 : i32, message = "bqd,bkd->bqk"}> : () -> ()
    %cst_293 = arith.constant dense<0.000000e+00> : vector<2x8x8xf32>
    %859 = tpu.matmul %857, %858, %cst_293 {dimension_numbers = #tpu.dot_dimension_numbers<[2], [2], [1], [1], [0, 0, 0, 1, 1, 1], [0], [0]>} : vector<2x8x8xbf16>, vector<2x8x8xbf16>, vector<2x8x8xf32> -> vector<2x8x8xf32>
    "tpu.trace_stop"() : () -> ()
    %cst_294 = arith.constant 0.353553385 : f32
    %860 = vector.broadcast %cst_294 : f32 to vector<2x8x8xf32>
    %861 = arith.mulf %859, %860 : vector<2x8x8xf32>
    %862 = arith.addf %861, %10 : vector<2x8x8xf32>
    %cst_295 = arith.constant dense<0xFF800000> : vector<2x8xf32>
    %863 = vector.multi_reduction <maximumf>, %862, %cst_295 [2] : vector<2x8x8xf32> to vector<2x8xf32>
    %864 = vector.shape_cast %863 : vector<2x8xf32> to vector<2x8x1xf32>
    %865 = vector.broadcast %864 : vector<2x8x1xf32> to vector<2x8x8xf32>
    %866 = arith.subf %862, %865 : vector<2x8x8xf32>
    %867 = math.exp %866 : vector<2x8x8xf32>
    %cst_296 = arith.constant dense<0.000000e+00> : vector<2x8xf32>
    %868 = vector.multi_reduction <add>, %867, %cst_296 [2] : vector<2x8x8xf32> to vector<2x8xf32>
    %869 = vector.shape_cast %868 : vector<2x8xf32> to vector<2x8x1xf32>
    %870 = vector.broadcast %869 : vector<2x8x1xf32> to vector<2x8x8xf32>
    %871 = arith.divf %867, %870 : vector<2x8x8xf32>
    %872 = arith.truncf %871 : vector<2x8x8xf32> to vector<2x8x8xbf16>
    %873 = vector.extract_strided_slice %799 {offsets = [0, 0, 24], sizes = [2, 8, 8], strides = [1, 1, 1]} : vector<2x8x32xbf16> to vector<2x8x8xbf16>
    "tpu.trace_start"() <{level = 10 : i32, message = "bqk,bkd->bqd"}> : () -> ()
    %cst_297 = arith.constant dense<0.000000e+00> : vector<2x8x8xf32>
    %874 = tpu.matmul %872, %873, %cst_297 {dimension_numbers = #tpu.dot_dimension_numbers<[2], [1], [1], [2], [0, 0, 0, 1, 1, 2], [0], [0]>} : vector<2x8x8xbf16>, vector<2x8x8xbf16>, vector<2x8x8xf32> -> vector<2x8x8xf32>
    "tpu.trace_stop"() : () -> ()
    %875 = vector.shape_cast %874 : vector<2x8x8xf32> to vector<16x8xf32>
    %876 = tpu.concatenate %818, %837, %856, %875 in 1 : vector<16x8xf32>, vector<16x8xf32>, vector<16x8xf32>, vector<16x8xf32> -> vector<16x32xf32>
    %877 = arith.truncf %876 : vector<16x32xf32> to vector<16x32xbf16>
    %cst_298 = arith.constant dense<0.000000e+00> : vector<16x32xf32>
    %878 = tpu.matmul %877, %792, %cst_298 {dimension_numbers = #tpu.dot_dimension_numbers<[1], [0], [0], [1], [0, 0, 1, 1], [], []>} : vector<16x32xbf16>, vector<32x32xbf16>, vector<16x32xf32> -> vector<16x32xf32>
    %879 = vector.broadcast %793 : vector<1x32xf32> to vector<16x32xf32>
    %880 = arith.addf %878, %879 : vector<16x32xf32>
    %881 = arith.addf %773, %880 : vector<16x32xf32>
    %c8 = arith.constant 8 : index
    %c0_299 = arith.constant 0 : index
    %c0_300 = arith.constant 0 : index
    %882 = vector.load %arg10[%c8, %c0_299, %c0_300] : memref<10x1x32xf32, #tpu.memory_space<vmem>>, vector<1x1x32xf32>
    %883 = vector.shape_cast %882 : vector<1x1x32xf32> to vector<1x32xf32>
    %c8_301 = arith.constant 8 : index
    %c0_302 = arith.constant 0 : index
    %c0_303 = arith.constant 0 : index
    %884 = vector.load %arg11[%c8_301, %c0_302, %c0_303] : memref<10x1x32xf32, #tpu.memory_space<vmem>>, vector<1x1x32xf32>
    %885 = vector.shape_cast %884 : vector<1x1x32xf32> to vector<1x32xf32>
    %cst_304 = arith.constant dense<0.000000e+00> : vector<16xf32>
    %886 = vector.multi_reduction <add>, %881, %cst_304 [1] : vector<16x32xf32> to vector<16xf32>
    %887 = vector.shape_cast %886 : vector<16xf32> to vector<16x1xf32>
    %cst_305 = arith.constant 3.200000e+01 : f32
    %888 = vector.broadcast %cst_305 : f32 to vector<16x1xf32>
    %889 = arith.divf %887, %888 : vector<16x1xf32>
    %890 = vector.broadcast %889 : vector<16x1xf32> to vector<16x32xf32>
    %891 = arith.subf %881, %890 : vector<16x32xf32>
    %892 = arith.mulf %891, %891 : vector<16x32xf32>
    %cst_306 = arith.constant dense<0.000000e+00> : vector<16xf32>
    %893 = vector.multi_reduction <add>, %892, %cst_306 [1] : vector<16x32xf32> to vector<16xf32>
    %894 = vector.shape_cast %893 : vector<16xf32> to vector<16x1xf32>
    %cst_307 = arith.constant 0.0322580636 : f32
    %895 = vector.broadcast %cst_307 : f32 to vector<16x1xf32>
    %896 = arith.mulf %894, %895 : vector<16x1xf32>
    %897 = math.sqrt %896 : vector<16x1xf32>
    %cst_308 = arith.constant 9.99999997E-7 : f32
    %898 = vector.broadcast %cst_308 : f32 to vector<16x1xf32>
    %899 = arith.addf %897, %898 : vector<16x1xf32>
    %900 = vector.broadcast %899 : vector<16x1xf32> to vector<16x32xf32>
    %901 = arith.divf %891, %900 : vector<16x32xf32>
    %902 = vector.broadcast %883 : vector<1x32xf32> to vector<16x32xf32>
    %903 = arith.mulf %902, %901 : vector<16x32xf32>
    %904 = vector.broadcast %885 : vector<1x32xf32> to vector<16x32xf32>
    %905 = arith.addf %903, %904 : vector<16x32xf32>
    %c3_309 = arith.constant 3 : index
    %c0_310 = arith.constant 0 : index
    %c0_311 = arith.constant 0 : index
    %906 = vector.load %arg6[%c3_309, %c0_310, %c0_311] : memref<4x32x128xbf16, #tpu.memory_space<vmem>>, vector<1x32x128xbf16>
    %907 = vector.shape_cast %906 : vector<1x32x128xbf16> to vector<32x128xbf16>
    %c3_312 = arith.constant 3 : index
    %c0_313 = arith.constant 0 : index
    %c0_314 = arith.constant 0 : index
    %908 = vector.load %arg7[%c3_312, %c0_313, %c0_314] : memref<4x1x128xf32, #tpu.memory_space<vmem>>, vector<1x1x128xf32>
    %909 = vector.shape_cast %908 : vector<1x1x128xf32> to vector<1x128xf32>
    %c0_315 = arith.constant 0 : index
    %c96 = arith.constant 96 : index
    %910 = vector.load %arg8[%c0_315, %c96] : memref<128x128xbf16, #tpu.memory_space<vmem>>, vector<128x32xbf16>
    %c0_316 = arith.constant 0 : index
    %c96_317 = arith.constant 96 : index
    %911 = vector.load %arg9[%c0_316, %c96_317] : memref<1x128xf32, #tpu.memory_space<vmem>>, vector<1x32xf32>
    %912 = arith.truncf %905 : vector<16x32xf32> to vector<16x32xbf16>
    %cst_318 = arith.constant dense<0.000000e+00> : vector<16x128xf32>
    %913 = tpu.matmul %912, %907, %cst_318 {dimension_numbers = #tpu.dot_dimension_numbers<[1], [0], [0], [1], [0, 0, 1, 1], [], []>} : vector<16x32xbf16>, vector<32x128xbf16>, vector<16x128xf32> -> vector<16x128xf32>
    %914 = vector.broadcast %909 : vector<1x128xf32> to vector<16x128xf32>
    %915 = arith.addf %913, %914 : vector<16x128xf32>
    %cst_319 = arith.constant 0.000000e+00 : f32
    %916 = vector.broadcast %cst_319 : f32 to vector<16x128xf32>
    %917 = arith.maximumf %915, %916 : vector<16x128xf32>
    %918 = arith.truncf %917 : vector<16x128xf32> to vector<16x128xbf16>
    %cst_320 = arith.constant dense<0.000000e+00> : vector<16x32xf32>
    %919 = tpu.matmul %918, %910, %cst_320 {dimension_numbers = #tpu.dot_dimension_numbers<[1], [0], [0], [1], [0, 0, 1, 1], [], []>} : vector<16x128xbf16>, vector<128x32xbf16>, vector<16x32xf32> -> vector<16x32xf32>
    %920 = vector.broadcast %911 : vector<1x32xf32> to vector<16x32xf32>
    %921 = arith.addf %919, %920 : vector<16x32xf32>
    %922 = arith.addf %905, %921 : vector<16x32xf32>
    %c9 = arith.constant 9 : index
    %c0_321 = arith.constant 0 : index
    %c0_322 = arith.constant 0 : index
    %923 = vector.load %arg10[%c9, %c0_321, %c0_322] : memref<10x1x32xf32, #tpu.memory_space<vmem>>, vector<1x1x32xf32>
    %924 = vector.shape_cast %923 : vector<1x1x32xf32> to vector<1x32xf32>
    %c9_323 = arith.constant 9 : index
    %c0_324 = arith.constant 0 : index
    %c0_325 = arith.constant 0 : index
    %925 = vector.load %arg11[%c9_323, %c0_324, %c0_325] : memref<10x1x32xf32, #tpu.memory_space<vmem>>, vector<1x1x32xf32>
    %926 = vector.shape_cast %925 : vector<1x1x32xf32> to vector<1x32xf32>
    %cst_326 = arith.constant dense<0.000000e+00> : vector<16xf32>
    %927 = vector.multi_reduction <add>, %922, %cst_326 [1] : vector<16x32xf32> to vector<16xf32>
    %928 = vector.shape_cast %927 : vector<16xf32> to vector<16x1xf32>
    %cst_327 = arith.constant 3.200000e+01 : f32
    %929 = vector.broadcast %cst_327 : f32 to vector<16x1xf32>
    %930 = arith.divf %928, %929 : vector<16x1xf32>
    %931 = vector.broadcast %930 : vector<16x1xf32> to vector<16x32xf32>
    %932 = arith.subf %922, %931 : vector<16x32xf32>
    %933 = arith.mulf %932, %932 : vector<16x32xf32>
    %cst_328 = arith.constant dense<0.000000e+00> : vector<16xf32>
    %934 = vector.multi_reduction <add>, %933, %cst_328 [1] : vector<16x32xf32> to vector<16xf32>
    %935 = vector.shape_cast %934 : vector<16xf32> to vector<16x1xf32>
    %cst_329 = arith.constant 0.0322580636 : f32
    %936 = vector.broadcast %cst_329 : f32 to vector<16x1xf32>
    %937 = arith.mulf %935, %936 : vector<16x1xf32>
    %938 = math.sqrt %937 : vector<16x1xf32>
    %cst_330 = arith.constant 9.99999997E-7 : f32
    %939 = vector.broadcast %cst_330 : f32 to vector<16x1xf32>
    %940 = arith.addf %938, %939 : vector<16x1xf32>
    %941 = vector.broadcast %940 : vector<16x1xf32> to vector<16x32xf32>
    %942 = arith.divf %932, %941 : vector<16x32xf32>
    %943 = vector.broadcast %924 : vector<1x32xf32> to vector<16x32xf32>
    %944 = arith.mulf %943, %942 : vector<16x32xf32>
    %945 = vector.broadcast %926 : vector<1x32xf32> to vector<16x32xf32>
    %946 = arith.addf %944, %945 : vector<16x32xf32>
    %c0_331 = arith.constant 0 : index
    %c0_332 = arith.constant 0 : index
    %947 = vector.load %arg12[%c0_331, %c0_332] : memref<16x32xf32, #tpu.memory_space<vmem>>, vector<16x32xf32>
    tpu.vector_store %arg12[%c0_331, %c0_332], %946 {strides = array<i32>} : memref<16x32xf32, #tpu.memory_space<vmem>>, vector<16x32xf32>,
    %c0_333 = arith.constant 0 : index
    %c0_334 = arith.constant 0 : index
    %948 = vector.load %arg13[%c0_333, %c0_334] : memref<16x32xf32, #tpu.memory_space<vmem>>, vector<16x32xf32>
    tpu.vector_store %arg13[%c0_333, %c0_334], %346 {strides = array<i32>} : memref<16x32xf32, #tpu.memory_space<vmem>>, vector<16x32xf32>,
    return
  }
}

</mosaic_0001>

<bundles_post_ra>
// kernel: squeeze.18
= control target key start
LH: loop header
LB: loop body
LE: loop exit
PB: predicated region body
PF: predicated region fallthrough
CT: control target
= control target key end

     0   :  { %vm7_vm0 = vcmask 261120   ;;  %s37_s8 = smov 32   ;;  %s38_s9 = smov 64   ;;  %vm13_vm1 = vcmask 1048320   ;;  %vm19_vm2 = vcmask 785920   ;;  %vm25_vm3 = vcmask 523520   ;;  %s55_s0 = inlined_call_operand.vmem [shape: f32[4,32], index: 0, kind: input, shape index: {}]   ;;  %s56_s1 = inlined_call_operand.vmem [shape: f32[1,1,128], index: 1, kind: output, shape index: {}]  }
   0x1   :  { %v4_v0 = vld [vmem:[%s55_s0] sm:$0xf]  ;;  %s36_s0 = smov 96  }
   0x2   :  { %5 = vst [vmem:[#allocation1] sm:$0xf] %v4_v0 }
   0x9   :  { %v10_v1 = vld [vmem:[#allocation1 + $0x3] sm:$0x1]   ;;  %v22_v2 = vld [vmem:[#allocation1 + $0x1] sm:$0x1]   ;;  %v6_v3 = vld [vmem:[#allocation1] sm:$0x1]  }
   0xa   :  { %11 = vrot.lane.b32.xlu0 %v10_v1, %s36_s0  ;;  %23 = vrot.lane.b32.xlu1 %v22_v2, %s37_s8  ;;  %v16_v4 = vld [vmem:[#allocation1 + $0x2] sm:$0x1]   ;;  %8 = vst.msk [vmem:[#allocation0] sm:$0x1] %vm7_vm0, %v6_v3  }
   0xe   :  { %17 = vrot.lane.b32.xlu0 %v16_v4, %s38_s9 }
  0x7c   :  { %v12_v5 = vpop.permute.xlu0 %11   ;;  %v24_v6 = vpop.permute.xlu1 %23  }
  0x7d   :  { %14 = vst.msk [vmem:[#allocation0] sm:$0x1] %vm13_vm1, %v12_v5  }
  0x80   :  { %v18_v7 = vpop.permute.xlu0 %17  }
  0x81   :  { %20 = vst.msk [vmem:[#allocation0] sm:$0x1] %vm19_vm2, %v18_v7  }
  0x82   :  { %26 = vst.msk [vmem:[#allocation0] sm:$0x1] %vm25_vm3, %v24_v6  }
  0x89   :  { %v30_v8 = vld [vmem:[#allocation0] sm:$0x1] }
  0x8a   :  { %32 = vst [vmem:[%s56_s1] sm:$0x1] %v30_v8 }

// kernel: mca_ed_pallas.1
= control target key start
LH: loop header
LB: loop body
LE: loop exit
PB: predicated region body
PF: predicated region fallthrough
CT: control target
= control target key end

     0   :  { %19 = vsyncpa [#allocation3], 0  ;;  %v9766_v1 = vmov 0.0   ;;  %vm9767_vm0 = vmmov 0   ;;  %vm102_vm1 = vcmask 261120   ;;  %s11686_s0 = inlined_call_operand.vmem [shape: f32[16,32], index: 0, kind: input, shape index: {}]   ;;  %s11687_s1 = inlined_call_operand.vmem [shape: f32[16,32], index: 1, kind: input, shape index: {}]   ;;  %s11688_s2 = inlined_call_operand.vmem [shape: f32[2,1,8], index: 2, kind: input, shape index: {}]   ;;  %s11689_s3 = inlined_call_operand.vmem [shape: f32[2,1,8], index: 3, kind: input, shape index: {}]   ;;  %s11690_s4 = inlined_call_operand.vmem [shape: bf16[6,32,128], index: 4, kind: input, shape index: {}]   ;;  %s11691_s5 = inlined_call_operand.vmem [shape: f32[6,1,128], index: 5, kind: input, shape index: {}]   ;;  %s11692_s6 = inlined_call_operand.vmem [shape: bf16[4,32,128], index: 6, kind: input, shape index: {}]   ;;  %s11693_s7 = inlined_call_operand.vmem [shape: f32[4,1,128], index: 7, kind: input, shape index: {}]   ;;  %s11694_s8 = inlined_call_operand.vmem [shape: bf16[128,128], index: 8, kind: input, shape index: {}]   ;;  %s11695_s9 = inlined_call_operand.vmem [shape: f32[1,128], index: 9, kind: input, shape index: {}]   ;;  %s11696_s10 = inlined_call_operand.vmem [shape: f32[10,1,32], index: 10, kind: input, shape index: {}]   ;;  %s11697_s11 = inlined_call_operand.vmem [shape: f32[10,1,32], index: 11, kind: input, shape index: {}]   ;;  %s11698_s12 = inlined_call_operand.hbm [shape: f32[16,32], index: 12, kind: output, shape index: {0}]   ;;  %s11699_s13 = inlined_call_operand.hbm [shape: f32[16,32], index: 13, kind: output, shape index: {1}]  }
   0x1   :  { %v9859_v0 = vld [vmem:[%s11690_s4] sm:$0xff]   ;;  %8476 = vmatprep.subr.bf16.mxu1 %v9766_v1  ;;  %8502 = vmatprep.subr.bf16.mxu0 %v9766_v1  ;;  %v9867_v2 = vld [vmem:[%s11690_s4 + $0x8] sm:$0xff]  }
   0x2   :  { %8477 = vmatpush3.bf16.msra.mxu1 %v9859_v0  ;;  %8480 = vmatprep.mubr.msk.bf16.mxu1 %vm9767_vm0, %v9766_v1  ;;  %v9874_v3 = vld [vmem:[%s11687_s1] sm:$0xff]  ;;  %v9879_v4 = vld [vmem:[%s11687_s1 + $0x8] sm:$0xff] }
   0x3   :  { %8478 = vmatprep.subr.bf16.mxu1 %v9766_v1  ;;  %8504 = vmatprep.mubr.msk.bf16.mxu0 %vm9767_vm0, %v9766_v1  ;;  %v83_v5 = vpack.c.bf16 %v9879_v4, %v9874_v3 }
   0x6   :  { %8479 = vmatpush3.bf16.msra.mxu1 %v9867_v2 }
   0x7   :  { %8484 = vmatprep.subr.bf16.mxu1 %v9766_v1 }
   0x9   :  { %8481 = vmatmul.mubr.msk.bf16.vlgmr.msra.gmra.mrb[0].mxu1 %vm102_vm1, %v83_v5 }
   0xa   :  { %8486 = vmatprep.mubr.msk.bf16.mxu1 %vm9767_vm0, %v9766_v1 }
   0xb   :  { %20 = vsyncpa [#allocation5], 0  ;;  %v9894_v6 = vld [vmem:[%s11691_s5] ss:$0 sm:$0xff]  ;;  %s9768_s17 = smov 96   ;;  %vm152_vm2 = vcmask 64512  }
   0xc   :  { %v9921_v20 = vld [vmem:[%s11689_s3] ss:$0 sm:$0xff]  ;;  %v9928_v28 = vld [vmem:[%s11689_s3 + $0x1] ss:$0 sm:$0xff]  ;;  %s9769_s22 = smov 64   ;;  %s11724_s23 = smov 88  }
   0xd   :  { %vm281_vm3 = vcmask 1043456   ;;  %s11722_s24 = smov 120   ;;  %s11720_s25 = smov 56   ;;  %vm1071_vm4 = vcmask 130048   ;;  %vm1074_vm5 = vcmask 195584  }
   0xe   :  { %s11718_s26 = smov 80   ;;  %s11716_s27 = smov 112  }
   0xf   :  { %s11714_s28 = smov 48   ;;  %s11712_s29 = smov 72  }
  0x10   :  { %s11710_s30 = smov 104   ;;  %s11708_s14 = smov 40  }
  0x11   :  { %s11706_s15 = smov 32   ;;  %s11704_s1 = smov 8  }
  0x12   :  { %s11702_s16 = smov 16   ;;  %s11700_s18 = smov 24  }
  0x13   :  { %s11726_s20 = smov 40   ;;  %s11727_s21 = smov 32  }
  0x14   :  { %s11733_s19 = smov 72  }
  0xdc   :  { %v140_v7 = vpop.f32.mrb[0].mxu1 }
  0xdd   :  { %v141_v8 = vadd.f32 %v9894_v6, %v140_v7  ;;  %v8482_v9 = vpop.f32.mrb[1].mxu1 }
  0xde   :  { %v143_v10 = vpop.f32.mrb[2].mxu1 }
  0xdf   :  { %v9897_v11 = vpack.c.bf16 %v141_v8, %v141_v8  ;;  %v144_v12 = vadd.f32 %v9894_v6, %v143_v10  ;;  %v8483_v13 = vpop.f32.mrb[3].mxu1 }
  0xe1   :  { %150 = vrot.lane.b32.xlu0 %v9897_v11, %s9768_s17  ;;  %v9902_v14 = vpack.c.bf16 %v144_v12, %v144_v12 }
  0xe5   :  { %200 = vrot.lane.b32.xlu0 %v9902_v14, %s9768_s17 }
 0x153   :  { %v151_v15 = vpop.permute.xlu0 %150 }
 0x154   :  { %v157_v16 = vsel %vm152_vm2, %v151_v15, 0 }
 0x155   :  { %8485 = vmatpush3.bf16.xpose.msra.mxu1 %v157_v16 }
 0x156   :  { %8490 = vmatprep.subr.bf16.mxu1 %v9766_v1 }
 0x157   :  { %v201_v17 = vpop.permute.xlu0 %200 }
 0x158   :  { %v206_v18 = vsel %vm152_vm2, %v201_v17, 0 }
 0x15c   :  { %8487 = vmatmul.mubr.msk.bf16.vlgmr.msra.gmra.mrb[4].mxu1 %vm152_vm2, %v9897_v11 }
 0x15d   :  { %8491 = vmatpush3.bf16.xpose.msra.mxu1 %v206_v18  ;;  %8492 = vmatprep.mubr.msk.bf16.mxu1 %vm9767_vm0, %v9766_v1 }
 0x15e   :  { %8496 = vmatprep.subr.bf16.mxu1 %v9766_v1 }
 0x164   :  { %8493 = vmatmul.mubr.msk.bf16.vlgmr.msra.gmra.mrb[8].mxu1 %vm152_vm2, %v9902_v14 }
 0x165   :  { %8498 = vmatprep.mubr.msk.bf16.mxu1 %vm9767_vm0, %v9766_v1 }
 0x22f   :  { %v193_v19 = vpop.f32.mrb[4].mxu1 }
 0x230   :  { %v248_v21 = vmul.f32 0.35355338, %v193_v19  ;;  %v8488_v22 = vpop.f32.mrb[5].mxu1 }
 0x231   :  { %v196_v23 = vpop.f32.mrb[6].mxu1 }
 0x232   :  { %v8489_v24 = vpop.f32.mrb[7].mxu1  ;;  %v250_v25 = vadd.f32 %v9921_v20, %v248_v21 }
 0x234   :  { %v252_v26 = vsel %vm152_vm2, %v250_v25, -inf }
 0x235   :  { %253 = vmax.xlane.f32.xlu1 %v252_v26 }
 0x237   :  { %v242_v27 = vpop.f32.mrb[8].mxu1 }
 0x238   :  { %v249_v29 = vmul.f32 0.35355338, %v242_v27  ;;  %v8494_v30 = vpop.f32.mrb[9].mxu1 }
 0x239   :  { %v245_v31 = vpop.f32.mrb[10].mxu1 }
 0x23a   :  { %v8495_v32 = vpop.f32.mrb[11].mxu1  ;;  %v251_v33 = vadd.f32 %v9928_v28, %v249_v29 }
 0x23c   :  { %v255_v34 = vsel %vm152_vm2, %v251_v33, -inf }
 0x23d   :  { %256 = vmax.xlane.f32.xlu1 %v255_v34 }
 0x24e   :  { %276 = vrot.lane.b32.xlu1 %v9897_v11, %s9769_s22 }
 0x252   :  { %325 = vrot.lane.b32.xlu1 %v9902_v14, %s9769_s22 }
 0x256   :  { %375 = vrot.lane.b32.xlu1 %v9897_v11, %s11724_s23 }
 0x2c2   :  { %v254_v35 = vpop.xlane.xlu1 %253 }
 0x2c3   :  { %v258_v36 = vsub.f32 %v250_v25, %v254_v35 }
 0x2c5   :  { %v260_v37 = vmul.f32 1.442695, %v258_v36 }
 0x2c7   :  { %9438 = vpow2.f32 %v260_v37 }
 0x2ca   :  { %v257_v38 = vpop.xlane.xlu1 %256 }
 0x2cb   :  { %v259_v39 = vsub.f32 %v251_v33, %v257_v38 }
 0x2cd   :  { %v262_v40 = vmul.f32 1.442695, %v259_v39 }
 0x2ce   :  { %v277_v41 = vpop.permute.xlu1 %276 }
 0x2cf   :  { %9440 = vpow2.f32 %v262_v40  ;;  %v283_v42 = vsel %vm281_vm3, %v277_v41, 0 }
 0x2d0   :  { %8497 = vmatpush3.bf16.msra.mxu1 %v283_v42 }
 0x2d1   :  { %v9439_v43 = vpop.eup %9438  ;;  %8508 = vmatprep.subr.bf16.mxu1 %v9766_v1 }
 0x2d2   :  { %v326_v44 = vpop.permute.xlu1 %325  ;;  %v264_v45 = vsel %vm152_vm2, %v9439_v43, 0.0 }
 0x2d3   :  { %265 = vadd.xlane.f32.xlu0 %v264_v45  ;;  %v331_v46 = vsel %vm281_vm3, %v326_v44, 0 }
 0x2d4   :  { %8503 = vmatpush3.bf16.msra.mxu0 %v331_v46 }
 0x2d5   :  { %8514 = vmatprep.subr.bf16.mxu0 %v9766_v1 }
 0x2d6   :  { %v376_v50 = vpop.permute.xlu1 %375 }
 0x2d7   :  { %v381_v55 = vsel %vm152_vm2, %v376_v50, 0 }
 0x2d9   :  { %v9441_v47 = vpop.eup %9440 }
 0x2da   :  { %v267_v48 = vsel %vm152_vm2, %v9441_v47, 0.0 }
 0x2db   :  { %268 = vadd.xlane.f32.xlu1 %v267_v48 }
 0x2e9   :  { %373 = vrot.lane.b32.xlu0 %v9897_v11, %s11722_s24 }
 0x2ec   :  { %425 = vrot.lane.b32.xlu1 %v9902_v14, %s11724_s23 }
 0x2f0   :  { %423 = vrot.lane.b32.xlu1 %v9902_v14, %s11722_s24 }
 0x360   :  { %v266_v49 = vpop.xlane.xlu0 %265 }
 0x361   :  { %9442 = vrcp.f32 %v266_v49 }
 0x364   :  { %v374_v60 = vpop.permute.xlu0 %373 }
 0x368   :  { %v269_v51 = vpop.xlane.xlu1 %268 }
 0x369   :  { %9444 = vrcp.f32 %v269_v51 }
 0x36b   :  { %v9443_v52 = vpop.eup %9442 }
 0x36c   :  { %v271_v53 = vmul.f32 %v9443_v52, %v9439_v43  ;;  %v426_v58 = vpop.permute.xlu1 %425 }
 0x36d   :  { %v431_v61 = vsel %vm152_vm2, %v426_v58, 0 }
 0x36e   :  { %v274_v54 = vpack.c.bf16 %v271_v53, %v271_v53 }
 0x370   :  { %8499 = vmatmul.mubr.msk.bf16.vlgmr.msra.gmra.mrb[12].mxu1 %vm152_vm2, %v274_v54  ;;  %v424_v62 = vpop.permute.xlu1 %423 }
 0x371   :  { %8509 = vmatpush3.bf16.xpose.msra.mxu1 %v381_v55  ;;  %8510 = vmatprep.mubr.msk.bf16.mxu1 %vm9767_vm0, %v9766_v1 }
 0x372   :  { %8520 = vmatprep.subr.bf16.mxu1 %v9766_v1 }
 0x373   :  { %v9445_v56 = vpop.eup %9444 }
 0x374   :  { %v273_v57 = vmul.f32 %v9445_v56, %v9441_v47 }
 0x376   :  { %v275_v59 = vpack.c.bf16 %v273_v57, %v273_v57 }
 0x378   :  { %8505 = vmatmul.mubr.msk.bf16.vlgmr.msra.gmra.mrb[0].mxu0 %vm152_vm2, %v275_v59  ;;  %8511 = vmatmul.mubr.msk.bf16.vlgmr.msra.gmra.mrb[16].mxu1 %vm152_vm2, %v374_v60 }
 0x379   :  { %8515 = vmatpush3.bf16.xpose.msra.mxu0 %v431_v61  ;;  %8516 = vmatprep.mubr.msk.bf16.mxu0 %vm9767_vm0, %v9766_v1 }
 0x37a   :  { %8526 = vmatprep.subr.bf16.mxu0 %v9766_v1  ;;  %8522 = vmatprep.mubr.msk.bf16.mxu1 %vm9767_vm0, %v9766_v1 }
 0x380   :  { %8517 = vmatmul.mubr.msk.bf16.vlgmr.msra.gmra.mrb[4].mxu0 %vm152_vm2, %v424_v62 }
 0x381   :  { %8528 = vmatprep.mubr.msk.bf16.mxu0 %vm9767_vm0, %v9766_v1 }
 0x443   :  { %v9966_v63 = vpop.f32.mrb[12].mxu1 }
 0x444   :  { %v8500_v5 = vpop.f32.mrb[13].mxu1 }
 0x445   :  { %v322_v7 = vpop.f32.mrb[14].mxu1 }
 0x446   :  { %v8501_v8 = vpop.f32.mrb[15].mxu1 }
 0x44b   :  { %v9968_v9 = vpop.f32.mrb[0].mxu0  ;;  %v417_v10 = vpop.f32.mrb[16].mxu1 }
 0x44c   :  { %v473_v12 = vmul.f32 0.35355338, %v417_v10  ;;  %v8506_v13 = vpop.f32.mrb[1].mxu0  ;;  %v8512_v15 = vpop.f32.mrb[17].mxu1 }
 0x44d   :  { %v370_v16 = vpop.f32.mrb[2].mxu0  ;;  %v420_v17 = vpop.f32.mrb[18].mxu1 }
 0x44e   :  { %v8507_v18 = vpop.f32.mrb[3].mxu0  ;;  %v8513_v19 = vpop.f32.mrb[19].mxu1  ;;  %v475_v21 = vadd.f32 %v9921_v20, %v473_v12 }
 0x450   :  { %v477_v22 = vsel %vm152_vm2, %v475_v21, -inf }
 0x451   :  { %478 = vmax.xlane.f32.xlu1 %v477_v22 }
 0x453   :  { %v467_v23 = vpop.f32.mrb[4].mxu0 }
 0x454   :  { %v474_v24 = vmul.f32 0.35355338, %v467_v23  ;;  %v8518_v25 = vpop.f32.mrb[5].mxu0 }
 0x455   :  { %v470_v26 = vpop.f32.mrb[6].mxu0 }
 0x456   :  { %v8519_v27 = vpop.f32.mrb[7].mxu0  ;;  %v476_v29 = vadd.f32 %v9928_v28, %v474_v24 }
 0x458   :  { %v480_v30 = vsel %vm152_vm2, %v476_v29, -inf }
 0x459   :  { %481 = vmax.xlane.f32.xlu0 %v480_v30 }
 0x462   :  { %501 = vrot.lane.b32.xlu1 %v9897_v11, %s11720_s25 }
 0x466   :  { %599 = vrot.lane.b32.xlu1 %v9897_v11, %s11718_s26 }
 0x46f   :  { %549 = vrot.lane.b32.xlu0 %v9902_v14, %s11720_s25 }
 0x473   :  { %597 = vrot.lane.b32.xlu0 %v9897_v11, %s11716_s27 }
 0x4de   :  { %v479_v31 = vpop.xlane.xlu1 %478 }
 0x4df   :  { %v483_v32 = vsub.f32 %v475_v21, %v479_v31 }
 0x4e1   :  { %v485_v33 = vmul.f32 1.442695, %v483_v32 }
 0x4e2   :  { %v502_v34 = vpop.permute.xlu1 %501 }
 0x4e3   :  { %9446 = vpow2.f32 %v485_v33  ;;  %v507_v35 = vsel %vm281_vm3, %v502_v34, 0 }
 0x4e4   :  { %8521 = vmatpush3.bf16.msra.mxu1 %v507_v35 }
 0x4e5   :  { %8532 = vmatprep.subr.bf16.mxu1 %v9766_v1 }
 0x4e6   :  { %v482_v36 = vpop.xlane.xlu0 %481  ;;  %v600_v45 = vpop.permute.xlu1 %599 }
 0x4e7   :  { %v484_v37 = vsub.f32 %v476_v29, %v482_v36  ;;  %v605_v51 = vsel %vm152_vm2, %v600_v45, 0 }
 0x4e9   :  { %v487_v38 = vmul.f32 1.442695, %v484_v37 }
 0x4ea   :  { %v550_v39 = vpop.permute.xlu0 %549 }
 0x4eb   :  { %9448 = vpow2.f32 %v487_v38  ;;  %v555_v40 = vsel %vm281_vm3, %v550_v39, 0 }
 0x4ec   :  { %8527 = vmatpush3.bf16.msra.mxu0 %v555_v40 }
 0x4ed   :  { %v9447_v41 = vpop.eup %9446  ;;  %8538 = vmatprep.subr.bf16.mxu0 %v9766_v1 }
 0x4ee   :  { %v489_v42 = vsel %vm152_vm2, %v9447_v41, 0.0  ;;  %v598_v56 = vpop.permute.xlu0 %597 }
 0x4ef   :  { %490 = vadd.xlane.f32.xlu1 %v489_v42 }
 0x4f5   :  { %v9449_v43 = vpop.eup %9448 }
 0x4f6   :  { %v492_v44 = vsel %vm152_vm2, %v9449_v43, 0.0 }
 0x4f7   :  { %493 = vadd.xlane.f32.xlu1 %v492_v44 }
 0x508   :  { %649 = vrot.lane.b32.xlu1 %v9902_v14, %s11718_s26 }
 0x50c   :  { %647 = vrot.lane.b32.xlu1 %v9902_v14, %s11716_s27 }
 0x57c   :  { %v491_v46 = vpop.xlane.xlu1 %490 }
 0x57d   :  { %9450 = vrcp.f32 %v491_v46 }
 0x584   :  { %v494_v47 = vpop.xlane.xlu1 %493 }
 0x585   :  { %9452 = vrcp.f32 %v494_v47 }
 0x587   :  { %v9451_v48 = vpop.eup %9450 }
 0x588   :  { %v496_v49 = vmul.f32 %v9451_v48, %v9447_v41  ;;  %v650_v54 = vpop.permute.xlu1 %649 }
 0x589   :  { %v655_v57 = vsel %vm152_vm2, %v650_v54, 0 }
 0x58a   :  { %v499_v50 = vpack.c.bf16 %v496_v49, %v496_v49 }
 0x58c   :  { %8523 = vmatmul.mubr.msk.bf16.vlgmr.msra.gmra.mrb[20].mxu1 %vm152_vm2, %v499_v50  ;;  %v648_v58 = vpop.permute.xlu1 %647 }
 0x58d   :  { %8533 = vmatpush3.bf16.xpose.msra.mxu1 %v605_v51  ;;  %8534 = vmatprep.mubr.msk.bf16.mxu1 %vm9767_vm0, %v9766_v1 }
 0x58e   :  { %8544 = vmatprep.subr.bf16.mxu1 %v9766_v1 }
 0x58f   :  { %v9453_v52 = vpop.eup %9452 }
 0x590   :  { %v498_v53 = vmul.f32 %v9453_v52, %v9449_v43 }
 0x592   :  { %v500_v55 = vpack.c.bf16 %v498_v53, %v498_v53 }
 0x594   :  { %8529 = vmatmul.mubr.msk.bf16.vlgmr.msra.gmra.mrb[8].mxu0 %vm152_vm2, %v500_v55  ;;  %8535 = vmatmul.mubr.msk.bf16.vlgmr.msra.gmra.mrb[24].mxu1 %vm152_vm2, %v598_v56 }
 0x595   :  { %8539 = vmatpush3.bf16.xpose.msra.mxu0 %v655_v57  ;;  %8540 = vmatprep.mubr.msk.bf16.mxu0 %vm9767_vm0, %v9766_v1 }
 0x596   :  { %8550 = vmatprep.subr.bf16.mxu0 %v9766_v1  ;;  %8546 = vmatprep.mubr.msk.bf16.mxu1 %vm9767_vm0, %v9766_v1 }
 0x59c   :  { %8541 = vmatmul.mubr.msk.bf16.vlgmr.msra.gmra.mrb[12].mxu0 %vm152_vm2, %v648_v58 }
 0x59d   :  { %8552 = vmatprep.mubr.msk.bf16.mxu0 %vm9767_vm0, %v9766_v1 }
 0x65f   :  { %v10008_v59 = vpop.f32.mrb[20].mxu1 }
 0x660   :  { %v8524_v60 = vpop.f32.mrb[21].mxu1 }
 0x661   :  { %v546_v61 = vpop.f32.mrb[22].mxu1 }
 0x662   :  { %v8525_v62 = vpop.f32.mrb[23].mxu1 }
 0x667   :  { %v10010_v5 = vpop.f32.mrb[8].mxu0  ;;  %v641_v7 = vpop.f32.mrb[24].mxu1 }
 0x668   :  { %v9296_v8 = vpack.i.bf16 %v10010_v5, %v10008_v59  ;;  %v697_v10 = vmul.f32 0.35355338, %v641_v7  ;;  %v8530_v12 = vpop.f32.mrb[9].mxu0  ;;  %v8536_v13 = vpop.f32.mrb[25].mxu1 }
 0x669   :  { %v594_v15 = vpop.f32.mrb[10].mxu0  ;;  %v644_v16 = vpop.f32.mrb[26].mxu1 }
 0x66a   :  { %v8531_v17 = vpop.f32.mrb[11].mxu0  ;;  %v8537_v18 = vpop.f32.mrb[27].mxu1  ;;  %v699_v19 = vadd.f32 %v9921_v20, %v697_v10 }
 0x66c   :  { %v701_v21 = vsel %vm152_vm2, %v699_v19, -inf }
 0x66d   :  { %702 = vmax.xlane.f32.xlu0 %v701_v21 }
 0x66f   :  { %v691_v22 = vpop.f32.mrb[12].mxu0 }
 0x670   :  { %v698_v23 = vmul.f32 0.35355338, %v691_v22  ;;  %v8542_v24 = vpop.f32.mrb[13].mxu0 }
 0x671   :  { %v694_v25 = vpop.f32.mrb[14].mxu0 }
 0x672   :  { %v8543_v26 = vpop.f32.mrb[15].mxu0  ;;  %v700_v27 = vadd.f32 %v9928_v28, %v698_v23 }
 0x674   :  { %v704_v29 = vsel %vm152_vm2, %v700_v27, -inf }
 0x675   :  { %705 = vmax.xlane.f32.xlu1 %v704_v29 }
 0x686   :  { %725 = vrot.lane.b32.xlu1 %v9897_v11, %s11714_s28 }
 0x68a   :  { %823 = vrot.lane.b32.xlu1 %v9897_v11, %s11712_s29 }
 0x68e   :  { %873 = vrot.lane.b32.xlu1 %v9902_v14, %s11712_s29 }
 0x692   :  { %871 = vrot.lane.b32.xlu1 %v9902_v14, %s11710_s30 }
 0x6fa   :  { %v703_v30 = vpop.xlane.xlu0 %702 }
 0x6fb   :  { %v707_v31 = vsub.f32 %v699_v19, %v703_v30 }
 0x6fd   :  { %v709_v32 = vmul.f32 1.442695, %v707_v31 }
 0x6ff   :  { %9454 = vpow2.f32 %v709_v32 }
 0x702   :  { %v706_v33 = vpop.xlane.xlu1 %705 }
 0x703   :  { %v708_v34 = vsub.f32 %v700_v27, %v706_v33 }
 0x705   :  { %v711_v35 = vmul.f32 1.442695, %v708_v34 }
 0x706   :  { %v726_v36 = vpop.permute.xlu1 %725 }
 0x707   :  { %9456 = vpow2.f32 %v711_v35  ;;  %v731_v37 = vsel %vm281_vm3, %v726_v36, 0 }
 0x708   :  { %8545 = vmatpush3.bf16.msra.mxu1 %v731_v37 }
 0x709   :  { %v9455_v38 = vpop.eup %9454  ;;  %8556 = vmatprep.subr.bf16.mxu1 %v9766_v1 }
 0x70a   :  { %v713_v39 = vsel %vm152_vm2, %v9455_v38, 0.0  ;;  %v824_v47 = vpop.permute.xlu1 %823 }
 0x70b   :  { %714 = vadd.xlane.f32.xlu0 %v713_v39  ;;  %v829_v50 = vsel %vm152_vm2, %v824_v47, 0 }
 0x70e   :  { %v874_v53 = vpop.permute.xlu1 %873 }
 0x70f   :  { %v879_v56 = vsel %vm152_vm2, %v874_v53, 0 }
 0x711   :  { %v9457_v40 = vpop.eup %9456 }
 0x712   :  { %v716_v41 = vsel %vm152_vm2, %v9457_v40, 0.0  ;;  %v872_v57 = vpop.permute.xlu1 %871 }
 0x713   :  { %717 = vadd.xlane.f32.xlu0 %v716_v41 }
 0x729   :  { %773 = vrot.lane.b32.xlu0 %v9902_v14, %s11714_s28 }
 0x72d   :  { %821 = vrot.lane.b32.xlu0 %v9897_v11, %s11710_s30 }
 0x798   :  { %v715_v42 = vpop.xlane.xlu0 %714 }
 0x799   :  { %9458 = vrcp.f32 %v715_v42 }
 0x7a0   :  { %v718_v43 = vpop.xlane.xlu0 %717 }
 0x7a1   :  { %9460 = vrcp.f32 %v718_v43 }
 0x7a3   :  { %v9459_v44 = vpop.eup %9458 }
 0x7a4   :  { %v774_v45 = vpop.permute.xlu0 %773  ;;  %v720_v46 = vmul.f32 %v9459_v44, %v9455_v38 }
 0x7a5   :  { %v779_v48 = vsel %vm281_vm3, %v774_v45, 0 }
 0x7a6   :  { %8551 = vmatpush3.bf16.msra.mxu0 %v779_v48  ;;  %v723_v49 = vpack.c.bf16 %v720_v46, %v720_v46 }
 0x7a7   :  { %8562 = vmatprep.subr.bf16.mxu0 %v9766_v1 }
 0x7a8   :  { %8547 = vmatmul.mubr.msk.bf16.vlgmr.msra.gmra.mrb[28].mxu1 %vm152_vm2, %v723_v49  ;;  %v822_v55 = vpop.permute.xlu0 %821 }
 0x7a9   :  { %8557 = vmatpush3.bf16.xpose.msra.mxu1 %v829_v50  ;;  %8558 = vmatprep.mubr.msk.bf16.mxu1 %vm9767_vm0, %v9766_v1 }
 0x7aa   :  { %8568 = vmatprep.subr.bf16.mxu1 %v9766_v1 }
 0x7ab   :  { %v9461_v51 = vpop.eup %9460 }
 0x7ac   :  { %v722_v52 = vmul.f32 %v9461_v51, %v9457_v40 }
 0x7ae   :  { %v724_v54 = vpack.c.bf16 %v722_v52, %v722_v52 }
 0x7b0   :  { %8553 = vmatmul.mubr.msk.bf16.vlgmr.msra.gmra.mrb[16].mxu0 %vm152_vm2, %v724_v54  ;;  %8559 = vmatmul.mubr.msk.bf16.vlgmr.msra.gmra.mrb[32].mxu1 %vm152_vm2, %v822_v55 }
 0x7b1   :  { %8563 = vmatpush3.bf16.xpose.msra.mxu0 %v879_v56  ;;  %8564 = vmatprep.mubr.msk.bf16.mxu0 %vm9767_vm0, %v9766_v1 }
 0x7b2   :  { %8574 = vmatprep.subr.bf16.mxu0 %v9766_v1  ;;  %8570 = vmatprep.mubr.msk.bf16.mxu1 %vm9767_vm0, %v9766_v1 }
 0x7b8   :  { %8565 = vmatmul.mubr.msk.bf16.vlgmr.msra.gmra.mrb[20].mxu0 %vm152_vm2, %v872_v57 }
 0x7b9   :  { %8576 = vmatprep.mubr.msk.bf16.mxu0 %vm9767_vm0, %v9766_v1 }
 0x87b   :  { %v767_v58 = vpop.f32.mrb[28].mxu1 }
 0x87c   :  { %v8548_v60 = vpop.f32.mrb[29].mxu1 }
 0x87d   :  { %v770_v61 = vpop.f32.mrb[30].mxu1 }
 0x87e   :  { %v8549_v62 = vpop.f32.mrb[31].mxu1 }
 0x883   :  { %v815_v7 = vpop.f32.mrb[16].mxu0  ;;  %v865_v10 = vpop.f32.mrb[32].mxu1 }
 0x884   :  { %v9301_v12 = vpack.i.bf16 %v815_v7, %v767_v58  ;;  %v921_v13 = vmul.f32 0.35355338, %v865_v10  ;;  %v8554_v15 = vpop.f32.mrb[17].mxu0  ;;  %v8560_v16 = vpop.f32.mrb[33].mxu1 }
 0x885   :  { %v818_v17 = vpop.f32.mrb[18].mxu0  ;;  %v868_v18 = vpop.f32.mrb[34].mxu1 }
 0x886   :  { %v8555_v19 = vpop.f32.mrb[19].mxu0  ;;  %v8561_v21 = vpop.f32.mrb[35].mxu1  ;;  %v923_v22 = vadd.f32 %v9921_v20, %v921_v13 }
 0x888   :  { %v925_v23 = vsel %vm152_vm2, %v923_v22, -inf }
 0x889   :  { %926 = vmax.xlane.f32.xlu0 %v925_v23 }
 0x88b   :  { %v915_v24 = vpop.f32.mrb[20].mxu0 }
 0x88c   :  { %v922_v25 = vmul.f32 0.35355338, %v915_v24  ;;  %v8566_v26 = vpop.f32.mrb[21].mxu0 }
 0x88d   :  { %v918_v27 = vpop.f32.mrb[22].mxu0 }
 0x88e   :  { %v8567_v29 = vpop.f32.mrb[23].mxu0  ;;  %v924_v30 = vadd.f32 %v9928_v28, %v922_v25 }
 0x890   :  { %v928_v31 = vsel %vm152_vm2, %v924_v30, -inf }
 0x891   :  { %929 = vmax.xlane.f32.xlu1 %v928_v31 }
 0x8a2   :  { %949 = vrot.lane.b32.xlu1 %v9897_v11, %s11708_s14 }
 0x8a6   :  { %1078 = vrot.lane.b32.xlu1 %v9859_v0, %s11706_s15 }
 0x8aa   :  { %9297 = vrot.lane.b32.xlu1 %v9296_v8, %s11704_s1  ;;  %s11728_s1 = smov 8  }
 0x916   :  { %v927_v20 = vpop.xlane.xlu0 %926 }
 0x917   :  { %v931_v32 = vsub.f32 %v923_v22, %v927_v20 }
 0x919   :  { %v933_v28 = vmul.f32 1.442695, %v931_v32 }
 0x91b   :  { %9462 = vpow2.f32 %v933_v28 }
 0x91e   :  { %v930_v33 = vpop.xlane.xlu1 %929 }
 0x91f   :  { %v932_v34 = vsub.f32 %v924_v30, %v930_v33 }
 0x921   :  { %v935_v35 = vmul.f32 1.442695, %v932_v34 }
 0x922   :  { %v950_v36 = vpop.permute.xlu1 %949 }
 0x923   :  { %9464 = vpow2.f32 %v935_v35  ;;  %v955_v11 = vsel %vm281_vm3, %v950_v36, 0 }
 0x924   :  { %8569 = vmatpush3.bf16.msra.mxu1 %v955_v11 }
 0x925   :  { %v9463_v37 = vpop.eup %9462  ;;  %8580 = vmatprep.subr.bf16.mxu1 %v9766_v1 }
 0x926   :  { %v937_v0 = vsel %vm152_vm2, %v9463_v37, 0.0 }
 0x927   :  { %938 = vadd.xlane.f32.xlu0 %v937_v0  ;;  %v9390_v0 = vld [vmem:[%s11694_s8] sm:$0xff]  }
 0x92d   :  { %v9465_v59 = vpop.eup %9464 }
 0x92e   :  { %v940_v5 = vsel %vm152_vm2, %v9465_v59, 0.0 }
 0x92f   :  { %941 = vadd.xlane.f32.xlu0 %v940_v5  ;;  %v9392_v5 = vld [vmem:[%s11694_s8 + $0x10] sm:$0xff]  }
 0x945   :  { %997 = vrot.lane.b32.xlu0 %v9902_v14, %s11708_s14  ;;  %v1079_v14 = vpop.permute.xlu1 %1078  ;;  %s11729_s14 = smov 16  }
 0x949   :  { %9302 = vrot.lane.b32.xlu0 %v9301_v12, %s11702_s16  ;;  %v9298_v57 = vpop.permute.xlu1 %9297  ;;  %s11731_s16 = smov 112  }
 0x94a   :  { %v9300_v58 = vunpack.i.h.bf16 %v9298_v57  ;;  %v9299_v60 = vunpack.i.l.bf16 %v9298_v57 }
 0x94c   :  { %v1070_v10 = vsel %vm152_vm2, %v9968_v9, %v9300_v58  ;;  %v1069_v12 = vsel %vm152_vm2, %v9966_v63, %v9299_v60 }
 0x94d   :  { %1080 = vrot.lane.b32.xlu0 %v9867_v2, %s11706_s15 }
 0x9b4   :  { %v939_v8 = vpop.xlane.xlu0 %938 }
 0x9b5   :  { %9466 = vrcp.f32 %v939_v8  ;;  %v9393_v8 = vld [vmem:[%s11694_s8 + $0x18] sm:$0xff]  }
 0x9bc   :  { %v942_v38 = vpop.xlane.xlu0 %941 }
 0x9bd   :  { %9468 = vrcp.f32 %v942_v38  ;;  %v9394_v38 = vld [vmem:[%s11694_s8 + $0x20] sm:$0xff]  }
 0x9bf   :  { %v9467_v39 = vpop.eup %9466 }
 0x9c0   :  { %v998_v40 = vpop.permute.xlu0 %997  ;;  %v944_v41 = vmul.f32 %v9467_v39, %v9463_v37  ;;  %v9389_v37 = vld [vmem:[%s11692_s6 + $0x8] sm:$0xff]  }
 0x9c1   :  { %v1003_v42 = vsel %vm281_vm3, %v998_v40, 0  ;;  %v9395_v39 = vld [vmem:[%s11694_s8 + $0x28] sm:$0xff]  }
 0x9c2   :  { %8575 = vmatpush3.bf16.msra.mxu0 %v1003_v42  ;;  %v947_v43 = vpack.c.bf16 %v944_v41, %v944_v41 }
 0x9c3   :  { %8588 = vmatprep.subr.bf16.mxu0 %v9766_v1 }
 0x9c4   :  { %8571 = vmatmul.mubr.msk.bf16.vlgmr.msra.gmra.mrb[36].mxu1 %vm152_vm2, %v947_v43  ;;  %v9303_v46 = vpop.permute.xlu0 %9302 }
 0x9c5   :  { %8581 = vmatpush3.bf16.msra.mxu1 %v1079_v14  ;;  %8584 = vmatprep.mubr.msk.bf16.mxu1 %vm9767_vm0, %v9766_v1  ;;  %v9305_v61 = vunpack.i.h.bf16 %v9303_v46  ;;  %v9304_v62 = vunpack.i.l.bf16 %v9303_v46 }
 0x9c6   :  { %8582 = vmatprep.subr.bf16.mxu1 %v9766_v1 }
 0x9c7   :  { %v9469_v2 = vpop.eup %9468  ;;  %v1073_v16 = vsel %vm1071_vm4, %v1070_v10, %v9305_v61  ;;  %v7958_v61 = vld [vmem:[%s11697_s11] ss:$0 sm:$0xff] }
 0x9c8   :  { %v946_v44 = vmul.f32 %v9469_v2, %v9465_v59  ;;  %v1081_v48 = vpop.permute.xlu0 %1080  ;;  %v9391_v59 = vld [vmem:[%s11694_s8 + $0x8] sm:$0xff]  }
 0x9c9   :  { %8583 = vmatpush3.bf16.msra.mxu1 %v1081_v48 }
 0x9ca   :  { %v948_v45 = vpack.c.bf16 %v946_v44, %v946_v44  ;;  %8596 = vmatprep.subr.bf16.mxu1 %v9766_v1 }
 0x9cc   :  { %8577 = vmatmul.mubr.msk.bf16.vlgmr.msra.gmra.mrb[24].mxu0 %vm152_vm2, %v948_v45 }
 0x9cd   :  { %8592 = vmatprep.mubr.msk.bf16.mxu0 %vm9767_vm0, %v9766_v1 }
 0xa97   :  { %v991_v47 = vpop.f32.mrb[36].mxu1 }
 0xa98   :  { %v8572_v49 = vpop.f32.mrb[37].mxu1 }
 0xa99   :  { %v994_v50 = vpop.f32.mrb[38].mxu1 }
 0xa9a   :  { %v8573_v51 = vpop.f32.mrb[39].mxu1 }
 0xa9f   :  { %v1039_v52 = vpop.f32.mrb[24].mxu0 }
 0xaa0   :  { %v9306_v53 = vpack.i.bf16 %v1039_v52, %v991_v47  ;;  %v8578_v54 = vpop.f32.mrb[25].mxu0 }
 0xaa1   :  { %v1042_v55 = vpop.f32.mrb[26].mxu0 }
 0xaa2   :  { %v8579_v56 = vpop.f32.mrb[27].mxu0  ;;  %9307 = vrot.lane.b32.xlu1 %v9306_v53, %s11700_s18  ;;  %s11734_s18 = smov 104  }
 0xaa3   :  { %v7957_v56 = vld [vmem:[%s11696_s10] ss:$0 sm:$0xff] }
 0xaa6   :  { %1084 = vrot.lane.b32.xlu1 %v9894_v6, %s11706_s15  ;;  %v1072_v6 = vsel %vm1071_vm4, %v1069_v12, %v9304_v62  ;;  %s11730_s15 = smov 24  }
 0xb14   :  { %v9308_v7 = vpop.permute.xlu1 %9307 }
 0xb15   :  { %v9310_v13 = vunpack.i.h.bf16 %v9308_v7  ;;  %v9309_v15 = vunpack.i.l.bf16 %v9308_v7 }
 0xb17   :  { %v1076_v17 = vsel %vm1074_vm5, %v1073_v16, %v9310_v13  ;;  %v1075_v18 = vsel %vm1074_vm5, %v1072_v6, %v9309_v15  ;;  %v9396_v13 = vld [vmem:[%s11694_s8 + $0x30] sm:$0xff]   ;;  %v9397_v15 = vld [vmem:[%s11694_s8 + $0x38] sm:$0xff]   ;;  %v7959_v16 = vld [vmem:[%s11693_s7] ss:$0 sm:$0xff] }
 0xb18   :  { %v1077_v19 = vpack.c.bf16 %v1076_v17, %v1075_v18  ;;  %v1085_v9 = vpop.permute.xlu1 %1084 }
 0xb1a   :  { %8585 = vmatmul.mubr.msk.bf16.vlgmr.msra.gmra.mrb[40].mxu1 %vm102_vm1, %v1077_v19 }
 0xb1b   :  { %8612 = vmatprep.mubr.msk.bf16.mxu1 %vm9767_vm0, %v9766_v1  ;;  %8597 = vmatpush3.bf16.msra.mxu1 %v9390_v0 }
 0xb1c   :  { %8598 = vmatprep.subr.bf16.mxu1 %v9766_v1 }
 0xb1f   :  { %8599 = vmatpush3.bf16.msra.mxu1 %v9391_v59 }
 0xb20   :  { %8600 = vmatprep.subr.bf16.mxu1 %v9766_v1 }
 0xb23   :  { %8601 = vmatpush3.bf16.msra.mxu1 %v9392_v5 }
 0xb24   :  { %8602 = vmatprep.subr.bf16.mxu1 %v9766_v1 }
 0xb27   :  { %8603 = vmatpush3.bf16.msra.mxu1 %v9393_v8  ;;  %v10167_v8 = vld [vmem:[%s11690_s4 + $0x10] sm:$0xff]  }
 0xb28   :  { %8604 = vmatprep.subr.bf16.mxu1 %v9766_v1 }
 0xb2b   :  { %8605 = vmatpush3.bf16.msra.mxu1 %v9394_v38  ;;  %v10173_v38 = vld [vmem:[%s11690_s4 + $0x18] sm:$0xff]  }
 0xb2c   :  { %8606 = vmatprep.subr.bf16.mxu1 %v9766_v1 }
 0xb2f   :  { %8607 = vmatpush3.bf16.msra.mxu1 %v9395_v39 }
 0xb30   :  { %8608 = vmatprep.subr.bf16.mxu1 %v9766_v1 }
 0xb33   :  { %8609 = vmatpush3.bf16.msra.mxu1 %v9396_v13 }
 0xb34   :  { %8610 = vmatprep.subr.bf16.mxu1 %v9766_v1 }
 0xb37   :  { %8611 = vmatpush3.bf16.msra.mxu1 %v9397_v15 }
 0xb38   :  { %8642 = vmatprep.subr.bf16.mxu1 %v9766_v1 }
 0xbed   :  { %v1124_v21 = vpop.f32.mrb[40].mxu1 }
 0xbee   :  { %v1125_v22 = vadd.f32 %v1124_v21, %v1085_v9  ;;  %v8586_v63 = vpop.f32.mrb[41].mxu1 }
 0xbef   :  { %v1127_v23 = vpop.f32.mrb[42].mxu1 }
 0xbf0   :  { %v1128_v24 = vadd.f32 %v1127_v23, %v1085_v9  ;;  %v8587_v25 = vpop.f32.mrb[43].mxu1  ;;  %v1131_v26 = vadd.f32 %v1125_v22, %v9874_v3 }
 0xbf2   :  { %v1135_v27 = vsel %vm102_vm1, %v1131_v26, 0.0  ;;  %v1132_v29 = vadd.f32 %v1128_v24, %v9879_v4  ;;  %v9388_v4 = vld [vmem:[%s11692_s6] sm:$0xff]  }
 0xbf3   :  { %1136 = vadd.xlane.f32.xlu0 %v1135_v27  ;;  %8589 = vmatpush3.bf16.msra.mxu0 %v9388_v4  ;;  %v7963_v24 = vld [vmem:[%s11695_s9] ss:$0 sm:$0xff] }
 0xbf4   :  { %v1138_v30 = vsel %vm102_vm1, %v1132_v29, 0.0  ;;  %8590 = vmatprep.subr.bf16.mxu0 %v9766_v1 }
 0xbf5   :  { %1139 = vadd.xlane.f32.xlu1 %v1138_v30 }
 0xbf7   :  { %8591 = vmatpush3.bf16.msra.mxu0 %v9389_v37 }
 0xbf8   :  { %8616 = vmatprep.subr.bf16.mxu0 %v9766_v1 }
 0xc80   :  { %v1137_v31 = vpop.xlane.xlu0 %1136 }
 0xc81   :  { %v1142_v20 = vmul.f32 0.03125, %v1137_v31 }
 0xc82   :  { %v1140_v32 = vpop.xlane.xlu1 %1139 }
 0xc83   :  { %v1144_v28 = vsub.f32 %v1131_v26, %v1142_v20  ;;  %v1143_v33 = vmul.f32 0.03125, %v1140_v32 }
 0xc85   :  { %v1145_v34 = vsub.f32 %v1132_v29, %v1143_v33  ;;  %v1146_v35 = vmul.f32 %v1144_v28, %v1144_v28 }
 0xc87   :  { %v1148_v36 = vsel %vm102_vm1, %v1146_v35, 0.0  ;;  %v1147_v11 = vmul.f32 %v1145_v34, %v1145_v34 }
 0xc88   :  { %1149 = vadd.xlane.f32.xlu0 %v1148_v36 }
 0xc89   :  { %v1151_v3 = vsel %vm102_vm1, %v1147_v11, 0.0 }
 0xc8c   :  { %1152 = vadd.xlane.f32.xlu0 %v1151_v3 }
 0xd15   :  { %v1150_v40 = vpop.xlane.xlu0 %1149 }
 0xd16   :  { %v1154_v41 = vmul.f32 0.032258064, %v1150_v40 }
 0xd18   :  { %9470 = vrsqrt.f32 %v1154_v41  ;;  %vm1158_vm6 = vcmp.eq.f32.partialorder %v1154_v41, inf  ;;  %v1161_v44 = vand.u32 2147483648, %v1154_v41  ;;  %vm1160_vm7 = vcmp.eq.f32.partialorder %v1154_v41, 0.0 }
 0xd19   :  { %v1153_v42 = vpop.xlane.xlu0 %1152 }
 0xd1a   :  { %v1155_v43 = vmul.f32 0.032258064, %v1153_v42 }
 0xd1c   :  { %9472 = vrsqrt.f32 %v1155_v43  ;;  %vm1165_vm8 = vcmp.eq.f32.partialorder %v1155_v43, inf  ;;  %v1168_v50 = vand.u32 2147483648, %v1155_v43  ;;  %vm1167_vm9 = vcmp.eq.f32.partialorder %v1155_v43, 0.0 }
 0xd22   :  { %v9471_v14 = vpop.eup %9470 }
 0xd23   :  { %v1157_v2 = vmul.f32 %v9471_v14, %v1154_v41 }
 0xd25   :  { %v1159_v45 = vsel %vm1158_vm6, %v1154_v41, %v1157_v2 }
 0xd26   :  { %v9473_v46 = vpop.eup %9472  ;;  %v1162_v47 = vsel %vm1160_vm7, %v1161_v44, %v1159_v45 }
 0xd27   :  { %v1170_v48 = vadd.f32 1e-06, %v1162_v47  ;;  %v1164_v49 = vmul.f32 %v9473_v46, %v1155_v43 }
 0xd29   :  { %9474 = vrcp.f32 %v1170_v48  ;;  %v1166_v51 = vsel %vm1165_vm8, %v1155_v43, %v1164_v49 }
 0xd2a   :  { %v1169_v52 = vsel %vm1167_vm9, %v1168_v50, %v1166_v51 }
 0xd2b   :  { %v1171_v53 = vadd.f32 1e-06, %v1169_v52 }
 0xd2d   :  { %9476 = vrcp.f32 %v1171_v53 }
 0xd33   :  { %v9475_v54 = vpop.eup %9474 }
 0xd34   :  { %v1173_v55 = vmul.f32 %v9475_v54, %v1144_v28  ;;  %v7974_v54 = vld [vmem:[%s11696_s10 + $0x1] ss:$0 sm:$0xff] }
 0xd36   :  { %v1182_v60 = vmul.f32 %v7957_v56, %v1173_v55 }
 0xd37   :  { %v9477_v57 = vpop.eup %9476 }
 0xd38   :  { %v1175_v58 = vmul.f32 %v9477_v57, %v1145_v34  ;;  %v1190_v7 = vadd.f32 %v7958_v61, %v1182_v60  ;;  %v7975_v60 = vld [vmem:[%s11697_s11 + $0x1] ss:$0 sm:$0xff] }
 0xd3a   :  { %v1183_v62 = vmul.f32 %v7957_v56, %v1175_v58 }
 0xd3c   :  { %v1191_v10 = vadd.f32 %v7958_v61, %v1183_v62 }
 0xd3e   :  { %v1214_v12 = vpack.c.bf16 %v1191_v10, %v1190_v7 }
 0xd40   :  { %8593 = vmatmul.mubr.msk.bf16.vlgmr.msra.gmra.mrb[28].mxu0 %vm102_vm1, %v1214_v12  ;;  %v10196_v12 = vld [vmem:[%s11691_s5 + $0x1] ss:$0 sm:$0xff] }
 0xd41   :  { %8620 = vmatprep.mubr.msk.bf16.mxu0 %vm9767_vm0, %v9766_v1  ;;  %8617 = vmatpush3.bf16.msra.mxu0 %v10167_v8 }
 0xd42   :  { %8618 = vmatprep.subr.bf16.mxu0 %v9766_v1 }
 0xd45   :  { %8619 = vmatpush3.bf16.msra.mxu0 %v10173_v38 }
 0xd46   :  { %8624 = vmatprep.subr.bf16.mxu0 %v9766_v1 }
 0xe13   :  { %v1270_v6 = vpop.f32.mrb[28].mxu0 }
 0xe14   :  { %v1271_v17 = vadd.f32 %v7959_v16, %v1270_v6  ;;  %v8594_v18 = vpop.f32.mrb[29].mxu0 }
 0xe15   :  { %v1273_v19 = vpop.f32.mrb[30].mxu0 }
 0xe16   :  { %v1274_v9 = vadd.f32 %v7959_v16, %v1273_v19  ;;  %v8595_v21 = vpop.f32.mrb[31].mxu0  ;;  %v1277_v22 = vmax.f32 %v1271_v17, 0.0 }
 0xe18   :  { %v1278_v63 = vmax.f32 %v1274_v9, 0.0 }
 0xe1a   :  { %v1279_v23 = vpack.c.bf16 %v1278_v63, %v1277_v22 }
 0xe1c   :  { %8613 = vmatmul.mubr.bf16.vlgmr.msra.gmra.mrb[44].mxu1 %v1279_v23 }
 0xe1d   :  { %8644 = vmatprep.mubr.msk.bf16.mxu1 %vm9767_vm0, %v9766_v1 }
 0xeef   :  { %v1368_v25 = vpop.f32.mrb[44].mxu1 }
 0xef0   :  { %v1369_v26 = vadd.f32 %v7963_v24, %v1368_v25  ;;  %v8614_v27 = vpop.f32.mrb[45].mxu1 }
 0xef1   :  { %v1371_v29 = vpop.f32.mrb[46].mxu1 }
 0xef2   :  { %v1372_v30 = vadd.f32 %v7963_v24, %v1371_v29  ;;  %v8615_v31 = vpop.f32.mrb[47].mxu1  ;;  %v1375_v20 = vadd.f32 %v1369_v26, %v1190_v7 }
 0xef4   :  { %v1381_v32 = vsel %vm102_vm1, %v1375_v20, 0.0  ;;  %v1376_v28 = vadd.f32 %v1372_v30, %v1191_v10  ;;  %v10223_v30 = vld [vmem:[%s11689_s3] ss:$0 sm:$0xff] }
 0xef5   :  { %1382 = vadd.xlane.f32.xlu1 %v1381_v32 }
 0xef6   :  { %v1384_v33 = vsel %vm102_vm1, %v1376_v28, 0.0 }
 0xef7   :  { %1385 = vadd.xlane.f32.xlu0 %v1384_v33 }
 0xf82   :  { %v1383_v34 = vpop.xlane.xlu1 %1382 }
 0xf83   :  { %v1387_v35 = vmul.f32 0.03125, %v1383_v34 }
 0xf84   :  { %v1386_v36 = vpop.xlane.xlu0 %1385 }
 0xf85   :  { %v1389_v11 = vsub.f32 %v1375_v20, %v1387_v35  ;;  %v1388_v3 = vmul.f32 0.03125, %v1386_v36  ;;  %v10230_v36 = vld [vmem:[%s11689_s3 + $0x1] ss:$0 sm:$0xff] }
 0xf87   :  { %v1390_v4 = vsub.f32 %v1376_v28, %v1388_v3  ;;  %v1391_v37 = vmul.f32 %v1389_v11, %v1389_v11 }
 0xf89   :  { %v1393_v0 = vsel %vm102_vm1, %v1391_v37, 0.0  ;;  %v1392_v59 = vmul.f32 %v1390_v4, %v1390_v4 }
 0xf8a   :  { %1394 = vadd.xlane.f32.xlu1 %v1393_v0 }
 0xf8b   :  { %v1396_v5 = vsel %vm102_vm1, %v1392_v59, 0.0 }
 0xf8c   :  { %1397 = vadd.xlane.f32.xlu0 %v1396_v5 }
0x1017   :  { %v1395_v39 = vpop.xlane.xlu1 %1394 }
0x1018   :  { %v1399_v40 = vmul.f32 0.032258064, %v1395_v39 }
0x1019   :  { %v1398_v41 = vpop.xlane.xlu0 %1397 }
0x101a   :  { %9478 = vrsqrt.f32 %v1399_v40  ;;  %v1400_v42 = vmul.f32 0.032258064, %v1398_v41  ;;  %vm1403_vm10 = vcmp.eq.f32.partialorder %v1399_v40, inf  ;;  %v1406_v2 = vand.u32 2147483648, %v1399_v40 }
0x101b   :  { %vm1405_vm11 = vcmp.eq.f32.partialorder %v1399_v40, 0.0 }
0x101c   :  { %9480 = vrsqrt.f32 %v1400_v42  ;;  %vm1410_vm12 = vcmp.eq.f32.partialorder %v1400_v42, inf  ;;  %v1413_v49 = vand.u32 2147483648, %v1400_v42  ;;  %vm1412_vm13 = vcmp.eq.f32.partialorder %v1400_v42, 0.0 }
0x1024   :  { %v9479_v43 = vpop.eup %9478 }
0x1025   :  { %v1402_v14 = vmul.f32 %v9479_v43, %v1399_v40 }
0x1026   :  { %v9481_v44 = vpop.eup %9480 }
0x1027   :  { %v1404_v45 = vsel %vm1403_vm10, %v1399_v40, %v1402_v14  ;;  %v1409_v47 = vmul.f32 %v9481_v44, %v1400_v42 }
0x1028   :  { %v1407_v46 = vsel %vm1405_vm11, %v1406_v2, %v1404_v45 }
0x1029   :  { %v1415_v48 = vadd.f32 1e-06, %v1407_v46  ;;  %v1411_v50 = vsel %vm1410_vm12, %v1400_v42, %v1409_v47 }
0x102a   :  { %v1414_v51 = vsel %vm1412_vm13, %v1413_v49, %v1411_v50 }
0x102b   :  { %9482 = vrcp.f32 %v1415_v48  ;;  %v1416_v52 = vadd.f32 1e-06, %v1414_v51 }
0x102d   :  { %9484 = vrcp.f32 %v1416_v52 }
0x1035   :  { %v9483_v53 = vpop.eup %9482 }
0x1036   :  { %v1418_v55 = vmul.f32 %v9483_v53, %v1389_v11 }
0x1037   :  { %v9485_v56 = vpop.eup %9484 }
0x1038   :  { %v1420_v57 = vmul.f32 %v9485_v56, %v1390_v4  ;;  %v1427_v58 = vmul.f32 %v7974_v54, %v1418_v55 }
0x103a   :  { %v1428_v61 = vmul.f32 %v7974_v54, %v1420_v57  ;;  %v10184_v62 = vadd.f32 %v7975_v60, %v1427_v58 }
0x103c   :  { %v10186_v7 = vadd.f32 %v7975_v60, %v1428_v61 }
0x103e   :  { %v1444_v10 = vpack.c.bf16 %v10186_v7, %v10184_v62 }
0x1040   :  { %8621 = vmatmul.mubr.msk.bf16.vlgmr.msra.gmra.mrb[32].mxu0 %vm102_vm1, %v1444_v10 }
0x1041   :  { %8626 = vmatprep.mubr.msk.bf16.mxu0 %vm9767_vm0, %v9766_v1 }
0x1113   :  { %v1500_v13 = vpop.f32.mrb[32].mxu0 }
0x1114   :  { %v1501_v15 = vadd.f32 %v10196_v12, %v1500_v13  ;;  %v8622_v16 = vpop.f32.mrb[33].mxu0 }
0x1115   :  { %v1503_v6 = vpop.f32.mrb[34].mxu0 }
0x1116   :  { %v10199_v17 = vpack.c.bf16 %v1501_v15, %v1501_v15  ;;  %v1504_v18 = vadd.f32 %v10196_v12, %v1503_v6  ;;  %v8623_v19 = vpop.f32.mrb[35].mxu0 }
0x1118   :  { %v10202_v9 = vpack.c.bf16 %v1504_v18, %v1504_v18  ;;  %1510 = vrot.lane.b32.xlu1 %v10199_v17, %s9768_s17 }
0x111a   :  { %1559 = vrot.lane.b32.xlu0 %v10202_v9, %s9768_s17 }
0x118a   :  { %v1511_v21 = vpop.permute.xlu1 %1510 }
0x118b   :  { %v1516_v22 = vsel %vm152_vm2, %v1511_v21, 0 }
0x118c   :  { %8625 = vmatpush3.bf16.xpose.msra.mxu0 %v1516_v22  ;;  %v1560_v63 = vpop.permute.xlu0 %1559 }
0x118d   :  { %8630 = vmatprep.subr.bf16.mxu0 %v9766_v1  ;;  %v1565_v23 = vsel %vm152_vm2, %v1560_v63, 0 }
0x1193   :  { %8627 = vmatmul.mubr.msk.bf16.vlgmr.msra.gmra.mrb[36].mxu0 %vm152_vm2, %v10199_v17 }
0x1194   :  { %8631 = vmatpush3.bf16.xpose.msra.mxu0 %v1565_v23  ;;  %8632 = vmatprep.mubr.msk.bf16.mxu0 %vm9767_vm0, %v9766_v1 }
0x1195   :  { %8636 = vmatprep.subr.bf16.mxu0 %v9766_v1 }
0x119b   :  { %8633 = vmatmul.mubr.msk.bf16.vlgmr.msra.gmra.mrb[40].mxu0 %vm152_vm2, %v10202_v9 }
0x119c   :  { %8638 = vmatprep.mubr.msk.bf16.mxu0 %vm9767_vm0, %v9766_v1 }
0x1266   :  { %v1552_v24 = vpop.f32.mrb[36].mxu0 }
0x1267   :  { %v1607_v25 = vmul.f32 0.35355338, %v1552_v24  ;;  %v8628_v26 = vpop.f32.mrb[37].mxu0 }
0x1268   :  { %v1555_v27 = vpop.f32.mrb[38].mxu0 }
0x1269   :  { %v8629_v29 = vpop.f32.mrb[39].mxu0  ;;  %v1609_v31 = vadd.f32 %v10223_v30, %v1607_v25 }
0x126b   :  { %v1611_v20 = vsel %vm152_vm2, %v1609_v31, -inf }
0x126c   :  { %1612 = vmax.xlane.f32.xlu1 %v1611_v20 }
0x126e   :  { %v1601_v32 = vpop.f32.mrb[40].mxu0 }
0x126f   :  { %v1608_v28 = vmul.f32 0.35355338, %v1601_v32  ;;  %v8634_v33 = vpop.f32.mrb[41].mxu0 }
0x1270   :  { %v1604_v34 = vpop.f32.mrb[42].mxu0 }
0x1271   :  { %v8635_v35 = vpop.f32.mrb[43].mxu0  ;;  %v1610_v11 = vadd.f32 %v10230_v36, %v1608_v28 }
0x1273   :  { %v1614_v3 = vsel %vm152_vm2, %v1610_v11, -inf }
0x1274   :  { %1615 = vmax.xlane.f32.xlu0 %v1614_v3 }
0x127d   :  { %1635 = vrot.lane.b32.xlu1 %v10199_v17, %s9769_s22 }
0x12f9   :  { %v1613_v4 = vpop.xlane.xlu1 %1612 }
0x12fa   :  { %v1617_v37 = vsub.f32 %v1609_v31, %v1613_v4 }
0x12fc   :  { %v1619_v0 = vmul.f32 1.442695, %v1617_v37 }
0x12fd   :  { %v1636_v59 = vpop.permute.xlu1 %1635 }
0x12fe   :  { %9486 = vpow2.f32 %v1619_v0  ;;  %v1641_v5 = vsel %vm281_vm3, %v1636_v59, 0 }
0x12ff   :  { %8637 = vmatpush3.bf16.msra.mxu0 %v1641_v5 }
0x1300   :  { %8648 = vmatprep.subr.bf16.mxu0 %v9766_v1 }
0x1301   :  { %v1616_v39 = vpop.xlane.xlu0 %1615 }
0x1302   :  { %v1618_v40 = vsub.f32 %v1610_v11, %v1616_v39 }
0x1304   :  { %v1621_v41 = vmul.f32 1.442695, %v1618_v40 }
0x1306   :  { %9488 = vpow2.f32 %v1621_v41 }
0x1308   :  { %v9487_v42 = vpop.eup %9486 }
0x1309   :  { %v1623_v43 = vsel %vm152_vm2, %v9487_v42, 0.0 }
0x130a   :  { %1624 = vadd.xlane.f32.xlu1 %v1623_v43 }
0x1310   :  { %v9489_v14 = vpop.eup %9488 }
0x1311   :  { %v1626_v2 = vsel %vm152_vm2, %v9489_v14, 0.0 }
0x1312   :  { %1627 = vadd.xlane.f32.xlu0 %v1626_v2 }
0x131b   :  { %1733 = vrot.lane.b32.xlu1 %v10199_v17, %s11724_s23 }
0x131f   :  { %1783 = vrot.lane.b32.xlu1 %v10202_v9, %s11724_s23 }
0x1323   :  { %1781 = vrot.lane.b32.xlu1 %v10202_v9, %s11722_s24 }
0x1328   :  { %1683 = vrot.lane.b32.xlu0 %v10202_v9, %s9769_s22 }
0x132c   :  { %1731 = vrot.lane.b32.xlu0 %v10199_v17, %s11722_s24 }
0x1397   :  { %v1625_v44 = vpop.xlane.xlu1 %1624 }
0x1398   :  { %9490 = vrcp.f32 %v1625_v44 }
0x139b   :  { %v1734_v49 = vpop.permute.xlu1 %1733 }
0x139c   :  { %v1739_v52 = vsel %vm152_vm2, %v1734_v49, 0 }
0x139f   :  { %v1628_v45 = vpop.xlane.xlu0 %1627  ;;  %v1784_v55 = vpop.permute.xlu1 %1783 }
0x13a0   :  { %9492 = vrcp.f32 %v1628_v45  ;;  %v1789_v58 = vsel %vm152_vm2, %v1784_v55, 0 }
0x13a2   :  { %v9491_v46 = vpop.eup %9490 }
0x13a3   :  { %v1684_v47 = vpop.permute.xlu0 %1683  ;;  %v1630_v48 = vmul.f32 %v9491_v46, %v9487_v42  ;;  %v1782_v60 = vpop.permute.xlu1 %1781 }
0x13a4   :  { %v1689_v50 = vsel %vm281_vm3, %v1684_v47, 0 }
0x13a5   :  { %8643 = vmatpush3.bf16.msra.mxu1 %v1689_v50  ;;  %v1633_v51 = vpack.c.bf16 %v1630_v48, %v1630_v48 }
0x13a6   :  { %8654 = vmatprep.subr.bf16.mxu1 %v9766_v1 }
0x13a7   :  { %8639 = vmatmul.mubr.msk.bf16.vlgmr.msra.gmra.mrb[44].mxu0 %vm152_vm2, %v1633_v51  ;;  %v1732_v57 = vpop.permute.xlu0 %1731 }
0x13a8   :  { %8649 = vmatpush3.bf16.xpose.msra.mxu0 %v1739_v52  ;;  %8650 = vmatprep.mubr.msk.bf16.mxu0 %vm9767_vm0, %v9766_v1 }
0x13a9   :  { %8660 = vmatprep.subr.bf16.mxu0 %v9766_v1 }
0x13aa   :  { %v9493_v53 = vpop.eup %9492 }
0x13ab   :  { %v1632_v54 = vmul.f32 %v9493_v53, %v9489_v14 }
0x13ad   :  { %v1634_v56 = vpack.c.bf16 %v1632_v54, %v1632_v54 }
0x13af   :  { %8645 = vmatmul.mubr.msk.bf16.vlgmr.msra.gmra.mrb[48].mxu1 %vm152_vm2, %v1634_v56  ;;  %8651 = vmatmul.mubr.msk.bf16.vlgmr.msra.gmra.mrb[48].mxu0 %vm152_vm2, %v1732_v57 }
0x13b0   :  { %8655 = vmatpush3.bf16.xpose.msra.mxu1 %v1789_v58  ;;  %8656 = vmatprep.mubr.msk.bf16.mxu1 %vm9767_vm0, %v9766_v1 }
0x13b1   :  { %8666 = vmatprep.subr.bf16.mxu1 %v9766_v1  ;;  %8662 = vmatprep.mubr.msk.bf16.mxu0 %vm9767_vm0, %v9766_v1 }
0x13b7   :  { %8657 = vmatmul.mubr.msk.bf16.vlgmr.msra.gmra.mrb[52].mxu1 %vm152_vm2, %v1782_v60 }
0x13b8   :  { %8668 = vmatprep.mubr.msk.bf16.mxu1 %vm9767_vm0, %v9766_v1 }
0x147a   :  { %v10268_v61 = vpop.f32.mrb[44].mxu0 }
0x147b   :  { %v8640_v10 = vpop.f32.mrb[45].mxu0 }
0x147c   :  { %v1680_v13 = vpop.f32.mrb[46].mxu0 }
0x147d   :  { %v8641_v15 = vpop.f32.mrb[47].mxu0 }
0x1482   :  { %v10270_v16 = vpop.f32.mrb[48].mxu1  ;;  %v1775_v6 = vpop.f32.mrb[48].mxu0 }
0x1483   :  { %v1831_v18 = vmul.f32 0.35355338, %v1775_v6  ;;  %v8646_v19 = vpop.f32.mrb[49].mxu1  ;;  %v8652_v21 = vpop.f32.mrb[49].mxu0 }
0x1484   :  { %v1728_v22 = vpop.f32.mrb[50].mxu1  ;;  %v1778_v63 = vpop.f32.mrb[50].mxu0 }
0x1485   :  { %v8647_v23 = vpop.f32.mrb[51].mxu1  ;;  %v8653_v24 = vpop.f32.mrb[51].mxu0  ;;  %v1833_v25 = vadd.f32 %v10223_v30, %v1831_v18 }
0x1487   :  { %v1835_v26 = vsel %vm152_vm2, %v1833_v25, -inf }
0x1488   :  { %1836 = vmax.xlane.f32.xlu0 %v1835_v26 }
0x148a   :  { %v1825_v27 = vpop.f32.mrb[52].mxu1 }
0x148b   :  { %v1832_v29 = vmul.f32 0.35355338, %v1825_v27  ;;  %v8658_v31 = vpop.f32.mrb[53].mxu1 }
0x148c   :  { %v1828_v20 = vpop.f32.mrb[54].mxu1 }
0x148d   :  { %v8659_v32 = vpop.f32.mrb[55].mxu1  ;;  %v1834_v28 = vadd.f32 %v10230_v36, %v1832_v29 }
0x148f   :  { %v1838_v33 = vsel %vm152_vm2, %v1834_v28, -inf }
0x1490   :  { %1839 = vmax.xlane.f32.xlu1 %v1838_v33 }
0x14a1   :  { %1859 = vrot.lane.b32.xlu1 %v10199_v17, %s11720_s25 }
0x14a5   :  { %1957 = vrot.lane.b32.xlu1 %v10199_v17, %s11718_s26 }
0x14a9   :  { %2007 = vrot.lane.b32.xlu1 %v10202_v9, %s11718_s26 }
0x14ad   :  { %2005 = vrot.lane.b32.xlu1 %v10202_v9, %s11716_s27 }
0x1515   :  { %v1837_v34 = vpop.xlane.xlu0 %1836 }
0x1516   :  { %v1841_v35 = vsub.f32 %v1833_v25, %v1837_v34 }
0x1518   :  { %v1843_v11 = vmul.f32 1.442695, %v1841_v35 }
0x151a   :  { %9494 = vpow2.f32 %v1843_v11 }
0x151d   :  { %v1840_v3 = vpop.xlane.xlu1 %1839 }
0x151e   :  { %v1842_v4 = vsub.f32 %v1834_v28, %v1840_v3 }
0x1520   :  { %v1845_v37 = vmul.f32 1.442695, %v1842_v4 }
0x1521   :  { %v1860_v0 = vpop.permute.xlu1 %1859 }
0x1522   :  { %9496 = vpow2.f32 %v1845_v37  ;;  %v1865_v59 = vsel %vm281_vm3, %v1860_v0, 0 }
0x1523   :  { %8661 = vmatpush3.bf16.msra.mxu0 %v1865_v59 }
0x1524   :  { %v9495_v5 = vpop.eup %9494  ;;  %8672 = vmatprep.subr.bf16.mxu0 %v9766_v1 }
0x1525   :  { %v1847_v39 = vsel %vm152_vm2, %v9495_v5, 0.0  ;;  %v1958_v45 = vpop.permute.xlu1 %1957 }
0x1526   :  { %1848 = vadd.xlane.f32.xlu0 %v1847_v39  ;;  %v1963_v48 = vsel %vm152_vm2, %v1958_v45, 0 }
0x1529   :  { %v2008_v51 = vpop.permute.xlu1 %2007 }
0x152a   :  { %v2013_v54 = vsel %vm152_vm2, %v2008_v51, 0 }
0x152c   :  { %v9497_v40 = vpop.eup %9496 }
0x152d   :  { %v1850_v41 = vsel %vm152_vm2, %v9497_v40, 0.0  ;;  %v2006_v55 = vpop.permute.xlu1 %2005 }
0x152e   :  { %1851 = vadd.xlane.f32.xlu0 %v1850_v41 }
0x1544   :  { %1907 = vrot.lane.b32.xlu0 %v10202_v9, %s11720_s25 }
0x1548   :  { %1955 = vrot.lane.b32.xlu0 %v10199_v17, %s11716_s27  ;;  %s11737_s27 = smov 56  }
0x15b3   :  { %v1849_v42 = vpop.xlane.xlu0 %1848 }
0x15b4   :  { %9498 = vrcp.f32 %v1849_v42 }
0x15bb   :  { %v1852_v43 = vpop.xlane.xlu0 %1851 }
0x15bc   :  { %9500 = vrcp.f32 %v1852_v43 }
0x15be   :  { %v9499_v14 = vpop.eup %9498 }
0x15bf   :  { %v1908_v2 = vpop.permute.xlu0 %1907  ;;  %v1854_v44 = vmul.f32 %v9499_v14, %v9495_v5 }
0x15c0   :  { %v1913_v46 = vsel %vm281_vm3, %v1908_v2, 0 }
0x15c1   :  { %8667 = vmatpush3.bf16.msra.mxu1 %v1913_v46  ;;  %v1857_v47 = vpack.c.bf16 %v1854_v44, %v1854_v44 }
0x15c2   :  { %8678 = vmatprep.subr.bf16.mxu1 %v9766_v1 }
0x15c3   :  { %8663 = vmatmul.mubr.msk.bf16.vlgmr.msra.gmra.mrb[52].mxu0 %vm152_vm2, %v1857_v47  ;;  %v1956_v53 = vpop.permute.xlu0 %1955 }
0x15c4   :  { %8673 = vmatpush3.bf16.xpose.msra.mxu0 %v1963_v48  ;;  %8674 = vmatprep.mubr.msk.bf16.mxu0 %vm9767_vm0, %v9766_v1 }
0x15c5   :  { %8684 = vmatprep.subr.bf16.mxu0 %v9766_v1 }
0x15c6   :  { %v9501_v49 = vpop.eup %9500 }
0x15c7   :  { %v1856_v50 = vmul.f32 %v9501_v49, %v9497_v40 }
0x15c9   :  { %v1858_v52 = vpack.c.bf16 %v1856_v50, %v1856_v50 }
0x15cb   :  { %8669 = vmatmul.mubr.msk.bf16.vlgmr.msra.gmra.mrb[56].mxu1 %vm152_vm2, %v1858_v52  ;;  %8675 = vmatmul.mubr.msk.bf16.vlgmr.msra.gmra.mrb[56].mxu0 %vm152_vm2, %v1956_v53 }
0x15cc   :  { %8679 = vmatpush3.bf16.xpose.msra.mxu1 %v2013_v54  ;;  %8680 = vmatprep.mubr.msk.bf16.mxu1 %vm9767_vm0, %v9766_v1 }
0x15cd   :  { %8690 = vmatprep.subr.bf16.mxu1 %v9766_v1  ;;  %8686 = vmatprep.mubr.msk.bf16.mxu0 %vm9767_vm0, %v9766_v1 }
0x15d3   :  { %8681 = vmatmul.mubr.msk.bf16.vlgmr.msra.gmra.mrb[60].mxu1 %vm152_vm2, %v2006_v55 }
0x15d4   :  { %8692 = vmatprep.mubr.msk.bf16.mxu1 %vm9767_vm0, %v9766_v1 }
0x1696   :  { %v10310_v56 = vpop.f32.mrb[52].mxu0 }
0x1697   :  { %v8664_v57 = vpop.f32.mrb[53].mxu0 }
0x1698   :  { %v1904_v58 = vpop.f32.mrb[54].mxu0 }
0x1699   :  { %v8665_v60 = vpop.f32.mrb[55].mxu0 }
0x169e   :  { %v10312_v10 = vpop.f32.mrb[56].mxu1  ;;  %v1999_v13 = vpop.f32.mrb[56].mxu0 }
0x169f   :  { %v9311_v15 = vpack.i.bf16 %v10312_v10, %v10310_v56  ;;  %v2055_v6 = vmul.f32 0.35355338, %v1999_v13  ;;  %v8670_v18 = vpop.f32.mrb[57].mxu1  ;;  %v8676_v19 = vpop.f32.mrb[57].mxu0 }
0x16a0   :  { %v1952_v21 = vpop.f32.mrb[58].mxu1  ;;  %v2002_v22 = vpop.f32.mrb[58].mxu0 }
0x16a1   :  { %v8671_v63 = vpop.f32.mrb[59].mxu1  ;;  %v8677_v23 = vpop.f32.mrb[59].mxu0  ;;  %v2057_v24 = vadd.f32 %v10223_v30, %v2055_v6 }
0x16a3   :  { %v2059_v25 = vsel %vm152_vm2, %v2057_v24, -inf }
0x16a4   :  { %2060 = vmax.xlane.f32.xlu0 %v2059_v25 }
0x16a6   :  { %v2049_v26 = vpop.f32.mrb[60].mxu1 }
0x16a7   :  { %v2056_v27 = vmul.f32 0.35355338, %v2049_v26  ;;  %v8682_v29 = vpop.f32.mrb[61].mxu1 }
0x16a8   :  { %v2052_v31 = vpop.f32.mrb[62].mxu1 }
0x16a9   :  { %v8683_v20 = vpop.f32.mrb[63].mxu1  ;;  %v2058_v32 = vadd.f32 %v10230_v36, %v2056_v27 }
0x16ab   :  { %v2062_v28 = vsel %vm152_vm2, %v2058_v32, -inf }
0x16ac   :  { %2063 = vmax.xlane.f32.xlu1 %v2062_v28 }
0x16bd   :  { %2083 = vrot.lane.b32.xlu1 %v10199_v17, %s11714_s28 }
0x16c1   :  { %2181 = vrot.lane.b32.xlu1 %v10199_v17, %s11712_s29 }
0x16c5   :  { %2231 = vrot.lane.b32.xlu1 %v10202_v9, %s11712_s29 }
0x16c9   :  { %2229 = vrot.lane.b32.xlu1 %v10202_v9, %s11710_s30 }
0x1731   :  { %v2061_v33 = vpop.xlane.xlu0 %2060 }
0x1732   :  { %v2065_v34 = vsub.f32 %v2057_v24, %v2061_v33 }
0x1734   :  { %v2067_v35 = vmul.f32 1.442695, %v2065_v34 }
0x1736   :  { %9502 = vpow2.f32 %v2067_v35 }
0x1739   :  { %v2064_v11 = vpop.xlane.xlu1 %2063 }
0x173a   :  { %v2066_v3 = vsub.f32 %v2058_v32, %v2064_v11 }
0x173c   :  { %v2069_v4 = vmul.f32 1.442695, %v2066_v3 }
0x173d   :  { %v2084_v37 = vpop.permute.xlu1 %2083 }
0x173e   :  { %9504 = vpow2.f32 %v2069_v4  ;;  %v2089_v0 = vsel %vm281_vm3, %v2084_v37, 0 }
0x173f   :  { %8685 = vmatpush3.bf16.msra.mxu0 %v2089_v0 }
0x1740   :  { %v9503_v59 = vpop.eup %9502  ;;  %8696 = vmatprep.subr.bf16.mxu0 %v9766_v1 }
0x1741   :  { %v2071_v5 = vsel %vm152_vm2, %v9503_v59, 0.0  ;;  %v2182_v44 = vpop.permute.xlu1 %2181 }
0x1742   :  { %2072 = vadd.xlane.f32.xlu0 %v2071_v5  ;;  %v2187_v47 = vsel %vm152_vm2, %v2182_v44, 0 }
0x1745   :  { %v2232_v50 = vpop.permute.xlu1 %2231 }
0x1746   :  { %v2237_v53 = vsel %vm152_vm2, %v2232_v50, 0 }
0x1748   :  { %v9505_v39 = vpop.eup %9504 }
0x1749   :  { %v2074_v40 = vsel %vm152_vm2, %v9505_v39, 0.0  ;;  %v2230_v54 = vpop.permute.xlu1 %2229 }
0x174a   :  { %2075 = vadd.xlane.f32.xlu0 %v2074_v40 }
0x1760   :  { %2131 = vrot.lane.b32.xlu0 %v10202_v9, %s11714_s28 }
0x1764   :  { %2179 = vrot.lane.b32.xlu0 %v10199_v17, %s11710_s30  ;;  %s11738_s30 = smov 80  }
0x17cf   :  { %v2073_v41 = vpop.xlane.xlu0 %2072 }
0x17d0   :  { %9506 = vrcp.f32 %v2073_v41 }
0x17d7   :  { %v2076_v42 = vpop.xlane.xlu0 %2075 }
0x17d8   :  { %9508 = vrcp.f32 %v2076_v42 }
0x17da   :  { %v9507_v43 = vpop.eup %9506 }
0x17db   :  { %v2132_v14 = vpop.permute.xlu0 %2131  ;;  %v2078_v2 = vmul.f32 %v9507_v43, %v9503_v59 }
0x17dc   :  { %v2137_v45 = vsel %vm281_vm3, %v2132_v14, 0 }
0x17dd   :  { %8691 = vmatpush3.bf16.msra.mxu1 %v2137_v45  ;;  %v2081_v46 = vpack.c.bf16 %v2078_v2, %v2078_v2 }
0x17de   :  { %8702 = vmatprep.subr.bf16.mxu1 %v9766_v1 }
0x17df   :  { %8687 = vmatmul.mubr.msk.bf16.vlgmr.msra.gmra.mrb[60].mxu0 %vm152_vm2, %v2081_v46  ;;  %v2180_v52 = vpop.permute.xlu0 %2179 }
0x17e0   :  { %8697 = vmatpush3.bf16.xpose.msra.mxu0 %v2187_v47  ;;  %8698 = vmatprep.mubr.msk.bf16.mxu0 %vm9767_vm0, %v9766_v1 }
0x17e1   :  { %8708 = vmatprep.subr.bf16.mxu0 %v9766_v1 }
0x17e2   :  { %v9509_v48 = vpop.eup %9508 }
0x17e3   :  { %v2080_v49 = vmul.f32 %v9509_v48, %v9505_v39 }
0x17e5   :  { %v2082_v51 = vpack.c.bf16 %v2080_v49, %v2080_v49 }
0x17e7   :  { %8693 = vmatmul.mubr.msk.bf16.vlgmr.msra.gmra.mrb[64].mxu1 %vm152_vm2, %v2082_v51  ;;  %8699 = vmatmul.mubr.msk.bf16.vlgmr.msra.gmra.mrb[64].mxu0 %vm152_vm2, %v2180_v52 }
0x17e8   :  { %8703 = vmatpush3.bf16.xpose.msra.mxu1 %v2237_v53  ;;  %8704 = vmatprep.mubr.msk.bf16.mxu1 %vm9767_vm0, %v9766_v1 }
0x17e9   :  { %8714 = vmatprep.subr.bf16.mxu1 %v9766_v1  ;;  %8710 = vmatprep.mubr.msk.bf16.mxu0 %vm9767_vm0, %v9766_v1 }
0x17ef   :  { %8705 = vmatmul.mubr.msk.bf16.vlgmr.msra.gmra.mrb[68].mxu1 %vm152_vm2, %v2230_v54 }
0x17f0   :  { %8716 = vmatprep.mubr.msk.bf16.mxu1 %vm9767_vm0, %v9766_v1 }
0x18b2   :  { %v2125_v55 = vpop.f32.mrb[60].mxu0 }
0x18b3   :  { %v8688_v57 = vpop.f32.mrb[61].mxu0 }
0x18b4   :  { %v2128_v58 = vpop.f32.mrb[62].mxu0 }
0x18b5   :  { %v8689_v60 = vpop.f32.mrb[63].mxu0 }
0x18ba   :  { %v2173_v13 = vpop.f32.mrb[64].mxu1  ;;  %v2223_v6 = vpop.f32.mrb[64].mxu0 }
0x18bb   :  { %v9316_v18 = vpack.i.bf16 %v2173_v13, %v2125_v55  ;;  %v2279_v19 = vmul.f32 0.35355338, %v2223_v6  ;;  %v8694_v21 = vpop.f32.mrb[65].mxu1  ;;  %v8700_v22 = vpop.f32.mrb[65].mxu0 }
0x18bc   :  { %v2176_v63 = vpop.f32.mrb[66].mxu1  ;;  %v2226_v23 = vpop.f32.mrb[66].mxu0 }
0x18bd   :  { %v8695_v24 = vpop.f32.mrb[67].mxu1  ;;  %v8701_v25 = vpop.f32.mrb[67].mxu0  ;;  %v2281_v26 = vadd.f32 %v10223_v30, %v2279_v19 }
0x18bf   :  { %v2283_v27 = vsel %vm152_vm2, %v2281_v26, -inf }
0x18c0   :  { %2284 = vmax.xlane.f32.xlu0 %v2283_v27 }
0x18c2   :  { %v2273_v29 = vpop.f32.mrb[68].mxu1 }
0x18c3   :  { %v2280_v31 = vmul.f32 0.35355338, %v2273_v29  ;;  %v8706_v20 = vpop.f32.mrb[69].mxu1 }
0x18c4   :  { %v2276_v32 = vpop.f32.mrb[70].mxu1 }
0x18c5   :  { %v8707_v28 = vpop.f32.mrb[71].mxu1  ;;  %v2282_v33 = vadd.f32 %v10230_v36, %v2280_v31 }
0x18c7   :  { %v2286_v34 = vsel %vm152_vm2, %v2282_v33, -inf }
0x18c8   :  { %2287 = vmax.xlane.f32.xlu1 %v2286_v34 }
0x18d9   :  { %2307 = vrot.lane.b32.xlu1 %v10199_v17, %s11726_s20 }
0x18dd   :  { %2434 = vrot.lane.b32.xlu1 %v10167_v8, %s11727_s21 }
0x18e1   :  { %9312 = vrot.lane.b32.xlu1 %v9311_v15, %s11728_s1 }
0x194d   :  { %v2285_v30 = vpop.xlane.xlu0 %2284 }
0x194e   :  { %v2289_v35 = vsub.f32 %v2281_v26, %v2285_v30 }
0x1950   :  { %v2291_v11 = vmul.f32 1.442695, %v2289_v35 }
0x1952   :  { %9510 = vpow2.f32 %v2291_v11 }
0x1955   :  { %v2288_v3 = vpop.xlane.xlu1 %2287 }
0x1956   :  { %v2290_v36 = vsub.f32 %v2282_v33, %v2288_v3 }
0x1958   :  { %v2293_v4 = vmul.f32 1.442695, %v2290_v36 }
0x1959   :  { %v2308_v37 = vpop.permute.xlu1 %2307 }
0x195a   :  { %9512 = vpow2.f32 %v2293_v4  ;;  %v2313_v0 = vsel %vm281_vm3, %v2308_v37, 0 }
0x195b   :  { %8709 = vmatpush3.bf16.msra.mxu0 %v2313_v0 }
0x195c   :  { %v9511_v17 = vpop.eup %9510  ;;  %8720 = vmatprep.subr.bf16.mxu0 %v9766_v1 }
0x195d   :  { %v2295_v8 = vsel %vm152_vm2, %v9511_v17, 0.0  ;;  %v2435_v43 = vpop.permute.xlu1 %2434 }
0x195e   :  { %2296 = vadd.xlane.f32.xlu0 %v2295_v8 }
0x1961   :  { %v9313_v54 = vpop.permute.xlu1 %9312 }
0x1962   :  { %v9315_v55 = vunpack.i.h.bf16 %v9313_v54  ;;  %v9314_v57 = vunpack.i.l.bf16 %v9313_v54 }
0x1964   :  { %v9513_v56 = vpop.eup %9512  ;;  %v2428_v6 = vsel %vm152_vm2, %v10270_v16, %v9315_v55  ;;  %v10426_v55 = vld [vmem:[%s11690_s4 + $0x20] sm:$0xff]  }
0x1965   :  { %v2298_v10 = vsel %vm152_vm2, %v9513_v56, 0.0 }
0x1966   :  { %2299 = vadd.xlane.f32.xlu0 %v2298_v10 }
0x197c   :  { %2355 = vrot.lane.b32.xlu0 %v10202_v9, %s11726_s20 }
0x1980   :  { %9317 = vrot.lane.b32.xlu0 %v9316_v18, %s11729_s14  ;;  %v2427_v18 = vsel %vm152_vm2, %v10268_v61, %v9314_v57 }
0x1984   :  { %2436 = vrot.lane.b32.xlu0 %v10173_v38, %s11727_s21 }
0x19eb   :  { %v2297_v15 = vpop.xlane.xlu0 %2296 }
0x19ec   :  { %9514 = vrcp.f32 %v2297_v15 }
0x19f3   :  { %v2300_v59 = vpop.xlane.xlu0 %2299 }
0x19f4   :  { %9516 = vrcp.f32 %v2300_v59 }
0x19f6   :  { %v9515_v5 = vpop.eup %9514 }
0x19f7   :  { %v2356_v39 = vpop.permute.xlu0 %2355  ;;  %v2302_v40 = vmul.f32 %v9515_v5, %v9511_v17  ;;  %v9401_v17 = vld [vmem:[%s11692_s6 + $0x18] sm:$0xff]  }
0x19f8   :  { %v2361_v41 = vsel %vm281_vm3, %v2356_v39, 0 }
0x19f9   :  { %8715 = vmatpush3.bf16.msra.mxu1 %v2361_v41  ;;  %v2305_v42 = vpack.c.bf16 %v2302_v40, %v2302_v40 }
0x19fa   :  { %8728 = vmatprep.subr.bf16.mxu1 %v9766_v1 }
0x19fb   :  { %8711 = vmatmul.mubr.msk.bf16.vlgmr.msra.gmra.mrb[68].mxu0 %vm152_vm2, %v2305_v42  ;;  %v9318_v2 = vpop.permute.xlu0 %9317 }
0x19fc   :  { %8721 = vmatpush3.bf16.msra.mxu0 %v2435_v43  ;;  %8724 = vmatprep.mubr.msk.bf16.mxu0 %vm9767_vm0, %v9766_v1  ;;  %v9320_v58 = vunpack.i.h.bf16 %v9318_v2  ;;  %v9319_v60 = vunpack.i.l.bf16 %v9318_v2 }
0x19fd   :  { %8722 = vmatprep.subr.bf16.mxu0 %v9766_v1 }
0x19fe   :  { %v9517_v38 = vpop.eup %9516  ;;  %v2429_v22 = vsel %vm1071_vm4, %v2427_v18, %v9319_v60  ;;  %v2430_v63 = vsel %vm1071_vm4, %v2428_v6, %v9320_v58  ;;  %v10435_v58 = vld [vmem:[%s11690_s4 + $0x28] sm:$0xff]   ;;  %v10442_v60 = vld [vmem:[%s11686_s0] sm:$0xff] }
0x19ff   :  { %v2304_v9 = vmul.f32 %v9517_v38, %v9513_v56  ;;  %v2437_v45 = vpop.permute.xlu0 %2436  ;;  %v8011_v18 = vld [vmem:[%s11693_s7 + $0x1] ss:$0 sm:$0xff] }
0x1a00   :  { %8723 = vmatpush3.bf16.msra.mxu0 %v2437_v45 }
0x1a01   :  { %v2306_v14 = vpack.c.bf16 %v2304_v9, %v2304_v9  ;;  %8736 = vmatprep.subr.bf16.mxu0 %v9766_v1 }
0x1a03   :  { %8717 = vmatmul.mubr.msk.bf16.vlgmr.msra.gmra.mrb[72].mxu1 %vm152_vm2, %v2306_v14 }
0x1a04   :  { %8732 = vmatprep.mubr.msk.bf16.mxu1 %vm9767_vm0, %v9766_v1 }
0x1ace   :  { %v2349_v44 = vpop.f32.mrb[68].mxu0 }
0x1acf   :  { %v8712_v46 = vpop.f32.mrb[69].mxu0 }
0x1ad0   :  { %v2352_v47 = vpop.f32.mrb[70].mxu0 }
0x1ad1   :  { %v8713_v48 = vpop.f32.mrb[71].mxu0  ;;  %v8004_v47 = vld [vmem:[%s11696_s10 + $0x2] ss:$0 sm:$0xff] }
0x1ad6   :  { %v2397_v49 = vpop.f32.mrb[72].mxu1 }
0x1ad7   :  { %v9321_v50 = vpack.i.bf16 %v2397_v49, %v2349_v44  ;;  %v8718_v51 = vpop.f32.mrb[73].mxu1 }
0x1ad8   :  { %v2400_v52 = vpop.f32.mrb[74].mxu1  ;;  %v8005_v51 = vld [vmem:[%s11697_s11 + $0x2] ss:$0 sm:$0xff] }
0x1ad9   :  { %9322 = vrot.lane.b32.xlu1 %v9321_v50, %s11730_s15  ;;  %v8719_v53 = vpop.f32.mrb[75].mxu1 }
0x1add   :  { %2440 = vrot.lane.b32.xlu1 %v10196_v12, %s11727_s21 }
0x1b4b   :  { %v9323_v13 = vpop.permute.xlu1 %9322 }
0x1b4c   :  { %v9325_v19 = vunpack.i.h.bf16 %v9323_v13  ;;  %v9324_v21 = vunpack.i.l.bf16 %v9323_v13  ;;  %v10447_v13 = vld [vmem:[%s11686_s0 + $0x8] sm:$0xff]  ;;  %s11732_s0 = smov 48  }
0x1b4d   :  { %v2821_v6 = vpack.c.bf16 %v10447_v13, %v10442_v60 }
0x1b4e   :  { %v2432_v12 = vsel %vm1074_vm5, %v2430_v63, %v9325_v19  ;;  %v2431_v23 = vsel %vm1074_vm5, %v2429_v22, %v9324_v21 }
0x1b4f   :  { %v2433_v24 = vpack.c.bf16 %v2432_v12, %v2431_v23  ;;  %v2441_v16 = vpop.permute.xlu1 %2440 }
0x1b51   :  { %8725 = vmatmul.mubr.msk.bf16.vlgmr.msra.gmra.mrb[72].mxu0 %vm102_vm1, %v2433_v24 }
0x1b52   :  { %8752 = vmatprep.mubr.msk.bf16.mxu0 %vm9767_vm0, %v9766_v1 }
0x1c24   :  { %v2480_v25 = vpop.f32.mrb[72].mxu0 }
0x1c25   :  { %v2481_v26 = vadd.f32 %v2480_v25, %v2441_v16  ;;  %v8726_v61 = vpop.f32.mrb[73].mxu0  ;;  %v10463_v25 = vld [vmem:[%s11691_s5 + $0x2] ss:$0 sm:$0xff] }
0x1c26   :  { %v2483_v27 = vpop.f32.mrb[74].mxu0 }
0x1c27   :  { %v2484_v29 = vadd.f32 %v2483_v27, %v2441_v16  ;;  %v8727_v31 = vpop.f32.mrb[75].mxu0  ;;  %v2487_v20 = vadd.f32 %v2481_v26, %v10184_v62 }
0x1c29   :  { %v2488_v32 = vadd.f32 %v2484_v29, %v10186_v7  ;;  %v2493_v28 = vsel %vm102_vm1, %v2487_v20, 0.0  ;;  %v9400_v7 = vld [vmem:[%s11692_s6 + $0x10] sm:$0xff]  }
0x1c2a   :  { %2494 = vadd.xlane.f32.xlu0 %v2493_v28  ;;  %8729 = vmatpush3.bf16.msra.mxu1 %v9400_v7 }
0x1c2b   :  { %v2496_v33 = vsel %vm102_vm1, %v2488_v32, 0.0  ;;  %8730 = vmatprep.subr.bf16.mxu1 %v9766_v1 }
0x1c2c   :  { %2497 = vadd.xlane.f32.xlu1 %v2496_v33 }
0x1c2e   :  { %8731 = vmatpush3.bf16.msra.mxu1 %v9401_v17 }
0x1c2f   :  { %8756 = vmatprep.subr.bf16.mxu1 %v9766_v1 }
0x1cb7   :  { %v2495_v34 = vpop.xlane.xlu0 %2494 }
0x1cb8   :  { %v2499_v30 = vmul.f32 0.03125, %v2495_v34 }
0x1cb9   :  { %v2498_v35 = vpop.xlane.xlu1 %2497 }
0x1cba   :  { %v2501_v11 = vsub.f32 %v2487_v20, %v2499_v30  ;;  %v2500_v3 = vmul.f32 0.03125, %v2498_v35 }
0x1cbc   :  { %v2502_v36 = vsub.f32 %v2488_v32, %v2500_v3  ;;  %v2503_v4 = vmul.f32 %v2501_v11, %v2501_v11  ;;  %v10492_v3 = vld [vmem:[%s11688_s2] ss:$0 sm:$0xff] }
0x1cbe   :  { %v2505_v37 = vsel %vm102_vm1, %v2503_v4, 0.0  ;;  %v2504_v0 = vmul.f32 %v2502_v36, %v2502_v36 }
0x1cbf   :  { %2506 = vadd.xlane.f32.xlu0 %v2505_v37 }
0x1cc0   :  { %v2508_v62 = vsel %vm102_vm1, %v2504_v0, 0.0 }
0x1cc3   :  { %2509 = vadd.xlane.f32.xlu0 %v2508_v62 }
0x1d4c   :  { %v2507_v8 = vpop.xlane.xlu0 %2506 }
0x1d4d   :  { %v2511_v56 = vmul.f32 0.032258064, %v2507_v8 }
0x1d4f   :  { %9518 = vrsqrt.f32 %v2511_v56  ;;  %vm2515_vm14 = vcmp.eq.f32.partialorder %v2511_v56, inf  ;;  %v2518_v39 = vand.u32 2147483648, %v2511_v56  ;;  %vm2517_vm15 = vcmp.eq.f32.partialorder %v2511_v56, 0.0 }
0x1d50   :  { %v2510_v10 = vpop.xlane.xlu0 %2509 }
0x1d51   :  { %v2512_v15 = vmul.f32 0.032258064, %v2510_v10 }
0x1d53   :  { %9520 = vrsqrt.f32 %v2512_v15  ;;  %vm2522_vm6 = vcmp.eq.f32.partialorder %v2512_v15, inf  ;;  %v2525_v9 = vand.u32 2147483648, %v2512_v15  ;;  %vm2524_vm7 = vcmp.eq.f32.partialorder %v2512_v15, 0.0 }
0x1d59   :  { %v9519_v59 = vpop.eup %9518 }
0x1d5a   :  { %v2514_v5 = vmul.f32 %v9519_v59, %v2511_v56 }
0x1d5c   :  { %v2516_v40 = vsel %vm2515_vm14, %v2511_v56, %v2514_v5  ;;  %v10499_v56 = vld [vmem:[%s11688_s2 + $0x1] ss:$0 sm:$0xff] }
0x1d5d   :  { %v9521_v41 = vpop.eup %9520  ;;  %v2519_v42 = vsel %vm2517_vm15, %v2518_v39, %v2516_v40 }
0x1d5e   :  { %v2527_v43 = vadd.f32 1e-06, %v2519_v42  ;;  %v2521_v38 = vmul.f32 %v9521_v41, %v2512_v15  ;;  %v9404_v41 = vld [vmem:[%s11694_s8] sm:$0xff]   ;;  %v9405_v42 = vld [vmem:[%s11694_s8 + $0x10] sm:$0xff]  }
0x1d60   :  { %9522 = vrcp.f32 %v2527_v43  ;;  %v2523_v14 = vsel %vm2522_vm6, %v2512_v15, %v2521_v38  ;;  %v9406_v43 = vld [vmem:[%s11694_s8 + $0x20] sm:$0xff]   ;;  %v9407_v38 = vld [vmem:[%s11694_s8 + $0x28] sm:$0xff]  }
0x1d61   :  { %v2526_v2 = vsel %vm2524_vm7, %v2525_v9, %v2523_v14  ;;  %v9408_v9 = vld [vmem:[%s11694_s8 + $0x8] sm:$0xff]   ;;  %v9409_v14 = vld [vmem:[%s11694_s8 + $0x38] sm:$0xff]  }
0x1d62   :  { %v2528_v44 = vadd.f32 1e-06, %v2526_v2  ;;  %v9410_v2 = vld [vmem:[%s11694_s8 + $0x18] sm:$0xff]  }
0x1d64   :  { %9524 = vrcp.f32 %v2528_v44  ;;  %v9411_v44 = vld [vmem:[%s11694_s8 + $0x30] sm:$0xff]  }
0x1d6a   :  { %v9523_v45 = vpop.eup %9522 }
0x1d6b   :  { %v2530_v46 = vmul.f32 %v9523_v45, %v2501_v11 }
0x1d6d   :  { %v2539_v50 = vmul.f32 %v8004_v47, %v2530_v46 }
0x1d6e   :  { %v9525_v48 = vpop.eup %9524 }
0x1d6f   :  { %v2532_v49 = vmul.f32 %v9525_v48, %v2502_v36  ;;  %v10419_v53 = vadd.f32 %v8005_v51, %v2539_v50 }
0x1d71   :  { %v2540_v52 = vmul.f32 %v8004_v47, %v2532_v49 }
0x1d73   :  { %v10421_v54 = vadd.f32 %v8005_v51, %v2540_v52 }
0x1d75   :  { %v2573_v57 = vpack.c.bf16 %v10421_v54, %v10419_v53 }
0x1d77   :  { %8733 = vmatmul.mubr.msk.bf16.vlgmr.msra.gmra.mrb[76].mxu1 %vm102_vm1, %v2573_v57 }
0x1d78   :  { %8757 = vmatpush3.bf16.msra.mxu1 %v10426_v55  ;;  %8760 = vmatprep.mubr.msk.bf16.mxu1 %vm9767_vm0, %v9766_v1 }
0x1d79   :  { %8758 = vmatprep.subr.bf16.mxu1 %v9766_v1 }
0x1d7c   :  { %8759 = vmatpush3.bf16.msra.mxu1 %v10435_v58 }
0x1d7d   :  { %8764 = vmatprep.subr.bf16.mxu1 %v9766_v1 }
0x1d7f   :  { %8761 = vmatmul.mubr.msk.bf16.vlgmr.msra.gmra.mrb[80].mxu1 %vm102_vm1, %v2821_v6 }
0x1d80   :  { %8766 = vmatprep.mubr.msk.bf16.mxu1 %vm9767_vm0, %v9766_v1 }
0x1e4a   :  { %v2629_v19 = vpop.f32.mrb[76].mxu1 }
0x1e4b   :  { %v2630_v21 = vadd.f32 %v8011_v18, %v2629_v19  ;;  %v8734_v22 = vpop.f32.mrb[77].mxu1 }
0x1e4c   :  { %v2632_v63 = vpop.f32.mrb[78].mxu1 }
0x1e4d   :  { %v2633_v12 = vadd.f32 %v8011_v18, %v2632_v63  ;;  %v8735_v23 = vpop.f32.mrb[79].mxu1  ;;  %v2636_v24 = vmax.f32 %v2630_v21, 0.0 }
0x1e4f   :  { %v2637_v16 = vmax.f32 %v2633_v12, 0.0 }
0x1e51   :  { %v10465_v26 = vpack.c.bf16 %v2637_v16, %v2636_v24 }
0x1e52   :  { %v2877_v61 = vpop.f32.mrb[80].mxu1 }
0x1e53   :  { %v2878_v27 = vadd.f32 %v10463_v25, %v2877_v61  ;;  %v8762_v29 = vpop.f32.mrb[81].mxu1 }
0x1e54   :  { %v2880_v31 = vpop.f32.mrb[82].mxu1 }
0x1e55   :  { %v10468_v20 = vpack.c.bf16 %v2878_v27, %v2878_v27  ;;  %v2881_v32 = vadd.f32 %v10463_v25, %v2880_v31  ;;  %v8763_v28 = vpop.f32.mrb[83].mxu1 }
0x1e57   :  { %v10471_v33 = vpack.c.bf16 %v2881_v32, %v2881_v32  ;;  %2887 = vrot.lane.b32.xlu1 %v10468_v20, %s9768_s17 }
0x1e59   :  { %2936 = vrot.lane.b32.xlu0 %v10471_v33, %s9768_s17 }
0x1ec9   :  { %v2888_v34 = vpop.permute.xlu1 %2887 }
0x1eca   :  { %v2893_v30 = vsel %vm152_vm2, %v2888_v34, 0 }
0x1ecb   :  { %8765 = vmatpush3.bf16.xpose.msra.mxu1 %v2893_v30  ;;  %v2937_v35 = vpop.permute.xlu0 %2936 }
0x1ecc   :  { %8770 = vmatprep.subr.bf16.mxu1 %v9766_v1  ;;  %v2942_v11 = vsel %vm152_vm2, %v2937_v35, 0 }
0x1ed2   :  { %8767 = vmatmul.mubr.msk.bf16.vlgmr.msra.gmra.mrb[84].mxu1 %vm152_vm2, %v10468_v20 }
0x1ed3   :  { %8771 = vmatpush3.bf16.xpose.msra.mxu1 %v2942_v11  ;;  %8772 = vmatprep.mubr.msk.bf16.mxu1 %vm9767_vm0, %v9766_v1 }
0x1ed4   :  { %8776 = vmatprep.subr.bf16.mxu1 %v9766_v1 }
0x1eda   :  { %8773 = vmatmul.mubr.msk.bf16.vlgmr.msra.gmra.mrb[88].mxu1 %vm152_vm2, %v10471_v33 }
0x1edb   :  { %8778 = vmatprep.mubr.msk.bf16.mxu1 %vm9767_vm0, %v9766_v1 }
0x1fa5   :  { %v2929_v36 = vpop.f32.mrb[84].mxu1 }
0x1fa6   :  { %v2984_v4 = vmul.f32 0.35355338, %v2929_v36  ;;  %v8768_v37 = vpop.f32.mrb[85].mxu1 }
0x1fa7   :  { %v2932_v0 = vpop.f32.mrb[86].mxu1 }
0x1fa8   :  { %v2986_v62 = vadd.f32 %v10492_v3, %v2984_v4  ;;  %v8769_v7 = vpop.f32.mrb[87].mxu1 }
0x1faa   :  { %v2988_v17 = vsel %vm152_vm2, %v2986_v62, -inf }
0x1fab   :  { %2989 = vmax.xlane.f32.xlu1 %v2988_v17 }
0x1fad   :  { %v2978_v8 = vpop.f32.mrb[88].mxu1 }
0x1fae   :  { %v2985_v10 = vmul.f32 0.35355338, %v2978_v8  ;;  %v8774_v15 = vpop.f32.mrb[89].mxu1 }
0x1faf   :  { %v2981_v59 = vpop.f32.mrb[90].mxu1 }
0x1fb0   :  { %v8775_v5 = vpop.f32.mrb[91].mxu1  ;;  %v2987_v39 = vadd.f32 %v10499_v56, %v2985_v10 }
0x1fb2   :  { %v2991_v40 = vsel %vm152_vm2, %v2987_v39, -inf }
0x1fb3   :  { %2992 = vmax.xlane.f32.xlu0 %v2991_v40 }
0x1fbc   :  { %2684 = vrot.lane.b32.xlu1 %v9404_v41, %s9768_s17 }
0x1fc0   :  { %2688 = vrot.lane.b32.xlu1 %v9405_v42, %s9768_s17 }
0x1fc4   :  { %2692 = vrot.lane.b32.xlu1 %v9406_v43, %s9768_s17 }
0x1fc8   :  { %2694 = vrot.lane.b32.xlu1 %v9407_v38, %s9768_s17 }
0x1fc9   :  { %2686 = vrot.lane.b32.xlu0 %v9408_v9, %s9768_s17 }
0x1fcc   :  { %2698 = vrot.lane.b32.xlu1 %v9409_v14, %s9768_s17 }
0x1fcd   :  { %2690 = vrot.lane.b32.xlu0 %v9410_v2, %s9768_s17 }
0x1fd0   :  { %3060 = vrot.lane.b32.xlu1 %v10471_v33, %s9769_s22 }
0x1fd1   :  { %2696 = vrot.lane.b32.xlu0 %v9411_v44, %s9768_s17 }
0x1fd5   :  { %3012 = vrot.lane.b32.xlu0 %v10468_v20, %s9769_s22 }
0x2038   :  { %v2990_v45 = vpop.xlane.xlu1 %2989 }
0x2039   :  { %v2994_v46 = vsub.f32 %v2986_v62, %v2990_v45 }
0x203b   :  { %v2996_v47 = vmul.f32 1.442695, %v2994_v46 }
0x203c   :  { %v2685_v48 = vpop.permute.xlu1 %2684 }
0x203d   :  { %9526 = vpow2.f32 %v2996_v47  ;;  %8737 = vmatpush3.bf16.msra.mxu0 %v2685_v48 }
0x203e   :  { %8738 = vmatprep.subr.bf16.mxu0 %v9766_v1 }
0x2040   :  { %v2993_v49 = vpop.xlane.xlu0 %2992  ;;  %v2689_v57 = vpop.permute.xlu1 %2688 }
0x2041   :  { %v2995_v50 = vsub.f32 %v2987_v39, %v2993_v49 }
0x2043   :  { %v2998_v51 = vmul.f32 1.442695, %v2995_v50 }
0x2044   :  { %v2687_v52 = vpop.permute.xlu0 %2686  ;;  %v2693_v21 = vpop.permute.xlu1 %2692 }
0x2045   :  { %9528 = vpow2.f32 %v2998_v51  ;;  %8739 = vmatpush3.bf16.msra.mxu0 %v2687_v52 }
0x2046   :  { %8740 = vmatprep.subr.bf16.mxu0 %v9766_v1 }
0x2047   :  { %v9527_v6 = vpop.eup %9526 }
0x2048   :  { %v2691_v18 = vpop.permute.xlu0 %2690  ;;  %v3000_v19 = vsel %vm152_vm2, %v9527_v6, 0.0  ;;  %v2695_v24 = vpop.permute.xlu1 %2694 }
0x2049   :  { %3001 = vadd.xlane.f32.xlu1 %v3000_v19  ;;  %8741 = vmatpush3.bf16.msra.mxu0 %v2689_v57 }
0x204a   :  { %8742 = vmatprep.subr.bf16.mxu0 %v9766_v1 }
0x204c   :  { %v2697_v22 = vpop.permute.xlu0 %2696  ;;  %v2699_v61 = vpop.permute.xlu1 %2698 }
0x204d   :  { %8743 = vmatpush3.bf16.msra.mxu0 %v2691_v18 }
0x204e   :  { %8744 = vmatprep.subr.bf16.mxu0 %v9766_v1 }
0x204f   :  { %v9529_v63 = vpop.eup %9528 }
0x2050   :  { %v3013_v12 = vpop.permute.xlu0 %3012  ;;  %v3003_v23 = vsel %vm152_vm2, %v9529_v63, 0.0  ;;  %v3061_v27 = vpop.permute.xlu1 %3060 }
0x2051   :  { %v3018_v16 = vsel %vm281_vm3, %v3013_v12, 0  ;;  %3004 = vadd.xlane.f32.xlu0 %v3003_v23  ;;  %8745 = vmatpush3.bf16.msra.mxu0 %v2693_v21  ;;  %v3066_v29 = vsel %vm281_vm3, %v3061_v27, 0 }
0x2052   :  { %8777 = vmatpush3.bf16.msra.mxu1 %v3018_v16  ;;  %8746 = vmatprep.subr.bf16.mxu0 %v9766_v1 }
0x2053   :  { %8788 = vmatprep.subr.bf16.mxu1 %v9766_v1 }
0x2055   :  { %8747 = vmatpush3.bf16.msra.mxu0 %v2695_v24 }
0x2056   :  { %8748 = vmatprep.subr.bf16.mxu0 %v9766_v1 }
0x2059   :  { %8749 = vmatpush3.bf16.msra.mxu0 %v2697_v22 }
0x205a   :  { %3160 = vrot.lane.b32.xlu1 %v10471_v33, %s11724_s23  ;;  %8750 = vmatprep.subr.bf16.mxu0 %v9766_v1 }
0x205d   :  { %8751 = vmatpush3.bf16.msra.mxu0 %v2699_v61 }
0x205e   :  { %3158 = vrot.lane.b32.xlu1 %v10471_v33, %s11722_s24  ;;  %8782 = vmatprep.subr.bf16.mxu0 %v9766_v1 }
0x2060   :  { %8753 = vmatmul.mubr.bf16.vlgmr.msra.gmra.mrb[76].mxu0 %v10465_v26 }
0x2061   :  { %8783 = vmatpush3.bf16.msra.mxu0 %v3066_v29  ;;  %8784 = vmatprep.mubr.msk.bf16.mxu0 %vm9767_vm0, %v9766_v1 }
0x2062   :  { %8794 = vmatprep.subr.bf16.mxu0 %v9766_v1 }
0x2067   :  { %3110 = vrot.lane.b32.xlu0 %v10468_v20, %s11724_s23 }
0x206b   :  { %3108 = vrot.lane.b32.xlu0 %v10468_v20, %s11722_s24 }
0x20d6   :  { %v3002_v31 = vpop.xlane.xlu1 %3001 }
0x20d7   :  { %9530 = vrcp.f32 %v3002_v31 }
0x20da   :  { %v3161_v4 = vpop.permute.xlu1 %3160 }
0x20db   :  { %v3166_v62 = vsel %vm152_vm2, %v3161_v4, 0 }
0x20de   :  { %v3005_v32 = vpop.xlane.xlu0 %3004  ;;  %v3159_v7 = vpop.permute.xlu1 %3158 }
0x20df   :  { %9532 = vrcp.f32 %v3005_v32 }
0x20e1   :  { %v9531_v28 = vpop.eup %9530 }
0x20e2   :  { %v3007_v34 = vmul.f32 %v9531_v28, %v9527_v6  ;;  %v3111_v30 = vpop.permute.xlu0 %3110 }
0x20e3   :  { %v3116_v35 = vsel %vm152_vm2, %v3111_v30, 0 }
0x20e4   :  { %v3010_v26 = vpack.c.bf16 %v3007_v34, %v3007_v34 }
0x20e6   :  { %8779 = vmatmul.mubr.msk.bf16.vlgmr.msra.gmra.mrb[92].mxu1 %vm152_vm2, %v3010_v26  ;;  %v3109_v0 = vpop.permute.xlu0 %3108 }
0x20e7   :  { %8789 = vmatpush3.bf16.xpose.msra.mxu1 %v3116_v35  ;;  %8790 = vmatprep.mubr.msk.bf16.mxu1 %vm9767_vm0, %v9766_v1 }
0x20e8   :  { %8800 = vmatprep.subr.bf16.mxu1 %v9766_v1 }
0x20e9   :  { %v9533_v11 = vpop.eup %9532 }
0x20ea   :  { %v3009_v36 = vmul.f32 %v9533_v11, %v9529_v63 }
0x20ec   :  { %v3011_v37 = vpack.c.bf16 %v3009_v36, %v3009_v36 }
0x20ee   :  { %8785 = vmatmul.mubr.msk.bf16.vlgmr.msra.gmra.mrb[80].mxu0 %vm152_vm2, %v3011_v37  ;;  %8791 = vmatmul.mubr.msk.bf16.vlgmr.msra.gmra.mrb[96].mxu1 %vm152_vm2, %v3109_v0 }
0x20ef   :  { %8795 = vmatpush3.bf16.xpose.msra.mxu0 %v3166_v62  ;;  %8796 = vmatprep.mubr.msk.bf16.mxu0 %vm9767_vm0, %v9766_v1 }
0x20f0   :  { %8806 = vmatprep.subr.bf16.mxu0 %v9766_v1  ;;  %8802 = vmatprep.mubr.msk.bf16.mxu1 %vm9767_vm0, %v9766_v1 }
0x20f6   :  { %8797 = vmatmul.mubr.msk.bf16.vlgmr.msra.gmra.mrb[84].mxu0 %vm152_vm2, %v3159_v7 }
0x20f7   :  { %8808 = vmatprep.mubr.msk.bf16.mxu0 %vm9767_vm0, %v9766_v1 }
0x2133   :  { %v10580_v17 = vpop.f32.mrb[76].mxu0 }
0x2134   :  { %v8754_v8 = vpop.f32.mrb[77].mxu0 }
0x2135   :  { %v10582_v10 = vpop.f32.mrb[78].mxu0 }
0x2136   :  { %v8755_v15 = vpop.f32.mrb[79].mxu0 }
0x21b9   :  { %v10584_v59 = vpop.f32.mrb[92].mxu1 }
0x21ba   :  { %v8780_v5 = vpop.f32.mrb[93].mxu1 }
0x21bb   :  { %v3057_v39 = vpop.f32.mrb[94].mxu1 }
0x21bc   :  { %v8781_v40 = vpop.f32.mrb[95].mxu1 }
0x21c1   :  { %v10586_v41 = vpop.f32.mrb[80].mxu0  ;;  %v3152_v42 = vpop.f32.mrb[96].mxu1 }
0x21c2   :  { %v3208_v43 = vmul.f32 0.35355338, %v3152_v42  ;;  %v8786_v38 = vpop.f32.mrb[81].mxu0  ;;  %v8792_v9 = vpop.f32.mrb[97].mxu1 }
0x21c3   :  { %v3105_v14 = vpop.f32.mrb[82].mxu0  ;;  %v3155_v2 = vpop.f32.mrb[98].mxu1 }
0x21c4   :  { %v3210_v44 = vadd.f32 %v10492_v3, %v3208_v43  ;;  %v8787_v45 = vpop.f32.mrb[83].mxu0  ;;  %v8793_v46 = vpop.f32.mrb[99].mxu1 }
0x21c6   :  { %v3212_v47 = vsel %vm152_vm2, %v3210_v44, -inf }
0x21c7   :  { %3213 = vmax.xlane.f32.xlu0 %v3212_v47 }
0x21c9   :  { %v3202_v48 = vpop.f32.mrb[84].mxu0 }
0x21ca   :  { %v3209_v49 = vmul.f32 0.35355338, %v3202_v48  ;;  %v8798_v50 = vpop.f32.mrb[85].mxu0 }
0x21cb   :  { %v3205_v51 = vpop.f32.mrb[86].mxu0 }
0x21cc   :  { %v3211_v52 = vadd.f32 %v10499_v56, %v3209_v49  ;;  %v8799_v57 = vpop.f32.mrb[87].mxu0 }
0x21ce   :  { %v3215_v6 = vsel %vm152_vm2, %v3211_v52, -inf }
0x21cf   :  { %3216 = vmax.xlane.f32.xlu1 %v3215_v6 }
0x21e0   :  { %3236 = vrot.lane.b32.xlu1 %v10468_v20, %s11720_s25 }
0x21e4   :  { %3334 = vrot.lane.b32.xlu1 %v10468_v20, %s11718_s26 }
0x21e8   :  { %3384 = vrot.lane.b32.xlu1 %v10471_v33, %s11718_s26 }
0x21ec   :  { %3382 = vrot.lane.b32.xlu1 %v10471_v33, %s11731_s16 }
0x2254   :  { %v3214_v18 = vpop.xlane.xlu0 %3213 }
0x2255   :  { %v3218_v19 = vsub.f32 %v3210_v44, %v3214_v18 }
0x2257   :  { %v3220_v21 = vmul.f32 1.442695, %v3218_v19 }
0x2259   :  { %9534 = vpow2.f32 %v3220_v21 }
0x225c   :  { %v3217_v22 = vpop.xlane.xlu1 %3216 }
0x225d   :  { %v3219_v63 = vsub.f32 %v3211_v52, %v3217_v22 }
0x225f   :  { %v3222_v12 = vmul.f32 1.442695, %v3219_v63 }
0x2260   :  { %v3237_v23 = vpop.permute.xlu1 %3236 }
0x2261   :  { %9536 = vpow2.f32 %v3222_v12  ;;  %v3242_v24 = vsel %vm281_vm3, %v3237_v23, 0 }
0x2262   :  { %8801 = vmatpush3.bf16.msra.mxu1 %v3242_v24 }
0x2263   :  { %v9535_v16 = vpop.eup %9534  ;;  %8812 = vmatprep.subr.bf16.mxu1 %v9766_v1 }
0x2264   :  { %v3224_v61 = vsel %vm152_vm2, %v9535_v16, 0.0  ;;  %v3335_v26 = vpop.permute.xlu1 %3334 }
0x2265   :  { %3225 = vadd.xlane.f32.xlu0 %v3224_v61  ;;  %v3340_v36 = vsel %vm152_vm2, %v3335_v26, 0 }
0x2268   :  { %v3385_v0 = vpop.permute.xlu1 %3384 }
0x2269   :  { %v3390_v8 = vsel %vm152_vm2, %v3385_v0, 0 }
0x226b   :  { %v9537_v27 = vpop.eup %9536 }
0x226c   :  { %v3227_v29 = vsel %vm152_vm2, %v9537_v27, 0.0  ;;  %v3383_v15 = vpop.permute.xlu1 %3382 }
0x226d   :  { %3228 = vadd.xlane.f32.xlu0 %v3227_v29 }
0x2283   :  { %3284 = vrot.lane.b32.xlu0 %v10471_v33, %s11720_s25 }
0x2287   :  { %3332 = vrot.lane.b32.xlu0 %v10468_v20, %s11731_s16 }
0x22f2   :  { %v3226_v31 = vpop.xlane.xlu0 %3225 }
0x22f3   :  { %9538 = vrcp.f32 %v3226_v31 }
0x22fa   :  { %v3229_v32 = vpop.xlane.xlu0 %3228 }
0x22fb   :  { %9540 = vrcp.f32 %v3229_v32 }
0x22fd   :  { %v9539_v28 = vpop.eup %9538 }
0x22fe   :  { %v3285_v34 = vpop.permute.xlu0 %3284  ;;  %v3231_v30 = vmul.f32 %v9539_v28, %v9535_v16 }
0x22ff   :  { %v3290_v35 = vsel %vm281_vm3, %v3285_v34, 0 }
0x2300   :  { %8807 = vmatpush3.bf16.msra.mxu0 %v3290_v35  ;;  %v3234_v11 = vpack.c.bf16 %v3231_v30, %v3231_v30 }
0x2301   :  { %8818 = vmatprep.subr.bf16.mxu0 %v9766_v1 }
0x2302   :  { %8803 = vmatmul.mubr.msk.bf16.vlgmr.msra.gmra.mrb[100].mxu1 %vm152_vm2, %v3234_v11  ;;  %v3333_v7 = vpop.permute.xlu0 %3332 }
0x2303   :  { %8813 = vmatpush3.bf16.xpose.msra.mxu1 %v3340_v36  ;;  %8814 = vmatprep.mubr.msk.bf16.mxu1 %vm9767_vm0, %v9766_v1 }
0x2304   :  { %8824 = vmatprep.subr.bf16.mxu1 %v9766_v1 }
0x2305   :  { %v9541_v4 = vpop.eup %9540 }
0x2306   :  { %v3233_v37 = vmul.f32 %v9541_v4, %v9537_v27 }
0x2308   :  { %v3235_v62 = vpack.c.bf16 %v3233_v37, %v3233_v37 }
0x230a   :  { %8809 = vmatmul.mubr.msk.bf16.vlgmr.msra.gmra.mrb[88].mxu0 %vm152_vm2, %v3235_v62  ;;  %8815 = vmatmul.mubr.msk.bf16.vlgmr.msra.gmra.mrb[104].mxu1 %vm152_vm2, %v3333_v7 }
0x230b   :  { %8819 = vmatpush3.bf16.xpose.msra.mxu0 %v3390_v8  ;;  %8820 = vmatprep.mubr.msk.bf16.mxu0 %vm9767_vm0, %v9766_v1 }
0x230c   :  { %8830 = vmatprep.subr.bf16.mxu0 %v9766_v1  ;;  %8826 = vmatprep.mubr.msk.bf16.mxu1 %vm9767_vm0, %v9766_v1 }
0x2312   :  { %8821 = vmatmul.mubr.msk.bf16.vlgmr.msra.gmra.mrb[92].mxu0 %vm152_vm2, %v3383_v15 }
0x2313   :  { %8832 = vmatprep.mubr.msk.bf16.mxu0 %vm9767_vm0, %v9766_v1 }
0x23d5   :  { %v10626_v5 = vpop.f32.mrb[100].mxu1 }
0x23d6   :  { %v8804_v39 = vpop.f32.mrb[101].mxu1 }
0x23d7   :  { %v3281_v40 = vpop.f32.mrb[102].mxu1 }
0x23d8   :  { %v8805_v42 = vpop.f32.mrb[103].mxu1 }
0x23dd   :  { %v10628_v43 = vpop.f32.mrb[88].mxu0  ;;  %v3376_v38 = vpop.f32.mrb[104].mxu1 }
0x23de   :  { %v9326_v9 = vpack.i.bf16 %v10628_v43, %v10626_v5  ;;  %v3432_v14 = vmul.f32 0.35355338, %v3376_v38  ;;  %v8810_v2 = vpop.f32.mrb[89].mxu0  ;;  %v8816_v44 = vpop.f32.mrb[105].mxu1 }
0x23df   :  { %v3329_v45 = vpop.f32.mrb[90].mxu0  ;;  %v3379_v46 = vpop.f32.mrb[106].mxu1 }
0x23e0   :  { %v3434_v47 = vadd.f32 %v10492_v3, %v3432_v14  ;;  %v8811_v48 = vpop.f32.mrb[91].mxu0  ;;  %v8817_v49 = vpop.f32.mrb[107].mxu1 }
0x23e2   :  { %v3436_v50 = vsel %vm152_vm2, %v3434_v47, -inf }
0x23e3   :  { %3437 = vmax.xlane.f32.xlu0 %v3436_v50 }
0x23e5   :  { %v3426_v51 = vpop.f32.mrb[92].mxu0 }
0x23e6   :  { %v3433_v52 = vmul.f32 0.35355338, %v3426_v51  ;;  %v8822_v57 = vpop.f32.mrb[93].mxu0 }
0x23e7   :  { %v3429_v6 = vpop.f32.mrb[94].mxu0 }
0x23e8   :  { %v3435_v18 = vadd.f32 %v10499_v56, %v3433_v52  ;;  %v8823_v19 = vpop.f32.mrb[95].mxu0 }
0x23ea   :  { %v3439_v21 = vsel %vm152_vm2, %v3435_v18, -inf }
0x23eb   :  { %3440 = vmax.xlane.f32.xlu1 %v3439_v21 }
0x23fc   :  { %3460 = vrot.lane.b32.xlu1 %v10468_v20, %s11732_s0 }
0x2400   :  { %3558 = vrot.lane.b32.xlu1 %v10468_v20, %s11733_s19 }
0x2404   :  { %3608 = vrot.lane.b32.xlu1 %v10471_v33, %s11733_s19 }
0x2408   :  { %3606 = vrot.lane.b32.xlu1 %v10471_v33, %s11734_s18 }
0x2470   :  { %v3438_v22 = vpop.xlane.xlu0 %3437 }
0x2471   :  { %v3442_v63 = vsub.f32 %v3434_v47, %v3438_v22 }
0x2473   :  { %v3444_v12 = vmul.f32 1.442695, %v3442_v63 }
0x2475   :  { %9542 = vpow2.f32 %v3444_v12 }
0x2478   :  { %v3441_v23 = vpop.xlane.xlu1 %3440 }
0x2479   :  { %v3443_v24 = vsub.f32 %v3435_v18, %v3441_v23 }
0x247b   :  { %v3446_v16 = vmul.f32 1.442695, %v3443_v24 }
0x247c   :  { %v3461_v61 = vpop.permute.xlu1 %3460 }
0x247d   :  { %9544 = vpow2.f32 %v3446_v16  ;;  %v3466_v27 = vsel %vm281_vm3, %v3461_v61, 0 }
0x247e   :  { %8825 = vmatpush3.bf16.msra.mxu1 %v3466_v27 }
0x247f   :  { %v9543_v29 = vpop.eup %9542  ;;  %8836 = vmatprep.subr.bf16.mxu1 %v9766_v1 }
0x2480   :  { %v3448_v31 = vsel %vm152_vm2, %v9543_v29, 0.0  ;;  %v3559_v36 = vpop.permute.xlu1 %3558 }
0x2481   :  { %3449 = vadd.xlane.f32.xlu0 %v3448_v31  ;;  %v3564_v0 = vsel %vm152_vm2, %v3559_v36, 0 }
0x2484   :  { %v3609_v8 = vpop.permute.xlu1 %3608 }
0x2485   :  { %v3614_v40 = vsel %vm152_vm2, %v3609_v8, 0 }
0x2487   :  { %v9545_v32 = vpop.eup %9544 }
0x2488   :  { %v3451_v28 = vsel %vm152_vm2, %v9545_v32, 0.0  ;;  %v3607_v42 = vpop.permute.xlu1 %3606 }
0x2489   :  { %3452 = vadd.xlane.f32.xlu0 %v3451_v28 }
0x249f   :  { %3508 = vrot.lane.b32.xlu0 %v10471_v33, %s11732_s0 }
0x24a3   :  { %3556 = vrot.lane.b32.xlu0 %v10468_v20, %s11734_s18 }
0x250e   :  { %v3450_v34 = vpop.xlane.xlu0 %3449 }
0x250f   :  { %9546 = vrcp.f32 %v3450_v34 }
0x2516   :  { %v3453_v30 = vpop.xlane.xlu0 %3452 }
0x2517   :  { %9548 = vrcp.f32 %v3453_v30 }
0x2519   :  { %v9547_v26 = vpop.eup %9546 }
0x251a   :  { %v3509_v35 = vpop.permute.xlu0 %3508  ;;  %v3455_v11 = vmul.f32 %v9547_v26, %v9543_v29 }
0x251b   :  { %v3514_v4 = vsel %vm281_vm3, %v3509_v35, 0 }
0x251c   :  { %8831 = vmatpush3.bf16.msra.mxu0 %v3514_v4  ;;  %v3458_v37 = vpack.c.bf16 %v3455_v11, %v3455_v11 }
0x251d   :  { %8842 = vmatprep.subr.bf16.mxu0 %v9766_v1 }
0x251e   :  { %8827 = vmatmul.mubr.msk.bf16.vlgmr.msra.gmra.mrb[108].mxu1 %vm152_vm2, %v3458_v37  ;;  %v3557_v39 = vpop.permute.xlu0 %3556 }
0x251f   :  { %8837 = vmatpush3.bf16.xpose.msra.mxu1 %v3564_v0  ;;  %8838 = vmatprep.mubr.msk.bf16.mxu1 %vm9767_vm0, %v9766_v1 }
0x2520   :  { %8848 = vmatprep.subr.bf16.mxu1 %v9766_v1 }
0x2521   :  { %v9549_v62 = vpop.eup %9548 }
0x2522   :  { %v3457_v7 = vmul.f32 %v9549_v62, %v9545_v32 }
0x2524   :  { %v3459_v15 = vpack.c.bf16 %v3457_v7, %v3457_v7 }
0x2526   :  { %8833 = vmatmul.mubr.msk.bf16.vlgmr.msra.gmra.mrb[96].mxu0 %vm152_vm2, %v3459_v15  ;;  %8839 = vmatmul.mubr.msk.bf16.vlgmr.msra.gmra.mrb[112].mxu1 %vm152_vm2, %v3557_v39 }
0x2527   :  { %8843 = vmatpush3.bf16.xpose.msra.mxu0 %v3614_v40  ;;  %8844 = vmatprep.mubr.msk.bf16.mxu0 %vm9767_vm0, %v9766_v1 }
0x2528   :  { %8854 = vmatprep.subr.bf16.mxu0 %v9766_v1  ;;  %8850 = vmatprep.mubr.msk.bf16.mxu1 %vm9767_vm0, %v9766_v1 }
0x252e   :  { %8845 = vmatmul.mubr.msk.bf16.vlgmr.msra.gmra.mrb[100].mxu0 %vm152_vm2, %v3607_v42 }
0x252f   :  { %8856 = vmatprep.mubr.msk.bf16.mxu0 %vm9767_vm0, %v9766_v1 }
0x25f1   :  { %v3502_v38 = vpop.f32.mrb[108].mxu1 }
0x25f2   :  { %v8828_v14 = vpop.f32.mrb[109].mxu1 }
0x25f3   :  { %v3505_v2 = vpop.f32.mrb[110].mxu1 }
0x25f4   :  { %v8829_v44 = vpop.f32.mrb[111].mxu1  ;;  %v8015_v2 = vld [vmem:[%s11695_s9] ss:$0 sm:$0xff] }
0x25f9   :  { %v3550_v45 = vpop.f32.mrb[96].mxu0  ;;  %v3600_v46 = vpop.f32.mrb[112].mxu1 }
0x25fa   :  { %v9331_v47 = vpack.i.bf16 %v3550_v45, %v3502_v38  ;;  %v3656_v48 = vmul.f32 0.35355338, %v3600_v46  ;;  %v8834_v49 = vpop.f32.mrb[97].mxu0  ;;  %v8840_v50 = vpop.f32.mrb[113].mxu1 }
0x25fb   :  { %v3553_v51 = vpop.f32.mrb[98].mxu0  ;;  %v3603_v52 = vpop.f32.mrb[114].mxu1 }
0x25fc   :  { %v3658_v57 = vadd.f32 %v10492_v3, %v3656_v48  ;;  %v8835_v6 = vpop.f32.mrb[99].mxu0  ;;  %v8841_v18 = vpop.f32.mrb[115].mxu1 }
0x25fe   :  { %v3660_v19 = vsel %vm152_vm2, %v3658_v57, -inf }
0x25ff   :  { %3661 = vmax.xlane.f32.xlu0 %v3660_v19 }
0x2601   :  { %v3650_v21 = vpop.f32.mrb[100].mxu0 }
0x2602   :  { %v3657_v22 = vmul.f32 0.35355338, %v3650_v21  ;;  %v8846_v63 = vpop.f32.mrb[101].mxu0 }
0x2603   :  { %v3653_v12 = vpop.f32.mrb[102].mxu0 }
0x2604   :  { %v3659_v23 = vadd.f32 %v10499_v56, %v3657_v22  ;;  %v8847_v24 = vpop.f32.mrb[103].mxu0 }
0x2606   :  { %v3663_v16 = vsel %vm152_vm2, %v3659_v23, -inf }
0x2607   :  { %3664 = vmax.xlane.f32.xlu1 %v3663_v16 }
0x2618   :  { %3684 = vrot.lane.b32.xlu1 %v10468_v20, %s11726_s20 }
0x261c   :  { %3811 = vrot.lane.b32.xlu1 %v10426_v55, %s11727_s21 }
0x2620   :  { %9327 = vrot.lane.b32.xlu1 %v9326_v9, %s11728_s1 }
0x268c   :  { %v3662_v3 = vpop.xlane.xlu0 %3661 }
0x268d   :  { %v3666_v61 = vsub.f32 %v3658_v57, %v3662_v3 }
0x268f   :  { %v3668_v27 = vmul.f32 1.442695, %v3666_v61 }
0x2691   :  { %9550 = vpow2.f32 %v3668_v27 }
0x2694   :  { %v3665_v56 = vpop.xlane.xlu1 %3664 }
0x2695   :  { %v3667_v29 = vsub.f32 %v3659_v23, %v3665_v56 }
0x2697   :  { %v3670_v31 = vmul.f32 1.442695, %v3667_v29 }
0x2698   :  { %v3685_v32 = vpop.permute.xlu1 %3684 }
0x2699   :  { %9552 = vpow2.f32 %v3670_v31  ;;  %v3690_v28 = vsel %vm281_vm3, %v3685_v32, 0 }
0x269a   :  { %8849 = vmatpush3.bf16.msra.mxu1 %v3690_v28 }
0x269b   :  { %v9551_v20 = vpop.eup %9550  ;;  %8860 = vmatprep.subr.bf16.mxu1 %v9766_v1 }
0x269c   :  { %v3672_v55 = vsel %vm152_vm2, %v9551_v20, 0.0 }
0x269d   :  { %3673 = vadd.xlane.f32.xlu0 %v3672_v55 }
0x26a3   :  { %v9553_v5 = vpop.eup %9552 }
0x26a4   :  { %v3675_v43 = vsel %vm152_vm2, %v9553_v5, 0.0 }
0x26a5   :  { %3676 = vadd.xlane.f32.xlu0 %v3675_v43 }
0x26bb   :  { %3732 = vrot.lane.b32.xlu0 %v10471_v33, %s11726_s20  ;;  %v3812_v33 = vpop.permute.xlu1 %3811 }
0x26bf   :  { %9332 = vrot.lane.b32.xlu0 %v9331_v47, %s11729_s14  ;;  %v9328_v44 = vpop.permute.xlu1 %9327 }
0x26c0   :  { %v9330_v45 = vunpack.i.h.bf16 %v9328_v44  ;;  %v9329_v46 = vunpack.i.l.bf16 %v9328_v44 }
0x26c2   :  { %v3805_v50 = vsel %vm152_vm2, %v10586_v41, %v9330_v45  ;;  %v3804_v51 = vsel %vm152_vm2, %v10584_v59, %v9329_v46 }
0x26c3   :  { %3813 = vrot.lane.b32.xlu0 %v10435_v58, %s11727_s21 }
0x26c7   :  { %3817 = vrot.lane.b32.xlu0 %v10463_v25, %s11727_s21 }
0x272a   :  { %v3674_v9 = vpop.xlane.xlu0 %3673 }
0x272b   :  { %9554 = vrcp.f32 %v3674_v9 }
0x2732   :  { %v3677_v34 = vpop.xlane.xlu0 %3676 }
0x2733   :  { %9556 = vrcp.f32 %v3677_v34 }
0x2735   :  { %v9555_v30 = vpop.eup %9554 }
0x2736   :  { %v3733_v26 = vpop.permute.xlu0 %3732  ;;  %v3679_v35 = vmul.f32 %v9555_v30, %v9551_v20 }
0x2737   :  { %v3738_v11 = vsel %vm281_vm3, %v3733_v26, 0 }
0x2738   :  { %8855 = vmatpush3.bf16.msra.mxu0 %v3738_v11  ;;  %v3682_v36 = vpack.c.bf16 %v3679_v35, %v3679_v35  ;;  %v10749_v35 = vld [vmem:[%s11690_s4 + $0x38] sm:$0xff]  }
0x2739   :  { %8868 = vmatprep.subr.bf16.mxu0 %v9766_v1 }
0x273a   :  { %8851 = vmatmul.mubr.msk.bf16.vlgmr.msra.gmra.mrb[116].mxu1 %vm152_vm2, %v3682_v36  ;;  %v9333_v37 = vpop.permute.xlu0 %9332 }
0x273b   :  { %8861 = vmatpush3.bf16.msra.mxu1 %v3812_v33  ;;  %8864 = vmatprep.mubr.msk.bf16.mxu1 %vm9767_vm0, %v9766_v1  ;;  %v9335_v47 = vunpack.i.h.bf16 %v9333_v37  ;;  %v9334_v48 = vunpack.i.l.bf16 %v9333_v37 }
0x273c   :  { %8862 = vmatprep.subr.bf16.mxu1 %v9766_v1 }
0x273d   :  { %v9557_v58 = vpop.eup %9556  ;;  %v3807_v6 = vsel %vm1071_vm4, %v3805_v50, %v9335_v47  ;;  %v3806_v18 = vsel %vm1071_vm4, %v3804_v51, %v9334_v48 }
0x273e   :  { %v3681_v25 = vmul.f32 %v9557_v58, %v9553_v5  ;;  %v3814_v62 = vpop.permute.xlu0 %3813 }
0x273f   :  { %8863 = vmatpush3.bf16.msra.mxu1 %v3814_v62 }
0x2740   :  { %v3683_v4 = vpack.c.bf16 %v3681_v25, %v3681_v25  ;;  %8876 = vmatprep.subr.bf16.mxu1 %v9766_v1 }
0x2742   :  { %8857 = vmatmul.mubr.msk.bf16.vlgmr.msra.gmra.mrb[104].mxu0 %vm152_vm2, %v3683_v4  ;;  %v3818_v3 = vpop.permute.xlu0 %3817 }
0x2743   :  { %8872 = vmatprep.mubr.msk.bf16.mxu0 %vm9767_vm0, %v9766_v1 }
0x280d   :  { %v3726_v0 = vpop.f32.mrb[116].mxu1 }
0x280e   :  { %v8852_v7 = vpop.f32.mrb[117].mxu1 }
0x280f   :  { %v3729_v8 = vpop.f32.mrb[118].mxu1 }
0x2810   :  { %v8853_v15 = vpop.f32.mrb[119].mxu1 }
0x2815   :  { %v3774_v39 = vpop.f32.mrb[104].mxu0 }
0x2816   :  { %v9336_v40 = vpack.i.bf16 %v3774_v39, %v3726_v0  ;;  %v8858_v42 = vpop.f32.mrb[105].mxu0 }
0x2817   :  { %v3777_v38 = vpop.f32.mrb[106].mxu0 }
0x2818   :  { %v8859_v14 = vpop.f32.mrb[107].mxu0  ;;  %9337 = vrot.lane.b32.xlu1 %v9336_v40, %s11730_s15 }
0x281c   :  { %2708 = vrot.lane.b32.xlu1 %v8015_v2, %s9768_s17 }
0x288a   :  { %v9338_v49 = vpop.permute.xlu1 %9337 }
0x288b   :  { %v9340_v52 = vunpack.i.h.bf16 %v9338_v49  ;;  %v9339_v57 = vunpack.i.l.bf16 %v9338_v49 }
0x288d   :  { %v3809_v19 = vsel %vm1074_vm5, %v3807_v6, %v9340_v52  ;;  %v3808_v21 = vsel %vm1074_vm5, %v3806_v18, %v9339_v57  ;;  %v8026_v57 = vld [vmem:[%s11696_s10 + $0x3] ss:$0 sm:$0xff] }
0x288e   :  { %v3810_v22 = vpack.c.bf16 %v3809_v19, %v3808_v21  ;;  %v2709_v63 = vpop.permute.xlu1 %2708  ;;  %v8027_v18 = vld [vmem:[%s11697_s11 + $0x3] ss:$0 sm:$0xff] }
0x288f   :  { %v2746_v12 = vadd.f32 %v10580_v17, %v2709_v63  ;;  %v2749_v23 = vadd.f32 %v10582_v10, %v2709_v63 }
0x2890   :  { %8865 = vmatmul.mubr.msk.bf16.vlgmr.msra.gmra.mrb[120].mxu1 %vm102_vm1, %v3810_v22 }
0x2891   :  { %v2753_v59 = vadd.f32 %v2749_v23, %v10421_v54  ;;  %v2752_v41 = vadd.f32 %v2746_v12, %v10419_v53  ;;  %8880 = vmatprep.mubr.msk.bf16.mxu1 %vm9767_vm0, %v9766_v1 }
0x2893   :  { %v2761_v24 = vsel %vm102_vm1, %v2753_v59, 0.0  ;;  %v2758_v16 = vsel %vm102_vm1, %v2752_v41, 0.0 }
0x2894   :  { %2762 = vadd.xlane.f32.xlu0 %v2761_v24  ;;  %2759 = vadd.xlane.f32.xlu1 %v2758_v16 }
0x2921   :  { %v2760_v61 = vpop.xlane.xlu1 %2759  ;;  %v2763_v17 = vpop.xlane.xlu0 %2762 }
0x2922   :  { %v2764_v27 = vmul.f32 0.03125, %v2760_v61  ;;  %v2765_v10 = vmul.f32 0.03125, %v2763_v17 }
0x2924   :  { %v10725_v29 = vsub.f32 %v2752_v41, %v2764_v27  ;;  %v10727_v32 = vsub.f32 %v2753_v59, %v2765_v10  ;;  %v10782_v41 = vld [vmem:[%s11691_s5 + $0x3] ss:$0 sm:$0xff] }
0x2926   :  { %v2768_v9 = vmul.f32 %v10725_v29, %v10725_v29  ;;  %v2769_v30 = vmul.f32 %v10727_v32, %v10727_v32 }
0x2928   :  { %v2770_v26 = vsel %vm102_vm1, %v2768_v9, 0.0 }
0x2963   :  { %v3857_v56 = vpop.f32.mrb[120].mxu1 }
0x2964   :  { %v3858_v54 = vadd.f32 %v3857_v56, %v3818_v3  ;;  %v8866_v31 = vpop.f32.mrb[121].mxu1 }
0x2965   :  { %v3860_v53 = vpop.f32.mrb[122].mxu1 }
0x2966   :  { %v3864_v28 = vadd.f32 %v3858_v54, %v10442_v60  ;;  %v3861_v20 = vadd.f32 %v3860_v53, %v3818_v3  ;;  %v8867_v55 = vpop.f32.mrb[123].mxu1  ;;  %v2773_v60 = vsel %vm102_vm1, %v2769_v30, 0.0 }
0x2968   :  { %v3865_v5 = vadd.f32 %v3861_v20, %v10447_v13  ;;  %v3870_v43 = vsel %vm102_vm1, %v3864_v28, 0.0  ;;  %v10742_v13 = vld [vmem:[%s11690_s4 + $0x30] sm:$0xff]  }
0x2969   :  { %3871 = vadd.xlane.f32.xlu0 %v3870_v43  ;;  %8869 = vmatpush3.bf16.msra.mxu0 %v10742_v13 }
0x296a   :  { %v3873_v34 = vsel %vm102_vm1, %v3865_v5, 0.0  ;;  %8870 = vmatprep.subr.bf16.mxu0 %v9766_v1 }
0x296b   :  { %3874 = vadd.xlane.f32.xlu1 %v3873_v34  ;;  %v8056_v34 = vld [vmem:[%s11696_s10 + $0x4] ss:$0 sm:$0xff] }
0x296d   :  { %2771 = vadd.xlane.f32.xlu0 %v2770_v26  ;;  %8871 = vmatpush3.bf16.msra.mxu0 %v10749_v35 }
0x296e   :  { %8884 = vmatprep.subr.bf16.mxu0 %v9766_v1 }
0x296f   :  { %2774 = vadd.xlane.f32.xlu1 %v2773_v60 }
0x29f6   :  { %v3872_v11 = vpop.xlane.xlu0 %3871 }
0x29f7   :  { %v3876_v36 = vmul.f32 0.03125, %v3872_v11 }
0x29f8   :  { %v3875_v33 = vpop.xlane.xlu1 %3874 }
0x29f9   :  { %v10753_v58 = vsub.f32 %v3864_v28, %v3876_v36  ;;  %v3877_v25 = vmul.f32 0.03125, %v3875_v33  ;;  %v8057_v36 = vld [vmem:[%s11697_s11 + $0x4] ss:$0 sm:$0xff] }
0x29fa   :  { %v2772_v4 = vpop.xlane.xlu0 %2771 }
0x29fb   :  { %v10755_v37 = vsub.f32 %v3865_v5, %v3877_v25  ;;  %v2776_v0 = vmul.f32 0.032258064, %v2772_v4  ;;  %v3880_v62 = vmul.f32 %v10753_v58, %v10753_v58 }
0x29fc   :  { %v2775_v7 = vpop.xlane.xlu1 %2774 }
0x29fd   :  { %9558 = vrsqrt.f32 %v2776_v0  ;;  %v2777_v8 = vmul.f32 0.032258064, %v2775_v7  ;;  %v3882_v15 = vsel %vm102_vm1, %v3880_v62, 0.0  ;;  %v3881_v39 = vmul.f32 %v10755_v37, %v10755_v37 }
0x29fe   :  { %3883 = vadd.xlane.f32.xlu0 %v3882_v15  ;;  %vm2780_vm8 = vcmp.eq.f32.partialorder %v2776_v0, inf  ;;  %v2783_v14 = vand.u32 2147483648, %v2776_v0  ;;  %vm2782_vm9 = vcmp.eq.f32.partialorder %v2776_v0, 0.0 }
0x29ff   :  { %9560 = vrsqrt.f32 %v2777_v8  ;;  %v3885_v40 = vsel %vm102_vm1, %v3881_v39, 0.0  ;;  %vm2787_vm10 = vcmp.eq.f32.partialorder %v2777_v8, inf  ;;  %v2790_v48 = vand.u32 2147483648, %v2777_v8 }
0x2a00   :  { %3886 = vadd.xlane.f32.xlu1 %v3885_v40  ;;  %vm2789_vm11 = vcmp.eq.f32.partialorder %v2777_v8, 0.0 }
0x2a07   :  { %v9559_v42 = vpop.eup %9558 }
0x2a08   :  { %v2779_v38 = vmul.f32 %v9559_v42, %v2776_v0 }
0x2a09   :  { %v9561_v2 = vpop.eup %9560 }
0x2a0a   :  { %v2781_v44 = vsel %vm2780_vm8, %v2776_v0, %v2779_v38  ;;  %v2786_v46 = vmul.f32 %v9561_v2, %v2777_v8 }
0x2a0b   :  { %v2784_v45 = vsel %vm2782_vm9, %v2783_v14, %v2781_v44 }
0x2a0c   :  { %v2792_v47 = vadd.f32 1e-06, %v2784_v45  ;;  %v2788_v49 = vsel %vm2787_vm10, %v2777_v8, %v2786_v46 }
0x2a0d   :  { %v2791_v50 = vsel %vm2789_vm11, %v2790_v48, %v2788_v49 }
0x2a0e   :  { %9562 = vrcp.f32 %v2792_v47  ;;  %v2793_v51 = vadd.f32 1e-06, %v2791_v50 }
0x2a10   :  { %9564 = vrcp.f32 %v2793_v51 }
0x2a11   :  { %3999 = vrot.lane.b32.xlu1 %v10749_v35, %s9768_s17 }
0x2a14   :  { %3997 = vrot.lane.b32.xlu0 %v10742_v13, %s9768_s17 }
0x2a15   :  { %4003 = vrot.lane.b32.xlu1 %v10782_v41, %s9768_s17 }
0x2a18   :  { %v9563_v52 = vpop.eup %9562 }
0x2a19   :  { %v2795_v6 = vmul.f32 %v9563_v52, %v10725_v29 }
0x2a1a   :  { %v9565_v19 = vpop.eup %9564 }
0x2a1b   :  { %v2804_v21 = vmul.f32 %v8026_v57, %v2795_v6  ;;  %v2797_v22 = vmul.f32 %v9565_v19, %v10727_v32  ;;  %v10836_v19 = vld [vmem:[%s11689_s3] ss:$0 sm:$0xff] }
0x2a1d   :  { %v2812_v63 = vadd.f32 %v8027_v18, %v2804_v21  ;;  %v2805_v12 = vmul.f32 %v8026_v57, %v2797_v22 }
0x2a1f   :  { %7898 = vst.msk [vmem:[#allocation4] sm:$0xff] %vm102_vm1, %v2812_v63  ;;  %v2813_v23 = vadd.f32 %v8027_v18, %v2805_v12 }
0x2a21   :  { %v10776_v59 = vpack.c.bf16 %v2813_v23, %v2812_v63  ;;  %7899 = vst.msk [vmem:[#allocation4 + $0x8] sm:$0xff] %vm102_vm1, %v2813_v23 }
0x2a8b   :  { %v3884_v24 = vpop.xlane.xlu0 %3883 }
0x2a8c   :  { %v3888_v16 = vmul.f32 0.032258064, %v3884_v24  ;;  %v10842_v24 = vld [vmem:[%s11689_s3 + $0x1] ss:$0 sm:$0xff] }
0x2a8d   :  { %v3887_v3 = vpop.xlane.xlu1 %3886 }
0x2a8e   :  { %9566 = vrsqrt.f32 %v3888_v16  ;;  %v3889_v61 = vmul.f32 0.032258064, %v3887_v3  ;;  %vm3892_vm12 = vcmp.eq.f32.partialorder %v3888_v16, inf  ;;  %v3895_v29 = vand.u32 2147483648, %v3888_v16 }
0x2a8f   :  { %v3998_v17 = vpop.permute.xlu0 %3997  ;;  %vm3894_vm13 = vcmp.eq.f32.partialorder %v3888_v16, 0.0 }
0x2a90   :  { %8877 = vmatpush3.bf16.msra.mxu1 %v3998_v17  ;;  %9568 = vrsqrt.f32 %v3889_v61  ;;  %vm3899_vm14 = vcmp.eq.f32.partialorder %v3889_v61, inf  ;;  %v3902_v20 = vand.u32 2147483648, %v3889_v61  ;;  %vm3901_vm15 = vcmp.eq.f32.partialorder %v3889_v61, 0.0 }
0x2a91   :  { %8878 = vmatprep.subr.bf16.mxu1 %v9766_v1  ;;  %v4000_v27 = vpop.permute.xlu1 %3999 }
0x2a94   :  { %8879 = vmatpush3.bf16.msra.mxu1 %v4000_v27 }
0x2a95   :  { %8890 = vmatprep.subr.bf16.mxu1 %v9766_v1 }
0x2a97   :  { %8881 = vmatmul.mubr.msk.bf16.vlgmr.msra.gmra.mrb[124].mxu1 %vm102_vm1, %v10776_v59 }
0x2a98   :  { %v9567_v10 = vpop.eup %9566  ;;  %8892 = vmatprep.mubr.msk.bf16.mxu1 %vm9767_vm0, %v9766_v1 }
0x2a99   :  { %v3891_v56 = vmul.f32 %v9567_v10, %v3888_v16 }
0x2a9a   :  { %v9569_v54 = vpop.eup %9568 }
0x2a9b   :  { %v3893_v31 = vsel %vm3892_vm12, %v3888_v16, %v3891_v56  ;;  %v3898_v32 = vmul.f32 %v9569_v54, %v3889_v61 }
0x2a9c   :  { %v3896_v53 = vsel %vm3894_vm13, %v3895_v29, %v3893_v31 }
0x2a9d   :  { %v3904_v28 = vadd.f32 1e-06, %v3896_v53  ;;  %v3900_v55 = vsel %vm3899_vm14, %v3889_v61, %v3898_v32 }
0x2a9e   :  { %v3903_v5 = vsel %vm3901_vm15, %v3902_v20, %v3900_v55 }
0x2a9f   :  { %9570 = vrcp.f32 %v3904_v28  ;;  %v3905_v43 = vadd.f32 1e-06, %v3903_v5 }
0x2aa1   :  { %9572 = vrcp.f32 %v3905_v43 }
0x2aa9   :  { %v9571_v9 = vpop.eup %9570 }
0x2aaa   :  { %v3907_v30 = vmul.f32 %v9571_v9, %v10753_v58  ;;  %v4004_v58 = vpop.permute.xlu1 %4003 }
0x2aab   :  { %v9573_v26 = vpop.eup %9572 }
0x2aac   :  { %v3909_v60 = vmul.f32 %v9573_v26, %v10755_v37  ;;  %v3916_v11 = vmul.f32 %v8056_v34, %v3907_v30 }
0x2aae   :  { %v3917_v33 = vmul.f32 %v8056_v34, %v3909_v60  ;;  %v10800_v25 = vadd.f32 %v8057_v36, %v3916_v11 }
0x2ab0   :  { %v10802_v4 = vadd.f32 %v8057_v36, %v3917_v33 }
0x2ab2   :  { %v3933_v0 = vpack.c.bf16 %v10802_v4, %v10800_v25 }
0x2ab4   :  { %8873 = vmatmul.mubr.msk.bf16.vlgmr.msra.gmra.mrb[108].mxu0 %vm102_vm1, %v3933_v0 }
0x2ab5   :  { %8886 = vmatprep.mubr.msk.bf16.mxu0 %vm9767_vm0, %v9766_v1 }
0x2b6a   :  { %v4043_v37 = vpop.f32.mrb[124].mxu1 }
0x2b6b   :  { %v4044_v62 = vadd.f32 %v4043_v37, %v4004_v58  ;;  %v8882_v7 = vpop.f32.mrb[125].mxu1 }
0x2b6c   :  { %v4046_v8 = vpop.f32.mrb[126].mxu1 }
0x2b6d   :  { %v10809_v15 = vpack.c.bf16 %v4044_v62, %v4044_v62  ;;  %v4047_v39 = vadd.f32 %v4046_v8, %v4004_v58  ;;  %v8883_v40 = vpop.f32.mrb[127].mxu1 }
0x2b6f   :  { %v10811_v42 = vpack.c.bf16 %v4047_v39, %v4047_v39  ;;  %v4058_v38 = vsel %vm152_vm2, %v10809_v15, 0 }
0x2b70   :  { %8885 = vmatpush3.bf16.xpose.msra.mxu0 %v4058_v38 }
0x2b71   :  { %v4104_v14 = vsel %vm152_vm2, %v10811_v42, 0  ;;  %8896 = vmatprep.subr.bf16.mxu0 %v9766_v1 }
0x2b72   :  { %8891 = vmatpush3.bf16.xpose.msra.mxu1 %v4104_v14 }
0x2b73   :  { %8902 = vmatprep.subr.bf16.mxu1 %v9766_v1 }
0x2b87   :  { %v3989_v2 = vpop.f32.mrb[108].mxu0 }
0x2b88   :  { %v3990_v44 = vadd.f32 %v10782_v41, %v3989_v2  ;;  %v8874_v45 = vpop.f32.mrb[109].mxu0 }
0x2b89   :  { %v3992_v46 = vpop.f32.mrb[110].mxu0 }
0x2b8a   :  { %v10820_v47 = vpack.c.bf16 %v3990_v44, %v3990_v44  ;;  %v3993_v48 = vadd.f32 %v10782_v41, %v3992_v46  ;;  %v8875_v49 = vpop.f32.mrb[111].mxu0 }
0x2b8c   :  { %v10823_v50 = vpack.c.bf16 %v3993_v48, %v3993_v48  ;;  %8887 = vmatmul.mubr.msk.bf16.vlgmr.msra.gmra.mrb[112].mxu0 %vm152_vm2, %v10820_v47 }
0x2b8d   :  { %8898 = vmatprep.mubr.msk.bf16.mxu0 %vm9767_vm0, %v9766_v1 }
0x2b8e   :  { %8893 = vmatmul.mubr.msk.bf16.vlgmr.msra.gmra.mrb[128].mxu1 %vm152_vm2, %v10823_v50 }
0x2b8f   :  { %8904 = vmatprep.mubr.msk.bf16.mxu1 %vm9767_vm0, %v9766_v1 }
0x2c5f   :  { %v4094_v51 = vpop.f32.mrb[112].mxu0 }
0x2c60   :  { %v4146_v52 = vmul.f32 0.35355338, %v4094_v51  ;;  %v8888_v57 = vpop.f32.mrb[113].mxu0 }
0x2c61   :  { %v4097_v6 = vpop.f32.mrb[114].mxu0  ;;  %v4140_v18 = vpop.f32.mrb[128].mxu1 }
0x2c62   :  { %v4148_v21 = vadd.f32 %v10836_v19, %v4146_v52  ;;  %v4147_v22 = vmul.f32 0.35355338, %v4140_v18  ;;  %v8889_v63 = vpop.f32.mrb[115].mxu0  ;;  %v8894_v12 = vpop.f32.mrb[129].mxu1 }
0x2c63   :  { %v4143_v23 = vpop.f32.mrb[130].mxu1 }
0x2c64   :  { %v4149_v16 = vadd.f32 %v10842_v24, %v4147_v22  ;;  %v8895_v3 = vpop.f32.mrb[131].mxu1  ;;  %v4150_v61 = vsel %vm152_vm2, %v4148_v21, -inf }
0x2c65   :  { %4151 = vmax.xlane.f32.xlu0 %v4150_v61 }
0x2c66   :  { %v4153_v17 = vsel %vm152_vm2, %v4149_v16, -inf }
0x2c67   :  { %4154 = vmax.xlane.f32.xlu1 %v4153_v17 }
0x2c78   :  { %4175 = vrot.lane.b32.xlu1 %v10809_v15, %s9768_s17 }
0x2c7c   :  { %4275 = vrot.lane.b32.xlu1 %v10809_v15, %s11722_s24 }
0x2c80   :  { %4326 = vrot.lane.b32.xlu1 %v10811_v42, %s11722_s24 }
0x2c84   :  { %4324 = vrot.lane.b32.xlu1 %v10823_v50, %s11722_s24 }
0x2cf2   :  { %v4152_v27 = vpop.xlane.xlu0 %4151 }
0x2cf3   :  { %v4156_v10 = vsub.f32 %v4148_v21, %v4152_v27 }
0x2cf4   :  { %v4155_v56 = vpop.xlane.xlu1 %4154 }
0x2cf5   :  { %v4158_v29 = vmul.f32 1.442695, %v4156_v10  ;;  %v4157_v54 = vsub.f32 %v4149_v16, %v4155_v56 }
0x2cf7   :  { %9574 = vpow2.f32 %v4158_v29  ;;  %v4160_v31 = vmul.f32 1.442695, %v4157_v54 }
0x2cf8   :  { %v4176_v53 = vpop.permute.xlu1 %4175 }
0x2cf9   :  { %9576 = vpow2.f32 %v4160_v31  ;;  %v4181_v32 = vsel %vm281_vm3, %v4176_v53, 0 }
0x2cfa   :  { %8897 = vmatpush3.bf16.msra.mxu0 %v4181_v32 }
0x2cfb   :  { %8908 = vmatprep.subr.bf16.mxu0 %v9766_v1 }
0x2cfc   :  { %v4276_v60 = vpop.permute.xlu1 %4275 }
0x2cfd   :  { %v4281_v0 = vsel %vm152_vm2, %v4276_v60, 0 }
0x2d00   :  { %v4327_v37 = vpop.permute.xlu1 %4326 }
0x2d01   :  { %v9575_v28 = vpop.eup %9574  ;;  %v4332_v7 = vsel %vm152_vm2, %v4327_v37, 0 }
0x2d02   :  { %v4162_v20 = vsel %vm152_vm2, %v9575_v28, 0.0 }
0x2d03   :  { %v9577_v55 = vpop.eup %9576  ;;  %4163 = vadd.xlane.f32.xlu0 %v4162_v20 }
0x2d04   :  { %v4165_v5 = vsel %vm152_vm2, %v9577_v55, 0.0  ;;  %v4325_v39 = vpop.permute.xlu1 %4324 }
0x2d07   :  { %4166 = vadd.xlane.f32.xlu0 %v4165_v5 }
0x2d1d   :  { %4224 = vrot.lane.b32.xlu0 %v10811_v42, %s9768_s17 }
0x2d21   :  { %4273 = vrot.lane.b32.xlu0 %v10820_v47, %s11722_s24 }
0x2d90   :  { %v4164_v43 = vpop.xlane.xlu0 %4163 }
0x2d91   :  { %9578 = vrcp.f32 %v4164_v43 }
0x2d94   :  { %v4167_v9 = vpop.xlane.xlu0 %4166 }
0x2d95   :  { %9580 = vrcp.f32 %v4167_v9 }
0x2d98   :  { %v4225_v34 = vpop.permute.xlu0 %4224 }
0x2d99   :  { %v4230_v30 = vsel %vm281_vm3, %v4225_v34, 0 }
0x2d9a   :  { %8903 = vmatpush3.bf16.msra.mxu1 %v4230_v30 }
0x2d9b   :  { %v9579_v26 = vpop.eup %9578  ;;  %8914 = vmatprep.subr.bf16.mxu1 %v9766_v1 }
0x2d9c   :  { %v4169_v11 = vmul.f32 %v9579_v26, %v9575_v28  ;;  %v4274_v8 = vpop.permute.xlu0 %4273 }
0x2d9e   :  { %v4172_v36 = vpack.c.bf16 %v4169_v11, %v4169_v11 }
0x2d9f   :  { %v9581_v33 = vpop.eup %9580 }
0x2da0   :  { %8899 = vmatmul.mubr.msk.bf16.vlgmr.msra.gmra.mrb[116].mxu0 %vm152_vm2, %v4172_v36  ;;  %v4171_v58 = vmul.f32 %v9581_v33, %v9577_v55 }
0x2da1   :  { %8909 = vmatpush3.bf16.xpose.msra.mxu0 %v4281_v0  ;;  %8910 = vmatprep.mubr.msk.bf16.mxu0 %vm9767_vm0, %v9766_v1 }
0x2da2   :  { %v4173_v62 = vpack.c.bf16 %v4171_v58, %v4171_v58  ;;  %8920 = vmatprep.subr.bf16.mxu0 %v9766_v1 }
0x2da4   :  { %8905 = vmatmul.mubr.msk.bf16.vlgmr.msra.gmra.mrb[132].mxu1 %vm152_vm2, %v4173_v62 }
0x2da5   :  { %8915 = vmatpush3.bf16.xpose.msra.mxu1 %v4332_v7  ;;  %8916 = vmatprep.mubr.msk.bf16.mxu1 %vm9767_vm0, %v9766_v1 }
0x2da6   :  { %8926 = vmatprep.subr.bf16.mxu1 %v9766_v1 }
0x2da8   :  { %8911 = vmatmul.mubr.msk.bf16.vlgmr.msra.gmra.mrb[120].mxu0 %vm152_vm2, %v4274_v8 }
0x2da9   :  { %8922 = vmatprep.mubr.msk.bf16.mxu0 %vm9767_vm0, %v9766_v1 }
0x2dac   :  { %8917 = vmatmul.mubr.msk.bf16.vlgmr.msra.gmra.mrb[136].mxu1 %vm152_vm2, %v4325_v39 }
0x2dad   :  { %8928 = vmatprep.mubr.msk.bf16.mxu1 %vm9767_vm0, %v9766_v1 }
0x2e73   :  { %v10881_v40 = vpop.f32.mrb[116].mxu0 }
0x2e74   :  { %v8900_v38 = vpop.f32.mrb[117].mxu0 }
0x2e75   :  { %v4220_v14 = vpop.f32.mrb[118].mxu0 }
0x2e76   :  { %v8901_v2 = vpop.f32.mrb[119].mxu0 }
0x2e77   :  { %v10883_v44 = vpop.f32.mrb[132].mxu1 }
0x2e78   :  { %v8906_v45 = vpop.f32.mrb[133].mxu1 }
0x2e79   :  { %v4269_v46 = vpop.f32.mrb[134].mxu1 }
0x2e7a   :  { %v8907_v48 = vpop.f32.mrb[135].mxu1 }
0x2e7b   :  { %v4317_v49 = vpop.f32.mrb[120].mxu0 }
0x2e7c   :  { %v4374_v51 = vmul.f32 0.35355338, %v4317_v49  ;;  %v8912_v52 = vpop.f32.mrb[121].mxu0 }
0x2e7d   :  { %v4320_v57 = vpop.f32.mrb[122].mxu0 }
0x2e7e   :  { %v4376_v6 = vadd.f32 %v10836_v19, %v4374_v51  ;;  %v8913_v18 = vpop.f32.mrb[123].mxu0 }
0x2e7f   :  { %v4368_v21 = vpop.f32.mrb[136].mxu1 }
0x2e80   :  { %v4375_v22 = vmul.f32 0.35355338, %v4368_v21  ;;  %v8918_v63 = vpop.f32.mrb[137].mxu1  ;;  %v4378_v12 = vsel %vm152_vm2, %v4376_v6, -inf }
0x2e81   :  { %4379 = vmax.xlane.f32.xlu0 %v4378_v12  ;;  %v4371_v23 = vpop.f32.mrb[138].mxu1 }
0x2e82   :  { %v4377_v16 = vadd.f32 %v10842_v24, %v4375_v22  ;;  %v8919_v3 = vpop.f32.mrb[139].mxu1 }
0x2e84   :  { %v4381_v61 = vsel %vm152_vm2, %v4377_v16, -inf }
0x2e85   :  { %4382 = vmax.xlane.f32.xlu1 %v4381_v61 }
0x2e96   :  { %4402 = vrot.lane.b32.xlu1 %v10809_v15, %s11724_s23 }
0x2e9a   :  { %4500 = vrot.lane.b32.xlu1 %v10809_v15, %s11731_s16 }
0x2e9e   :  { %4550 = vrot.lane.b32.xlu1 %v10811_v42, %s11731_s16 }
0x2ea2   :  { %4548 = vrot.lane.b32.xlu1 %v10823_v50, %s11731_s16 }
0x2f0e   :  { %v4380_v17 = vpop.xlane.xlu0 %4379 }
0x2f0f   :  { %v4384_v27 = vsub.f32 %v4376_v6, %v4380_v17 }
0x2f11   :  { %v4386_v10 = vmul.f32 1.442695, %v4384_v27 }
0x2f12   :  { %v4383_v56 = vpop.xlane.xlu1 %4382 }
0x2f13   :  { %9582 = vpow2.f32 %v4386_v10  ;;  %v4385_v29 = vsub.f32 %v4377_v16, %v4383_v56 }
0x2f15   :  { %v4388_v54 = vmul.f32 1.442695, %v4385_v29 }
0x2f16   :  { %v4403_v31 = vpop.permute.xlu1 %4402 }
0x2f17   :  { %9584 = vpow2.f32 %v4388_v54  ;;  %v4408_v53 = vsel %vm281_vm3, %v4403_v31, 0 }
0x2f18   :  { %8921 = vmatpush3.bf16.msra.mxu0 %v4408_v53 }
0x2f19   :  { %8932 = vmatprep.subr.bf16.mxu0 %v9766_v1 }
0x2f1a   :  { %v4501_v26 = vpop.permute.xlu1 %4500 }
0x2f1b   :  { %v4506_v33 = vsel %vm152_vm2, %v4501_v26, 0 }
0x2f1d   :  { %v9583_v32 = vpop.eup %9582 }
0x2f1e   :  { %v4390_v28 = vsel %vm152_vm2, %v9583_v32, 0.0  ;;  %v4551_v58 = vpop.permute.xlu1 %4550 }
0x2f1f   :  { %4391 = vadd.xlane.f32.xlu0 %v4390_v28  ;;  %v4556_v62 = vsel %vm152_vm2, %v4551_v58, 0 }
0x2f21   :  { %v9585_v20 = vpop.eup %9584 }
0x2f22   :  { %v4393_v55 = vsel %vm152_vm2, %v9585_v20, 0.0  ;;  %v4549_v8 = vpop.permute.xlu1 %4548 }
0x2f23   :  { %4394 = vadd.xlane.f32.xlu0 %v4393_v55 }
0x2f39   :  { %4450 = vrot.lane.b32.xlu0 %v10811_v42, %s11724_s23 }
0x2f3d   :  { %4498 = vrot.lane.b32.xlu0 %v10820_v47, %s11731_s16 }
0x2fac   :  { %v4392_v5 = vpop.xlane.xlu0 %4391 }
0x2fad   :  { %9586 = vrcp.f32 %v4392_v5 }
0x2fb0   :  { %v4395_v43 = vpop.xlane.xlu0 %4394 }
0x2fb1   :  { %9588 = vrcp.f32 %v4395_v43 }
0x2fb4   :  { %v4451_v9 = vpop.permute.xlu0 %4450 }
0x2fb5   :  { %v4456_v34 = vsel %vm281_vm3, %v4451_v9, 0 }
0x2fb6   :  { %8927 = vmatpush3.bf16.msra.mxu1 %v4456_v34 }
0x2fb7   :  { %v9587_v30 = vpop.eup %9586  ;;  %8938 = vmatprep.subr.bf16.mxu1 %v9766_v1 }
0x2fb8   :  { %v4397_v60 = vmul.f32 %v9587_v30, %v9583_v32  ;;  %v4499_v7 = vpop.permute.xlu0 %4498 }
0x2fba   :  { %v4400_v11 = vpack.c.bf16 %v4397_v60, %v4397_v60 }
0x2fbb   :  { %v9589_v36 = vpop.eup %9588 }
0x2fbc   :  { %8923 = vmatmul.mubr.msk.bf16.vlgmr.msra.gmra.mrb[124].mxu0 %vm152_vm2, %v4400_v11  ;;  %v4399_v0 = vmul.f32 %v9589_v36, %v9585_v20 }
0x2fbd   :  { %8933 = vmatpush3.bf16.xpose.msra.mxu0 %v4506_v33  ;;  %8934 = vmatprep.mubr.msk.bf16.mxu0 %vm9767_vm0, %v9766_v1 }
0x2fbe   :  { %v4401_v37 = vpack.c.bf16 %v4399_v0, %v4399_v0  ;;  %8944 = vmatprep.subr.bf16.mxu0 %v9766_v1 }
0x2fc0   :  { %8929 = vmatmul.mubr.msk.bf16.vlgmr.msra.gmra.mrb[140].mxu1 %vm152_vm2, %v4401_v37 }
0x2fc1   :  { %8939 = vmatpush3.bf16.xpose.msra.mxu1 %v4556_v62  ;;  %8940 = vmatprep.mubr.msk.bf16.mxu1 %vm9767_vm0, %v9766_v1 }
0x2fc2   :  { %8950 = vmatprep.subr.bf16.mxu1 %v9766_v1 }
0x2fc4   :  { %8935 = vmatmul.mubr.msk.bf16.vlgmr.msra.gmra.mrb[128].mxu0 %vm152_vm2, %v4499_v7 }
0x2fc5   :  { %8946 = vmatprep.mubr.msk.bf16.mxu0 %vm9767_vm0, %v9766_v1 }
0x2fc8   :  { %8941 = vmatmul.mubr.msk.bf16.vlgmr.msra.gmra.mrb[144].mxu1 %vm152_vm2, %v4549_v8 }
0x2fc9   :  { %8952 = vmatprep.mubr.msk.bf16.mxu1 %vm9767_vm0, %v9766_v1 }
0x308f   :  { %v10923_v39 = vpop.f32.mrb[124].mxu0 }
0x3090   :  { %v8924_v38 = vpop.f32.mrb[125].mxu0 }
0x3091   :  { %v4447_v14 = vpop.f32.mrb[126].mxu0 }
0x3092   :  { %v8925_v2 = vpop.f32.mrb[127].mxu0 }
0x3093   :  { %v10925_v45 = vpop.f32.mrb[140].mxu1 }
0x3094   :  { %v9341_v46 = vpack.i.bf16 %v10925_v45, %v10923_v39  ;;  %v8930_v48 = vpop.f32.mrb[141].mxu1 }
0x3095   :  { %v4495_v49 = vpop.f32.mrb[142].mxu1 }
0x3096   :  { %v8931_v51 = vpop.f32.mrb[143].mxu1 }
0x3097   :  { %v4542_v52 = vpop.f32.mrb[128].mxu0 }
0x3098   :  { %v4598_v57 = vmul.f32 0.35355338, %v4542_v52  ;;  %v8936_v6 = vpop.f32.mrb[129].mxu0 }
0x3099   :  { %v4545_v18 = vpop.f32.mrb[130].mxu0 }
0x309a   :  { %v4600_v21 = vadd.f32 %v10836_v19, %v4598_v57  ;;  %v8937_v22 = vpop.f32.mrb[131].mxu0 }
0x309b   :  { %v4592_v63 = vpop.f32.mrb[144].mxu1 }
0x309c   :  { %v4599_v12 = vmul.f32 0.35355338, %v4592_v63  ;;  %v8942_v23 = vpop.f32.mrb[145].mxu1  ;;  %v4602_v16 = vsel %vm152_vm2, %v4600_v21, -inf }
0x309d   :  { %4603 = vmax.xlane.f32.xlu0 %v4602_v16  ;;  %v4595_v3 = vpop.f32.mrb[146].mxu1 }
0x309e   :  { %v4601_v61 = vadd.f32 %v10842_v24, %v4599_v12  ;;  %v8943_v17 = vpop.f32.mrb[147].mxu1 }
0x30a0   :  { %v4605_v27 = vsel %vm152_vm2, %v4601_v61, -inf }
0x30a1   :  { %4606 = vmax.xlane.f32.xlu1 %v4605_v27 }
0x30b2   :  { %4626 = vrot.lane.b32.xlu1 %v10809_v15, %s11718_s26 }
0x30b6   :  { %4724 = vrot.lane.b32.xlu1 %v10809_v15, %s11734_s18 }
0x30ba   :  { %4774 = vrot.lane.b32.xlu1 %v10811_v42, %s11734_s18 }
0x30be   :  { %4772 = vrot.lane.b32.xlu1 %v10823_v50, %s11734_s18 }
0x312a   :  { %v4604_v10 = vpop.xlane.xlu0 %4603 }
0x312b   :  { %v4608_v56 = vsub.f32 %v4600_v21, %v4604_v10 }
0x312d   :  { %v4610_v29 = vmul.f32 1.442695, %v4608_v56 }
0x312e   :  { %v4607_v54 = vpop.xlane.xlu1 %4606 }
0x312f   :  { %9590 = vpow2.f32 %v4610_v29  ;;  %v4609_v31 = vsub.f32 %v4601_v61, %v4607_v54 }
0x3131   :  { %v4612_v53 = vmul.f32 1.442695, %v4609_v31 }
0x3132   :  { %v4627_v32 = vpop.permute.xlu1 %4626 }
0x3133   :  { %9592 = vpow2.f32 %v4612_v53  ;;  %v4632_v28 = vsel %vm281_vm3, %v4627_v32, 0 }
0x3134   :  { %8945 = vmatpush3.bf16.msra.mxu0 %v4632_v28 }
0x3135   :  { %8956 = vmatprep.subr.bf16.mxu0 %v9766_v1 }
0x3136   :  { %v4725_v60 = vpop.permute.xlu1 %4724 }
0x3137   :  { %v4730_v0 = vsel %vm152_vm2, %v4725_v60, 0 }
0x3139   :  { %v9591_v20 = vpop.eup %9590 }
0x313a   :  { %v4614_v55 = vsel %vm152_vm2, %v9591_v20, 0.0  ;;  %v4775_v58 = vpop.permute.xlu1 %4774 }
0x313b   :  { %4615 = vadd.xlane.f32.xlu0 %v4614_v55  ;;  %v4780_v62 = vsel %vm152_vm2, %v4775_v58, 0 }
0x313d   :  { %v9593_v5 = vpop.eup %9592 }
0x313e   :  { %v4617_v50 = vsel %vm152_vm2, %v9593_v5, 0.0  ;;  %v4773_v8 = vpop.permute.xlu1 %4772 }
0x313f   :  { %4618 = vadd.xlane.f32.xlu0 %v4617_v50 }
0x3155   :  { %4674 = vrot.lane.b32.xlu0 %v10811_v42, %s11718_s26 }
0x3159   :  { %4722 = vrot.lane.b32.xlu0 %v10820_v47, %s11734_s18 }
0x31c8   :  { %v4616_v43 = vpop.xlane.xlu0 %4615 }
0x31c9   :  { %9594 = vrcp.f32 %v4616_v43 }
0x31cc   :  { %v4619_v9 = vpop.xlane.xlu0 %4618 }
0x31cd   :  { %9596 = vrcp.f32 %v4619_v9 }
0x31d0   :  { %v4675_v34 = vpop.permute.xlu0 %4674 }
0x31d1   :  { %v4680_v30 = vsel %vm281_vm3, %v4675_v34, 0 }
0x31d2   :  { %8951 = vmatpush3.bf16.msra.mxu1 %v4680_v30 }
0x31d3   :  { %v9595_v26 = vpop.eup %9594  ;;  %8962 = vmatprep.subr.bf16.mxu1 %v9766_v1 }
0x31d4   :  { %v4621_v11 = vmul.f32 %v9595_v26, %v9591_v20  ;;  %v4723_v7 = vpop.permute.xlu0 %4722 }
0x31d6   :  { %v4624_v36 = vpack.c.bf16 %v4621_v11, %v4621_v11 }
0x31d7   :  { %v9597_v33 = vpop.eup %9596 }
0x31d8   :  { %8947 = vmatmul.mubr.msk.bf16.vlgmr.msra.gmra.mrb[132].mxu0 %vm152_vm2, %v4624_v36  ;;  %v4623_v47 = vmul.f32 %v9597_v33, %v9593_v5 }
0x31d9   :  { %8957 = vmatpush3.bf16.xpose.msra.mxu0 %v4730_v0  ;;  %8958 = vmatprep.mubr.msk.bf16.mxu0 %vm9767_vm0, %v9766_v1 }
0x31da   :  { %v4625_v37 = vpack.c.bf16 %v4623_v47, %v4623_v47  ;;  %8968 = vmatprep.subr.bf16.mxu0 %v9766_v1 }
0x31dc   :  { %8953 = vmatmul.mubr.msk.bf16.vlgmr.msra.gmra.mrb[148].mxu1 %vm152_vm2, %v4625_v37 }
0x31dd   :  { %8963 = vmatpush3.bf16.xpose.msra.mxu1 %v4780_v62  ;;  %8964 = vmatprep.mubr.msk.bf16.mxu1 %vm9767_vm0, %v9766_v1 }
0x31de   :  { %8974 = vmatprep.subr.bf16.mxu1 %v9766_v1 }
0x31e0   :  { %8959 = vmatmul.mubr.msk.bf16.vlgmr.msra.gmra.mrb[136].mxu0 %vm152_vm2, %v4723_v7 }
0x31e1   :  { %8970 = vmatprep.mubr.msk.bf16.mxu0 %vm9767_vm0, %v9766_v1 }
0x31e4   :  { %8965 = vmatmul.mubr.msk.bf16.vlgmr.msra.gmra.mrb[152].mxu1 %vm152_vm2, %v4773_v8 }
0x31e5   :  { %8976 = vmatprep.mubr.msk.bf16.mxu1 %vm9767_vm0, %v9766_v1 }
0x32ab   :  { %v4668_v38 = vpop.f32.mrb[132].mxu0 }
0x32ac   :  { %v8948_v14 = vpop.f32.mrb[133].mxu0 }
0x32ad   :  { %v4671_v2 = vpop.f32.mrb[134].mxu0 }
0x32ae   :  { %v8949_v48 = vpop.f32.mrb[135].mxu0 }
0x32af   :  { %v4716_v49 = vpop.f32.mrb[148].mxu1 }
0x32b0   :  { %v9346_v51 = vpack.i.bf16 %v4716_v49, %v4668_v38  ;;  %v8954_v52 = vpop.f32.mrb[149].mxu1 }
0x32b1   :  { %v4719_v57 = vpop.f32.mrb[150].mxu1 }
0x32b2   :  { %v8955_v6 = vpop.f32.mrb[151].mxu1 }
0x32b3   :  { %v4766_v18 = vpop.f32.mrb[136].mxu0 }
0x32b4   :  { %v4822_v21 = vmul.f32 0.35355338, %v4766_v18  ;;  %v8960_v22 = vpop.f32.mrb[137].mxu0 }
0x32b5   :  { %v4769_v63 = vpop.f32.mrb[138].mxu0 }
0x32b6   :  { %v4824_v12 = vadd.f32 %v10836_v19, %v4822_v21  ;;  %v8961_v23 = vpop.f32.mrb[139].mxu0 }
0x32b7   :  { %v4816_v16 = vpop.f32.mrb[152].mxu1 }
0x32b8   :  { %v4823_v3 = vmul.f32 0.35355338, %v4816_v16  ;;  %v8966_v61 = vpop.f32.mrb[153].mxu1  ;;  %v4826_v17 = vsel %vm152_vm2, %v4824_v12, -inf }
0x32b9   :  { %4827 = vmax.xlane.f32.xlu0 %v4826_v17  ;;  %v4819_v27 = vpop.f32.mrb[154].mxu1 }
0x32ba   :  { %v4825_v10 = vadd.f32 %v10842_v24, %v4823_v3  ;;  %v8967_v56 = vpop.f32.mrb[155].mxu1 }
0x32bc   :  { %v4829_v29 = vsel %vm152_vm2, %v4825_v10, -inf }
0x32bd   :  { %4830 = vmax.xlane.f32.xlu1 %v4829_v29 }
0x32ce   :  { %4850 = vrot.lane.b32.xlu1 %v10809_v15, %s11733_s19 }
0x32d2   :  { %4977 = vrot.lane.b32.xlu1 %v10742_v13, %s11727_s21 }
0x32d6   :  { %9342 = vrot.lane.b32.xlu1 %v9341_v46, %s11728_s1 }
0x3346   :  { %v4828_v19 = vpop.xlane.xlu0 %4827 }
0x3347   :  { %v4832_v54 = vsub.f32 %v4824_v12, %v4828_v19 }
0x3349   :  { %v4834_v31 = vmul.f32 1.442695, %v4832_v54 }
0x334a   :  { %v4831_v53 = vpop.xlane.xlu1 %4830 }
0x334b   :  { %9598 = vpow2.f32 %v4834_v31  ;;  %v4833_v24 = vsub.f32 %v4825_v10, %v4831_v53 }
0x334d   :  { %v4836_v32 = vmul.f32 1.442695, %v4833_v24 }
0x334e   :  { %v4851_v28 = vpop.permute.xlu1 %4850 }
0x334f   :  { %9600 = vpow2.f32 %v4836_v32  ;;  %v4856_v20 = vsel %vm281_vm3, %v4851_v28, 0 }
0x3350   :  { %8969 = vmatpush3.bf16.msra.mxu0 %v4856_v20 }
0x3351   :  { %8980 = vmatprep.subr.bf16.mxu0 %v9766_v1 }
0x3355   :  { %v9599_v13 = vpop.eup %9598 }
0x3356   :  { %v4838_v15 = vsel %vm152_vm2, %v9599_v13, 0.0 }
0x3357   :  { %4839 = vadd.xlane.f32.xlu0 %v4838_v15  ;;  %v9415_v15 = vld [vmem:[%s11692_s6 + $0x28] sm:$0xff]  }
0x3359   :  { %v9601_v39 = vpop.eup %9600 }
0x335a   :  { %v4841_v45 = vsel %vm152_vm2, %v9601_v39, 0.0 }
0x335b   :  { %4842 = vadd.xlane.f32.xlu0 %v4841_v45  ;;  %v9417_v45 = vld [vmem:[%s11694_s8 + $0x8] sm:$0xff]  }
0x3371   :  { %4898 = vrot.lane.b32.xlu0 %v10811_v42, %s11733_s19  ;;  %v4978_v42 = vpop.permute.xlu1 %4977 }
0x3375   :  { %9347 = vrot.lane.b32.xlu0 %v9346_v51, %s11729_s14  ;;  %v9343_v38 = vpop.permute.xlu1 %9342 }
0x3376   :  { %v9345_v14 = vunpack.i.h.bf16 %v9343_v38  ;;  %v9344_v2 = vunpack.i.l.bf16 %v9343_v38 }
0x3378   :  { %v4971_v52 = vsel %vm152_vm2, %v10883_v44, %v9345_v14  ;;  %v4970_v57 = vsel %vm152_vm2, %v10881_v40, %v9344_v2 }
0x3379   :  { %4979 = vrot.lane.b32.xlu0 %v10749_v35, %s11727_s21 }
0x33e4   :  { %v4840_v46 = vpop.xlane.xlu0 %4839 }
0x33e5   :  { %9602 = vrcp.f32 %v4840_v46  ;;  %v9418_v46 = vld [vmem:[%s11694_s8 + $0x10] sm:$0xff]  }
0x33e8   :  { %v4843_v55 = vpop.xlane.xlu0 %4842 }
0x33e9   :  { %9604 = vrcp.f32 %v4843_v55  ;;  %v9420_v55 = vld [vmem:[%s11694_s8 + $0x20] sm:$0xff]  }
0x33ec   :  { %v4899_v5 = vpop.permute.xlu0 %4898 }
0x33ed   :  { %v4904_v50 = vsel %vm281_vm3, %v4899_v5, 0  ;;  %v9419_v5 = vld [vmem:[%s11694_s8 + $0x18] sm:$0xff]  }
0x33ee   :  { %8975 = vmatpush3.bf16.msra.mxu1 %v4904_v50  ;;  %v9422_v50 = vld [vmem:[%s11694_s8 + $0x30] sm:$0xff]  }
0x33ef   :  { %v9603_v43 = vpop.eup %9602  ;;  %8988 = vmatprep.subr.bf16.mxu1 %v9766_v1 }
0x33f0   :  { %v4845_v9 = vmul.f32 %v9603_v43, %v9599_v13  ;;  %v9348_v60 = vpop.permute.xlu0 %9347  ;;  %v9421_v43 = vld [vmem:[%s11694_s8 + $0x28] sm:$0xff]  }
0x33f1   :  { %v9350_v48 = vunpack.i.h.bf16 %v9348_v60  ;;  %v9349_v49 = vunpack.i.l.bf16 %v9348_v60 }
0x33f2   :  { %v4848_v34 = vpack.c.bf16 %v4845_v9, %v4845_v9  ;;  %v9423_v9 = vld [vmem:[%s11694_s8 + $0x38] sm:$0xff]  }
0x33f3   :  { %v9605_v30 = vpop.eup %9604  ;;  %v4972_v21 = vsel %vm1071_vm4, %v4970_v57, %v9349_v49  ;;  %v4973_v22 = vsel %vm1071_vm4, %v4971_v52, %v9350_v48  ;;  %v8087_v48 = vld [vmem:[%s11696_s10 + $0x5] ss:$0 sm:$0xff] }
0x33f4   :  { %8971 = vmatmul.mubr.msk.bf16.vlgmr.msra.gmra.mrb[140].mxu0 %vm152_vm2, %v4848_v34  ;;  %v4847_v26 = vmul.f32 %v9605_v30, %v9601_v39  ;;  %v4980_v11 = vpop.permute.xlu0 %4979  ;;  %v9416_v39 = vld [vmem:[%s11694_s8] sm:$0xff]  }
0x33f5   :  { %8981 = vmatpush3.bf16.msra.mxu0 %v4978_v42  ;;  %8984 = vmatprep.mubr.msk.bf16.mxu0 %vm9767_vm0, %v9766_v1 }
0x33f6   :  { %v4849_v35 = vpack.c.bf16 %v4847_v26, %v4847_v26  ;;  %8982 = vmatprep.subr.bf16.mxu0 %v9766_v1 }
0x33f8   :  { %8977 = vmatmul.mubr.msk.bf16.vlgmr.msra.gmra.mrb[156].mxu1 %vm152_vm2, %v4849_v35 }
0x33f9   :  { %8992 = vmatprep.mubr.msk.bf16.mxu1 %vm9767_vm0, %v9766_v1  ;;  %8983 = vmatpush3.bf16.msra.mxu0 %v4980_v11 }
0x33fa   :  { %8996 = vmatprep.subr.bf16.mxu0 %v9766_v1 }
0x34c7   :  { %v4892_v36 = vpop.f32.mrb[140].mxu0 }
0x34c8   :  { %v8972_v33 = vpop.f32.mrb[141].mxu0 }
0x34c9   :  { %v4895_v0 = vpop.f32.mrb[142].mxu0 }
0x34ca   :  { %v8973_v47 = vpop.f32.mrb[143].mxu0 }
0x34cb   :  { %v4940_v58 = vpop.f32.mrb[156].mxu1 }
0x34cc   :  { %v9351_v37 = vpack.i.bf16 %v4940_v58, %v4892_v36  ;;  %v8978_v62 = vpop.f32.mrb[157].mxu1 }
0x34cd   :  { %v4943_v7 = vpop.f32.mrb[158].mxu1 }
0x34ce   :  { %9352 = vrot.lane.b32.xlu1 %v9351_v37, %s11730_s15  ;;  %v8979_v8 = vpop.f32.mrb[159].mxu1 }
0x34d2   :  { %4983 = vrot.lane.b32.xlu1 %v10782_v41, %s11727_s21 }
0x3540   :  { %v9353_v51 = vpop.permute.xlu1 %9352 }
0x3541   :  { %v9355_v6 = vunpack.i.h.bf16 %v9353_v51  ;;  %v9354_v18 = vunpack.i.l.bf16 %v9353_v51 }
0x3543   :  { %v4975_v41 = vsel %vm1074_vm5, %v4973_v22, %v9355_v6  ;;  %v4974_v63 = vsel %vm1074_vm5, %v4972_v21, %v9354_v18  ;;  %v8088_v18 = vld [vmem:[%s11697_s11 + $0x5] ss:$0 sm:$0xff] }
0x3544   :  { %v4976_v12 = vpack.c.bf16 %v4975_v41, %v4974_v63  ;;  %v4984_v44 = vpop.permute.xlu1 %4983 }
0x3546   :  { %8985 = vmatmul.mubr.msk.bf16.vlgmr.msra.gmra.mrb[144].mxu0 %vm102_vm1, %v4976_v12 }
0x3547   :  { %9012 = vmatprep.mubr.msk.bf16.mxu0 %vm9767_vm0, %v9766_v1 }
0x3619   :  { %v5023_v23 = vpop.f32.mrb[144].mxu0 }
0x361a   :  { %v5024_v16 = vadd.f32 %v5023_v23, %v4984_v44  ;;  %v8986_v40 = vpop.f32.mrb[145].mxu0 }
0x361b   :  { %v5026_v3 = vpop.f32.mrb[146].mxu0 }
0x361c   :  { %v5030_v61 = vadd.f32 %v5024_v16, %v10800_v25  ;;  %v5027_v17 = vadd.f32 %v5026_v3, %v4984_v44  ;;  %v8987_v27 = vpop.f32.mrb[147].mxu0  ;;  %v8098_v3 = vld [vmem:[%s11695_s9] ss:$0 sm:$0xff] }
0x361e   :  { %v5031_v10 = vadd.f32 %v5027_v17, %v10802_v4  ;;  %v5036_v56 = vsel %vm102_vm1, %v5030_v61, 0.0  ;;  %v9414_v4 = vld [vmem:[%s11692_s6 + $0x20] sm:$0xff]  }
0x361f   :  { %5037 = vadd.xlane.f32.xlu0 %v5036_v56  ;;  %8989 = vmatpush3.bf16.msra.mxu1 %v9414_v4 }
0x3620   :  { %v5039_v29 = vsel %vm102_vm1, %v5031_v10, 0.0  ;;  %8990 = vmatprep.subr.bf16.mxu1 %v9766_v1 }
0x3621   :  { %5040 = vadd.xlane.f32.xlu1 %v5039_v29 }
0x3623   :  { %8991 = vmatpush3.bf16.msra.mxu1 %v9415_v15 }
0x3624   :  { %9016 = vmatprep.subr.bf16.mxu1 %v9766_v1 }
0x3632   :  { %5227 = vrot.lane.b32.xlu1 %v9416_v39, %s9769_s22 }
0x3636   :  { %5231 = vrot.lane.b32.xlu1 %v9418_v46, %s9769_s22 }
0x363a   :  { %5233 = vrot.lane.b32.xlu1 %v9419_v5, %s9769_s22 }
0x363e   :  { %5237 = vrot.lane.b32.xlu1 %v9421_v43, %s9769_s22 }
0x3642   :  { %5241 = vrot.lane.b32.xlu1 %v9423_v9, %s9769_s22 }
0x36ac   :  { %v5038_v19 = vpop.xlane.xlu0 %5037 }
0x36ad   :  { %v5042_v54 = vmul.f32 0.03125, %v5038_v19 }
0x36ae   :  { %v5041_v31 = vpop.xlane.xlu1 %5040 }
0x36af   :  { %v5044_v53 = vsub.f32 %v5030_v61, %v5042_v54  ;;  %v5043_v24 = vmul.f32 0.03125, %v5041_v31  ;;  %v8094_v61 = vld [vmem:[%s11693_s7 + $0x2] ss:$0 sm:$0xff] }
0x36b1   :  { %v5045_v32 = vsub.f32 %v5031_v10, %v5043_v24  ;;  %v5046_v28 = vmul.f32 %v5044_v53, %v5044_v53 }
0x36b2   :  { %v5228_v2 = vpop.permute.xlu1 %5227 }
0x36b3   :  { %v5048_v20 = vsel %vm102_vm1, %v5046_v28, 0.0  ;;  %v5047_v25 = vmul.f32 %v5045_v32, %v5045_v32  ;;  %8997 = vmatpush3.bf16.msra.mxu0 %v5228_v2 }
0x36b4   :  { %5049 = vadd.xlane.f32.xlu0 %v5048_v20  ;;  %8998 = vmatprep.subr.bf16.mxu0 %v9766_v1 }
0x36b5   :  { %v5051_v13 = vsel %vm102_vm1, %v5047_v25, 0.0 }
0x36b6   :  { %v5232_v6 = vpop.permute.xlu1 %5231 }
0x36b8   :  { %5052 = vadd.xlane.f32.xlu0 %v5051_v13 }
0x36ba   :  { %v5234_v12 = vpop.permute.xlu1 %5233 }
0x36be   :  { %v5238_v23 = vpop.permute.xlu1 %5237 }
0x36c2   :  { %v5242_v40 = vpop.permute.xlu1 %5241 }
0x36ce   :  { %5229 = vrot.lane.b32.xlu0 %v9417_v45, %s9769_s22 }
0x36d2   :  { %5235 = vrot.lane.b32.xlu0 %v9420_v55, %s9769_s22 }
0x36d6   :  { %5239 = vrot.lane.b32.xlu0 %v9422_v50, %s9769_s22 }
0x36da   :  { %5251 = vrot.lane.b32.xlu0 %v8098_v3, %s9769_s22 }
0x3741   :  { %v5050_v34 = vpop.xlane.xlu0 %5049 }
0x3742   :  { %v5054_v30 = vmul.f32 0.032258064, %v5050_v34 }
0x3744   :  { %9606 = vrsqrt.f32 %v5054_v30  ;;  %vm5058_vm6 = vcmp.eq.f32.partialorder %v5054_v30, inf  ;;  %v5061_v11 = vand.u32 2147483648, %v5054_v30  ;;  %vm5060_vm7 = vcmp.eq.f32.partialorder %v5054_v30, 0.0 }
0x3745   :  { %v5053_v42 = vpop.xlane.xlu0 %5052 }
0x3746   :  { %v5055_v26 = vmul.f32 0.032258064, %v5053_v42 }
0x3748   :  { %9608 = vrsqrt.f32 %v5055_v26  ;;  %vm5065_vm8 = vcmp.eq.f32.partialorder %v5055_v26, inf  ;;  %v5068_v37 = vand.u32 2147483648, %v5055_v26  ;;  %vm5067_vm9 = vcmp.eq.f32.partialorder %v5055_v26, 0.0 }
0x3749   :  { %v5230_v49 = vpop.permute.xlu0 %5229 }
0x374a   :  { %8999 = vmatpush3.bf16.msra.mxu0 %v5230_v49 }
0x374b   :  { %9000 = vmatprep.subr.bf16.mxu0 %v9766_v1 }
0x374d   :  { %v5236_v44 = vpop.permute.xlu0 %5235 }
0x374e   :  { %v9607_v35 = vpop.eup %9606  ;;  %9001 = vmatpush3.bf16.msra.mxu0 %v5232_v6  ;;  %v8109_v6 = vld [vmem:[%s11696_s10 + $0x6] ss:$0 sm:$0xff] }
0x374f   :  { %v5057_v60 = vmul.f32 %v9607_v35, %v5054_v30  ;;  %9002 = vmatprep.subr.bf16.mxu0 %v9766_v1 }
0x3751   :  { %v5059_v36 = vsel %vm5058_vm6, %v5054_v30, %v5057_v60  ;;  %v5240_v16 = vpop.permute.xlu0 %5239  ;;  %v11091_v60 = vld [vmem:[%s11690_s4 + $0x40] sm:$0xff]  }
0x3752   :  { %v9609_v33 = vpop.eup %9608  ;;  %v5062_v0 = vsel %vm5060_vm7, %v5061_v11, %v5059_v36  ;;  %9003 = vmatpush3.bf16.msra.mxu0 %v5234_v12  ;;  %v11097_v11 = vld [vmem:[%s11690_s4 + $0x48] sm:$0xff]  }
0x3753   :  { %v5070_v47 = vadd.f32 1e-06, %v5062_v0  ;;  %v5064_v58 = vmul.f32 %v9609_v33, %v5055_v26  ;;  %9004 = vmatprep.subr.bf16.mxu0 %v9766_v1 }
0x3755   :  { %9610 = vrcp.f32 %v5070_v47  ;;  %v5066_v62 = vsel %vm5065_vm8, %v5055_v26, %v5064_v58  ;;  %v5252_v24 = vpop.permute.xlu0 %5251 }
0x3756   :  { %v5069_v7 = vsel %vm5067_vm9, %v5068_v37, %v5066_v62  ;;  %9005 = vmatpush3.bf16.msra.mxu0 %v5236_v44 }
0x3757   :  { %v5071_v8 = vadd.f32 1e-06, %v5069_v7  ;;  %9006 = vmatprep.subr.bf16.mxu0 %v9766_v1 }
0x3759   :  { %9612 = vrcp.f32 %v5071_v8 }
0x375a   :  { %9007 = vmatpush3.bf16.msra.mxu0 %v5238_v23 }
0x375b   :  { %9008 = vmatprep.subr.bf16.mxu0 %v9766_v1 }
0x375e   :  { %9009 = vmatpush3.bf16.msra.mxu0 %v5240_v16 }
0x375f   :  { %v9611_v38 = vpop.eup %9610  ;;  %9010 = vmatprep.subr.bf16.mxu0 %v9766_v1 }
0x3760   :  { %v5073_v14 = vmul.f32 %v9611_v38, %v5044_v53 }
0x3762   :  { %v5082_v57 = vmul.f32 %v8087_v48, %v5073_v14  ;;  %9011 = vmatpush3.bf16.msra.mxu0 %v5242_v40  ;;  %v11120_v40 = vld [vmem:[%s11691_s5 + $0x4] ss:$0 sm:$0xff] }
0x3763   :  { %v9613_v51 = vpop.eup %9612  ;;  %9042 = vmatprep.subr.bf16.mxu0 %v9766_v1 }
0x3764   :  { %v5075_v52 = vmul.f32 %v9613_v51, %v5045_v32  ;;  %v5090_v22 = vadd.f32 %v8088_v18, %v5082_v57 }
0x3766   :  { %v5083_v21 = vmul.f32 %v8087_v48, %v5075_v52 }
0x3768   :  { %v5091_v41 = vadd.f32 %v8088_v18, %v5083_v21 }
0x376a   :  { %v5116_v63 = vpack.c.bf16 %v5091_v41, %v5090_v22 }
0x376c   :  { %8993 = vmatmul.mubr.msk.bf16.vlgmr.msra.gmra.mrb[160].mxu1 %vm102_vm1, %v5116_v63  ;;  %v8110_v63 = vld [vmem:[%s11697_s11 + $0x6] ss:$0 sm:$0xff] }
0x376d   :  { %9020 = vmatprep.mubr.msk.bf16.mxu1 %vm9767_vm0, %v9766_v1  ;;  %9017 = vmatpush3.bf16.msra.mxu1 %v11091_v60 }
0x376e   :  { %9018 = vmatprep.subr.bf16.mxu1 %v9766_v1 }
0x3771   :  { %9019 = vmatpush3.bf16.msra.mxu1 %v11097_v11 }
0x3772   :  { %9024 = vmatprep.subr.bf16.mxu1 %v9766_v1 }
0x383f   :  { %v5172_v17 = vpop.f32.mrb[160].mxu1 }
0x3840   :  { %v5173_v27 = vadd.f32 %v8094_v61, %v5172_v17  ;;  %v8994_v10 = vpop.f32.mrb[161].mxu1 }
0x3841   :  { %v5175_v56 = vpop.f32.mrb[162].mxu1 }
0x3842   :  { %v5176_v29 = vadd.f32 %v8094_v61, %v5175_v56  ;;  %v8995_v19 = vpop.f32.mrb[163].mxu1  ;;  %v5179_v54 = vmax.f32 %v5173_v27, 0.0 }
0x3844   :  { %v5180_v31 = vmax.f32 %v5176_v29, 0.0 }
0x3846   :  { %v5181_v53 = vpack.c.bf16 %v5180_v31, %v5179_v54 }
0x3848   :  { %9013 = vmatmul.mubr.bf16.vlgmr.msra.gmra.mrb[148].mxu0 %v5181_v53 }
0x3849   :  { %9044 = vmatprep.mubr.msk.bf16.mxu0 %vm9767_vm0, %v9766_v1 }
0x391b   :  { %v5288_v32 = vpop.f32.mrb[148].mxu0 }
0x391c   :  { %v5289_v28 = vadd.f32 %v5288_v32, %v5252_v24  ;;  %v9014_v20 = vpop.f32.mrb[149].mxu0 }
0x391d   :  { %v5291_v25 = vpop.f32.mrb[150].mxu0 }
0x391e   :  { %v5295_v13 = vadd.f32 %v5289_v28, %v5090_v22  ;;  %v5292_v4 = vadd.f32 %v5291_v25, %v5252_v24  ;;  %v9015_v15 = vpop.f32.mrb[151].mxu0 }
0x3920   :  { %v5296_v39 = vadd.f32 %v5292_v4, %v5091_v41  ;;  %v5301_v45 = vsel %vm102_vm1, %v5295_v13, 0.0 }
0x3921   :  { %5302 = vadd.xlane.f32.xlu1 %v5301_v45 }
0x3922   :  { %v5304_v46 = vsel %vm102_vm1, %v5296_v39, 0.0 }
0x3923   :  { %5305 = vadd.xlane.f32.xlu0 %v5304_v46 }
0x39ae   :  { %v5303_v55 = vpop.xlane.xlu1 %5302 }
0x39af   :  { %v5307_v5 = vmul.f32 0.03125, %v5303_v55 }
0x39b0   :  { %v5306_v50 = vpop.xlane.xlu0 %5305 }
0x39b1   :  { %v5309_v43 = vsub.f32 %v5295_v13, %v5307_v5  ;;  %v5308_v9 = vmul.f32 0.03125, %v5306_v50  ;;  %v11147_v13 = vld [vmem:[%s11688_s2] ss:$0 sm:$0xff]  ;;  %v11154_v50 = vld [vmem:[%s11688_s2 + $0x1] ss:$0 sm:$0xff]  ;;  %s11735_s2 = smov 88  }
0x39b3   :  { %v5310_v34 = vsub.f32 %v5296_v39, %v5308_v9  ;;  %v5311_v30 = vmul.f32 %v5309_v43, %v5309_v43 }
0x39b5   :  { %v5313_v42 = vsel %vm102_vm1, %v5311_v30, 0.0  ;;  %v5312_v26 = vmul.f32 %v5310_v34, %v5310_v34 }
0x39b6   :  { %5314 = vadd.xlane.f32.xlu0 %v5313_v42 }
0x39b7   :  { %v5316_v35 = vsel %vm102_vm1, %v5312_v26, 0.0 }
0x39b8   :  { %5317 = vadd.xlane.f32.xlu1 %v5316_v35 }
0x3a43   :  { %v5315_v36 = vpop.xlane.xlu0 %5314 }
0x3a44   :  { %v5319_v33 = vmul.f32 0.032258064, %v5315_v36 }
0x3a45   :  { %v5318_v0 = vpop.xlane.xlu1 %5317 }
0x3a46   :  { %9614 = vrsqrt.f32 %v5319_v33  ;;  %v5320_v47 = vmul.f32 0.032258064, %v5318_v0  ;;  %vm5323_vm10 = vcmp.eq.f32.partialorder %v5319_v33, inf  ;;  %v5326_v62 = vand.u32 2147483648, %v5319_v33 }
0x3a47   :  { %vm5325_vm11 = vcmp.eq.f32.partialorder %v5319_v33, 0.0 }
0x3a48   :  { %9616 = vrsqrt.f32 %v5320_v47  ;;  %vm5330_vm12 = vcmp.eq.f32.partialorder %v5320_v47, inf  ;;  %v5333_v48 = vand.u32 2147483648, %v5320_v47  ;;  %vm5332_vm13 = vcmp.eq.f32.partialorder %v5320_v47, 0.0 }
0x3a50   :  { %v9615_v58 = vpop.eup %9614 }
0x3a51   :  { %v5322_v37 = vmul.f32 %v9615_v58, %v5319_v33 }
0x3a52   :  { %v9617_v7 = vpop.eup %9616 }
0x3a53   :  { %v5324_v8 = vsel %vm5323_vm10, %v5319_v33, %v5322_v37  ;;  %v5329_v14 = vmul.f32 %v9617_v7, %v5320_v47 }
0x3a54   :  { %v5327_v38 = vsel %vm5325_vm11, %v5326_v62, %v5324_v8 }
0x3a55   :  { %v5335_v2 = vadd.f32 1e-06, %v5327_v38  ;;  %v5331_v49 = vsel %vm5330_vm12, %v5320_v47, %v5329_v14 }
0x3a56   :  { %v5334_v51 = vsel %vm5332_vm13, %v5333_v48, %v5331_v49 }
0x3a57   :  { %9618 = vrcp.f32 %v5335_v2  ;;  %v5336_v52 = vadd.f32 1e-06, %v5334_v51 }
0x3a59   :  { %9620 = vrcp.f32 %v5336_v52 }
0x3a61   :  { %v9619_v57 = vpop.eup %9618 }
0x3a62   :  { %v5338_v18 = vmul.f32 %v9619_v57, %v5309_v43 }
0x3a63   :  { %v9621_v21 = vpop.eup %9620 }
0x3a64   :  { %v5340_v22 = vmul.f32 %v9621_v21, %v5310_v34  ;;  %v5347_v41 = vmul.f32 %v8109_v6, %v5338_v18 }
0x3a66   :  { %v5348_v12 = vmul.f32 %v8109_v6, %v5340_v22  ;;  %v11108_v44 = vadd.f32 %v8110_v63, %v5347_v41 }
0x3a68   :  { %v11110_v23 = vadd.f32 %v8110_v63, %v5348_v12 }
0x3a6a   :  { %v5364_v16 = vpack.c.bf16 %v11110_v23, %v11108_v44 }
0x3a6c   :  { %9021 = vmatmul.mubr.msk.bf16.vlgmr.msra.gmra.mrb[164].mxu1 %vm102_vm1, %v5364_v16 }
0x3a6d   :  { %9026 = vmatprep.mubr.msk.bf16.mxu1 %vm9767_vm0, %v9766_v1 }
0x3b3f   :  { %v5420_v3 = vpop.f32.mrb[164].mxu1 }
0x3b40   :  { %v5421_v61 = vadd.f32 %v11120_v40, %v5420_v3  ;;  %v9022_v17 = vpop.f32.mrb[165].mxu1 }
0x3b41   :  { %v5423_v27 = vpop.f32.mrb[166].mxu1 }
0x3b42   :  { %v11123_v10 = vpack.c.bf16 %v5421_v61, %v5421_v61  ;;  %v5424_v56 = vadd.f32 %v11120_v40, %v5423_v27  ;;  %v9023_v29 = vpop.f32.mrb[167].mxu1 }
0x3b44   :  { %v11126_v19 = vpack.c.bf16 %v5424_v56, %v5424_v56  ;;  %5430 = vrot.lane.b32.xlu0 %v11123_v10, %s9768_s17 }
0x3b46   :  { %5479 = vrot.lane.b32.xlu1 %v11126_v19, %s9768_s17 }
0x3bb6   :  { %v5431_v54 = vpop.permute.xlu0 %5430 }
0x3bb7   :  { %v5436_v31 = vsel %vm152_vm2, %v5431_v54, 0 }
0x3bb8   :  { %9025 = vmatpush3.bf16.xpose.msra.mxu1 %v5436_v31  ;;  %v5480_v53 = vpop.permute.xlu1 %5479 }
0x3bb9   :  { %9030 = vmatprep.subr.bf16.mxu1 %v9766_v1  ;;  %v5485_v24 = vsel %vm152_vm2, %v5480_v53, 0 }
0x3bbf   :  { %9027 = vmatmul.mubr.msk.bf16.vlgmr.msra.gmra.mrb[168].mxu1 %vm152_vm2, %v11123_v10 }
0x3bc0   :  { %9031 = vmatpush3.bf16.xpose.msra.mxu1 %v5485_v24  ;;  %9032 = vmatprep.mubr.msk.bf16.mxu1 %vm9767_vm0, %v9766_v1 }
0x3bc1   :  { %9036 = vmatprep.subr.bf16.mxu1 %v9766_v1 }
0x3bc7   :  { %9033 = vmatmul.mubr.msk.bf16.vlgmr.msra.gmra.mrb[172].mxu1 %vm152_vm2, %v11126_v19 }
0x3bc8   :  { %9038 = vmatprep.mubr.msk.bf16.mxu1 %vm9767_vm0, %v9766_v1 }
0x3c92   :  { %v5472_v32 = vpop.f32.mrb[168].mxu1 }
0x3c93   :  { %v5527_v28 = vmul.f32 0.35355338, %v5472_v32  ;;  %v9028_v20 = vpop.f32.mrb[169].mxu1 }
0x3c94   :  { %v5475_v25 = vpop.f32.mrb[170].mxu1 }
0x3c95   :  { %v5529_v4 = vadd.f32 %v11147_v13, %v5527_v28  ;;  %v9029_v15 = vpop.f32.mrb[171].mxu1 }
0x3c97   :  { %v5531_v39 = vsel %vm152_vm2, %v5529_v4, -inf }
0x3c98   :  { %5532 = vmax.xlane.f32.xlu1 %v5531_v39 }
0x3c9a   :  { %v5521_v45 = vpop.f32.mrb[172].mxu1 }
0x3c9b   :  { %v5528_v46 = vmul.f32 0.35355338, %v5521_v45  ;;  %v9034_v55 = vpop.f32.mrb[173].mxu1 }
0x3c9c   :  { %v5524_v5 = vpop.f32.mrb[174].mxu1 }
0x3c9d   :  { %v5530_v43 = vadd.f32 %v11154_v50, %v5528_v46  ;;  %v9035_v9 = vpop.f32.mrb[175].mxu1 }
0x3c9f   :  { %v5534_v34 = vsel %vm152_vm2, %v5530_v43, -inf }
0x3ca0   :  { %5535 = vmax.xlane.f32.xlu0 %v5534_v34 }
0x3ca9   :  { %5603 = vrot.lane.b32.xlu1 %v11126_v19, %s9769_s22 }
0x3cb6   :  { %5555 = vrot.lane.b32.xlu0 %v11123_v10, %s9769_s22  ;;  %s11736_s22 = smov 120  }
0x3d25   :  { %v5533_v30 = vpop.xlane.xlu1 %5532 }
0x3d26   :  { %v5537_v42 = vsub.f32 %v5529_v4, %v5533_v30 }
0x3d28   :  { %v5539_v26 = vmul.f32 1.442695, %v5537_v42 }
0x3d29   :  { %v5604_v35 = vpop.permute.xlu1 %5603 }
0x3d2a   :  { %9622 = vpow2.f32 %v5539_v26  ;;  %v5609_v36 = vsel %vm281_vm3, %v5604_v35, 0 }
0x3d2b   :  { %9043 = vmatpush3.bf16.msra.mxu0 %v5609_v36 }
0x3d2c   :  { %9054 = vmatprep.subr.bf16.mxu0 %v9766_v1 }
0x3d2d   :  { %v5536_v33 = vpop.xlane.xlu0 %5535 }
0x3d2e   :  { %v5538_v0 = vsub.f32 %v5530_v43, %v5536_v33 }
0x3d30   :  { %v5541_v47 = vmul.f32 1.442695, %v5538_v0 }
0x3d31   :  { %v5556_v58 = vpop.permute.xlu0 %5555 }
0x3d32   :  { %9624 = vpow2.f32 %v5541_v47  ;;  %v5561_v37 = vsel %vm281_vm3, %v5556_v58, 0 }
0x3d33   :  { %9037 = vmatpush3.bf16.msra.mxu1 %v5561_v37 }
0x3d34   :  { %v9623_v62 = vpop.eup %9622  ;;  %9048 = vmatprep.subr.bf16.mxu1 %v9766_v1 }
0x3d35   :  { %v5543_v7 = vsel %vm152_vm2, %v9623_v62, 0.0 }
0x3d36   :  { %5544 = vadd.xlane.f32.xlu0 %v5543_v7 }
0x3d3c   :  { %v9625_v8 = vpop.eup %9624 }
0x3d3d   :  { %v5546_v38 = vsel %vm152_vm2, %v9625_v8, 0.0 }
0x3d3e   :  { %5547 = vadd.xlane.f32.xlu1 %v5546_v38 }
0x3d4c   :  { %5703 = vrot.lane.b32.xlu0 %v11126_v19, %s11735_s2 }
0x3d4f   :  { %5653 = vrot.lane.b32.xlu1 %v11123_v10, %s11735_s2 }
0x3d50   :  { %5701 = vrot.lane.b32.xlu0 %v11126_v19, %s11736_s22 }
0x3d53   :  { %5651 = vrot.lane.b32.xlu1 %v11123_v10, %s11736_s22 }
0x3dc3   :  { %v5545_v14 = vpop.xlane.xlu0 %5544 }
0x3dc4   :  { %9626 = vrcp.f32 %v5545_v14 }
0x3dc7   :  { %v5704_v21 = vpop.permute.xlu0 %5703 }
0x3dc8   :  { %v5709_v63 = vsel %vm152_vm2, %v5704_v21, 0 }
0x3dcb   :  { %v5548_v2 = vpop.xlane.xlu1 %5547  ;;  %v5702_v12 = vpop.permute.xlu0 %5701 }
0x3dcc   :  { %9628 = vrcp.f32 %v5548_v2 }
0x3dce   :  { %v9627_v48 = vpop.eup %9626 }
0x3dcf   :  { %v5550_v49 = vmul.f32 %v9627_v48, %v9623_v62  ;;  %v5654_v51 = vpop.permute.xlu1 %5653 }
0x3dd0   :  { %v5659_v57 = vsel %vm152_vm2, %v5654_v51, 0 }
0x3dd1   :  { %v5553_v52 = vpack.c.bf16 %v5550_v49, %v5550_v49 }
0x3dd3   :  { %9039 = vmatmul.mubr.msk.bf16.vlgmr.msra.gmra.mrb[176].mxu1 %vm152_vm2, %v5553_v52  ;;  %v5652_v41 = vpop.permute.xlu1 %5651 }
0x3dd4   :  { %9049 = vmatpush3.bf16.xpose.msra.mxu1 %v5659_v57  ;;  %9050 = vmatprep.mubr.msk.bf16.mxu1 %vm9767_vm0, %v9766_v1 }
0x3dd5   :  { %9060 = vmatprep.subr.bf16.mxu1 %v9766_v1 }
0x3dd6   :  { %v9629_v6 = vpop.eup %9628 }
0x3dd7   :  { %v5552_v18 = vmul.f32 %v9629_v6, %v9625_v8 }
0x3dd9   :  { %v5554_v22 = vpack.c.bf16 %v5552_v18, %v5552_v18 }
0x3ddb   :  { %9045 = vmatmul.mubr.msk.bf16.vlgmr.msra.gmra.mrb[152].mxu0 %vm152_vm2, %v5554_v22  ;;  %9051 = vmatmul.mubr.msk.bf16.vlgmr.msra.gmra.mrb[180].mxu1 %vm152_vm2, %v5652_v41 }
0x3ddc   :  { %9055 = vmatpush3.bf16.xpose.msra.mxu0 %v5709_v63  ;;  %9056 = vmatprep.mubr.msk.bf16.mxu0 %vm9767_vm0, %v9766_v1 }
0x3ddd   :  { %9066 = vmatprep.subr.bf16.mxu0 %v9766_v1  ;;  %9062 = vmatprep.mubr.msk.bf16.mxu1 %vm9767_vm0, %v9766_v1 }
0x3de3   :  { %9057 = vmatmul.mubr.msk.bf16.vlgmr.msra.gmra.mrb[156].mxu0 %vm152_vm2, %v5702_v12 }
0x3de4   :  { %9068 = vmatprep.mubr.msk.bf16.mxu0 %vm9767_vm0, %v9766_v1 }
0x3ea6   :  { %v11192_v16 = vpop.f32.mrb[176].mxu1 }
0x3ea7   :  { %v9040_v3 = vpop.f32.mrb[177].mxu1 }
0x3ea8   :  { %v5600_v61 = vpop.f32.mrb[178].mxu1 }
0x3ea9   :  { %v9041_v17 = vpop.f32.mrb[179].mxu1 }
0x3eae   :  { %v11194_v27 = vpop.f32.mrb[152].mxu0  ;;  %v5695_v56 = vpop.f32.mrb[180].mxu1 }
0x3eaf   :  { %v5751_v29 = vmul.f32 0.35355338, %v5695_v56  ;;  %v9046_v54 = vpop.f32.mrb[153].mxu0  ;;  %v9052_v31 = vpop.f32.mrb[181].mxu1 }
0x3eb0   :  { %v5648_v53 = vpop.f32.mrb[154].mxu0  ;;  %v5698_v24 = vpop.f32.mrb[182].mxu1 }
0x3eb1   :  { %v5753_v32 = vadd.f32 %v11147_v13, %v5751_v29  ;;  %v9047_v28 = vpop.f32.mrb[155].mxu0  ;;  %v9053_v20 = vpop.f32.mrb[183].mxu1 }
0x3eb3   :  { %v5755_v25 = vsel %vm152_vm2, %v5753_v32, -inf }
0x3eb4   :  { %5756 = vmax.xlane.f32.xlu1 %v5755_v25 }
0x3eb6   :  { %v5745_v4 = vpop.f32.mrb[156].mxu0 }
0x3eb7   :  { %v5752_v15 = vmul.f32 0.35355338, %v5745_v4  ;;  %v9058_v39 = vpop.f32.mrb[157].mxu0 }
0x3eb8   :  { %v5748_v45 = vpop.f32.mrb[158].mxu0 }
0x3eb9   :  { %v5754_v46 = vadd.f32 %v11154_v50, %v5752_v15  ;;  %v9059_v55 = vpop.f32.mrb[159].mxu0 }
0x3ebb   :  { %v5758_v5 = vsel %vm152_vm2, %v5754_v46, -inf }
0x3ebc   :  { %5759 = vmax.xlane.f32.xlu0 %v5758_v5 }
0x3ec5   :  { %5827 = vrot.lane.b32.xlu1 %v11126_v19, %s11737_s27 }
0x3ed2   :  { %5779 = vrot.lane.b32.xlu0 %v11123_v10, %s11737_s27 }
0x3f41   :  { %v5757_v43 = vpop.xlane.xlu1 %5756 }
0x3f42   :  { %v5761_v9 = vsub.f32 %v5753_v32, %v5757_v43 }
0x3f44   :  { %v5763_v34 = vmul.f32 1.442695, %v5761_v9 }
0x3f45   :  { %v5828_v30 = vpop.permute.xlu1 %5827 }
0x3f46   :  { %9630 = vpow2.f32 %v5763_v34  ;;  %v5833_v42 = vsel %vm281_vm3, %v5828_v30, 0 }
0x3f47   :  { %9067 = vmatpush3.bf16.msra.mxu0 %v5833_v42 }
0x3f48   :  { %9078 = vmatprep.subr.bf16.mxu0 %v9766_v1 }
0x3f49   :  { %v5760_v26 = vpop.xlane.xlu0 %5759 }
0x3f4a   :  { %v5762_v35 = vsub.f32 %v5754_v46, %v5760_v26 }
0x3f4c   :  { %v5765_v36 = vmul.f32 1.442695, %v5762_v35 }
0x3f4d   :  { %v5780_v33 = vpop.permute.xlu0 %5779 }
0x3f4e   :  { %9632 = vpow2.f32 %v5765_v36  ;;  %v5785_v0 = vsel %vm281_vm3, %v5780_v33, 0 }
0x3f4f   :  { %9061 = vmatpush3.bf16.msra.mxu1 %v5785_v0 }
0x3f50   :  { %v9631_v47 = vpop.eup %9630  ;;  %9072 = vmatprep.subr.bf16.mxu1 %v9766_v1 }
0x3f51   :  { %v5767_v58 = vsel %vm152_vm2, %v9631_v47, 0.0 }
0x3f52   :  { %5768 = vadd.xlane.f32.xlu0 %v5767_v58 }
0x3f58   :  { %v9633_v37 = vpop.eup %9632 }
0x3f59   :  { %v5770_v62 = vsel %vm152_vm2, %v9633_v37, 0.0 }
0x3f5a   :  { %5771 = vadd.xlane.f32.xlu1 %v5770_v62 }
0x3f68   :  { %5927 = vrot.lane.b32.xlu0 %v11126_v19, %s11738_s30 }
0x3f6b   :  { %5877 = vrot.lane.b32.xlu1 %v11123_v10, %s11738_s30 }
0x3f6c   :  { %5925 = vrot.lane.b32.xlu0 %v11126_v19, %s11731_s16 }
0x3f6f   :  { %5875 = vrot.lane.b32.xlu1 %v11123_v10, %s11731_s16 }
0x3fdf   :  { %v5769_v7 = vpop.xlane.xlu0 %5768 }
0x3fe0   :  { %9634 = vrcp.f32 %v5769_v7 }
0x3fe3   :  { %v5928_v57 = vpop.permute.xlu0 %5927 }
0x3fe4   :  { %v5933_v21 = vsel %vm152_vm2, %v5928_v57, 0 }
0x3fe7   :  { %v5772_v8 = vpop.xlane.xlu1 %5771  ;;  %v5926_v22 = vpop.permute.xlu0 %5925 }
0x3fe8   :  { %9636 = vrcp.f32 %v5772_v8 }
0x3fea   :  { %v9635_v38 = vpop.eup %9634 }
0x3feb   :  { %v5774_v14 = vmul.f32 %v9635_v38, %v9631_v47  ;;  %v5878_v2 = vpop.permute.xlu1 %5877 }
0x3fec   :  { %v5883_v49 = vsel %vm152_vm2, %v5878_v2, 0 }
0x3fed   :  { %v5777_v48 = vpack.c.bf16 %v5774_v14, %v5774_v14 }
0x3fef   :  { %9063 = vmatmul.mubr.msk.bf16.vlgmr.msra.gmra.mrb[184].mxu1 %vm152_vm2, %v5777_v48  ;;  %v5876_v18 = vpop.permute.xlu1 %5875 }
0x3ff0   :  { %9073 = vmatpush3.bf16.xpose.msra.mxu1 %v5883_v49  ;;  %9074 = vmatprep.mubr.msk.bf16.mxu1 %vm9767_vm0, %v9766_v1 }
0x3ff1   :  { %9084 = vmatprep.subr.bf16.mxu1 %v9766_v1 }
0x3ff2   :  { %v9637_v51 = vpop.eup %9636 }
0x3ff3   :  { %v5776_v52 = vmul.f32 %v9637_v51, %v9633_v37 }
0x3ff5   :  { %v5778_v6 = vpack.c.bf16 %v5776_v52, %v5776_v52 }
0x3ff7   :  { %9069 = vmatmul.mubr.msk.bf16.vlgmr.msra.gmra.mrb[160].mxu0 %vm152_vm2, %v5778_v6  ;;  %9075 = vmatmul.mubr.msk.bf16.vlgmr.msra.gmra.mrb[188].mxu1 %vm152_vm2, %v5876_v18 }
0x3ff8   :  { %9079 = vmatpush3.bf16.xpose.msra.mxu0 %v5933_v21  ;;  %9080 = vmatprep.mubr.msk.bf16.mxu0 %vm9767_vm0, %v9766_v1 }
0x3ff9   :  { %9090 = vmatprep.subr.bf16.mxu0 %v9766_v1  ;;  %9086 = vmatprep.mubr.msk.bf16.mxu1 %vm9767_vm0, %v9766_v1 }
0x3fff   :  { %9081 = vmatmul.mubr.msk.bf16.vlgmr.msra.gmra.mrb[164].mxu0 %vm152_vm2, %v5926_v22 }
0x4000   :  { %9092 = vmatprep.mubr.msk.bf16.mxu0 %vm9767_vm0, %v9766_v1 }
0x40c2   :  { %v11234_v41 = vpop.f32.mrb[184].mxu1 }
0x40c3   :  { %v9064_v63 = vpop.f32.mrb[185].mxu1 }
0x40c4   :  { %v5824_v12 = vpop.f32.mrb[186].mxu1 }
0x40c5   :  { %v9065_v3 = vpop.f32.mrb[187].mxu1 }
0x40ca   :  { %v11236_v61 = vpop.f32.mrb[160].mxu0  ;;  %v5919_v17 = vpop.f32.mrb[188].mxu1 }
0x40cb   :  { %v9356_v56 = vpack.i.bf16 %v11236_v61, %v11234_v41  ;;  %v5975_v29 = vmul.f32 0.35355338, %v5919_v17  ;;  %v9070_v54 = vpop.f32.mrb[161].mxu0  ;;  %v9076_v31 = vpop.f32.mrb[189].mxu1 }
0x40cc   :  { %v5872_v53 = vpop.f32.mrb[162].mxu0  ;;  %v5922_v24 = vpop.f32.mrb[190].mxu1 }
0x40cd   :  { %v5977_v32 = vadd.f32 %v11147_v13, %v5975_v29  ;;  %v9071_v28 = vpop.f32.mrb[163].mxu0  ;;  %v9077_v20 = vpop.f32.mrb[191].mxu1 }
0x40cf   :  { %v5979_v25 = vsel %vm152_vm2, %v5977_v32, -inf }
0x40d0   :  { %5980 = vmax.xlane.f32.xlu1 %v5979_v25 }
0x40d2   :  { %v5969_v4 = vpop.f32.mrb[164].mxu0 }
0x40d3   :  { %v5976_v15 = vmul.f32 0.35355338, %v5969_v4  ;;  %v9082_v39 = vpop.f32.mrb[165].mxu0 }
0x40d4   :  { %v5972_v45 = vpop.f32.mrb[166].mxu0 }
0x40d5   :  { %v5978_v46 = vadd.f32 %v11154_v50, %v5976_v15  ;;  %v9083_v55 = vpop.f32.mrb[167].mxu0 }
0x40d7   :  { %v5982_v5 = vsel %vm152_vm2, %v5978_v46, -inf }
0x40d8   :  { %5983 = vmax.xlane.f32.xlu0 %v5982_v5 }
0x40e1   :  { %6051 = vrot.lane.b32.xlu1 %v11126_v19, %s11732_s0 }
0x40ee   :  { %6003 = vrot.lane.b32.xlu0 %v11123_v10, %s11732_s0 }
0x415d   :  { %v5981_v43 = vpop.xlane.xlu1 %5980 }
0x415e   :  { %v5985_v9 = vsub.f32 %v5977_v32, %v5981_v43 }
0x4160   :  { %v5987_v34 = vmul.f32 1.442695, %v5985_v9 }
0x4161   :  { %v6052_v30 = vpop.permute.xlu1 %6051 }
0x4162   :  { %9638 = vpow2.f32 %v5987_v34  ;;  %v6057_v42 = vsel %vm281_vm3, %v6052_v30, 0 }
0x4163   :  { %9091 = vmatpush3.bf16.msra.mxu0 %v6057_v42 }
0x4164   :  { %9102 = vmatprep.subr.bf16.mxu0 %v9766_v1 }
0x4165   :  { %v5984_v26 = vpop.xlane.xlu0 %5983 }
0x4166   :  { %v5986_v35 = vsub.f32 %v5978_v46, %v5984_v26 }
0x4168   :  { %v5989_v36 = vmul.f32 1.442695, %v5986_v35 }
0x4169   :  { %v6004_v33 = vpop.permute.xlu0 %6003 }
0x416a   :  { %9640 = vpow2.f32 %v5989_v36  ;;  %v6009_v0 = vsel %vm281_vm3, %v6004_v33, 0 }
0x416b   :  { %9085 = vmatpush3.bf16.msra.mxu1 %v6009_v0 }
0x416c   :  { %v9639_v47 = vpop.eup %9638  ;;  %9096 = vmatprep.subr.bf16.mxu1 %v9766_v1 }
0x416d   :  { %v5991_v58 = vsel %vm152_vm2, %v9639_v47, 0.0 }
0x416e   :  { %5992 = vadd.xlane.f32.xlu0 %v5991_v58 }
0x4174   :  { %v9641_v37 = vpop.eup %9640 }
0x4175   :  { %v5994_v62 = vsel %vm152_vm2, %v9641_v37, 0.0 }
0x4176   :  { %5995 = vadd.xlane.f32.xlu1 %v5994_v62 }
0x4184   :  { %6151 = vrot.lane.b32.xlu0 %v11126_v19, %s11733_s19 }
0x4187   :  { %6101 = vrot.lane.b32.xlu1 %v11123_v10, %s11733_s19 }
0x4188   :  { %6149 = vrot.lane.b32.xlu0 %v11126_v19, %s11734_s18 }
0x418b   :  { %6099 = vrot.lane.b32.xlu1 %v11123_v10, %s11734_s18 }
0x41fb   :  { %v5993_v7 = vpop.xlane.xlu0 %5992 }
0x41fc   :  { %9642 = vrcp.f32 %v5993_v7 }
0x41ff   :  { %v6152_v57 = vpop.permute.xlu0 %6151 }
0x4200   :  { %v6157_v21 = vsel %vm152_vm2, %v6152_v57, 0 }
0x4203   :  { %v5996_v8 = vpop.xlane.xlu1 %5995  ;;  %v6150_v22 = vpop.permute.xlu0 %6149 }
0x4204   :  { %9644 = vrcp.f32 %v5996_v8 }
0x4206   :  { %v9643_v38 = vpop.eup %9642 }
0x4207   :  { %v5998_v14 = vmul.f32 %v9643_v38, %v9639_v47  ;;  %v6102_v2 = vpop.permute.xlu1 %6101 }
0x4208   :  { %v6107_v49 = vsel %vm152_vm2, %v6102_v2, 0 }
0x4209   :  { %v6001_v48 = vpack.c.bf16 %v5998_v14, %v5998_v14 }
0x420b   :  { %9087 = vmatmul.mubr.msk.bf16.vlgmr.msra.gmra.mrb[192].mxu1 %vm152_vm2, %v6001_v48  ;;  %v6100_v18 = vpop.permute.xlu1 %6099 }
0x420c   :  { %9097 = vmatpush3.bf16.xpose.msra.mxu1 %v6107_v49  ;;  %9098 = vmatprep.mubr.msk.bf16.mxu1 %vm9767_vm0, %v9766_v1 }
0x420d   :  { %9108 = vmatprep.subr.bf16.mxu1 %v9766_v1 }
0x420e   :  { %v9645_v51 = vpop.eup %9644 }
0x420f   :  { %v6000_v52 = vmul.f32 %v9645_v51, %v9641_v37 }
0x4211   :  { %v6002_v6 = vpack.c.bf16 %v6000_v52, %v6000_v52 }
0x4213   :  { %9093 = vmatmul.mubr.msk.bf16.vlgmr.msra.gmra.mrb[168].mxu0 %vm152_vm2, %v6002_v6  ;;  %9099 = vmatmul.mubr.msk.bf16.vlgmr.msra.gmra.mrb[196].mxu1 %vm152_vm2, %v6100_v18 }
0x4214   :  { %9103 = vmatpush3.bf16.xpose.msra.mxu0 %v6157_v21  ;;  %9104 = vmatprep.mubr.msk.bf16.mxu0 %vm9767_vm0, %v9766_v1 }
0x4215   :  { %9114 = vmatprep.subr.bf16.mxu0 %v9766_v1  ;;  %9110 = vmatprep.mubr.msk.bf16.mxu1 %vm9767_vm0, %v9766_v1 }
0x421b   :  { %9105 = vmatmul.mubr.msk.bf16.vlgmr.msra.gmra.mrb[172].mxu0 %vm152_vm2, %v6150_v22 }
0x421c   :  { %9116 = vmatprep.mubr.msk.bf16.mxu0 %vm9767_vm0, %v9766_v1 }
0x42de   :  { %v6045_v63 = vpop.f32.mrb[192].mxu1 }
0x42df   :  { %v9088_v12 = vpop.f32.mrb[193].mxu1 }
0x42e0   :  { %v6048_v3 = vpop.f32.mrb[194].mxu1 }
0x42e1   :  { %v9089_v17 = vpop.f32.mrb[195].mxu1 }
0x42e6   :  { %v6093_v29 = vpop.f32.mrb[168].mxu0  ;;  %v6143_v54 = vpop.f32.mrb[196].mxu1 }
0x42e7   :  { %v9361_v31 = vpack.i.bf16 %v6093_v29, %v6045_v63  ;;  %v6199_v53 = vmul.f32 0.35355338, %v6143_v54  ;;  %v9094_v24 = vpop.f32.mrb[169].mxu0  ;;  %v9100_v32 = vpop.f32.mrb[197].mxu1 }
0x42e8   :  { %v6096_v28 = vpop.f32.mrb[170].mxu0  ;;  %v6146_v20 = vpop.f32.mrb[198].mxu1 }
0x42e9   :  { %v6201_v25 = vadd.f32 %v11147_v13, %v6199_v53  ;;  %v9095_v4 = vpop.f32.mrb[171].mxu0  ;;  %v9101_v15 = vpop.f32.mrb[199].mxu1 }
0x42eb   :  { %v6203_v39 = vsel %vm152_vm2, %v6201_v25, -inf }
0x42ec   :  { %6204 = vmax.xlane.f32.xlu1 %v6203_v39 }
0x42ee   :  { %v6193_v45 = vpop.f32.mrb[172].mxu0 }
0x42ef   :  { %v6200_v46 = vmul.f32 0.35355338, %v6193_v45  ;;  %v9106_v55 = vpop.f32.mrb[173].mxu0 }
0x42f0   :  { %v6196_v5 = vpop.f32.mrb[174].mxu0 }
0x42f1   :  { %v6202_v43 = vadd.f32 %v11154_v50, %v6200_v46  ;;  %v9107_v9 = vpop.f32.mrb[175].mxu0 }
0x42f3   :  { %v6206_v34 = vsel %vm152_vm2, %v6202_v43, -inf }
0x42f4   :  { %6207 = vmax.xlane.f32.xlu0 %v6206_v34 }
0x4379   :  { %v6205_v30 = vpop.xlane.xlu1 %6204 }
0x437a   :  { %v6209_v42 = vsub.f32 %v6201_v25, %v6205_v30  ;;  %v11330_v30 = vld [vmem:[%s11690_s4 + $0x50] sm:$0xff]  }
0x437c   :  { %v6211_v26 = vmul.f32 1.442695, %v6209_v42 }
0x437e   :  { %9646 = vpow2.f32 %v6211_v26 }
0x4381   :  { %v6208_v13 = vpop.xlane.xlu0 %6207 }
0x4382   :  { %v6210_v35 = vsub.f32 %v6202_v43, %v6208_v13 }
0x4384   :  { %v6213_v36 = vmul.f32 1.442695, %v6210_v35 }
0x4386   :  { %9648 = vpow2.f32 %v6213_v36 }
0x4388   :  { %v9647_v33 = vpop.eup %9646 }
0x4389   :  { %v6215_v0 = vsel %vm152_vm2, %v9647_v33, 0.0 }
0x438a   :  { %6216 = vadd.xlane.f32.xlu0 %v6215_v0 }
0x4390   :  { %v9649_v47 = vpop.eup %9648 }
0x4391   :  { %v6218_v58 = vsel %vm152_vm2, %v9649_v47, 0.0 }
0x4392   :  { %6219 = vadd.xlane.f32.xlu1 %v6218_v58 }
0x43a0   :  { %6227 = vrot.lane.b32.xlu0 %v11123_v10, %s11726_s20 }
0x43a3   :  { %6275 = vrot.lane.b32.xlu1 %v11126_v19, %s11726_s20 }
0x43a4   :  { %9357 = vrot.lane.b32.xlu0 %v9356_v56, %s11728_s1 }
0x43a7   :  { %6354 = vrot.lane.b32.xlu1 %v11091_v60, %s11727_s21 }
0x43ab   :  { %9362 = vrot.lane.b32.xlu1 %v9361_v31, %s11729_s14 }
0x43af   :  { %6356 = vrot.lane.b32.xlu1 %v11097_v11, %s11727_s21 }
0x4417   :  { %v6217_v50 = vpop.xlane.xlu0 %6216 }
0x4418   :  { %9650 = vrcp.f32 %v6217_v50  ;;  %v11350_v50 = vld [vmem:[%s11691_s5 + $0x5] ss:$0 sm:$0xff] }
0x441b   :  { %v6228_v37 = vpop.permute.xlu0 %6227 }
0x441c   :  { %v6233_v10 = vsel %vm281_vm3, %v6228_v37, 0 }
0x441d   :  { %9109 = vmatpush3.bf16.msra.mxu1 %v6233_v10 }
0x441e   :  { %9120 = vmatprep.subr.bf16.mxu1 %v9766_v1 }
0x441f   :  { %v6220_v19 = vpop.xlane.xlu1 %6219  ;;  %v9358_v63 = vpop.permute.xlu0 %9357 }
0x4420   :  { %9652 = vrcp.f32 %v6220_v19  ;;  %v9360_v12 = vunpack.i.h.bf16 %v9358_v63  ;;  %v9359_v3 = vunpack.i.l.bf16 %v9358_v63  ;;  %v8140_v63 = vld [vmem:[%s11697_s11 + $0x7] ss:$0 sm:$0xff] }
0x4422   :  { %v9651_v41 = vpop.eup %9650  ;;  %v6348_v31 = vsel %vm152_vm2, %v11194_v27, %v9360_v12  ;;  %v6347_v53 = vsel %vm152_vm2, %v11192_v16, %v9359_v3 }
0x4423   :  { %v6222_v61 = vmul.f32 %v9651_v41, %v9647_v33  ;;  %v6276_v56 = vpop.permute.xlu1 %6275 }
0x4424   :  { %v6281_v60 = vsel %vm281_vm3, %v6276_v56, 0 }
0x4425   :  { %9115 = vmatpush3.bf16.msra.mxu0 %v6281_v60  ;;  %v6225_v62 = vpack.c.bf16 %v6222_v61, %v6222_v61 }
0x4426   :  { %9128 = vmatprep.subr.bf16.mxu0 %v9766_v1 }
0x4427   :  { %9111 = vmatmul.mubr.msk.bf16.vlgmr.msra.gmra.mrb[200].mxu1 %vm152_vm2, %v6225_v62  ;;  %v6355_v11 = vpop.permute.xlu1 %6354 }
0x4428   :  { %9121 = vmatpush3.bf16.msra.mxu1 %v6355_v11  ;;  %9124 = vmatprep.mubr.msk.bf16.mxu1 %vm9767_vm0, %v9766_v1 }
0x4429   :  { %9122 = vmatprep.subr.bf16.mxu1 %v9766_v1 }
0x442a   :  { %v9653_v7 = vpop.eup %9652 }
0x442b   :  { %v6224_v8 = vmul.f32 %v9653_v7, %v9649_v47  ;;  %v9363_v14 = vpop.permute.xlu1 %9362 }
0x442c   :  { %v9365_v17 = vunpack.i.h.bf16 %v9363_v14  ;;  %v9364_v29 = vunpack.i.l.bf16 %v9363_v14 }
0x442d   :  { %v6226_v38 = vpack.c.bf16 %v6224_v8, %v6224_v8 }
0x442e   :  { %v6350_v28 = vsel %vm1071_vm4, %v6348_v31, %v9365_v17  ;;  %v6349_v20 = vsel %vm1071_vm4, %v6347_v53, %v9364_v29 }
0x442f   :  { %9117 = vmatmul.mubr.msk.bf16.vlgmr.msra.gmra.mrb[176].mxu0 %vm152_vm2, %v6226_v38  ;;  %v6357_v48 = vpop.permute.xlu1 %6356 }
0x4430   :  { %9132 = vmatprep.mubr.msk.bf16.mxu0 %vm9767_vm0, %v9766_v1  ;;  %9123 = vmatpush3.bf16.msra.mxu1 %v6357_v48 }
0x4431   :  { %9136 = vmatprep.subr.bf16.mxu1 %v9766_v1  ;;  %9129 = vmatpush3.bf16.msra.mxu0 %v11330_v30 }
0x4432   :  { %9130 = vmatprep.subr.bf16.mxu0 %v9766_v1 }
0x44fa   :  { %v6269_v2 = vpop.f32.mrb[200].mxu1 }
0x44fb   :  { %v9112_v49 = vpop.f32.mrb[201].mxu1 }
0x44fc   :  { %v6272_v51 = vpop.f32.mrb[202].mxu1 }
0x44fd   :  { %v9113_v52 = vpop.f32.mrb[203].mxu1 }
0x4502   :  { %v6317_v57 = vpop.f32.mrb[176].mxu0 }
0x4503   :  { %v9366_v6 = vpack.i.bf16 %v6317_v57, %v6269_v2  ;;  %v9118_v18 = vpop.f32.mrb[177].mxu0  ;;  %v8139_v57 = vld [vmem:[%s11696_s10 + $0x7] ss:$0 sm:$0xff] }
0x4504   :  { %v6320_v21 = vpop.f32.mrb[178].mxu0 }
0x4505   :  { %v9119_v22 = vpop.f32.mrb[179].mxu0  ;;  %9367 = vrot.lane.b32.xlu0 %v9366_v6, %s11730_s15 }
0x4509   :  { %6360 = vrot.lane.b32.xlu0 %v11120_v40, %s11727_s21 }
0x4577   :  { %v9368_v54 = vpop.permute.xlu0 %9367 }
0x4578   :  { %v9370_v24 = vunpack.i.h.bf16 %v9368_v54  ;;  %v9369_v32 = vunpack.i.l.bf16 %v9368_v54 }
0x457a   :  { %v6352_v40 = vsel %vm1074_vm5, %v6350_v28, %v9370_v24  ;;  %v6351_v25 = vsel %vm1074_vm5, %v6349_v20, %v9369_v32 }
0x457b   :  { %v6353_v4 = vpack.c.bf16 %v6352_v40, %v6351_v25  ;;  %v6361_v27 = vpop.permute.xlu0 %6360 }
0x457d   :  { %9125 = vmatmul.mubr.msk.bf16.vlgmr.msra.gmra.mrb[204].mxu1 %vm102_vm1, %v6353_v4 }
0x457e   :  { %9140 = vmatprep.mubr.msk.bf16.mxu1 %vm9767_vm0, %v9766_v1 }
0x4650   :  { %v6400_v15 = vpop.f32.mrb[204].mxu1 }
0x4651   :  { %v6401_v39 = vadd.f32 %v6400_v15, %v6361_v27  ;;  %v9126_v16 = vpop.f32.mrb[205].mxu1 }
0x4652   :  { %v6403_v45 = vpop.f32.mrb[206].mxu1 }
0x4653   :  { %v6407_v46 = vadd.f32 %v6401_v39, %v11108_v44  ;;  %v6404_v55 = vadd.f32 %v6403_v45, %v6361_v27  ;;  %v9127_v5 = vpop.f32.mrb[207].mxu1  ;;  %v11337_v44 = vld [vmem:[%s11690_s4 + $0x58] sm:$0xff]  }
0x4654   :  { %9131 = vmatpush3.bf16.msra.mxu0 %v11337_v44 }
0x4655   :  { %v6408_v43 = vadd.f32 %v6404_v55, %v11110_v23  ;;  %v6413_v9 = vsel %vm102_vm1, %v6407_v46, 0.0  ;;  %9144 = vmatprep.subr.bf16.mxu0 %v9766_v1 }
0x4656   :  { %6414 = vadd.xlane.f32.xlu1 %v6413_v9 }
0x4657   :  { %v6416_v34 = vsel %vm102_vm1, %v6408_v43, 0.0 }
0x4658   :  { %6417 = vadd.xlane.f32.xlu0 %v6416_v34 }
0x46e3   :  { %v6415_v23 = vpop.xlane.xlu1 %6414 }
0x46e4   :  { %v6419_v42 = vmul.f32 0.03125, %v6415_v23 }
0x46e5   :  { %v6418_v26 = vpop.xlane.xlu0 %6417 }
0x46e6   :  { %v6421_v13 = vsub.f32 %v6407_v46, %v6419_v42  ;;  %v6420_v35 = vmul.f32 0.03125, %v6418_v26 }
0x46e8   :  { %v6422_v36 = vsub.f32 %v6408_v43, %v6420_v35  ;;  %v6423_v33 = vmul.f32 %v6421_v13, %v6421_v13 }
0x46ea   :  { %v6425_v0 = vsel %vm102_vm1, %v6423_v33, 0.0  ;;  %v6424_v47 = vmul.f32 %v6422_v36, %v6422_v36 }
0x46eb   :  { %6426 = vadd.xlane.f32.xlu0 %v6425_v0 }
0x46ec   :  { %v6428_v58 = vsel %vm102_vm1, %v6424_v47, 0.0 }
0x46ed   :  { %6429 = vadd.xlane.f32.xlu1 %v6428_v58  ;;  %v11408_v58 = vld [vmem:[%s11689_s3 + $0x1] ss:$0 sm:$0xff] }
0x46fe   :  { %6541 = vrot.lane.b32.xlu1 %v11337_v44, %s9768_s17 }
0x4701   :  { %6539 = vrot.lane.b32.xlu0 %v11330_v30, %s9768_s17 }
0x4702   :  { %6545 = vrot.lane.b32.xlu1 %v11350_v50, %s9768_s17 }
0x4778   :  { %v6427_v37 = vpop.xlane.xlu0 %6426 }
0x4779   :  { %v6431_v10 = vmul.f32 0.032258064, %v6427_v37 }
0x477a   :  { %v6430_v19 = vpop.xlane.xlu1 %6429 }
0x477b   :  { %9654 = vrsqrt.f32 %v6431_v10  ;;  %v6432_v41 = vmul.f32 0.032258064, %v6430_v19  ;;  %vm6435_vm14 = vcmp.eq.f32.partialorder %v6431_v10, inf  ;;  %v6438_v11 = vand.u32 2147483648, %v6431_v10 }
0x477c   :  { %v6540_v61 = vpop.permute.xlu0 %6539  ;;  %vm6437_vm15 = vcmp.eq.f32.partialorder %v6431_v10, 0.0 }
0x477d   :  { %9137 = vmatpush3.bf16.msra.mxu1 %v6540_v61  ;;  %9656 = vrsqrt.f32 %v6432_v41  ;;  %vm6442_vm6 = vcmp.eq.f32.partialorder %v6432_v41, inf  ;;  %v6445_v48 = vand.u32 2147483648, %v6432_v41  ;;  %vm6444_vm7 = vcmp.eq.f32.partialorder %v6432_v41, 0.0 }
0x477e   :  { %v6542_v56 = vpop.permute.xlu1 %6541  ;;  %9138 = vmatprep.subr.bf16.mxu1 %v9766_v1 }
0x4781   :  { %9139 = vmatpush3.bf16.msra.mxu1 %v6542_v56 }
0x4782   :  { %9150 = vmatprep.subr.bf16.mxu1 %v9766_v1  ;;  %v6546_v54 = vpop.permute.xlu1 %6545 }
0x4784   :  { %9141 = vmatmul.mubr.msk.bf16.vlgmr.msra.gmra.mrb[208].mxu1 %vm102_vm1, %v10776_v59 }
0x4785   :  { %v9655_v60 = vpop.eup %9654  ;;  %9152 = vmatprep.mubr.msk.bf16.mxu1 %vm9767_vm0, %v9766_v1 }
0x4786   :  { %v6434_v62 = vmul.f32 %v9655_v60, %v6431_v10 }
0x4787   :  { %v9657_v7 = vpop.eup %9656 }
0x4788   :  { %v6436_v8 = vsel %vm6435_vm14, %v6431_v10, %v6434_v62  ;;  %v6441_v14 = vmul.f32 %v9657_v7, %v6432_v41 }
0x4789   :  { %v6439_v38 = vsel %vm6437_vm15, %v6438_v11, %v6436_v8 }
0x478a   :  { %v6447_v2 = vadd.f32 1e-06, %v6439_v38  ;;  %v6443_v49 = vsel %vm6442_vm6, %v6432_v41, %v6441_v14 }
0x478b   :  { %v6446_v51 = vsel %vm6444_vm7, %v6445_v48, %v6443_v49 }
0x478c   :  { %9658 = vrcp.f32 %v6447_v2  ;;  %v6448_v59 = vadd.f32 1e-06, %v6446_v51 }
0x478e   :  { %9660 = vrcp.f32 %v6448_v59 }
0x4796   :  { %v9659_v52 = vpop.eup %9658 }
0x4797   :  { %v6450_v6 = vmul.f32 %v9659_v52, %v6421_v13  ;;  %v11402_v13 = vld [vmem:[%s11689_s3] ss:$0 sm:$0xff] }
0x4798   :  { %v9661_v18 = vpop.eup %9660 }
0x4799   :  { %v6452_v21 = vmul.f32 %v9661_v18, %v6422_v36  ;;  %v6459_v22 = vmul.f32 %v8139_v57, %v6450_v6 }
0x479b   :  { %v6460_v12 = vmul.f32 %v8139_v57, %v6452_v21  ;;  %v11366_v3 = vadd.f32 %v8140_v63, %v6459_v22 }
0x479d   :  { %v11368_v17 = vadd.f32 %v8140_v63, %v6460_v12 }
0x479f   :  { %v6476_v29 = vpack.c.bf16 %v11368_v17, %v11366_v3 }
0x47a1   :  { %9133 = vmatmul.mubr.msk.bf16.vlgmr.msra.gmra.mrb[180].mxu0 %vm102_vm1, %v6476_v29 }
0x47a2   :  { %9146 = vmatprep.mubr.msk.bf16.mxu0 %vm9767_vm0, %v9766_v1 }
0x4857   :  { %v6582_v31 = vpop.f32.mrb[208].mxu1 }
0x4858   :  { %v6583_v53 = vadd.f32 %v6582_v31, %v6546_v54  ;;  %v9142_v24 = vpop.f32.mrb[209].mxu1 }
0x4859   :  { %v6585_v32 = vpop.f32.mrb[210].mxu1 }
0x485a   :  { %v11375_v28 = vpack.c.bf16 %v6583_v53, %v6583_v53  ;;  %v6586_v20 = vadd.f32 %v6585_v32, %v6546_v54  ;;  %v9143_v40 = vpop.f32.mrb[211].mxu1 }
0x485c   :  { %v11377_v25 = vpack.c.bf16 %v6586_v20, %v6586_v20  ;;  %v6597_v4 = vsel %vm152_vm2, %v11375_v28, 0 }
0x485d   :  { %9145 = vmatpush3.bf16.xpose.msra.mxu0 %v6597_v4 }
0x485e   :  { %v6643_v27 = vsel %vm152_vm2, %v11377_v25, 0  ;;  %9156 = vmatprep.subr.bf16.mxu0 %v9766_v1 }
0x485f   :  { %9151 = vmatpush3.bf16.xpose.msra.mxu1 %v6643_v27 }
0x4860   :  { %9162 = vmatprep.subr.bf16.mxu1 %v9766_v1 }
0x4874   :  { %v6532_v15 = vpop.f32.mrb[180].mxu0 }
0x4875   :  { %v6533_v39 = vadd.f32 %v11350_v50, %v6532_v15  ;;  %v9134_v16 = vpop.f32.mrb[181].mxu0 }
0x4876   :  { %v6535_v45 = vpop.f32.mrb[182].mxu0 }
0x4877   :  { %v11386_v46 = vpack.c.bf16 %v6533_v39, %v6533_v39  ;;  %v6536_v55 = vadd.f32 %v11350_v50, %v6535_v45  ;;  %v9135_v5 = vpop.f32.mrb[183].mxu0 }
0x4879   :  { %v11389_v43 = vpack.c.bf16 %v6536_v55, %v6536_v55  ;;  %9147 = vmatmul.mubr.msk.bf16.vlgmr.msra.gmra.mrb[184].mxu0 %vm152_vm2, %v11386_v46 }
0x487a   :  { %9158 = vmatprep.mubr.msk.bf16.mxu0 %vm9767_vm0, %v9766_v1 }
0x487b   :  { %9153 = vmatmul.mubr.msk.bf16.vlgmr.msra.gmra.mrb[212].mxu1 %vm152_vm2, %v11389_v43 }
0x487c   :  { %9164 = vmatprep.mubr.msk.bf16.mxu1 %vm9767_vm0, %v9766_v1 }
0x494c   :  { %v6633_v9 = vpop.f32.mrb[184].mxu0 }
0x494d   :  { %v6685_v34 = vmul.f32 0.35355338, %v6633_v9  ;;  %v9148_v23 = vpop.f32.mrb[185].mxu0 }
0x494e   :  { %v6636_v42 = vpop.f32.mrb[186].mxu0  ;;  %v6679_v26 = vpop.f32.mrb[212].mxu1 }
0x494f   :  { %v6687_v35 = vadd.f32 %v11402_v13, %v6685_v34  ;;  %v6686_v36 = vmul.f32 0.35355338, %v6679_v26  ;;  %v9149_v33 = vpop.f32.mrb[187].mxu0  ;;  %v9154_v0 = vpop.f32.mrb[213].mxu1 }
0x4950   :  { %v6682_v47 = vpop.f32.mrb[214].mxu1 }
0x4951   :  { %v6688_v37 = vadd.f32 %v11408_v58, %v6686_v36  ;;  %v9155_v10 = vpop.f32.mrb[215].mxu1  ;;  %v6689_v19 = vsel %vm152_vm2, %v6687_v35, -inf }
0x4952   :  { %6690 = vmax.xlane.f32.xlu0 %v6689_v19 }
0x4953   :  { %v6692_v41 = vsel %vm152_vm2, %v6688_v37, -inf }
0x4954   :  { %6693 = vmax.xlane.f32.xlu1 %v6692_v41 }
0x4965   :  { %6714 = vrot.lane.b32.xlu1 %v11375_v28, %s9768_s17 }
0x4969   :  { %6814 = vrot.lane.b32.xlu1 %v11375_v28, %s11736_s22 }
0x496d   :  { %6865 = vrot.lane.b32.xlu1 %v11377_v25, %s11736_s22 }
0x4971   :  { %6863 = vrot.lane.b32.xlu1 %v11389_v43, %s11736_s22 }
0x49df   :  { %v6691_v61 = vpop.xlane.xlu0 %6690 }
0x49e0   :  { %v6695_v56 = vsub.f32 %v6687_v35, %v6691_v61 }
0x49e1   :  { %v6694_v60 = vpop.xlane.xlu1 %6693 }
0x49e2   :  { %v6697_v62 = vmul.f32 1.442695, %v6695_v56  ;;  %v6696_v11 = vsub.f32 %v6688_v37, %v6694_v60 }
0x49e4   :  { %9662 = vpow2.f32 %v6697_v62  ;;  %v6699_v7 = vmul.f32 1.442695, %v6696_v11 }
0x49e5   :  { %v6715_v8 = vpop.permute.xlu1 %6714 }
0x49e6   :  { %9664 = vpow2.f32 %v6699_v7  ;;  %v6720_v38 = vsel %vm281_vm3, %v6715_v8, 0 }
0x49e7   :  { %9157 = vmatpush3.bf16.msra.mxu0 %v6720_v38 }
0x49e8   :  { %9168 = vmatprep.subr.bf16.mxu0 %v9766_v1 }
0x49e9   :  { %v6815_v18 = vpop.permute.xlu1 %6814 }
0x49ea   :  { %v6820_v12 = vsel %vm152_vm2, %v6815_v18, 0 }
0x49ed   :  { %v6866_v54 = vpop.permute.xlu1 %6865 }
0x49ee   :  { %v9663_v14 = vpop.eup %9662  ;;  %v6871_v53 = vsel %vm152_vm2, %v6866_v54, 0 }
0x49ef   :  { %v6701_v2 = vsel %vm152_vm2, %v9663_v14, 0.0 }
0x49f0   :  { %v9665_v48 = vpop.eup %9664  ;;  %6702 = vadd.xlane.f32.xlu0 %v6701_v2 }
0x49f1   :  { %v6704_v49 = vsel %vm152_vm2, %v9665_v48, 0.0  ;;  %v6864_v32 = vpop.permute.xlu1 %6863 }
0x49f4   :  { %6705 = vadd.xlane.f32.xlu0 %v6704_v49 }
0x4a0a   :  { %6763 = vrot.lane.b32.xlu0 %v11377_v25, %s9768_s17 }
0x4a0e   :  { %6812 = vrot.lane.b32.xlu0 %v11386_v46, %s11736_s22 }
0x4a7d   :  { %v6703_v51 = vpop.xlane.xlu0 %6702 }
0x4a7e   :  { %9666 = vrcp.f32 %v6703_v51 }
0x4a81   :  { %v6706_v59 = vpop.xlane.xlu0 %6705 }
0x4a82   :  { %9668 = vrcp.f32 %v6706_v59 }
0x4a85   :  { %v6764_v52 = vpop.permute.xlu0 %6763 }
0x4a86   :  { %v6769_v57 = vsel %vm281_vm3, %v6764_v52, 0 }
0x4a87   :  { %9163 = vmatpush3.bf16.msra.mxu1 %v6769_v57 }
0x4a88   :  { %v9667_v6 = vpop.eup %9666  ;;  %9174 = vmatprep.subr.bf16.mxu1 %v9766_v1 }
0x4a89   :  { %v6708_v21 = vmul.f32 %v9667_v6, %v9663_v14  ;;  %v6813_v24 = vpop.permute.xlu0 %6812 }
0x4a8b   :  { %v6711_v22 = vpack.c.bf16 %v6708_v21, %v6708_v21 }
0x4a8c   :  { %v9669_v63 = vpop.eup %9668 }
0x4a8d   :  { %v6710_v29 = vmul.f32 %v9669_v63, %v9665_v48  ;;  %9159 = vmatmul.mubr.msk.bf16.vlgmr.msra.gmra.mrb[188].mxu0 %vm152_vm2, %v6711_v22 }
0x4a8e   :  { %9169 = vmatpush3.bf16.xpose.msra.mxu0 %v6820_v12  ;;  %9170 = vmatprep.mubr.msk.bf16.mxu0 %vm9767_vm0, %v9766_v1 }
0x4a8f   :  { %v6712_v31 = vpack.c.bf16 %v6710_v29, %v6710_v29  ;;  %9180 = vmatprep.subr.bf16.mxu0 %v9766_v1 }
0x4a91   :  { %9165 = vmatmul.mubr.msk.bf16.vlgmr.msra.gmra.mrb[216].mxu1 %vm152_vm2, %v6712_v31 }
0x4a92   :  { %9175 = vmatpush3.bf16.xpose.msra.mxu1 %v6871_v53  ;;  %9176 = vmatprep.mubr.msk.bf16.mxu1 %vm9767_vm0, %v9766_v1 }
0x4a93   :  { %9186 = vmatprep.subr.bf16.mxu1 %v9766_v1 }
0x4a95   :  { %9171 = vmatmul.mubr.msk.bf16.vlgmr.msra.gmra.mrb[192].mxu0 %vm152_vm2, %v6813_v24 }
0x4a96   :  { %9182 = vmatprep.mubr.msk.bf16.mxu0 %vm9767_vm0, %v9766_v1 }
0x4a99   :  { %9177 = vmatmul.mubr.msk.bf16.vlgmr.msra.gmra.mrb[220].mxu1 %vm152_vm2, %v6864_v32 }
0x4a9a   :  { %9188 = vmatprep.mubr.msk.bf16.mxu1 %vm9767_vm0, %v9766_v1 }
0x4b60   :  { %v11447_v20 = vpop.f32.mrb[188].mxu0 }
0x4b61   :  { %v9160_v40 = vpop.f32.mrb[189].mxu0 }
0x4b62   :  { %v6759_v4 = vpop.f32.mrb[190].mxu0 }
0x4b63   :  { %v9161_v27 = vpop.f32.mrb[191].mxu0 }
0x4b64   :  { %v11449_v15 = vpop.f32.mrb[216].mxu1 }
0x4b65   :  { %v9166_v39 = vpop.f32.mrb[217].mxu1 }
0x4b66   :  { %v6808_v16 = vpop.f32.mrb[218].mxu1 }
0x4b67   :  { %v9167_v45 = vpop.f32.mrb[219].mxu1 }
0x4b68   :  { %v6856_v55 = vpop.f32.mrb[192].mxu0 }
0x4b69   :  { %v6913_v5 = vmul.f32 0.35355338, %v6856_v55  ;;  %v9172_v9 = vpop.f32.mrb[193].mxu0 }
0x4b6a   :  { %v6859_v34 = vpop.f32.mrb[194].mxu0 }
0x4b6b   :  { %v6915_v23 = vadd.f32 %v11402_v13, %v6913_v5  ;;  %v9173_v42 = vpop.f32.mrb[195].mxu0 }
0x4b6c   :  { %v6907_v26 = vpop.f32.mrb[220].mxu1 }
0x4b6d   :  { %v6914_v35 = vmul.f32 0.35355338, %v6907_v26  ;;  %v9178_v36 = vpop.f32.mrb[221].mxu1  ;;  %v6917_v33 = vsel %vm152_vm2, %v6915_v23, -inf }
0x4b6e   :  { %6918 = vmax.xlane.f32.xlu0 %v6917_v33  ;;  %v6910_v0 = vpop.f32.mrb[222].mxu1 }
0x4b6f   :  { %v6916_v47 = vadd.f32 %v11408_v58, %v6914_v35  ;;  %v9179_v37 = vpop.f32.mrb[223].mxu1 }
0x4b71   :  { %v6920_v10 = vsel %vm152_vm2, %v6916_v47, -inf }
0x4b72   :  { %6921 = vmax.xlane.f32.xlu1 %v6920_v10 }
0x4b83   :  { %6941 = vrot.lane.b32.xlu1 %v11375_v28, %s11735_s2 }
0x4b87   :  { %7039 = vrot.lane.b32.xlu1 %v11375_v28, %s11731_s16 }
0x4b8b   :  { %7089 = vrot.lane.b32.xlu1 %v11377_v25, %s11731_s16 }
0x4b8f   :  { %7087 = vrot.lane.b32.xlu1 %v11389_v43, %s11731_s16 }
0x4bfb   :  { %v6919_v19 = vpop.xlane.xlu0 %6918 }
0x4bfc   :  { %v6923_v41 = vsub.f32 %v6915_v23, %v6919_v19 }
0x4bfe   :  { %v6925_v61 = vmul.f32 1.442695, %v6923_v41 }
0x4bff   :  { %v6922_v56 = vpop.xlane.xlu1 %6921 }
0x4c00   :  { %9670 = vpow2.f32 %v6925_v61  ;;  %v6924_v60 = vsub.f32 %v6916_v47, %v6922_v56 }
0x4c02   :  { %v6927_v62 = vmul.f32 1.442695, %v6924_v60 }
0x4c03   :  { %v6942_v11 = vpop.permute.xlu1 %6941 }
0x4c04   :  { %9672 = vpow2.f32 %v6927_v62  ;;  %v6947_v7 = vsel %vm281_vm3, %v6942_v11, 0 }
0x4c05   :  { %9181 = vmatpush3.bf16.msra.mxu0 %v6947_v7 }
0x4c06   :  { %9192 = vmatprep.subr.bf16.mxu0 %v9766_v1 }
0x4c07   :  { %v7040_v57 = vpop.permute.xlu1 %7039 }
0x4c08   :  { %v7045_v22 = vsel %vm152_vm2, %v7040_v57, 0 }
0x4c0a   :  { %v9671_v8 = vpop.eup %9670 }
0x4c0b   :  { %v6929_v38 = vsel %vm152_vm2, %v9671_v8, 0.0  ;;  %v7090_v12 = vpop.permute.xlu1 %7089 }
0x4c0c   :  { %6930 = vadd.xlane.f32.xlu0 %v6929_v38  ;;  %v7095_v54 = vsel %vm152_vm2, %v7090_v12, 0 }
0x4c0e   :  { %v9673_v14 = vpop.eup %9672 }
0x4c0f   :  { %v6932_v2 = vsel %vm152_vm2, %v9673_v14, 0.0  ;;  %v7088_v53 = vpop.permute.xlu1 %7087 }
0x4c10   :  { %6933 = vadd.xlane.f32.xlu0 %v6932_v2 }
0x4c26   :  { %6989 = vrot.lane.b32.xlu0 %v11377_v25, %s11735_s2 }
0x4c2a   :  { %7037 = vrot.lane.b32.xlu0 %v11386_v46, %s11731_s16 }
0x4c99   :  { %v6931_v48 = vpop.xlane.xlu0 %6930 }
0x4c9a   :  { %9674 = vrcp.f32 %v6931_v48 }
0x4c9d   :  { %v6934_v49 = vpop.xlane.xlu0 %6933 }
0x4c9e   :  { %9676 = vrcp.f32 %v6934_v49 }
0x4ca1   :  { %v6990_v51 = vpop.permute.xlu0 %6989 }
0x4ca2   :  { %v6995_v59 = vsel %vm281_vm3, %v6990_v51, 0 }
0x4ca3   :  { %9187 = vmatpush3.bf16.msra.mxu1 %v6995_v59 }
0x4ca4   :  { %v9675_v52 = vpop.eup %9674  ;;  %9198 = vmatprep.subr.bf16.mxu1 %v9766_v1 }
0x4ca5   :  { %v6936_v6 = vmul.f32 %v9675_v52, %v9671_v8  ;;  %v7038_v31 = vpop.permute.xlu0 %7037 }
0x4ca7   :  { %v6939_v18 = vpack.c.bf16 %v6936_v6, %v6936_v6 }
0x4ca8   :  { %v9677_v21 = vpop.eup %9676 }
0x4ca9   :  { %v6938_v63 = vmul.f32 %v9677_v21, %v9673_v14  ;;  %9183 = vmatmul.mubr.msk.bf16.vlgmr.msra.gmra.mrb[196].mxu0 %vm152_vm2, %v6939_v18 }
0x4caa   :  { %9193 = vmatpush3.bf16.xpose.msra.mxu0 %v7045_v22  ;;  %9194 = vmatprep.mubr.msk.bf16.mxu0 %vm9767_vm0, %v9766_v1 }
0x4cab   :  { %v6940_v29 = vpack.c.bf16 %v6938_v63, %v6938_v63  ;;  %9204 = vmatprep.subr.bf16.mxu0 %v9766_v1 }
0x4cad   :  { %9189 = vmatmul.mubr.msk.bf16.vlgmr.msra.gmra.mrb[224].mxu1 %vm152_vm2, %v6940_v29 }
0x4cae   :  { %9199 = vmatpush3.bf16.xpose.msra.mxu1 %v7095_v54  ;;  %9200 = vmatprep.mubr.msk.bf16.mxu1 %vm9767_vm0, %v9766_v1 }
0x4caf   :  { %9210 = vmatprep.subr.bf16.mxu1 %v9766_v1 }
0x4cb1   :  { %9195 = vmatmul.mubr.msk.bf16.vlgmr.msra.gmra.mrb[200].mxu0 %vm152_vm2, %v7038_v31 }
0x4cb2   :  { %9206 = vmatprep.mubr.msk.bf16.mxu0 %vm9767_vm0, %v9766_v1 }
0x4cb5   :  { %9201 = vmatmul.mubr.msk.bf16.vlgmr.msra.gmra.mrb[228].mxu1 %vm152_vm2, %v7088_v53 }
0x4cb6   :  { %9212 = vmatprep.mubr.msk.bf16.mxu1 %vm9767_vm0, %v9766_v1 }
0x4d7c   :  { %v11489_v24 = vpop.f32.mrb[196].mxu0 }
0x4d7d   :  { %v9184_v32 = vpop.f32.mrb[197].mxu0 }
0x4d7e   :  { %v6986_v40 = vpop.f32.mrb[198].mxu0 }
0x4d7f   :  { %v9185_v4 = vpop.f32.mrb[199].mxu0 }
0x4d80   :  { %v11491_v27 = vpop.f32.mrb[224].mxu1 }
0x4d81   :  { %v9371_v39 = vpack.i.bf16 %v11491_v27, %v11489_v24  ;;  %v9190_v16 = vpop.f32.mrb[225].mxu1 }
0x4d82   :  { %v7034_v45 = vpop.f32.mrb[226].mxu1 }
0x4d83   :  { %v9191_v55 = vpop.f32.mrb[227].mxu1 }
0x4d84   :  { %v7081_v5 = vpop.f32.mrb[200].mxu0 }
0x4d85   :  { %v7137_v9 = vmul.f32 0.35355338, %v7081_v5  ;;  %v9196_v34 = vpop.f32.mrb[201].mxu0 }
0x4d86   :  { %v7084_v23 = vpop.f32.mrb[202].mxu0 }
0x4d87   :  { %v7139_v42 = vadd.f32 %v11402_v13, %v7137_v9  ;;  %v9197_v26 = vpop.f32.mrb[203].mxu0 }
0x4d88   :  { %v7131_v35 = vpop.f32.mrb[228].mxu1 }
0x4d89   :  { %v7138_v36 = vmul.f32 0.35355338, %v7131_v35  ;;  %v9202_v33 = vpop.f32.mrb[229].mxu1  ;;  %v7141_v0 = vsel %vm152_vm2, %v7139_v42, -inf }
0x4d8a   :  { %7142 = vmax.xlane.f32.xlu0 %v7141_v0  ;;  %v7134_v47 = vpop.f32.mrb[230].mxu1 }
0x4d8b   :  { %v7140_v37 = vadd.f32 %v11408_v58, %v7138_v36  ;;  %v9203_v10 = vpop.f32.mrb[231].mxu1 }
0x4d8d   :  { %v7144_v19 = vsel %vm152_vm2, %v7140_v37, -inf }
0x4d8e   :  { %7145 = vmax.xlane.f32.xlu1 %v7144_v19 }
0x4d9f   :  { %7165 = vrot.lane.b32.xlu1 %v11375_v28, %s11738_s30 }
0x4da3   :  { %7263 = vrot.lane.b32.xlu1 %v11375_v28, %s11734_s18 }
0x4da7   :  { %7313 = vrot.lane.b32.xlu1 %v11377_v25, %s11734_s18 }
0x4dab   :  { %7311 = vrot.lane.b32.xlu1 %v11389_v43, %s11734_s18 }
0x4e17   :  { %v7143_v41 = vpop.xlane.xlu0 %7142 }
0x4e18   :  { %v7147_v61 = vsub.f32 %v7139_v42, %v7143_v41 }
0x4e1a   :  { %v7149_v56 = vmul.f32 1.442695, %v7147_v61 }
0x4e1b   :  { %v7146_v60 = vpop.xlane.xlu1 %7145 }
0x4e1c   :  { %9678 = vpow2.f32 %v7149_v56  ;;  %v7148_v62 = vsub.f32 %v7140_v37, %v7146_v60 }
0x4e1e   :  { %v7151_v11 = vmul.f32 1.442695, %v7148_v62 }
0x4e1f   :  { %v7166_v7 = vpop.permute.xlu1 %7165 }
0x4e20   :  { %9680 = vpow2.f32 %v7151_v11  ;;  %v7171_v8 = vsel %vm281_vm3, %v7166_v7, 0 }
0x4e21   :  { %9205 = vmatpush3.bf16.msra.mxu0 %v7171_v8 }
0x4e22   :  { %9216 = vmatprep.subr.bf16.mxu0 %v9766_v1 }
0x4e23   :  { %v7264_v57 = vpop.permute.xlu1 %7263 }
0x4e24   :  { %v7269_v22 = vsel %vm152_vm2, %v7264_v57, 0 }
0x4e26   :  { %v9679_v38 = vpop.eup %9678 }
0x4e27   :  { %v7153_v14 = vsel %vm152_vm2, %v9679_v38, 0.0 }
0x4e28   :  { %7154 = vadd.xlane.f32.xlu0 %v7153_v14 }
0x4e2a   :  { %v9681_v2 = vpop.eup %9680 }
0x4e2b   :  { %v7156_v43 = vsel %vm152_vm2, %v9681_v2, 0.0 }
0x4e2c   :  { %7157 = vadd.xlane.f32.xlu0 %v7156_v43 }
0x4e42   :  { %7213 = vrot.lane.b32.xlu0 %v11377_v25, %s11738_s30 }
0x4e46   :  { %7261 = vrot.lane.b32.xlu0 %v11386_v46, %s11734_s18  ;;  %v7314_v46 = vpop.permute.xlu1 %7313 }
0x4e47   :  { %v7319_v29 = vsel %vm152_vm2, %v7314_v46, 0 }
0x4e4a   :  { %v7312_v31 = vpop.permute.xlu1 %7311 }
0x4eb5   :  { %v7155_v48 = vpop.xlane.xlu0 %7154 }
0x4eb6   :  { %9682 = vrcp.f32 %v7155_v48 }
0x4eb9   :  { %v7158_v49 = vpop.xlane.xlu0 %7157 }
0x4eba   :  { %9684 = vrcp.f32 %v7158_v49 }
0x4ebd   :  { %v7214_v51 = vpop.permute.xlu0 %7213 }
0x4ebe   :  { %v7219_v59 = vsel %vm281_vm3, %v7214_v51, 0 }
0x4ebf   :  { %9211 = vmatpush3.bf16.msra.mxu1 %v7219_v59 }
0x4ec0   :  { %v9683_v52 = vpop.eup %9682  ;;  %9222 = vmatprep.subr.bf16.mxu1 %v9766_v1 }
0x4ec1   :  { %v7160_v6 = vmul.f32 %v9683_v52, %v9679_v38  ;;  %v7262_v54 = vpop.permute.xlu0 %7261 }
0x4ec3   :  { %v7163_v18 = vpack.c.bf16 %v7160_v6, %v7160_v6 }
0x4ec4   :  { %v9685_v21 = vpop.eup %9684 }
0x4ec5   :  { %v7162_v63 = vmul.f32 %v9685_v21, %v9681_v2  ;;  %9207 = vmatmul.mubr.msk.bf16.vlgmr.msra.gmra.mrb[204].mxu0 %vm152_vm2, %v7163_v18 }
0x4ec6   :  { %9217 = vmatpush3.bf16.xpose.msra.mxu0 %v7269_v22  ;;  %9218 = vmatprep.mubr.msk.bf16.mxu0 %vm9767_vm0, %v9766_v1 }
0x4ec7   :  { %v7164_v12 = vpack.c.bf16 %v7162_v63, %v7162_v63  ;;  %9228 = vmatprep.subr.bf16.mxu0 %v9766_v1 }
0x4ec9   :  { %9213 = vmatmul.mubr.msk.bf16.vlgmr.msra.gmra.mrb[232].mxu1 %vm152_vm2, %v7164_v12 }
0x4eca   :  { %9223 = vmatpush3.bf16.xpose.msra.mxu1 %v7319_v29  ;;  %9224 = vmatprep.mubr.msk.bf16.mxu1 %vm9767_vm0, %v9766_v1 }
0x4ecb   :  { %9234 = vmatprep.subr.bf16.mxu1 %v9766_v1 }
0x4ecd   :  { %9219 = vmatmul.mubr.msk.bf16.vlgmr.msra.gmra.mrb[208].mxu0 %vm152_vm2, %v7262_v54 }
0x4ece   :  { %9230 = vmatprep.mubr.msk.bf16.mxu0 %vm9767_vm0, %v9766_v1 }
0x4ed1   :  { %9225 = vmatmul.mubr.msk.bf16.vlgmr.msra.gmra.mrb[236].mxu1 %vm152_vm2, %v7312_v31 }
0x4ed2   :  { %9236 = vmatprep.mubr.msk.bf16.mxu1 %vm9767_vm0, %v9766_v1 }
0x4f98   :  { %v7207_v53 = vpop.f32.mrb[204].mxu0 }
0x4f99   :  { %v9208_v32 = vpop.f32.mrb[205].mxu0 }
0x4f9a   :  { %v7210_v40 = vpop.f32.mrb[206].mxu0 }
0x4f9b   :  { %v9209_v4 = vpop.f32.mrb[207].mxu0 }
0x4f9c   :  { %v7255_v16 = vpop.f32.mrb[232].mxu1 }
0x4f9d   :  { %v9376_v45 = vpack.i.bf16 %v7255_v16, %v7207_v53  ;;  %v9214_v55 = vpop.f32.mrb[233].mxu1 }
0x4f9e   :  { %v7258_v5 = vpop.f32.mrb[234].mxu1 }
0x4f9f   :  { %v9215_v9 = vpop.f32.mrb[235].mxu1 }
0x4fa0   :  { %v7305_v34 = vpop.f32.mrb[208].mxu0 }
0x4fa1   :  { %v7361_v23 = vmul.f32 0.35355338, %v7305_v34  ;;  %v9220_v42 = vpop.f32.mrb[209].mxu0 }
0x4fa2   :  { %v7308_v26 = vpop.f32.mrb[210].mxu0 }
0x4fa3   :  { %v7363_v35 = vadd.f32 %v11402_v13, %v7361_v23  ;;  %v9221_v36 = vpop.f32.mrb[211].mxu0 }
0x4fa4   :  { %v7355_v33 = vpop.f32.mrb[236].mxu1 }
0x4fa5   :  { %v7362_v0 = vmul.f32 0.35355338, %v7355_v33  ;;  %v9226_v47 = vpop.f32.mrb[237].mxu1  ;;  %v7365_v37 = vsel %vm152_vm2, %v7363_v35, -inf }
0x4fa6   :  { %7366 = vmax.xlane.f32.xlu0 %v7365_v37  ;;  %v7358_v10 = vpop.f32.mrb[238].mxu1 }
0x4fa7   :  { %v7364_v19 = vadd.f32 %v11408_v58, %v7362_v0  ;;  %v9227_v41 = vpop.f32.mrb[239].mxu1 }
0x4fa9   :  { %v7368_v61 = vsel %vm152_vm2, %v7364_v19, -inf }
0x4faa   :  { %7369 = vmax.xlane.f32.xlu1 %v7368_v61 }
0x4fbb   :  { %7389 = vrot.lane.b32.xlu1 %v11375_v28, %s11733_s19 }
0x4fbf   :  { %7516 = vrot.lane.b32.xlu1 %v11330_v30, %s11727_s21 }
0x4fc3   :  { %9372 = vrot.lane.b32.xlu1 %v9371_v39, %s11728_s1 }
0x5033   :  { %v7367_v13 = vpop.xlane.xlu0 %7366 }
0x5034   :  { %v7371_v56 = vsub.f32 %v7363_v35, %v7367_v13 }
0x5036   :  { %v7373_v60 = vmul.f32 1.442695, %v7371_v56 }
0x5037   :  { %v7370_v62 = vpop.xlane.xlu1 %7369 }
0x5038   :  { %9686 = vpow2.f32 %v7373_v60  ;;  %v7372_v58 = vsub.f32 %v7364_v19, %v7370_v62 }
0x503a   :  { %v7375_v11 = vmul.f32 1.442695, %v7372_v58 }
0x503b   :  { %v7390_v7 = vpop.permute.xlu1 %7389 }
0x503c   :  { %9688 = vpow2.f32 %v7375_v11  ;;  %v7395_v8 = vsel %vm281_vm3, %v7390_v7, 0 }
0x503d   :  { %9229 = vmatpush3.bf16.msra.mxu0 %v7395_v8 }
0x503e   :  { %9240 = vmatprep.subr.bf16.mxu0 %v9766_v1 }
0x5042   :  { %v9687_v30 = vpop.eup %9686 }
0x5043   :  { %v7377_v28 = vsel %vm152_vm2, %v9687_v30, 0.0 }
0x5044   :  { %7378 = vadd.xlane.f32.xlu0 %v7377_v28  ;;  %v9430_v28 = vld [vmem:[%s11694_s8] sm:$0xff]  }
0x5046   :  { %v9689_v24 = vpop.eup %9688 }
0x5047   :  { %v7380_v27 = vsel %vm152_vm2, %v9689_v24, 0.0 }
0x5048   :  { %7381 = vadd.xlane.f32.xlu0 %v7380_v27  ;;  %v9432_v27 = vld [vmem:[%s11694_s8 + $0x10] sm:$0xff]  }
0x505e   :  { %7437 = vrot.lane.b32.xlu0 %v11377_v25, %s11733_s19  ;;  %v7517_v25 = vpop.permute.xlu1 %7516 }
0x5062   :  { %9377 = vrot.lane.b32.xlu0 %v9376_v45, %s11729_s14  ;;  %v9373_v31 = vpop.permute.xlu1 %9372 }
0x5063   :  { %v9375_v53 = vunpack.i.h.bf16 %v9373_v31  ;;  %v9374_v32 = vunpack.i.l.bf16 %v9373_v31 }
0x5065   :  { %v7510_v45 = vsel %vm152_vm2, %v11449_v15, %v9375_v53  ;;  %v7509_v55 = vsel %vm152_vm2, %v11447_v20, %v9374_v32  ;;  %v8170_v32 = vld [vmem:[%s11696_s10 + $0x8] ss:$0 sm:$0xff] }
0x5066   :  { %7518 = vrot.lane.b32.xlu0 %v11337_v44, %s11727_s21 }
0x50d1   :  { %v7379_v39 = vpop.xlane.xlu0 %7378 }
0x50d2   :  { %9690 = vrcp.f32 %v7379_v39  ;;  %v9434_v39 = vld [vmem:[%s11694_s8 + $0x20] sm:$0xff]  }
0x50d5   :  { %v7382_v38 = vpop.xlane.xlu0 %7381 }
0x50d6   :  { %9692 = vrcp.f32 %v7382_v38  ;;  %v9433_v38 = vld [vmem:[%s11694_s8 + $0x18] sm:$0xff]  }
0x50d9   :  { %v7438_v14 = vpop.permute.xlu0 %7437 }
0x50da   :  { %v7443_v2 = vsel %vm281_vm3, %v7438_v14, 0  ;;  %v9436_v14 = vld [vmem:[%s11694_s8 + $0x30] sm:$0xff]  }
0x50db   :  { %9235 = vmatpush3.bf16.msra.mxu1 %v7443_v2  ;;  %v9435_v2 = vld [vmem:[%s11694_s8 + $0x28] sm:$0xff]  }
0x50dc   :  { %v9691_v43 = vpop.eup %9690  ;;  %9248 = vmatprep.subr.bf16.mxu1 %v9766_v1 }
0x50dd   :  { %v7384_v48 = vmul.f32 %v9691_v43, %v9687_v30  ;;  %v9378_v52 = vpop.permute.xlu0 %9377  ;;  %v9429_v30 = vld [vmem:[%s11692_s6 + $0x38] sm:$0xff]  }
0x50de   :  { %v9380_v40 = vunpack.i.h.bf16 %v9378_v52  ;;  %v9379_v4 = vunpack.i.l.bf16 %v9378_v52  ;;  %v9437_v43 = vld [vmem:[%s11694_s8 + $0x38] sm:$0xff]  }
0x50df   :  { %v7387_v49 = vpack.c.bf16 %v7384_v48, %v7384_v48 }
0x50e0   :  { %v9693_v51 = vpop.eup %9692  ;;  %v7511_v34 = vsel %vm1071_vm4, %v7509_v55, %v9379_v4  ;;  %v7512_v23 = vsel %vm1071_vm4, %v7510_v45, %v9380_v40 }
0x50e1   :  { %v7386_v59 = vmul.f32 %v9693_v51, %v9689_v24  ;;  %9231 = vmatmul.mubr.msk.bf16.vlgmr.msra.gmra.mrb[212].mxu0 %vm152_vm2, %v7387_v49  ;;  %v7519_v57 = vpop.permute.xlu0 %7518  ;;  %v9431_v24 = vld [vmem:[%s11694_s8 + $0x8] sm:$0xff]  }
0x50e2   :  { %9241 = vmatpush3.bf16.msra.mxu0 %v7517_v25  ;;  %9244 = vmatprep.mubr.msk.bf16.mxu0 %vm9767_vm0, %v9766_v1 }
0x50e3   :  { %v7388_v44 = vpack.c.bf16 %v7386_v59, %v7386_v59  ;;  %9242 = vmatprep.subr.bf16.mxu0 %v9766_v1 }
0x50e5   :  { %9237 = vmatmul.mubr.msk.bf16.vlgmr.msra.gmra.mrb[240].mxu1 %vm152_vm2, %v7388_v44 }
0x50e6   :  { %9252 = vmatprep.mubr.msk.bf16.mxu1 %vm9767_vm0, %v9766_v1  ;;  %9243 = vmatpush3.bf16.msra.mxu0 %v7519_v57 }
0x50e7   :  { %9256 = vmatprep.subr.bf16.mxu0 %v9766_v1 }
0x51b4   :  { %v7431_v6 = vpop.f32.mrb[212].mxu0 }
0x51b5   :  { %v9232_v18 = vpop.f32.mrb[213].mxu0 }
0x51b6   :  { %v7434_v21 = vpop.f32.mrb[214].mxu0 }
0x51b7   :  { %v9233_v22 = vpop.f32.mrb[215].mxu0 }
0x51b8   :  { %v7479_v63 = vpop.f32.mrb[240].mxu1 }
0x51b9   :  { %v9381_v46 = vpack.i.bf16 %v7479_v63, %v7431_v6  ;;  %v9238_v12 = vpop.f32.mrb[241].mxu1 }
0x51ba   :  { %v7482_v29 = vpop.f32.mrb[242].mxu1 }
0x51bb   :  { %9382 = vrot.lane.b32.xlu1 %v9381_v46, %s11730_s15  ;;  %v9239_v54 = vpop.f32.mrb[243].mxu1 }
0x51bf   :  { %7522 = vrot.lane.b32.xlu1 %v11350_v50, %s11727_s21 }
0x522d   :  { %v9383_v16 = vpop.permute.xlu1 %9382 }
0x522e   :  { %v9385_v5 = vunpack.i.h.bf16 %v9383_v16  ;;  %v9384_v9 = vunpack.i.l.bf16 %v9383_v16 }
0x5230   :  { %v7514_v50 = vsel %vm1074_vm5, %v7512_v23, %v9385_v5  ;;  %v7513_v42 = vsel %vm1074_vm5, %v7511_v34, %v9384_v9  ;;  %v8171_v5 = vld [vmem:[%s11697_s11 + $0x8] ss:$0 sm:$0xff] }
0x5231   :  { %v7515_v26 = vpack.c.bf16 %v7514_v50, %v7513_v42  ;;  %v7523_v15 = vpop.permute.xlu1 %7522 }
0x5233   :  { %9245 = vmatmul.mubr.msk.bf16.vlgmr.msra.gmra.mrb[216].mxu0 %vm102_vm1, %v7515_v26 }
0x5234   :  { %9272 = vmatprep.mubr.msk.bf16.mxu0 %vm9767_vm0, %v9766_v1 }
0x5306   :  { %v7562_v35 = vpop.f32.mrb[216].mxu0 }
0x5307   :  { %v7563_v36 = vadd.f32 %v7562_v35, %v7523_v15  ;;  %v9246_v20 = vpop.f32.mrb[217].mxu0 }
0x5308   :  { %v7565_v33 = vpop.f32.mrb[218].mxu0  ;;  %v8181_v20 = vld [vmem:[%s11695_s9] ss:$0 sm:$0xff] }
0x5309   :  { %v7569_v0 = vadd.f32 %v7563_v36, %v11366_v3  ;;  %v7566_v47 = vadd.f32 %v7565_v33, %v7523_v15  ;;  %v9247_v37 = vpop.f32.mrb[219].mxu0  ;;  %v8177_v33 = vld [vmem:[%s11693_s7 + $0x3] ss:$0 sm:$0xff]  ;;  %s9783_s7 = smov [#allocation4]  }
0x530a   :  { %s7917_s9 = sshll.u32 %s9783_s7, 4  ;;  %s7918_s9 = int_to_ptr.vmem [resolvable:$true] %s7917_s9 }
0x530b   :  { %v7570_v10 = vadd.f32 %v7566_v47, %v11368_v17  ;;  %v7575_v19 = vsel %vm102_vm1, %v7569_v0, 0.0  ;;  %v9428_v17 = vld [vmem:[%s11692_s6 + $0x30] sm:$0xff]   ;;  %p9723_p1 = scmp.lt.s32.totalorder %s7918_s9, %s7918_s9 }
0x530c   :  { %7576 = vadd.xlane.f32.xlu0 %v7575_v19  ;;  %9249 = vmatpush3.bf16.msra.mxu1 %v9428_v17 }
0x530d   :  { %v7578_v41 = vsel %vm102_vm1, %v7570_v10, 0.0  ;;  %9250 = vmatprep.subr.bf16.mxu1 %v9766_v1 }
0x530e   :  { %7579 = vadd.xlane.f32.xlu1 %v7578_v41 }
0x5310   :  { %9251 = vmatpush3.bf16.msra.mxu1 %v9429_v30 }
0x531f   :  { %7766 = vrot.lane.b32.xlu1 %v9430_v28, %s11727_s21 }
0x5323   :  { %7770 = vrot.lane.b32.xlu1 %v9432_v27, %s11727_s21 }
0x5327   :  { %7772 = vrot.lane.b32.xlu1 %v9433_v38, %s11727_s21 }
0x532b   :  { %7776 = vrot.lane.b32.xlu1 %v9435_v2, %s11727_s21 }
0x532f   :  { %7780 = vrot.lane.b32.xlu1 %v9437_v43, %s11727_s21 }
0x5399   :  { %v7577_v61 = vpop.xlane.xlu0 %7576 }
0x539a   :  { %v7581_v13 = vmul.f32 0.03125, %v7577_v61 }
0x539b   :  { %v7580_v56 = vpop.xlane.xlu1 %7579 }
0x539c   :  { %v7583_v60 = vsub.f32 %v7569_v0, %v7581_v13  ;;  %v7582_v62 = vmul.f32 0.03125, %v7580_v56 }
0x539e   :  { %v7584_v58 = vsub.f32 %v7570_v10, %v7582_v62  ;;  %v7585_v11 = vmul.f32 %v7583_v60, %v7583_v60 }
0x539f   :  { %v7767_v53 = vpop.permute.xlu1 %7766 }
0x53a0   :  { %v7587_v7 = vsel %vm102_vm1, %v7585_v11, 0.0  ;;  %v7586_v3 = vmul.f32 %v7584_v58, %v7584_v58  ;;  %9257 = vmatpush3.bf16.msra.mxu0 %v7767_v53 }
0x53a1   :  { %7588 = vadd.xlane.f32.xlu0 %v7587_v7  ;;  %9258 = vmatprep.subr.bf16.mxu0 %v9766_v1 }
0x53a2   :  { %v7590_v8 = vsel %vm102_vm1, %v7586_v3, 0.0 }
0x53a3   :  { %v7771_v55 = vpop.permute.xlu1 %7770 }
0x53a5   :  { %7591 = vadd.xlane.f32.xlu0 %v7590_v8 }
0x53a7   :  { %v7773_v42 = vpop.permute.xlu1 %7772 }
0x53ab   :  { %v7777_v15 = vpop.permute.xlu1 %7776 }
0x53af   :  { %v7781_v36 = vpop.permute.xlu1 %7780 }
0x53bb   :  { %7768 = vrot.lane.b32.xlu0 %v9431_v24, %s11727_s21 }
0x53bf   :  { %7774 = vrot.lane.b32.xlu0 %v9434_v39, %s11727_s21 }
0x53c3   :  { %7778 = vrot.lane.b32.xlu0 %v9436_v14, %s11727_s21 }
0x53c7   :  { %7790 = vrot.lane.b32.xlu0 %v8181_v20, %s11727_s21  ;;  %s9718_s21 = scalar_lea.vmem %s7918_s9, 256 }
0x53c8   :  { %p9719_p0 = scmp.ne.s32.totalorder %s7918_s9, %s9718_s21  ;;  %p9724_p2 = scmp.lt.s32.totalorder %s9718_s21, %s9718_s21 }
0x53ca   :  { %p9725_p3 = por %p9724_p2, %p9723_p1 }
0x53cc   :  { %p9726_p4 = pnand %p9725_p3, %p9719_p0 }
0x542e   :  { %v7589_v48 = vpop.xlane.xlu0 %7588 }
0x542f   :  { %v7593_v49 = vmul.f32 0.032258064, %v7589_v48 }
0x5431   :  { %9694 = vrsqrt.f32 %v7593_v49  ;;  %vm7597_vm0 = vcmp.eq.f32.partialorder %v7593_v49, inf  ;;  %v7600_v52 = vand.u32 2147483648, %v7593_v49  ;;  %vm7599_vm2 = vcmp.eq.f32.partialorder %v7593_v49, 0.0 }
0x5432   :  { %v7592_v51 = vpop.xlane.xlu0 %7591 }
0x5433   :  { %v7594_v25 = vmul.f32 0.032258064, %v7592_v51 }
0x5435   :  { %9696 = vrsqrt.f32 %v7594_v25  ;;  %vm7604_vm3 = vcmp.eq.f32.partialorder %v7594_v25, inf  ;;  %v7607_v63 = vand.u32 2147483648, %v7594_v25  ;;  %vm7606_vm4 = vcmp.eq.f32.partialorder %v7594_v25, 0.0 }
0x5436   :  { %v7769_v40 = vpop.permute.xlu0 %7768 }
0x5437   :  { %9259 = vmatpush3.bf16.msra.mxu0 %v7769_v40 }
0x5438   :  { %9260 = vmatprep.subr.bf16.mxu0 %v9766_v1 }
0x543a   :  { %v7775_v26 = vpop.permute.xlu0 %7774 }
0x543b   :  { %v9695_v59 = vpop.eup %9694  ;;  %9261 = vmatpush3.bf16.msra.mxu0 %v7771_v55 }
0x543c   :  { %v7596_v44 = vmul.f32 %v9695_v59, %v7593_v49  ;;  %9262 = vmatprep.subr.bf16.mxu0 %v9766_v1 }
0x543e   :  { %v7598_v57 = vsel %vm7597_vm0, %v7593_v49, %v7596_v44  ;;  %v7779_v35 = vpop.permute.xlu0 %7778 }
0x543f   :  { %v9697_v6 = vpop.eup %9696  ;;  %v7601_v18 = vsel %vm7599_vm2, %v7600_v52, %v7598_v57  ;;  %9263 = vmatpush3.bf16.msra.mxu0 %v7773_v42 }
0x5440   :  { %v7609_v21 = vadd.f32 1e-06, %v7601_v18  ;;  %v7603_v22 = vmul.f32 %v9697_v6, %v7594_v25  ;;  %9264 = vmatprep.subr.bf16.mxu0 %v9766_v1 }
0x5442   :  { %9698 = vrcp.f32 %v7609_v21  ;;  %v7605_v46 = vsel %vm7604_vm3, %v7594_v25, %v7603_v22  ;;  %v7791_v56 = vpop.permute.xlu0 %7790 }
0x5443   :  { %v7608_v12 = vsel %vm7606_vm4, %v7607_v63, %v7605_v46  ;;  %9265 = vmatpush3.bf16.msra.mxu0 %v7775_v26 }
0x5444   :  { %v7610_v29 = vadd.f32 1e-06, %v7608_v12  ;;  %9266 = vmatprep.subr.bf16.mxu0 %v9766_v1 }
0x5446   :  { %9700 = vrcp.f32 %v7610_v29 }
0x5447   :  { %9267 = vmatpush3.bf16.msra.mxu0 %v7777_v15 }
0x5448   :  { %9268 = vmatprep.subr.bf16.mxu0 %v9766_v1 }
0x544b   :  { %9269 = vmatpush3.bf16.msra.mxu0 %v7779_v35 }
0x544c   :  { %v9699_v54 = vpop.eup %9698  ;;  %9270 = vmatprep.subr.bf16.mxu0 %v9766_v1 }
0x544d   :  { %v7612_v31 = vmul.f32 %v9699_v54, %v7583_v60 }
0x544f   :  { %v7621_v45 = vmul.f32 %v8170_v32, %v7612_v31  ;;  %9271 = vmatpush3.bf16.msra.mxu0 %v7781_v36 }
0x5450   :  { %v9701_v4 = vpop.eup %9700 }
0x5451   :  { %v7614_v16 = vmul.f32 %v9701_v4, %v7584_v58  ;;  %v7629_v34 = vadd.f32 %v8171_v5, %v7621_v45 }
0x5453   :  { %v7622_v9 = vmul.f32 %v8170_v32, %v7614_v16 }
0x5455   :  { %v7630_v23 = vadd.f32 %v8171_v5, %v7622_v9 }
0x5457   :  { %v7655_v50 = vpack.c.bf16 %v7630_v23, %v7629_v34 }
0x5459   :  { %9253 = vmatmul.mubr.msk.bf16.vlgmr.msra.gmra.mrb[244].mxu1 %vm102_vm1, %v7655_v50 }
0x552c   :  { %v7711_v0 = vpop.f32.mrb[244].mxu1 }
0x552d   :  { %v7712_v47 = vadd.f32 %v8177_v33, %v7711_v0  ;;  %v9254_v37 = vpop.f32.mrb[245].mxu1 }
0x552e   :  { %v7714_v10 = vpop.f32.mrb[246].mxu1 }
0x552f   :  { %v7715_v19 = vadd.f32 %v8177_v33, %v7714_v10  ;;  %v9255_v41 = vpop.f32.mrb[247].mxu1  ;;  %v7718_v61 = vmax.f32 %v7712_v47, 0.0 }
0x5531   :  { %v7719_v1 = vmax.f32 %v7715_v19, 0.0 }
0x5533   :  { %v7720_v13 = vpack.c.bf16 %v7719_v1, %v7718_v61 }
0x5535   :  { %9273 = vmatmul.mubr.bf16.vlgmr.msra.gmra.mrb[220].mxu0 %v7720_v13 }
0x5608   :  { %v7827_v60 = vpop.f32.mrb[220].mxu0 }
0x5609   :  { %v7828_v62 = vadd.f32 %v7827_v60, %v7791_v56  ;;  %v9274_v58 = vpop.f32.mrb[221].mxu0 }
0x560a   :  { %v7830_v11 = vpop.f32.mrb[222].mxu0 }
0x560b   :  { %v7834_v7 = vadd.f32 %v7828_v62, %v7629_v34  ;;  %v7831_v3 = vadd.f32 %v7830_v11, %v7791_v56  ;;  %v9275_v8 = vpop.f32.mrb[223].mxu0 }
0x560d   :  { %v7835_v17 = vadd.f32 %v7831_v3, %v7630_v23  ;;  %v7840_v30 = vsel %vm102_vm1, %v7834_v7, 0.0 }
0x560e   :  { %7841 = vadd.xlane.f32.xlu1 %v7840_v30 }
0x560f   :  { %v7843_v28 = vsel %vm102_vm1, %v7835_v17, 0.0 }
0x5610   :  { %7844 = vadd.xlane.f32.xlu0 %v7843_v28 }
0x569b   :  { %v7842_v24 = vpop.xlane.xlu1 %7841 }
0x569c   :  { %v7846_v27 = vmul.f32 0.03125, %v7842_v24 }
0x569d   :  { %v7845_v39 = vpop.xlane.xlu0 %7844 }
0x569e   :  { %v7848_v38 = vsub.f32 %v7834_v7, %v7846_v27  ;;  %v7847_v14 = vmul.f32 0.03125, %v7845_v39 }
0x56a0   :  { %v7849_v2 = vsub.f32 %v7835_v17, %v7847_v14  ;;  %v7850_v43 = vmul.f32 %v7848_v38, %v7848_v38 }
0x56a2   :  { %v7852_v48 = vsel %vm102_vm1, %v7850_v43, 0.0  ;;  %v7851_v49 = vmul.f32 %v7849_v2, %v7849_v2 }
0x56a3   :  { %7853 = vadd.xlane.f32.xlu0 %v7852_v48 }
0x56a4   :  { %v7855_v51 = vsel %vm102_vm1, %v7851_v49, 0.0 }
0x56a5   :  { %7856 = vadd.xlane.f32.xlu1 %v7855_v51 }
0x56a6   :  { %9729 = shalt.err (!%p9726_p4)
}
0x56a7   :  { %s9730_s2 = scalar_lea.hbm %s11699_s13, 256 }
0x56a8   :  { %p9731_p5 = scmp.ne.s32.totalorder %s11699_s13, %s9730_s2  ;;  %p9734_p6 = scmp.lt.u32.totalorder %s9730_s2, %s11699_s13 }
0x56aa   :  { %p9736_p7 = pnand %p9734_p6, %p9731_p5 }
0x56ac   :  { %9739 = shalt.err (!%p9736_p7)
}
0x56ad   :  { %s9784_s4 = smov 128   ;;  %v8192_v40 = vld [vmem:[%s11696_s10 + $0x9] ss:$0 sm:$0xff]  ;;  %s9785_s27 = smov [#allocation2]  }
0x56ae   :  { %7923 = dma.vmem_to_hbm [thread:$0]  %s7918_s9, 256, %s11699_s13, [#allocation5], %s9784_s4, %s9784_s4, %s11728_s1  }
0x56af   :  { %v8193_v16 = vld [vmem:[%s11697_s11 + $0x9] ss:$0 sm:$0xff]  ;;  %s7905_s20 = sshll.u32 %s9785_s27, 4  ;;  %s7906_s20 = int_to_ptr.vmem [resolvable:$true] %s7905_s20 }
0x56b0   :  { %s9740_s8 = scalar_lea.vmem %s7906_s20, 256  ;;  %p9745_p9 = scmp.lt.s32.totalorder %s7906_s20, %s7906_s20 }
0x56b1   :  { %p9741_p8 = scmp.ne.s32.totalorder %s7906_s20, %s9740_s8  ;;  %p9746_p10 = scmp.lt.s32.totalorder %s9740_s8, %s9740_s8 }
0x56b3   :  { %p9747_p11 = por %p9746_p10, %p9745_p9 }
0x56b5   :  { %p9748_p12 = pnand %p9747_p11, %p9741_p8 }
0x5730   :  { %v7854_v25 = vpop.xlane.xlu0 %7853 }
0x5731   :  { %v7858_v59 = vmul.f32 0.032258064, %v7854_v25 }
0x5732   :  { %v7857_v44 = vpop.xlane.xlu1 %7856 }
0x5733   :  { %9702 = vrsqrt.f32 %v7858_v59  ;;  %v7859_v52 = vmul.f32 0.032258064, %v7857_v44  ;;  %vm7862_vm5 = vcmp.eq.f32.partialorder %v7858_v59, inf  ;;  %v7865_v18 = vand.u32 2147483648, %v7858_v59 }
0x5734   :  { %vm7864_vm8 = vcmp.eq.f32.partialorder %v7858_v59, 0.0 }
0x5735   :  { %9704 = vrsqrt.f32 %v7859_v52  ;;  %vm7869_vm9 = vcmp.eq.f32.partialorder %v7859_v52, inf  ;;  %v7872_v29 = vand.u32 2147483648, %v7859_v52  ;;  %vm7871_vm10 = vcmp.eq.f32.partialorder %v7859_v52, 0.0 }
0x573d   :  { %v9703_v57 = vpop.eup %9702 }
0x573e   :  { %v7861_v6 = vmul.f32 %v9703_v57, %v7858_v59 }
0x573f   :  { %v9705_v21 = vpop.eup %9704 }
0x5740   :  { %v7863_v22 = vsel %vm7862_vm5, %v7858_v59, %v7861_v6  ;;  %v7868_v46 = vmul.f32 %v9705_v21, %v7859_v52 }
0x5741   :  { %v7866_v63 = vsel %vm7864_vm8, %v7865_v18, %v7863_v22 }
0x5742   :  { %v7874_v12 = vadd.f32 1e-06, %v7866_v63  ;;  %v7870_v54 = vsel %vm7869_vm9, %v7859_v52, %v7868_v46 }
0x5743   :  { %v7873_v31 = vsel %vm7871_vm10, %v7872_v29, %v7870_v54 }
0x5744   :  { %9706 = vrcp.f32 %v7874_v12  ;;  %v7875_v53 = vadd.f32 1e-06, %v7873_v31 }
0x5746   :  { %9708 = vrcp.f32 %v7875_v53 }
0x574e   :  { %v9707_v32 = vpop.eup %9706 }
0x574f   :  { %v7877_v4 = vmul.f32 %v9707_v32, %v7848_v38 }
0x5750   :  { %v9709_v45 = vpop.eup %9708 }
0x5751   :  { %v7886_v55 = vmul.f32 %v8192_v40, %v7877_v4  ;;  %v7879_v5 = vmul.f32 %v9709_v45, %v7849_v2 }
0x5753   :  { %v7894_v9 = vadd.f32 %v8193_v16, %v7886_v55  ;;  %v7887_v34 = vmul.f32 %v8192_v40, %v7879_v5 }
0x5755   :  { %7896 = vst.msk [vmem:[#allocation2] sm:$0xff] %vm102_vm1, %v7894_v9  ;;  %v7895_v23 = vadd.f32 %v8193_v16, %v7887_v34 }
0x5757   :  { %7897 = vst.msk [vmem:[#allocation2 + $0x8] sm:$0xff] %vm102_vm1, %v7895_v23 }
0x5758   :  { %9751 = shalt.err (!%p9748_p12)
}
0x5759   :  { %s9752_s0 = scalar_lea.hbm %s11698_s12, 256 }
0x575a   :  { %p9753_p13 = scmp.ne.s32.totalorder %s11698_s12, %s9752_s0  ;;  %p9756_p0 = scmp.lt.u32.totalorder %s9752_s0, %s11698_s12 }
0x575c   :  { %p9758_p1 = pnand %p9756_p0, %p9753_p13 }
0x575e   :  { %9761 = shalt.err (!%p9758_p1)
}
0x575f   :  { %7911 = dma.vmem_to_hbm [thread:$0]  %s7906_s20, 256, %s11698_s12, [#allocation3], %s9784_s4, %s9784_s4, %s11728_s1  }
0x5760   :  { %9762 = dma.done.wait [#allocation3], 256  }
0x5761   :  { %9763 = vsyncadd [#allocation3], 4294967040 }
0x5762   :  { %9764 = dma.done.wait [#allocation5], 256  }
0x5763   :  { %9765 = vsyncadd [#allocation5], 4294967040 }
0x5764   :  { %7930 = vsyncpa [#allocation3], 1 }
0x5765   :  { %7931 = vsyncpa [#allocation5], 1 }

</bundles_post_ra>
